<compile_context>
chip_gen: v6e
topology: v6e:2x2x1
jax: 0.10.0
libtpu: 0.0.40
codegen_flags: <defaults>
</compile_context>

<pallas_src>
import functools

import jax
import jax.numpy as jnp
from jax.experimental import pallas as pl
from jax.experimental.pallas import tpu as pltpu


# Layer configs: (input_dim, output_dim, context_size, dilation)
LAYER_CFG = (
    (16, 512, 5, 1),
    (512, 512, 3, 2),
    (512, 512, 3, 3),
    (512, 512, 1, 1),
    (512, 1500, 1, 1),
    (1500, 7, 1, 1),
)

_PAD_1500 = 1536          # lane-dense padding of the 1500-wide layer
BN_EPS = 1e-5
_ASYNC_W = (2, 3, 4)      # 0-based layer indices whose weights are streamed
                          # into VMEM with in-kernel async DMA (W3, W4, W5)


def _pad_dim(d):
    return _PAD_1500 if d == 1500 else d


def _tdnn_layer(x_bf, w_ref, b_ref, *, n_b, prev_t, cs, dil, apply_softmax):
    """One TDNN layer on VALUES: context-window linear + bias + ReLU +
    training-mode BatchNorm (+ optional softmax).

    x_bf : (n_b*prev_t, din) bf16 value (flattened batch*time rows).
    w_ref: VMEM ref; (cs, din, dout) bf16, or (1, cs*din, dout) for the
           folded-K layer-1 layout.
    b_ref: VMEM ref; (1, dout) f32.
    Returns (y_f32, new_t) with y of shape (n_b*new_t, dout).
    """
    new_t = prev_t - dil * (cs - 1)
    din = x_bf.shape[1]
    bias = b_ref[...]                                   # read once per layer

    if cs == 1:
        # 1x1 layer: one MXU call over all rows.
        pre = jnp.dot(x_bf, w_ref[0], preferred_element_type=jnp.float32)
    elif cs * din <= 128:
        # Narrow input (layer 1): materialize the unfold so the context folds
        # into K (one matmul, K = cs*din) instead of cs tiny K=din matmuls.
        rows = []
        for b in range(n_b):
            base = b * prev_t
            frames = [x_bf[base + c * dil: base + c * dil + new_t, :]
                      for c in range(cs)]
            rows.append(jnp.concatenate(frames, axis=-1))      # (new_t, cs*din)
        unfolded = jnp.concatenate(rows, axis=0)               # (n_b*new_t, cs*din)
        pre = jnp.dot(unfolded, w_ref[0], preferred_element_type=jnp.float32)
    else:
        # Wide cs>1 layers: one matmul per context over the FULL activation
        # (M = n_b*prev_t), then combine with shifted adds per batch element
        # so frames never mix across the batch boundary.
        parts = [jnp.dot(x_bf, w_ref[c], preferred_element_type=jnp.float32)
                 for c in range(cs)]
        rows = []
        for b in range(n_b):
            base = b * prev_t
            acc = parts[0][base: base + new_t, :]
            for c in range(1, cs):
                off = base + c * dil
                acc = acc + parts[c][off: off + new_t, :]
            rows.append(acc)
        pre = jnp.concatenate(rows, axis=0)                    # (n_b*new_t, dout)

    y = jnp.maximum(pre + bias, 0.0)                           # Linear bias + ReLU

    # BatchNorm1d, training mode: per-channel stats over all (batch*time) rows,
    # biased variance, gamma=1, beta=0.
    inv_n = 1.0 / float(n_b * new_t)
    mean = jnp.sum(y, axis=0, keepdims=True) * inv_n
    mean_sq = jnp.sum(y * y, axis=0, keepdims=True) * inv_n
    var = jnp.maximum(mean_sq - mean * mean, 0.0)
    y = (y - mean) * jax.lax.rsqrt(var + BN_EPS)

    if apply_softmax:
        m = jnp.max(y, axis=-1, keepdims=True)
        e = jnp.exp(y - m)
        # Exact divide (not approx reciprocal) so probabilities sum to 1.
        y = e / jnp.sum(e, axis=-1, keepdims=True)

    return y, new_t


def fused_net_kernel(x_ref,
                     w1_ref, b1_ref,
                     w2_ref, b2_ref,
                     w3_hbm, b3_ref,
                     w4_hbm, b4_ref,
                     w5_hbm, b5_ref,
                     w6_ref, b6_ref,
                     o_ref,
                     act1, act2, act3, act4, act5,
                     w3_vmem, w4_vmem, w5_vmem,
                     dma_sems,
                     *, n_b, seq_len):
    """Whole 6-layer TDNN + softmax in one kernel invocation."""
    # Kick off the big mid-network weight DMAs immediately; they overlap the
    # compute of layers 1-2 / 2-3 / 3-4 and are waited on just before use.
    w3_cp = pltpu.make_async_copy(w3_hbm, w3_vmem, dma_sems.at[0])
    w3_cp.start()
    w4_cp = pltpu.make_async_copy(w4_hbm, w4_vmem, dma_sems.at[1])
    w4_cp.start()
    w5_cp = pltpu.make_async_copy(w5_hbm, w5_vmem, dma_sems.at[2])
    w5_cp.start()

    cfg = LAYER_CFG
    t = seq_len

    # Layer 1 (16 -> 512, cs=5): context folded into K=80, one MXU call.
    y, t = _tdnn_layer(x_ref[...].astype(jnp.bfloat16), w1_ref, b1_ref,
                       n_b=n_b, prev_t=t, cs=cfg[0][2], dil=cfg[0][3],
                       apply_softmax=False)
    act1[...] = y.astype(jnp.bfloat16)

    # Layer 2 (512 -> 512, cs=3, dil=2).
    y, t = _tdnn_layer(act1[...], w2_ref, b2_ref,
                       n_b=n_b, prev_t=t, cs=cfg[1][2], dil=cfg[1][3],
                       apply_softmax=False)
    act2[...] = y.astype(jnp.bfloat16)

    # Layer 3 (512 -> 512, cs=3, dil=3): weight streamed in behind layers 1-2.
    w3_cp.wait()
    y, t = _tdnn_layer(act2[...], w3_vmem, b3_ref,
                       n_b=n_b, prev_t=t, cs=cfg[2][2], dil=cfg[2][3],
                       apply_softmax=False)
    act3[...] = y.astype(jnp.bfloat16)

    # Layer 4 (512 -> 512, 1x1).
    w4_cp.wait()
    y, t = _tdnn_layer(act3[...], w4_vmem, b4_ref,
                       n_b=n_b, prev_t=t, cs=cfg[3][2], dil=cfg[3][3],
                       apply_softmax=False)
    act4[...] = y.astype(jnp.bfloat16)

    # Layer 5 (512 -> 1500 [padded 1536], 1x1).
    w5_cp.wait()
    y, t = _tdnn_layer(act4[...], w5_vmem, b5_ref,
                       n_b=n_b, prev_t=t, cs=cfg[4][2], dil=cfg[4][3],
                       apply_softmax=False)
    act5[...] = y.astype(jnp.bfloat16)

    # Layer 6 (1500 [padded 1536] -> 7, 1x1) + softmax over the 7 classes.
    y, _ = _tdnn_layer(act5[...], w6_ref, b6_ref,
                       n_b=n_b, prev_t=t, cs=cfg[5][2], dil=cfg[5][3],
                       apply_softmax=True)
    o_ref[...] = y


def init_params(key):
    """nn.Linear-style init (U(-1/sqrt(fan_in), +1/sqrt(fan_in))).
    Weights stored as (context, Din, Dout) bf16 -- or (1, cs*Din, Dout) for the
    folded-K narrow layer 1 -- biases as (1, Dout) f32.  The 1500-wide layer is
    zero-padded to 1536 (and the matching W6 input rows are zero)."""
    params = []
    for (din, dout, cs, _dil) in LAYER_CFG:
        key, kw, kb = jax.random.split(key, 3)
        fan_in = din * cs
        bound = 1.0 / (fan_in ** 0.5)
        w = jax.random.uniform(kw, (dout, fan_in), jnp.float32, -bound, bound)
        bias = jax.random.uniform(kb, (dout,), jnp.float32, -bound, bound)
        if cs > 1 and cs * din <= 128:
            w_t = w.T.reshape(1, cs * din, dout)      # folded-K layout (layer 1)
        else:
            w_t = w.T.reshape(cs, din, dout)          # [c, d, o] == W[o, c*din + d]
        b2d = bias.reshape(1, dout)
        if dout == 1500:                              # pad output channels (layer 5)
            w_t = jnp.pad(w_t, ((0, 0), (0, 0), (0, _PAD_1500 - 1500)))
            b2d = jnp.pad(b2d, ((0, 0), (0, _PAD_1500 - 1500)))
        if din == 1500:                               # pad input channels (layer 6)
            w_t = jnp.pad(w_t, ((0, 0), (0, _PAD_1500 - 1500), (0, 0)))
        params.append((w_t.astype(jnp.bfloat16), b2d.astype(jnp.float32)))
    return params


def net_forward(x, params):
    """x: (B, T, 16) f32 -> (B, T-14, 7), softmax over the 7 classes."""
    b, t, din = x.shape
    assert din == LAYER_CFG[0][0]

    # Static shape bookkeeping: per-hidden-layer bf16 VMEM scratch + output len.
    scratch_shapes = []
    cur_t = t
    for (_di, do, cs, dil) in LAYER_CFG[:-1]:
        cur_t = cur_t - dil * (cs - 1)
        scratch_shapes.append(
            pltpu.VMEM((b * cur_t, _pad_dim(do)), jnp.bfloat16))
    out_t = cur_t - LAYER_CFG[-1][3] * (LAYER_CFG[-1][2] - 1)
    n_classes = LAYER_CFG[-1][1]

    # VMEM landing buffers + DMA semaphores for the streamed weights.
    for i in _ASYNC_W:
        w = params[i][0]
        scratch_shapes.append(pltpu.VMEM(w.shape, w.dtype))
    scratch_shapes.append(pltpu.SemaphoreType.DMA((len(_ASYNC_W),)))

    flat_params = []
    in_specs = [pl.BlockSpec(memory_space=pltpu.MemorySpace.VMEM)]   # x
    for i, (w, bias) in enumerate(params):
        flat_params += [w, bias]
        w_space = pl.ANY if i in _ASYNC_W else pltpu.MemorySpace.VMEM
        in_specs += [pl.BlockSpec(memory_space=w_space),
                     pl.BlockSpec(memory_space=pltpu.MemorySpace.VMEM)]

    kernel = functools.partial(fused_net_kernel, n_b=b, seq_len=t)
    out2d = pl.pallas_call(
        kernel,
        out_shape=jax.ShapeDtypeStruct((b * out_t, n_classes), jnp.float32),
        in_specs=in_specs,
        out_specs=pl.BlockSpec(memory_space=pltpu.MemorySpace.VMEM),
        scratch_shapes=scratch_shapes,
        compiler_params=pltpu.CompilerParams(
            vmem_limit_bytes=32 * 1024 * 1024),
    )(x.reshape(b * t, din), *flat_params)
    return out2d.reshape(b, out_t, n_classes)


if __name__ == "__main__":
    key = jax.random.PRNGKey(0)
    k_in, k_params = jax.random.split(key)

    # Small shapes: batch=2, seq=20, input features=16 (layer1 expects 16).
    # Context windows (5/d1, 3/d2, 3/d3, then 1x layers): seq 20 -> 6.
    x = jax.random.normal(k_in, (2, 20, 16), dtype=jnp.float32)
    params = init_params(k_params)

    fwd = jax.jit(net_forward)
    out = jax.block_until_ready(fwd(x, params))

    assert out.shape == (2, 6, 7), out.shape
    # Softmax sanity: exact divide => rows sum to 1 within f32 rounding.
    row_sums = jnp.sum(out, axis=-1)
    assert bool(jnp.allclose(row_sums, 1.0, atol=1e-4)), row_sums
    assert bool(jnp.all(jnp.isfinite(out)))

    print("KERNEL_OK")
</pallas_src>

<mosaic_0001>
module attributes {stable_mosaic.version = 11 : i64} {
  func.func @fused_net_kernel(%arg0: memref<40x16xf32, #tpu.memory_space<vmem>>, %arg1: memref<1x80x512xbf16, #tpu.memory_space<vmem>>, %arg2: memref<1x512xf32, #tpu.memory_space<vmem>>, %arg3: memref<3x512x512xbf16, #tpu.memory_space<vmem>>, %arg4: memref<1x512xf32, #tpu.memory_space<vmem>>, %arg5: memref<3x512x512xbf16, #tpu.memory_space<any>>, %arg6: memref<1x512xf32, #tpu.memory_space<vmem>>, %arg7: memref<1x512x512xbf16, #tpu.memory_space<any>>, %arg8: memref<1x512xf32, #tpu.memory_space<vmem>>, %arg9: memref<1x512x1536xbf16, #tpu.memory_space<any>>, %arg10: memref<1x1536xf32, #tpu.memory_space<vmem>>, %arg11: memref<1x1536x7xbf16, #tpu.memory_space<vmem>>, %arg12: memref<1x7xf32, #tpu.memory_space<vmem>>, %arg13: memref<12x7xf32, #tpu.memory_space<vmem>>, %arg14: memref<32x512xbf16, #tpu.memory_space<vmem>>, %arg15: memref<24x512xbf16, #tpu.memory_space<vmem>>, %arg16: memref<12x512xbf16, #tpu.memory_space<vmem>>, %arg17: memref<12x512xbf16, #tpu.memory_space<vmem>>, %arg18: memref<12x1536xbf16, #tpu.memory_space<vmem>>, %arg19: memref<3x512x512xbf16, #tpu.memory_space<vmem>>, %arg20: memref<1x512x512xbf16, #tpu.memory_space<vmem>>, %arg21: memref<1x512x1536xbf16, #tpu.memory_space<vmem>>, %arg22: memref<3x!tpu.dma_semaphore, #tpu.memory_space<semaphore_mem>>) attributes {dimension_semantics = [], scalar_prefetch = 0 : i64, scratch_operands = 9 : i64, tpu.core_type = #tpu.core_type<tc>} {
    %c0_i32 = arith.constant 0 : i32
    %0 = tpu.memref_slice %arg22[%c0_i32] : memref<3x!tpu.dma_semaphore, #tpu.memory_space<semaphore_mem>> -> memref<1x!tpu.dma_semaphore, #tpu.memory_space<semaphore_mem>>
    %1 = tpu.memref_squeeze %0 : memref<1x!tpu.dma_semaphore, #tpu.memory_space<semaphore_mem>> -> memref<!tpu.dma_semaphore, #tpu.memory_space<semaphore_mem>>
    tpu.enqueue_dma source(%arg5 : memref<3x512x512xbf16, #tpu.memory_space<any>>) target(%arg19 : memref<3x512x512xbf16, #tpu.memory_space<vmem>>) target_semaphore(%1 : memref<!tpu.dma_semaphore, #tpu.memory_space<semaphore_mem>>)
    %c1_i32 = arith.constant 1 : i32
    %2 = tpu.memref_slice %arg22[%c1_i32] : memref<3x!tpu.dma_semaphore, #tpu.memory_space<semaphore_mem>> -> memref<1x!tpu.dma_semaphore, #tpu.memory_space<semaphore_mem>>
    %3 = tpu.memref_squeeze %2 : memref<1x!tpu.dma_semaphore, #tpu.memory_space<semaphore_mem>> -> memref<!tpu.dma_semaphore, #tpu.memory_space<semaphore_mem>>
    tpu.enqueue_dma source(%arg7 : memref<1x512x512xbf16, #tpu.memory_space<any>>) target(%arg20 : memref<1x512x512xbf16, #tpu.memory_space<vmem>>) target_semaphore(%3 : memref<!tpu.dma_semaphore, #tpu.memory_space<semaphore_mem>>)
    %c2_i32 = arith.constant 2 : i32
    %4 = tpu.memref_slice %arg22[%c2_i32] : memref<3x!tpu.dma_semaphore, #tpu.memory_space<semaphore_mem>> -> memref<1x!tpu.dma_semaphore, #tpu.memory_space<semaphore_mem>>
    %5 = tpu.memref_squeeze %4 : memref<1x!tpu.dma_semaphore, #tpu.memory_space<semaphore_mem>> -> memref<!tpu.dma_semaphore, #tpu.memory_space<semaphore_mem>>
    tpu.enqueue_dma source(%arg9 : memref<1x512x1536xbf16, #tpu.memory_space<any>>) target(%arg21 : memref<1x512x1536xbf16, #tpu.memory_space<vmem>>) target_semaphore(%5 : memref<!tpu.dma_semaphore, #tpu.memory_space<semaphore_mem>>)
    %c0 = arith.constant 0 : index
    %c0_0 = arith.constant 0 : index
    %6 = vector.load %arg0[%c0, %c0_0] : memref<40x16xf32, #tpu.memory_space<vmem>>, vector<40x16xf32>
    %7 = arith.truncf %6 : vector<40x16xf32> to vector<40x16xbf16>
    %c0_1 = arith.constant 0 : index
    %c0_2 = arith.constant 0 : index
    %8 = vector.load %arg2[%c0_1, %c0_2] : memref<1x512xf32, #tpu.memory_space<vmem>>, vector<1x512xf32>
    %9 = vector.extract_strided_slice %7 {offsets = [0, 0], sizes = [16, 16], strides = [1, 1]} : vector<40x16xbf16> to vector<16x16xbf16>
    %10 = vector.extract_strided_slice %7 {offsets = [1, 0], sizes = [16, 16], strides = [1, 1]} : vector<40x16xbf16> to vector<16x16xbf16>
    %11 = vector.extract_strided_slice %7 {offsets = [2, 0], sizes = [16, 16], strides = [1, 1]} : vector<40x16xbf16> to vector<16x16xbf16>
    %12 = vector.extract_strided_slice %7 {offsets = [3, 0], sizes = [16, 16], strides = [1, 1]} : vector<40x16xbf16> to vector<16x16xbf16>
    %13 = vector.extract_strided_slice %7 {offsets = [4, 0], sizes = [16, 16], strides = [1, 1]} : vector<40x16xbf16> to vector<16x16xbf16>
    %14 = tpu.concatenate %9, %10, %11, %12, %13 in 1 : vector<16x16xbf16>, vector<16x16xbf16>, vector<16x16xbf16>, vector<16x16xbf16>, vector<16x16xbf16> -> vector<16x80xbf16>
    %15 = vector.extract_strided_slice %7 {offsets = [20, 0], sizes = [16, 16], strides = [1, 1]} : vector<40x16xbf16> to vector<16x16xbf16>
    %16 = vector.extract_strided_slice %7 {offsets = [21, 0], sizes = [16, 16], strides = [1, 1]} : vector<40x16xbf16> to vector<16x16xbf16>
    %17 = vector.extract_strided_slice %7 {offsets = [22, 0], sizes = [16, 16], strides = [1, 1]} : vector<40x16xbf16> to vector<16x16xbf16>
    %18 = vector.extract_strided_slice %7 {offsets = [23, 0], sizes = [16, 16], strides = [1, 1]} : vector<40x16xbf16> to vector<16x16xbf16>
    %19 = vector.extract_strided_slice %7 {offsets = [24, 0], sizes = [16, 16], strides = [1, 1]} : vector<40x16xbf16> to vector<16x16xbf16>
    %20 = tpu.concatenate %15, %16, %17, %18, %19 in 1 : vector<16x16xbf16>, vector<16x16xbf16>, vector<16x16xbf16>, vector<16x16xbf16>, vector<16x16xbf16> -> vector<16x80xbf16>
    %21 = tpu.concatenate %14, %20 in 0 : vector<16x80xbf16>, vector<16x80xbf16> -> vector<32x80xbf16>
    %c0_3 = arith.constant 0 : index
    %c0_4 = arith.constant 0 : index
    %c0_5 = arith.constant 0 : index
    %22 = vector.load %arg1[%c0_3, %c0_4, %c0_5] : memref<1x80x512xbf16, #tpu.memory_space<vmem>>, vector<1x80x512xbf16>
    %23 = vector.shape_cast %22 : vector<1x80x512xbf16> to vector<80x512xbf16>
    %cst = arith.constant dense<0.000000e+00> : vector<32x512xf32>
    %24 = tpu.matmul %21, %23, %cst {dimension_numbers = #tpu.dot_dimension_numbers<[1], [0], [0], [1], [0, 0, 1, 1], [], []>} : vector<32x80xbf16>, vector<80x512xbf16>, vector<32x512xf32> -> vector<32x512xf32>
    %25 = vector.broadcast %8 : vector<1x512xf32> to vector<32x512xf32>
    %26 = arith.addf %24, %25 : vector<32x512xf32>
    %cst_6 = arith.constant 0.000000e+00 : f32
    %27 = vector.broadcast %cst_6 : f32 to vector<32x512xf32>
    %28 = arith.maximumf %26, %27 : vector<32x512xf32>
    %cst_7 = arith.constant dense<0.000000e+00> : vector<512xf32>
    %29 = vector.multi_reduction <add>, %28, %cst_7 [0] : vector<32x512xf32> to vector<512xf32>
    %30 = vector.shape_cast %29 : vector<512xf32> to vector<1x512xf32>
    %cst_8 = arith.constant 3.125000e-02 : f32
    %31 = vector.broadcast %cst_8 : f32 to vector<1x512xf32>
    %32 = arith.mulf %30, %31 : vector<1x512xf32>
    %33 = arith.mulf %28, %28 : vector<32x512xf32>
    %cst_9 = arith.constant dense<0.000000e+00> : vector<512xf32>
    %34 = vector.multi_reduction <add>, %33, %cst_9 [0] : vector<32x512xf32> to vector<512xf32>
    %35 = vector.shape_cast %34 : vector<512xf32> to vector<1x512xf32>
    %cst_10 = arith.constant 3.125000e-02 : f32
    %36 = vector.broadcast %cst_10 : f32 to vector<1x512xf32>
    %37 = arith.mulf %35, %36 : vector<1x512xf32>
    %38 = arith.mulf %32, %32 : vector<1x512xf32>
    %39 = arith.subf %37, %38 : vector<1x512xf32>
    %cst_11 = arith.constant 0.000000e+00 : f32
    %40 = vector.broadcast %cst_11 : f32 to vector<1x512xf32>
    %41 = arith.maximumf %39, %40 : vector<1x512xf32>
    %42 = vector.broadcast %32 : vector<1x512xf32> to vector<32x512xf32>
    %43 = arith.subf %28, %42 : vector<32x512xf32>
    %cst_12 = arith.constant 9.99999974E-6 : f32
    %44 = vector.broadcast %cst_12 : f32 to vector<1x512xf32>
    %45 = arith.addf %41, %44 : vector<1x512xf32>
    %46 = math.rsqrt %45 : vector<1x512xf32>
    %47 = vector.broadcast %46 : vector<1x512xf32> to vector<32x512xf32>
    %48 = arith.mulf %43, %47 : vector<32x512xf32>
    %49 = arith.truncf %48 : vector<32x512xf32> to vector<32x512xbf16>
    %c0_13 = arith.constant 0 : index
    %c0_14 = arith.constant 0 : index
    %50 = vector.load %arg14[%c0_13, %c0_14] : memref<32x512xbf16, #tpu.memory_space<vmem>>, vector<32x512xbf16>
    tpu.vector_store %arg14[%c0_13, %c0_14], %49 {strides = array<i32>} : memref<32x512xbf16, #tpu.memory_space<vmem>>, vector<32x512xbf16>,
    %c0_15 = arith.constant 0 : index
    %c0_16 = arith.constant 0 : index
    %51 = vector.load %arg14[%c0_15, %c0_16] : memref<32x512xbf16, #tpu.memory_space<vmem>>, vector<32x512xbf16>
    %c0_17 = arith.constant 0 : index
    %c0_18 = arith.constant 0 : index
    %52 = vector.load %arg4[%c0_17, %c0_18] : memref<1x512xf32, #tpu.memory_space<vmem>>, vector<1x512xf32>
    %c0_19 = arith.constant 0 : index
    %c0_20 = arith.constant 0 : index
    %c0_21 = arith.constant 0 : index
    %53 = vector.load %arg3[%c0_19, %c0_20, %c0_21] : memref<3x512x512xbf16, #tpu.memory_space<vmem>>, vector<1x512x512xbf16>
    %54 = vector.shape_cast %53 : vector<1x512x512xbf16> to vector<512x512xbf16>
    %cst_22 = arith.constant dense<0.000000e+00> : vector<32x512xf32>
    %55 = tpu.matmul %51, %54, %cst_22 {dimension_numbers = #tpu.dot_dimension_numbers<[1], [0], [0], [1], [0, 0, 1, 1], [], []>} : vector<32x512xbf16>, vector<512x512xbf16>, vector<32x512xf32> -> vector<32x512xf32>
    %c1 = arith.constant 1 : index
    %c0_23 = arith.constant 0 : index
    %c0_24 = arith.constant 0 : index
    %56 = vector.load %arg3[%c1, %c0_23, %c0_24] : memref<3x512x512xbf16, #tpu.memory_space<vmem>>, vector<1x512x512xbf16>
    %57 = vector.shape_cast %56 : vector<1x512x512xbf16> to vector<512x512xbf16>
    %cst_25 = arith.constant dense<0.000000e+00> : vector<32x512xf32>
    %58 = tpu.matmul %51, %57, %cst_25 {dimension_numbers = #tpu.dot_dimension_numbers<[1], [0], [0], [1], [0, 0, 1, 1], [], []>} : vector<32x512xbf16>, vector<512x512xbf16>, vector<32x512xf32> -> vector<32x512xf32>
    %c2 = arith.constant 2 : index
    %c0_26 = arith.constant 0 : index
    %c0_27 = arith.constant 0 : index
    %59 = vector.load %arg3[%c2, %c0_26, %c0_27] : memref<3x512x512xbf16, #tpu.memory_space<vmem>>, vector<1x512x512xbf16>
    %60 = vector.shape_cast %59 : vector<1x512x512xbf16> to vector<512x512xbf16>
    %cst_28 = arith.constant dense<0.000000e+00> : vector<32x512xf32>
    %61 = tpu.matmul %51, %60, %cst_28 {dimension_numbers = #tpu.dot_dimension_numbers<[1], [0], [0], [1], [0, 0, 1, 1], [], []>} : vector<32x512xbf16>, vector<512x512xbf16>, vector<32x512xf32> -> vector<32x512xf32>
    %62 = vector.extract_strided_slice %55 {offsets = [0, 0], sizes = [12, 512], strides = [1, 1]} : vector<32x512xf32> to vector<12x512xf32>
    %63 = vector.extract_strided_slice %58 {offsets = [2, 0], sizes = [12, 512], strides = [1, 1]} : vector<32x512xf32> to vector<12x512xf32>
    %64 = arith.addf %62, %63 : vector<12x512xf32>
    %65 = vector.extract_strided_slice %61 {offsets = [4, 0], sizes = [12, 512], strides = [1, 1]} : vector<32x512xf32> to vector<12x512xf32>
    %66 = arith.addf %64, %65 : vector<12x512xf32>
    %67 = vector.extract_strided_slice %55 {offsets = [16, 0], sizes = [12, 512], strides = [1, 1]} : vector<32x512xf32> to vector<12x512xf32>
    %68 = vector.extract_strided_slice %58 {offsets = [18, 0], sizes = [12, 512], strides = [1, 1]} : vector<32x512xf32> to vector<12x512xf32>
    %69 = arith.addf %67, %68 : vector<12x512xf32>
    %70 = vector.extract_strided_slice %61 {offsets = [20, 0], sizes = [12, 512], strides = [1, 1]} : vector<32x512xf32> to vector<12x512xf32>
    %71 = arith.addf %69, %70 : vector<12x512xf32>
    %72 = tpu.concatenate %66, %71 in 0 : vector<12x512xf32>, vector<12x512xf32> -> vector<24x512xf32>
    %73 = vector.broadcast %52 : vector<1x512xf32> to vector<24x512xf32>
    %74 = arith.addf %72, %73 : vector<24x512xf32>
    %cst_29 = arith.constant 0.000000e+00 : f32
    %75 = vector.broadcast %cst_29 : f32 to vector<24x512xf32>
    %76 = arith.maximumf %74, %75 : vector<24x512xf32>
    %cst_30 = arith.constant dense<0.000000e+00> : vector<512xf32>
    %77 = vector.multi_reduction <add>, %76, %cst_30 [0] : vector<24x512xf32> to vector<512xf32>
    %78 = vector.shape_cast %77 : vector<512xf32> to vector<1x512xf32>
    %cst_31 = arith.constant 0.0416666679 : f32
    %79 = vector.broadcast %cst_31 : f32 to vector<1x512xf32>
    %80 = arith.mulf %78, %79 : vector<1x512xf32>
    %81 = arith.mulf %76, %76 : vector<24x512xf32>
    %cst_32 = arith.constant dense<0.000000e+00> : vector<512xf32>
    %82 = vector.multi_reduction <add>, %81, %cst_32 [0] : vector<24x512xf32> to vector<512xf32>
    %83 = vector.shape_cast %82 : vector<512xf32> to vector<1x512xf32>
    %cst_33 = arith.constant 0.0416666679 : f32
    %84 = vector.broadcast %cst_33 : f32 to vector<1x512xf32>
    %85 = arith.mulf %83, %84 : vector<1x512xf32>
    %86 = arith.mulf %80, %80 : vector<1x512xf32>
    %87 = arith.subf %85, %86 : vector<1x512xf32>
    %cst_34 = arith.constant 0.000000e+00 : f32
    %88 = vector.broadcast %cst_34 : f32 to vector<1x512xf32>
    %89 = arith.maximumf %87, %88 : vector<1x512xf32>
    %90 = vector.broadcast %80 : vector<1x512xf32> to vector<24x512xf32>
    %91 = arith.subf %76, %90 : vector<24x512xf32>
    %cst_35 = arith.constant 9.99999974E-6 : f32
    %92 = vector.broadcast %cst_35 : f32 to vector<1x512xf32>
    %93 = arith.addf %89, %92 : vector<1x512xf32>
    %94 = math.rsqrt %93 : vector<1x512xf32>
    %95 = vector.broadcast %94 : vector<1x512xf32> to vector<24x512xf32>
    %96 = arith.mulf %91, %95 : vector<24x512xf32>
    %97 = arith.truncf %96 : vector<24x512xf32> to vector<24x512xbf16>
    %c0_36 = arith.constant 0 : index
    %c0_37 = arith.constant 0 : index
    %98 = vector.load %arg15[%c0_36, %c0_37] : memref<24x512xbf16, #tpu.memory_space<vmem>>, vector<24x512xbf16>
    tpu.vector_store %arg15[%c0_36, %c0_37], %97 {strides = array<i32>} : memref<24x512xbf16, #tpu.memory_space<vmem>>, vector<24x512xbf16>,
    %c0_i32_38 = arith.constant 0 : i32
    %99 = tpu.memref_slice %arg22[%c0_i32_38] : memref<3x!tpu.dma_semaphore, #tpu.memory_space<semaphore_mem>> -> memref<1x!tpu.dma_semaphore, #tpu.memory_space<semaphore_mem>>
    %100 = tpu.memref_squeeze %99 : memref<1x!tpu.dma_semaphore, #tpu.memory_space<semaphore_mem>> -> memref<!tpu.dma_semaphore, #tpu.memory_space<semaphore_mem>>
    tpu.wait_dma2 semaphore(%100 : memref<!tpu.dma_semaphore, #tpu.memory_space<semaphore_mem>>) src(%arg5 : memref<3x512x512xbf16, #tpu.memory_space<any>>) dst(%arg19 : memref<3x512x512xbf16, #tpu.memory_space<vmem>>)
    %c0_39 = arith.constant 0 : index
    %c0_40 = arith.constant 0 : index
    %101 = vector.load %arg15[%c0_39, %c0_40] : memref<24x512xbf16, #tpu.memory_space<vmem>>, vector<24x512xbf16>
    %c0_41 = arith.constant 0 : index
    %c0_42 = arith.constant 0 : index
    %102 = vector.load %arg6[%c0_41, %c0_42] : memref<1x512xf32, #tpu.memory_space<vmem>>, vector<1x512xf32>
    %c0_43 = arith.constant 0 : index
    %c0_44 = arith.constant 0 : index
    %c0_45 = arith.constant 0 : index
    %103 = vector.load %arg19[%c0_43, %c0_44, %c0_45] : memref<3x512x512xbf16, #tpu.memory_space<vmem>>, vector<1x512x512xbf16>
    %104 = vector.shape_cast %103 : vector<1x512x512xbf16> to vector<512x512xbf16>
    %cst_46 = arith.constant dense<0.000000e+00> : vector<24x512xf32>
    %105 = tpu.matmul %101, %104, %cst_46 {dimension_numbers = #tpu.dot_dimension_numbers<[1], [0], [0], [1], [0, 0, 1, 1], [], []>} : vector<24x512xbf16>, vector<512x512xbf16>, vector<24x512xf32> -> vector<24x512xf32>
    %c1_47 = arith.constant 1 : index
    %c0_48 = arith.constant 0 : index
    %c0_49 = arith.constant 0 : index
    %106 = vector.load %arg19[%c1_47, %c0_48, %c0_49] : memref<3x512x512xbf16, #tpu.memory_space<vmem>>, vector<1x512x512xbf16>
    %107 = vector.shape_cast %106 : vector<1x512x512xbf16> to vector<512x512xbf16>
    %cst_50 = arith.constant dense<0.000000e+00> : vector<24x512xf32>
    %108 = tpu.matmul %101, %107, %cst_50 {dimension_numbers = #tpu.dot_dimension_numbers<[1], [0], [0], [1], [0, 0, 1, 1], [], []>} : vector<24x512xbf16>, vector<512x512xbf16>, vector<24x512xf32> -> vector<24x512xf32>
    %c2_51 = arith.constant 2 : index
    %c0_52 = arith.constant 0 : index
    %c0_53 = arith.constant 0 : index
    %109 = vector.load %arg19[%c2_51, %c0_52, %c0_53] : memref<3x512x512xbf16, #tpu.memory_space<vmem>>, vector<1x512x512xbf16>
    %110 = vector.shape_cast %109 : vector<1x512x512xbf16> to vector<512x512xbf16>
    %cst_54 = arith.constant dense<0.000000e+00> : vector<24x512xf32>
    %111 = tpu.matmul %101, %110, %cst_54 {dimension_numbers = #tpu.dot_dimension_numbers<[1], [0], [0], [1], [0, 0, 1, 1], [], []>} : vector<24x512xbf16>, vector<512x512xbf16>, vector<24x512xf32> -> vector<24x512xf32>
    %112 = vector.extract_strided_slice %105 {offsets = [0, 0], sizes = [6, 512], strides = [1, 1]} : vector<24x512xf32> to vector<6x512xf32>
    %113 = vector.extract_strided_slice %108 {offsets = [3, 0], sizes = [6, 512], strides = [1, 1]} : vector<24x512xf32> to vector<6x512xf32>
    %114 = arith.addf %112, %113 : vector<6x512xf32>
    %115 = vector.extract_strided_slice %111 {offsets = [6, 0], sizes = [6, 512], strides = [1, 1]} : vector<24x512xf32> to vector<6x512xf32>
    %116 = arith.addf %114, %115 : vector<6x512xf32>
    %117 = vector.extract_strided_slice %105 {offsets = [12, 0], sizes = [6, 512], strides = [1, 1]} : vector<24x512xf32> to vector<6x512xf32>
    %118 = vector.extract_strided_slice %108 {offsets = [15, 0], sizes = [6, 512], strides = [1, 1]} : vector<24x512xf32> to vector<6x512xf32>
    %119 = arith.addf %117, %118 : vector<6x512xf32>
    %120 = vector.extract_strided_slice %111 {offsets = [18, 0], sizes = [6, 512], strides = [1, 1]} : vector<24x512xf32> to vector<6x512xf32>
    %121 = arith.addf %119, %120 : vector<6x512xf32>
    %122 = tpu.concatenate %116, %121 in 0 : vector<6x512xf32>, vector<6x512xf32> -> vector<12x512xf32>
    %123 = vector.broadcast %102 : vector<1x512xf32> to vector<12x512xf32>
    %124 = arith.addf %122, %123 : vector<12x512xf32>
    %cst_55 = arith.constant 0.000000e+00 : f32
    %125 = vector.broadcast %cst_55 : f32 to vector<12x512xf32>
    %126 = arith.maximumf %124, %125 : vector<12x512xf32>
    %cst_56 = arith.constant dense<0.000000e+00> : vector<512xf32>
    %127 = vector.multi_reduction <add>, %126, %cst_56 [0] : vector<12x512xf32> to vector<512xf32>
    %128 = vector.shape_cast %127 : vector<512xf32> to vector<1x512xf32>
    %cst_57 = arith.constant 0.0833333358 : f32
    %129 = vector.broadcast %cst_57 : f32 to vector<1x512xf32>
    %130 = arith.mulf %128, %129 : vector<1x512xf32>
    %131 = arith.mulf %126, %126 : vector<12x512xf32>
    %cst_58 = arith.constant dense<0.000000e+00> : vector<512xf32>
    %132 = vector.multi_reduction <add>, %131, %cst_58 [0] : vector<12x512xf32> to vector<512xf32>
    %133 = vector.shape_cast %132 : vector<512xf32> to vector<1x512xf32>
    %cst_59 = arith.constant 0.0833333358 : f32
    %134 = vector.broadcast %cst_59 : f32 to vector<1x512xf32>
    %135 = arith.mulf %133, %134 : vector<1x512xf32>
    %136 = arith.mulf %130, %130 : vector<1x512xf32>
    %137 = arith.subf %135, %136 : vector<1x512xf32>
    %cst_60 = arith.constant 0.000000e+00 : f32
    %138 = vector.broadcast %cst_60 : f32 to vector<1x512xf32>
    %139 = arith.maximumf %137, %138 : vector<1x512xf32>
    %140 = vector.broadcast %130 : vector<1x512xf32> to vector<12x512xf32>
    %141 = arith.subf %126, %140 : vector<12x512xf32>
    %cst_61 = arith.constant 9.99999974E-6 : f32
    %142 = vector.broadcast %cst_61 : f32 to vector<1x512xf32>
    %143 = arith.addf %139, %142 : vector<1x512xf32>
    %144 = math.rsqrt %143 : vector<1x512xf32>
    %145 = vector.broadcast %144 : vector<1x512xf32> to vector<12x512xf32>
    %146 = arith.mulf %141, %145 : vector<12x512xf32>
    %147 = arith.truncf %146 : vector<12x512xf32> to vector<12x512xbf16>
    %c0_62 = arith.constant 0 : index
    %c0_63 = arith.constant 0 : index
    %148 = vector.load %arg16[%c0_62, %c0_63] : memref<12x512xbf16, #tpu.memory_space<vmem>>, vector<12x512xbf16>
    tpu.vector_store %arg16[%c0_62, %c0_63], %147 {strides = array<i32>} : memref<12x512xbf16, #tpu.memory_space<vmem>>, vector<12x512xbf16>,
    %c1_i32_64 = arith.constant 1 : i32
    %149 = tpu.memref_slice %arg22[%c1_i32_64] : memref<3x!tpu.dma_semaphore, #tpu.memory_space<semaphore_mem>> -> memref<1x!tpu.dma_semaphore, #tpu.memory_space<semaphore_mem>>
    %150 = tpu.memref_squeeze %149 : memref<1x!tpu.dma_semaphore, #tpu.memory_space<semaphore_mem>> -> memref<!tpu.dma_semaphore, #tpu.memory_space<semaphore_mem>>
    tpu.wait_dma2 semaphore(%150 : memref<!tpu.dma_semaphore, #tpu.memory_space<semaphore_mem>>) src(%arg7 : memref<1x512x512xbf16, #tpu.memory_space<any>>) dst(%arg20 : memref<1x512x512xbf16, #tpu.memory_space<vmem>>)
    %c0_65 = arith.constant 0 : index
    %c0_66 = arith.constant 0 : index
    %151 = vector.load %arg16[%c0_65, %c0_66] : memref<12x512xbf16, #tpu.memory_space<vmem>>, vector<12x512xbf16>
    %c0_67 = arith.constant 0 : index
    %c0_68 = arith.constant 0 : index
    %152 = vector.load %arg8[%c0_67, %c0_68] : memref<1x512xf32, #tpu.memory_space<vmem>>, vector<1x512xf32>
    %c0_69 = arith.constant 0 : index
    %c0_70 = arith.constant 0 : index
    %c0_71 = arith.constant 0 : index
    %153 = vector.load %arg20[%c0_69, %c0_70, %c0_71] : memref<1x512x512xbf16, #tpu.memory_space<vmem>>, vector<1x512x512xbf16>
    %154 = vector.shape_cast %153 : vector<1x512x512xbf16> to vector<512x512xbf16>
    %cst_72 = arith.constant dense<0.000000e+00> : vector<12x512xf32>
    %155 = tpu.matmul %151, %154, %cst_72 {dimension_numbers = #tpu.dot_dimension_numbers<[1], [0], [0], [1], [0, 0, 1, 1], [], []>} : vector<12x512xbf16>, vector<512x512xbf16>, vector<12x512xf32> -> vector<12x512xf32>
    %156 = vector.broadcast %152 : vector<1x512xf32> to vector<12x512xf32>
    %157 = arith.addf %155, %156 : vector<12x512xf32>
    %cst_73 = arith.constant 0.000000e+00 : f32
    %158 = vector.broadcast %cst_73 : f32 to vector<12x512xf32>
    %159 = arith.maximumf %157, %158 : vector<12x512xf32>
    %cst_74 = arith.constant dense<0.000000e+00> : vector<512xf32>
    %160 = vector.multi_reduction <add>, %159, %cst_74 [0] : vector<12x512xf32> to vector<512xf32>
    %161 = vector.shape_cast %160 : vector<512xf32> to vector<1x512xf32>
    %cst_75 = arith.constant 0.0833333358 : f32
    %162 = vector.broadcast %cst_75 : f32 to vector<1x512xf32>
    %163 = arith.mulf %161, %162 : vector<1x512xf32>
    %164 = arith.mulf %159, %159 : vector<12x512xf32>
    %cst_76 = arith.constant dense<0.000000e+00> : vector<512xf32>
    %165 = vector.multi_reduction <add>, %164, %cst_76 [0] : vector<12x512xf32> to vector<512xf32>
    %166 = vector.shape_cast %165 : vector<512xf32> to vector<1x512xf32>
    %cst_77 = arith.constant 0.0833333358 : f32
    %167 = vector.broadcast %cst_77 : f32 to vector<1x512xf32>
    %168 = arith.mulf %166, %167 : vector<1x512xf32>
    %169 = arith.mulf %163, %163 : vector<1x512xf32>
    %170 = arith.subf %168, %169 : vector<1x512xf32>
    %cst_78 = arith.constant 0.000000e+00 : f32
    %171 = vector.broadcast %cst_78 : f32 to vector<1x512xf32>
    %172 = arith.maximumf %170, %171 : vector<1x512xf32>
    %173 = vector.broadcast %163 : vector<1x512xf32> to vector<12x512xf32>
    %174 = arith.subf %159, %173 : vector<12x512xf32>
    %cst_79 = arith.constant 9.99999974E-6 : f32
    %175 = vector.broadcast %cst_79 : f32 to vector<1x512xf32>
    %176 = arith.addf %172, %175 : vector<1x512xf32>
    %177 = math.rsqrt %176 : vector<1x512xf32>
    %178 = vector.broadcast %177 : vector<1x512xf32> to vector<12x512xf32>
    %179 = arith.mulf %174, %178 : vector<12x512xf32>
    %180 = arith.truncf %179 : vector<12x512xf32> to vector<12x512xbf16>
    %c0_80 = arith.constant 0 : index
    %c0_81 = arith.constant 0 : index
    %181 = vector.load %arg17[%c0_80, %c0_81] : memref<12x512xbf16, #tpu.memory_space<vmem>>, vector<12x512xbf16>
    tpu.vector_store %arg17[%c0_80, %c0_81], %180 {strides = array<i32>} : memref<12x512xbf16, #tpu.memory_space<vmem>>, vector<12x512xbf16>,
    %c2_i32_82 = arith.constant 2 : i32
    %182 = tpu.memref_slice %arg22[%c2_i32_82] : memref<3x!tpu.dma_semaphore, #tpu.memory_space<semaphore_mem>> -> memref<1x!tpu.dma_semaphore, #tpu.memory_space<semaphore_mem>>
    %183 = tpu.memref_squeeze %182 : memref<1x!tpu.dma_semaphore, #tpu.memory_space<semaphore_mem>> -> memref<!tpu.dma_semaphore, #tpu.memory_space<semaphore_mem>>
    tpu.wait_dma2 semaphore(%183 : memref<!tpu.dma_semaphore, #tpu.memory_space<semaphore_mem>>) src(%arg9 : memref<1x512x1536xbf16, #tpu.memory_space<any>>) dst(%arg21 : memref<1x512x1536xbf16, #tpu.memory_space<vmem>>)
    %c0_83 = arith.constant 0 : index
    %c0_84 = arith.constant 0 : index
    %184 = vector.load %arg17[%c0_83, %c0_84] : memref<12x512xbf16, #tpu.memory_space<vmem>>, vector<12x512xbf16>
    %c0_85 = arith.constant 0 : index
    %c0_86 = arith.constant 0 : index
    %185 = vector.load %arg10[%c0_85, %c0_86] : memref<1x1536xf32, #tpu.memory_space<vmem>>, vector<1x1536xf32>
    %c0_87 = arith.constant 0 : index
    %c0_88 = arith.constant 0 : index
    %c0_89 = arith.constant 0 : index
    %186 = vector.load %arg21[%c0_87, %c0_88, %c0_89] : memref<1x512x1536xbf16, #tpu.memory_space<vmem>>, vector<1x512x1536xbf16>
    %187 = vector.shape_cast %186 : vector<1x512x1536xbf16> to vector<512x1536xbf16>
    %cst_90 = arith.constant dense<0.000000e+00> : vector<12x1536xf32>
    %188 = tpu.matmul %184, %187, %cst_90 {dimension_numbers = #tpu.dot_dimension_numbers<[1], [0], [0], [1], [0, 0, 1, 1], [], []>} : vector<12x512xbf16>, vector<512x1536xbf16>, vector<12x1536xf32> -> vector<12x1536xf32>
    %189 = vector.broadcast %185 : vector<1x1536xf32> to vector<12x1536xf32>
    %190 = arith.addf %188, %189 : vector<12x1536xf32>
    %cst_91 = arith.constant 0.000000e+00 : f32
    %191 = vector.broadcast %cst_91 : f32 to vector<12x1536xf32>
    %192 = arith.maximumf %190, %191 : vector<12x1536xf32>
    %cst_92 = arith.constant dense<0.000000e+00> : vector<1536xf32>
    %193 = vector.multi_reduction <add>, %192, %cst_92 [0] : vector<12x1536xf32> to vector<1536xf32>
    %194 = vector.shape_cast %193 : vector<1536xf32> to vector<1x1536xf32>
    %cst_93 = arith.constant 0.0833333358 : f32
    %195 = vector.broadcast %cst_93 : f32 to vector<1x1536xf32>
    %196 = arith.mulf %194, %195 : vector<1x1536xf32>
    %197 = arith.mulf %192, %192 : vector<12x1536xf32>
    %cst_94 = arith.constant dense<0.000000e+00> : vector<1536xf32>
    %198 = vector.multi_reduction <add>, %197, %cst_94 [0] : vector<12x1536xf32> to vector<1536xf32>
    %199 = vector.shape_cast %198 : vector<1536xf32> to vector<1x1536xf32>
    %cst_95 = arith.constant 0.0833333358 : f32
    %200 = vector.broadcast %cst_95 : f32 to vector<1x1536xf32>
    %201 = arith.mulf %199, %200 : vector<1x1536xf32>
    %202 = arith.mulf %196, %196 : vector<1x1536xf32>
    %203 = arith.subf %201, %202 : vector<1x1536xf32>
    %cst_96 = arith.constant 0.000000e+00 : f32
    %204 = vector.broadcast %cst_96 : f32 to vector<1x1536xf32>
    %205 = arith.maximumf %203, %204 : vector<1x1536xf32>
    %206 = vector.broadcast %196 : vector<1x1536xf32> to vector<12x1536xf32>
    %207 = arith.subf %192, %206 : vector<12x1536xf32>
    %cst_97 = arith.constant 9.99999974E-6 : f32
    %208 = vector.broadcast %cst_97 : f32 to vector<1x1536xf32>
    %209 = arith.addf %205, %208 : vector<1x1536xf32>
    %210 = math.rsqrt %209 : vector<1x1536xf32>
    %211 = vector.broadcast %210 : vector<1x1536xf32> to vector<12x1536xf32>
    %212 = arith.mulf %207, %211 : vector<12x1536xf32>
    %213 = arith.truncf %212 : vector<12x1536xf32> to vector<12x1536xbf16>
    %c0_98 = arith.constant 0 : index
    %c0_99 = arith.constant 0 : index
    %214 = vector.load %arg18[%c0_98, %c0_99] : memref<12x1536xbf16, #tpu.memory_space<vmem>>, vector<12x1536xbf16>
    tpu.vector_store %arg18[%c0_98, %c0_99], %213 {strides = array<i32>} : memref<12x1536xbf16, #tpu.memory_space<vmem>>, vector<12x1536xbf16>,
    %c0_100 = arith.constant 0 : index
    %c0_101 = arith.constant 0 : index
    %215 = vector.load %arg18[%c0_100, %c0_101] : memref<12x1536xbf16, #tpu.memory_space<vmem>>, vector<12x1536xbf16>
    %c0_102 = arith.constant 0 : index
    %c0_103 = arith.constant 0 : index
    %216 = vector.load %arg12[%c0_102, %c0_103] : memref<1x7xf32, #tpu.memory_space<vmem>>, vector<1x7xf32>
    %c0_104 = arith.constant 0 : index
    %c0_105 = arith.constant 0 : index
    %c0_106 = arith.constant 0 : index
    %217 = vector.load %arg11[%c0_104, %c0_105, %c0_106] : memref<1x1536x7xbf16, #tpu.memory_space<vmem>>, vector<1x1536x7xbf16>
    %218 = vector.shape_cast %217 : vector<1x1536x7xbf16> to vector<1536x7xbf16>
    %cst_107 = arith.constant dense<0.000000e+00> : vector<12x7xf32>
    %219 = tpu.matmul %215, %218, %cst_107 {dimension_numbers = #tpu.dot_dimension_numbers<[1], [0], [0], [1], [0, 0, 1, 1], [], []>} : vector<12x1536xbf16>, vector<1536x7xbf16>, vector<12x7xf32> -> vector<12x7xf32>
    %220 = vector.broadcast %216 : vector<1x7xf32> to vector<12x7xf32>
    %221 = arith.addf %219, %220 : vector<12x7xf32>
    %cst_108 = arith.constant 0.000000e+00 : f32
    %222 = vector.broadcast %cst_108 : f32 to vector<12x7xf32>
    %223 = arith.maximumf %221, %222 : vector<12x7xf32>
    %cst_109 = arith.constant dense<0.000000e+00> : vector<7xf32>
    %224 = vector.multi_reduction <add>, %223, %cst_109 [0] : vector<12x7xf32> to vector<7xf32>
    %225 = vector.shape_cast %224 : vector<7xf32> to vector<1x7xf32>
    %cst_110 = arith.constant 0.0833333358 : f32
    %226 = vector.broadcast %cst_110 : f32 to vector<1x7xf32>
    %227 = arith.mulf %225, %226 : vector<1x7xf32>
    %228 = arith.mulf %223, %223 : vector<12x7xf32>
    %cst_111 = arith.constant dense<0.000000e+00> : vector<7xf32>
    %229 = vector.multi_reduction <add>, %228, %cst_111 [0] : vector<12x7xf32> to vector<7xf32>
    %230 = vector.shape_cast %229 : vector<7xf32> to vector<1x7xf32>
    %cst_112 = arith.constant 0.0833333358 : f32
    %231 = vector.broadcast %cst_112 : f32 to vector<1x7xf32>
    %232 = arith.mulf %230, %231 : vector<1x7xf32>
    %233 = arith.mulf %227, %227 : vector<1x7xf32>
    %234 = arith.subf %232, %233 : vector<1x7xf32>
    %cst_113 = arith.constant 0.000000e+00 : f32
    %235 = vector.broadcast %cst_113 : f32 to vector<1x7xf32>
    %236 = arith.maximumf %234, %235 : vector<1x7xf32>
    %237 = vector.broadcast %227 : vector<1x7xf32> to vector<12x7xf32>
    %238 = arith.subf %223, %237 : vector<12x7xf32>
    %cst_114 = arith.constant 9.99999974E-6 : f32
    %239 = vector.broadcast %cst_114 : f32 to vector<1x7xf32>
    %240 = arith.addf %236, %239 : vector<1x7xf32>
    %241 = math.rsqrt %240 : vector<1x7xf32>
    %242 = vector.broadcast %241 : vector<1x7xf32> to vector<12x7xf32>
    %243 = arith.mulf %238, %242 : vector<12x7xf32>
    %cst_115 = arith.constant dense<0xFF800000> : vector<12xf32>
    %244 = vector.multi_reduction <maximumf>, %243, %cst_115 [1] : vector<12x7xf32> to vector<12xf32>
    %245 = vector.shape_cast %244 : vector<12xf32> to vector<12x1xf32>
    %246 = vector.broadcast %245 : vector<12x1xf32> to vector<12x7xf32>
    %247 = arith.subf %243, %246 : vector<12x7xf32>
    %248 = math.exp %247 : vector<12x7xf32>
    %cst_116 = arith.constant dense<0.000000e+00> : vector<12xf32>
    %249 = vector.multi_reduction <add>, %248, %cst_116 [1] : vector<12x7xf32> to vector<12xf32>
    %250 = vector.shape_cast %249 : vector<12xf32> to vector<12x1xf32>
    %251 = vector.broadcast %250 : vector<12x1xf32> to vector<12x7xf32>
    %252 = arith.divf %248, %251 : vector<12x7xf32>
    %c0_117 = arith.constant 0 : index
    %c0_118 = arith.constant 0 : index
    %253 = vector.load %arg13[%c0_117, %c0_118] : memref<12x7xf32, #tpu.memory_space<vmem>>, vector<12x7xf32>
    tpu.vector_store %arg13[%c0_117, %c0_118], %252 {strides = array<i32>} : memref<12x7xf32, #tpu.memory_space<vmem>>, vector<12x7xf32>,
    return
  }
}

</mosaic_0001>

<bundles_post_ra>
// kernel: net_forward.1
= control target key start
LH: loop header
LB: loop body
LE: loop exit
PB: predicated region body
PF: predicated region fallthrough
CT: control target
= control target key end

     0   :  { %18 = vsyncpa [#allocation12], 0  ;;  %s18621_s0 = inlined_call_operand.vmem [shape: f32[40,16], index: 0, kind: input, shape index: {}]   ;;  %s18622_s1 = inlined_call_operand.hbm [shape: bf16[1,80,512], index: 1, kind: input, shape index: {}]   ;;  %s18623_s2 = inlined_call_operand.hbm [shape: f32[1,512], index: 2, kind: input, shape index: {}]   ;;  %s18624_s3 = inlined_call_operand.hbm [shape: bf16[3,512,512], index: 3, kind: input, shape index: {}]   ;;  %s18625_s4 = inlined_call_operand.hbm [shape: f32[1,512], index: 4, kind: input, shape index: {}]   ;;  %s18626_s5 = inlined_call_operand.hbm [shape: bf16[3,512,512], index: 5, kind: input, shape index: {}]   ;;  %s18627_s6 = inlined_call_operand.hbm [shape: f32[1,512], index: 6, kind: input, shape index: {}]   ;;  %s18628_s7 = inlined_call_operand.hbm [shape: bf16[1,512,512], index: 7, kind: input, shape index: {}]   ;;  %s18629_s8 = inlined_call_operand.hbm [shape: f32[1,512], index: 8, kind: input, shape index: {}]   ;;  %s18630_s9 = inlined_call_operand.hbm [shape: bf16[1,512,1536], index: 9, kind: input, shape index: {}]   ;;  %s18631_s10 = inlined_call_operand.hbm [shape: f32[1,1536], index: 10, kind: input, shape index: {}]   ;;  %s18632_s11 = inlined_call_operand.vmem [shape: bf16[1,1536,7], index: 11, kind: input, shape index: {}]   ;;  %s18633_s12 = inlined_call_operand.hbm [shape: f32[1,7], index: 12, kind: input, shape index: {}]   ;;  %s18634_s13 = inlined_call_operand.vmem [shape: f32[12,7], index: 13, kind: output, shape index: {}]  }
   0x1   :  { %19 = vsyncpa [#allocation14], 0 }
   0x2   :  { %20 = vsyncpa [#allocation17], 0 }
   0x3   :  { %21 = vsyncpa [#allocation20], 0 }
   0x4   :  { %22 = vsyncpa [#allocation23], 0  ;;  %s17165_s25 = smov [#allocation13]   ;;  %s17166_s27 = smov [#allocation16]  }
   0x5   :  { %s43_s26 = sshll.u32 %s17165_s25, 4  ;;  %s65_s28 = sshll.u32 %s17166_s27, 4  ;;  %s44_s26 = int_to_ptr.vmem [resolvable:$true] %s43_s26  ;;  %s66_s28 = int_to_ptr.vmem [resolvable:$true] %s65_s28 }
   0x6   :  { %s16937_s29 = scalar_lea.vmem %s44_s26, 64  ;;  %p16942_p1 = scmp.lt.s32.totalorder %s44_s26, %s44_s26 }
   0x7   :  { %p16938_p0 = scmp.ne.s32.totalorder %s44_s26, %s16937_s29  ;;  %p16943_p2 = scmp.lt.s32.totalorder %s16937_s29, %s16937_s29 }
   0x9   :  { %p16944_p3 = por %p16943_p2, %p16942_p1 }
   0xb   :  { %p16945_p4 = pnand %p16944_p3, %p16938_p0 }
   0xd   :  { %16948 = shalt.err (!%p16945_p4)
}
   0xe   :  { %46 = dma.hbm_to_vmem [thread:$0]  %s18623_s2, 64, %s44_s26, [#allocation14]  }
   0xf   :  { %s16957_s15 = scalar_lea.vmem %s66_s28, 64  ;;  %p16962_p6 = scmp.lt.s32.totalorder %s66_s28, %s66_s28 }
  0x10   :  { %p16958_p5 = scmp.ne.s32.totalorder %s66_s28, %s16957_s15  ;;  %p16963_p7 = scmp.lt.s32.totalorder %s16957_s15, %s16957_s15 }
  0x12   :  { %p16964_p8 = por %p16963_p7, %p16962_p6 }
  0x14   :  { %p16965_p9 = pnand %p16964_p8, %p16958_p5 }
  0x16   :  { %16968 = shalt.err (!%p16965_p9)
}
  0x17   :  { %68 = dma.hbm_to_vmem [thread:$0]  %s18625_s4, 64, %s66_s28, [#allocation17]  }
  0x18   :  { %s17167_s18 = smov [#allocation19]   ;;  %s17168_s20 = smov [#allocation11]  }
  0x19   :  { %s85_s19 = sshll.u32 %s17167_s18, 4  ;;  %s30_s21 = sshll.u32 %s17168_s20, 4  ;;  %s86_s19 = int_to_ptr.vmem [resolvable:$true] %s85_s19  ;;  %s31_s21 = int_to_ptr.vmem [resolvable:$true] %s30_s21 }
  0x1a   :  { %s16977_s22 = scalar_lea.vmem %s86_s19, 64  ;;  %p16982_p11 = scmp.lt.s32.totalorder %s86_s19, %s86_s19 }
  0x1b   :  { %p16978_p10 = scmp.ne.s32.totalorder %s86_s19, %s16977_s22  ;;  %p16983_p12 = scmp.lt.s32.totalorder %s16977_s22, %s16977_s22 }
  0x1d   :  { %p16984_p13 = por %p16983_p12, %p16982_p11 }
  0x1f   :  { %p16985_p0 = pnand %p16984_p13, %p16978_p10 }
  0x21   :  { %16988 = shalt.err (!%p16985_p0)
}
  0x22   :  { %88 = dma.hbm_to_vmem [thread:$0]  %s18629_s8, 64, %s86_s19, [#allocation20]  }
  0x23   :  { %s16997_s24 = scalar_lea.vmem %s31_s21, 2560  ;;  %p17002_p2 = scmp.lt.s32.totalorder %s31_s21, %s31_s21 }
  0x24   :  { %p16998_p1 = scmp.ne.s32.totalorder %s31_s21, %s16997_s24  ;;  %p17003_p3 = scmp.lt.s32.totalorder %s16997_s24, %s16997_s24 }
  0x26   :  { %p17004_p4 = por %p17003_p3, %p17002_p2 }
  0x28   :  { %p17005_p5 = pnand %p17004_p4, %p16998_p1 }
  0x2a   :  { %17008 = shalt.err (!%p17005_p5)
}
  0x2b   :  { %s17169_s4 = smov 256   ;;  %s17170_s25 = smov 16  }
  0x2c   :  { %36 = dma.hbm_to_vmem [thread:$0]  %s18622_s1, 2560, %s31_s21, [#allocation12], %s17169_s4, %s17169_s4, %s17170_s25  }
  0x2d   :  { %s17171_s28 = smov [#allocation15]   ;;  %s17172_s30 = smov [#allocation18]  }
  0x2e   :  { %s52_s29 = sshll.u32 %s17171_s28, 4  ;;  %s75_s14 = sshll.u32 %s17172_s30, 4  ;;  %s53_s29 = int_to_ptr.vmem [resolvable:$true] %s52_s29  ;;  %s76_s14 = int_to_ptr.vmem [resolvable:$true] %s75_s14 }
  0x2f   :  { %s17017_s8 = scalar_lea.vmem %s53_s29, 49152  ;;  %p17022_p7 = scmp.lt.s32.totalorder %s53_s29, %s53_s29 }
  0x30   :  { %p17018_p6 = scmp.ne.s32.totalorder %s53_s29, %s17017_s8  ;;  %p17023_p8 = scmp.lt.s32.totalorder %s17017_s8, %s17017_s8 }
  0x32   :  { %p17024_p9 = por %p17023_p8, %p17022_p7 }
  0x34   :  { %p17025_p10 = pnand %p17024_p9, %p17018_p6 }
  0x36   :  { %17028 = shalt.err (!%p17025_p10)
}
  0x37   :  { %58 = dma.hbm_to_vmem [thread:$0]  %s18624_s3, 49152, %s53_s29, [#allocation14], %s17169_s4, %s17169_s4, %s17170_s25  }
  0x38   :  { %s17037_s17 = scalar_lea.vmem %s76_s14, 64  ;;  %p17042_p12 = scmp.lt.s32.totalorder %s76_s14, %s76_s14 }
  0x39   :  { %p17038_p11 = scmp.ne.s32.totalorder %s76_s14, %s17037_s17  ;;  %p17043_p13 = scmp.lt.s32.totalorder %s17037_s17, %s17037_s17 }
  0x3b   :  { %p17044_p0 = por %p17043_p13, %p17042_p12 }
  0x3d   :  { %p17045_p1 = pnand %p17044_p0, %p17038_p11 }
  0x3f   :  { %17048 = shalt.err (!%p17045_p1)
}
  0x40   :  { %78 = dma.hbm_to_vmem [thread:$0]  %s18627_s6, 64, %s76_s14, [#allocation17]  }
  0x41   :  { %s17173_s19 = smov [#allocation21]   ;;  %s17174_s21 = smov [#allocation22]  }
  0x42   :  { %s95_s20 = sshll.u32 %s17173_s19, 4  ;;  %s107_s22 = sshll.u32 %s17174_s21, 4  ;;  %s96_s20 = int_to_ptr.vmem [resolvable:$true] %s95_s20  ;;  %s108_s22 = int_to_ptr.vmem [resolvable:$true] %s107_s22 }
  0x43   :  { %s17057_s2 = scalar_lea.vmem %s96_s20, 192  ;;  %p17062_p3 = scmp.lt.s32.totalorder %s96_s20, %s96_s20 }
  0x44   :  { %p17058_p2 = scmp.ne.s32.totalorder %s96_s20, %s17057_s2  ;;  %p17063_p4 = scmp.lt.s32.totalorder %s17057_s2, %s17057_s2 }
  0x46   :  { %p17064_p5 = por %p17063_p4, %p17062_p3 }
  0x48   :  { %p17065_p6 = pnand %p17064_p5, %p17058_p2 }
  0x4a   :  { %17068 = shalt.err (!%p17065_p6)
}
  0x4b   :  { %98 = dma.hbm_to_vmem [thread:$0]  %s18631_s10, 192, %s96_s20, [#allocation20]  }
  0x4c   :  { %s17077_s24 = scalar_lea.vmem %s108_s22, 16  ;;  %s17081_s6 = scalar_lea.vmem %s108_s22, 32 }
  0x4d   :  { %p17078_p7 = scmp.ne.s32.totalorder %s108_s22, %s17077_s24  ;;  %p17082_p8 = scmp.lt.s32.totalorder %s108_s22, %s108_s22 }
  0x4e   :  { %p17083_p9 = scmp.lt.s32.totalorder %s17081_s6, %s17077_s24 }
  0x50   :  { %p17084_p10 = por %p17083_p9, %p17082_p8 }
  0x52   :  { %p17085_p11 = pnand %p17084_p10, %p17078_p7 }
  0x54   :  { %17088 = shalt.err (!%p17085_p11)
}
  0x55   :  { %110 = dma.hbm_to_vmem [thread:$0]  %s18633_s12, 16, %s108_s22, [#allocation23]  }
  0x56   :  { %17149 = dma.done.wait [#allocation12], 2560  }
  0x57   :  { %17150 = vsyncadd [#allocation12], 4294964736 }
  0x58   :  { %17151 = dma.done.wait [#allocation14], 49216  }
  0x59   :  { %17152 = vsyncadd [#allocation14], 4294918080 }
  0x5a   :  { %17153 = dma.done.wait [#allocation17], 128  }
  0x5b   :  { %17154 = vsyncadd [#allocation17], 4294967168 }
  0x5c   :  { %17155 = dma.done.wait [#allocation20], 256  }
  0x5d   :  { %17156 = vsyncadd [#allocation20], 4294967040 }
  0x5e   :  { %17157 = dma.done.wait [#allocation23], 16  }
  0x5f   :  { %17158 = vsyncadd [#allocation23], 4294967280  ;;  %v175_v0 = vld [vmem:[%s18621_s0 + $0x20] sm:$0xff]  ;;  %v172_v2 = vld [vmem:[%s18621_s0 + $0x8] sm:$0xff]  ;;  %vm197_vm0 = vcmask 1046528   ;;  %vm215_vm1 = vcmask 1045504  }
  0x60   :  { %v171_v1 = vld [vmem:[%s18621_s0] sm:$0xff]  ;;  %v17287_v3 = vpack.c.bf16 %v175_v0, %v175_v0  ;;  %v173_v4 = vld [vmem:[%s18621_s0 + $0x10] sm:$0xff]  ;;  %v174_v5 = vld [vmem:[%s18621_s0 + $0x18] sm:$0xff]  ;;  %vm180_vm2 = vsmask.f32 7424  ;;  %s17175_s0 = smov 32  }
  0x61   :  { %v17295_v6 = vpack.c.bf16 %v172_v2, %v171_v1  ;;  %v17297_v7 = vpack.c.bf16 %v174_v5, %v173_v4  ;;  %v14796_v8 = vld [vmem:[#allocation11 + $0x84] ss:$16 sps:$4 sm:$0xff]   ;;  %vm203_vm3 = vsmask.f32 6400  ;;  %v14798_v17 = vld [vmem:[#allocation11 + $0x8c] ss:$16 sps:$4 sm:$0xff]  }
  0x62   :  { %v247_v9 = vrot.slane %v17287_v3, 1  ;;  %v235_v12 = vshll.u32 %v17287_v3, 16  ;;  %v239_v15 = vshrl.u32 %v17287_v3, 16  ;;  %441 = vmatprep.subr.bf16.mxu0 %v14796_v8  ;;  %v14800_v22 = vld [vmem:[#allocation11 + $0x80] ss:$16 sps:$4 sm:$0xff]   ;;  %494 = vmatprep.subr.bf16.mxu1 %v14798_v17  ;;  %s17176_s17 = smov 64  }
  0x63   :  { %v198_v10 = vrot.slane %v17295_v6, 1  ;;  %v216_v11 = vrot.slane %v17295_v6, 2  ;;  %v199_v13 = vrot.slane %v17297_v7, 1  ;;  %v217_v14 = vrot.slane %v17297_v7, 2  ;;  %v14801_v25 = vld [vmem:[#allocation11 + $0x88] ss:$16 sps:$4 sm:$0xff]   ;;  %442 = vmatpush1.bf16.msra.mxu0 %v14800_v22 }
  0x64   :  { %v182_v16 = vshrl.u32 %v17295_v6, 16  ;;  %251 = vrot.lane.b32.xlu1 %v247_v9, %s17175_s0  ;;  %v237_v18 = vrot.slane %v235_v12, 1  ;;  %v184_v19 = vshll.u32 %v17295_v6, 16  ;;  %v189_v20 = vshll.u32 %v17297_v7, 16  ;;  %v14802_v26 = vld [vmem:[#allocation11 + $0x64] ss:$16 sps:$4 sm:$0xff]   ;;  %495 = vmatpush1.bf16.msra.mxu1 %v14801_v25 }
  0x65   :  { %v207_v21 = vshrl.u32 %v17297_v7, 16  ;;  %v200_v23 = vsel %vm197_vm0, %v198_v10, %v199_v13  ;;  %v218_v24 = vsel %vm215_vm1, %v216_v11, %v217_v14  ;;  %v248_v27 = vsel %vm197_vm0, %v199_v13, %v247_v9  ;;  %443 = vmatprep.subr.bf16.mxu0 %v14802_v26  ;;  %v14804_v34 = vld [vmem:[#allocation11 + $0x6c] ss:$16 sps:$4 sm:$0xff]   ;;  %v14806_v37 = vld [vmem:[#allocation11 + $0x60] ss:$16 sps:$4 sm:$0xff]   ;;  %s17178_s1 = smov 48  }
  0x66   :  { %201 = vrot.lane.b32.xlu0 %v200_v23, %s17175_s0  ;;  %v186_v28 = vrot.slane %v184_v19, 1  ;;  %v204_v29 = vrot.slane %v182_v16, 1  ;;  %v191_v30 = vrot.slane %v189_v20, 1  ;;  %v205_v31 = vrot.slane %v184_v19, 2  ;;  %v14807_v38 = vld [vmem:[#allocation11 + $0x68] ss:$16 sps:$4 sm:$0xff]   ;;  %496 = vmatprep.subr.bf16.mxu1 %v14804_v34 }
  0x67   :  { %v209_v32 = vrot.slane %v207_v21, 1  ;;  %v210_v33 = vrot.slane %v189_v20, 2  ;;  %v241_v35 = vor.u32 %v239_v15, %v237_v18  ;;  %v14808_v41 = vld [vmem:[#allocation11 + $0x44] ss:$16 sps:$4 sm:$0xff]   ;;  %444 = vmatpush1.bf16.msra.mxu0 %v14806_v37  ;;  %v14810_v42 = vld [vmem:[#allocation11 + $0x4c] ss:$16 sps:$4 sm:$0xff]  }
  0x68   :  { %219 = vrot.lane.b32.xlu1 %v218_v24, %s17176_s17  ;;  %v187_v36 = vor.u32 %v186_v28, %v182_v16  ;;  %v206_v39 = vor.u32 %v205_v31, %v204_v29  ;;  %v14812_v43 = vld [vmem:[#allocation11 + $0x40] ss:$16 sps:$4 sm:$0xff]   ;;  %v14813_v44 = vld [vmem:[#allocation11 + $0x48] ss:$16 sps:$4 sm:$0xff]   ;;  %v253_v45 = vrot.slane %v239_v15, 1  ;;  %v233_v47 = vor.u32 %v207_v21, %v191_v30  ;;  %497 = vmatpush1.bf16.msra.mxu1 %v14807_v38  ;;  %s17180_s19 = smov [#allocation8]  }
  0x69   :  { %v211_v40 = vor.u32 %v210_v33, %v209_v32  ;;  %v254_v48 = vrot.slane %v235_v12, 2  ;;  %445 = vmatprep.subr.bf16.mxu0 %v14808_v41  ;;  %v14814_v49 = vld [vmem:[#allocation11 + $0x24] ss:$16 sps:$4 sm:$0xff]   ;;  %498 = vmatprep.subr.bf16.mxu1 %v14810_v42  ;;  %v14816_v50 = vld [vmem:[#allocation11 + $0x2c] ss:$16 sps:$4 sm:$0xff]   ;;  %v17177_v53 = vmov 0  }
  0x6a   :  { %249 = vrot.lane.b32.xlu0 %v248_v27, %s17175_s0  ;;  %v192_v46 = vsel %vm180_vm2, %v187_v36, %v191_v30  ;;  %v14818_v52 = vld [vmem:[#allocation11 + $0x20] ss:$16 sps:$4 sm:$0xff]   ;;  %467 = vmatprep.mubr.bf16.mxu0 %v17177_v53  ;;  %v14819_v54 = vld [vmem:[#allocation11 + $0x28] ss:$16 sps:$4 sm:$0xff]   ;;  %v238_v55 = vsel %vm180_vm2, %v233_v47, %v237_v18  ;;  %v14820_v57 = vld [vmem:[#allocation11 + $0x4] ss:$16 sps:$4 sm:$0xff]  }
  0x6b   :  { %v212_v51 = vsel %vm203_vm3, %v206_v39, %v211_v40  ;;  %520 = vmatprep.mubr.bf16.mxu1 %v17177_v53  ;;  %446 = vmatpush1.bf16.msra.mxu0 %v14812_v43  ;;  %v255_v56 = vor.u32 %v254_v48, %v253_v45  ;;  %v14822_v58 = vld [vmem:[#allocation11 + $0xc] ss:$16 sps:$4 sm:$0xff]   ;;  %v14824_v59 = vld [vmem:[#allocation11] ss:$16 sps:$4 sm:$0xff]   ;;  %v14825_v60 = vld [vmem:[#allocation11 + $0x8] ss:$16 sps:$4 sm:$0xff]  }
  0x6c   :  { %244 = vrot.lane.b32.xlu1 %v241_v35, %s17170_s25  ;;  %499 = vmatpush1.bf16.msra.mxu1 %v14813_v44  ;;  %v261_v62 = vrot.slane %v17287_v3, 2  ;;  %vm221_vm4 = vcmask 130048   ;;  %vm224_vm5 = vcmask 261120   ;;  %vm227_vm6 = vcmask 392192   ;;  %v14831_v28 = vld [vmem:[#allocation15 + $0x2e4] ss:$16 sps:$4 sm:$0xff]  }
  0x6d   :  { %447 = vmatprep.subr.bf16.mxu0 %v14814_v49  ;;  %500 = vmatprep.subr.bf16.mxu1 %v14816_v50  ;;  %v256_v61 = vsel %vm203_vm3, %v211_v40, %v255_v56  ;;  %vm230_vm7 = vcmask 523264   ;;  %vm429_vm8 = vcmask 654336   ;;  %v14826_v29 = vld [vmem:[#allocation15 + $0xe0] ss:$16 sps:$4 sm:$0xff]   ;;  %v14834_v31 = vld [vmem:[#allocation15 + $0xc4] ss:$16 sps:$4 sm:$0xff]  }
  0x6e   :  { %193 = vrot.lane.b32.xlu0 %v192_v46, %s17170_s25  ;;  %v262_v63 = vsel %vm215_vm1, %v217_v14, %v261_v62  ;;  %v14829_v30 = vld [vmem:[#allocation15 + $0x2e0] ss:$16 sps:$4 sm:$0xff]   ;;  %v14837_v32 = vld [vmem:[#allocation15 + $0x2c4] ss:$16 sps:$4 sm:$0xff]   ;;  %s155_s20 = sshll.u32 %s17180_s19, 4  ;;  %s156_s20 = int_to_ptr.vmem [resolvable:$true] %s155_s20 }
  0x6f   :  { %448 = vmatpush1.bf16.msra.mxu0 %v14818_v52  ;;  %v14832_v33 = vld [vmem:[#allocation15 + $0xc0] ss:$16 sps:$4 sm:$0xff]   ;;  %v14840_v35 = vld [vmem:[#allocation15 + $0xa4] ss:$16 sps:$4 sm:$0xff]  }
  0x70   :  { %213 = vrot.lane.b32.xlu1 %v212_v51, %s17178_s1  ;;  %501 = vmatpush1.bf16.msra.mxu1 %v14819_v54  ;;  %v14835_v34 = vld [vmem:[#allocation15 + $0x2c0] ss:$16 sps:$4 sm:$0xff]   ;;  %v14843_v36 = vld [vmem:[#allocation15 + $0x2a4] ss:$16 sps:$4 sm:$0xff]  }
  0x71   :  { %449 = vmatprep.subr.bf16.mxu0 %v14820_v57  ;;  %502 = vmatprep.subr.bf16.mxu1 %v14822_v58  ;;  %v14838_v37 = vld [vmem:[#allocation15 + $0xa0] ss:$16 sps:$4 sm:$0xff]   ;;  %v14846_v39 = vld [vmem:[#allocation15 + $0x84] ss:$16 sps:$4 sm:$0xff]  }
  0x72   :  { %242 = vrot.lane.b32.xlu0 %v238_v55, %s17170_s25  ;;  %v14841_v38 = vld [vmem:[#allocation15 + $0x2a0] ss:$16 sps:$4 sm:$0xff]   ;;  %v14849_v40 = vld [vmem:[#allocation15 + $0x284] ss:$16 sps:$4 sm:$0xff]   ;;  %s17179_s25 = smov [#allocation7]  }
  0x73   :  { %450 = vmatpush1.bf16.msra.mxu0 %v14824_v59  ;;  %v14844_v41 = vld [vmem:[#allocation15 + $0x80] ss:$16 sps:$4 sm:$0xff]   ;;  %v14852_v43 = vld [vmem:[#allocation15 + $0x64] ss:$16 sps:$4 sm:$0xff]   ;;  %s143_s18 = sshll.u32 %s17179_s25, 4  ;;  %s144_s18 = int_to_ptr.vmem [resolvable:$true] %s143_s18 }
  0x74   :  { %259 = vrot.lane.b32.xlu1 %v255_v56, %s17178_s1  ;;  %503 = vmatpush1.bf16.msra.mxu1 %v14825_v60  ;;  %v14847_v42 = vld [vmem:[#allocation15 + $0x280] ss:$16 sps:$4 sm:$0xff]   ;;  %v14855_v44 = vld [vmem:[#allocation15 + $0x264] ss:$16 sps:$4 sm:$0xff]   ;;  %s17097_s21 = scalar_lea.vmem %s144_s18, 49152  ;;  %p17102_p13 = scmp.lt.s32.totalorder %s144_s18, %s144_s18 }
  0x75   :  { %1631 = vmatprep.subr.bf16.mxu1 %v14831_v28  ;;  %v14850_v45 = vld [vmem:[#allocation15 + $0x60] ss:$16 sps:$4 sm:$0xff]   ;;  %v14858_v47 = vld [vmem:[#allocation15 + $0x44] ss:$16 sps:$4 sm:$0xff]   ;;  %v14927_v28 = vld [vmem:[#allocation15 + $0x2ec] ss:$16 sps:$4 sm:$0xff]   ;;  %p17098_p12 = scmp.ne.s32.totalorder %s144_s18, %s17097_s21  ;;  %p17103_p0 = scmp.lt.s32.totalorder %s17097_s21, %s17097_s21 }
  0x76   :  { %257 = vrot.lane.b32.xlu0 %v256_v61, %s17178_s1  ;;  %v14853_v46 = vld [vmem:[#allocation15 + $0x260] ss:$16 sps:$4 sm:$0xff]   ;;  %v14861_v48 = vld [vmem:[#allocation15 + $0x244] ss:$16 sps:$4 sm:$0xff]  }
  0x77   :  { %v14856_v49 = vld [vmem:[#allocation15 + $0x40] ss:$16 sps:$4 sm:$0xff]   ;;  %v14864_v51 = vld [vmem:[#allocation15 + $0x24] ss:$16 sps:$4 sm:$0xff]   ;;  %p17104_p1 = por %p17103_p0, %p17102_p13 }
  0x78   :  { %265 = vrot.lane.b32.xlu1 %v261_v62, %s17176_s17  ;;  %v14859_v50 = vld [vmem:[#allocation15 + $0x240] ss:$16 sps:$4 sm:$0xff]   ;;  %v14867_v52 = vld [vmem:[#allocation15 + $0x224] ss:$16 sps:$4 sm:$0xff]  }
  0x79   :  { %v14865_v54 = vld [vmem:[#allocation15 + $0x220] ss:$16 sps:$4 sm:$0xff]   ;;  %v14870_v55 = vld [vmem:[#allocation15 + $0x4] ss:$16 sps:$4 sm:$0xff]   ;;  %p17105_p2 = pnand %p17104_p1, %p17098_p12 }
  0x7a   :  { %263 = vrot.lane.b32.xlu0 %v262_v63, %s17176_s17  ;;  %v14873_v56 = vld [vmem:[#allocation15 + $0x204] ss:$16 sps:$4 sm:$0xff]   ;;  %v14868_v57 = vld [vmem:[#allocation15] ss:$16 sps:$4 sm:$0xff]  }
  0x7b   :  { %v14871_v58 = vld [vmem:[#allocation15 + $0x200] ss:$16 sps:$4 sm:$0xff]   ;;  %v14876_v59 = vld [vmem:[#allocation15 + $0x1e4] ss:$16 sps:$4 sm:$0xff]  }
  0x7c   :  { %v14879_v60 = vld [vmem:[#allocation15 + $0x3e4] ss:$16 sps:$4 sm:$0xff]   ;;  %v14874_v61 = vld [vmem:[#allocation15 + $0x1e0] ss:$16 sps:$4 sm:$0xff]  }
  0x7d   :  { %v14877_v62 = vld [vmem:[#allocation15 + $0x3e0] ss:$16 sps:$4 sm:$0xff]   ;;  %v14882_v63 = vld [vmem:[#allocation15 + $0x1c4] ss:$16 sps:$4 sm:$0xff]  }
  0xd6   :  { %v252_v0 = vpop.permute.xlu1 %251 }
  0xd8   :  { %v202_v1 = vpop.permute.xlu0 %201 }
  0xda   :  { %v220_v2 = vpop.permute.xlu1 %219 }
  0xdc   :  { %v250_v4 = vpop.permute.xlu0 %249 }
  0xde   :  { %v245_v5 = vpop.permute.xlu1 %244 }
  0xdf   :  { %v270_v15 = vsel %vm221_vm4, %v17287_v3, %v245_v5  ;;  %v14891_v5 = vld [vmem:[#allocation15 + $0x3a4] ss:$16 sps:$4 sm:$0xff]  }
  0xe0   :  { %v194_v8 = vpop.permute.xlu0 %193  ;;  %v274_v18 = vsel %vm224_vm5, %v270_v15, %v252_v0  ;;  %v14885_v0 = vld [vmem:[#allocation15 + $0x3c4] ss:$16 sps:$4 sm:$0xff]  }
  0xe1   :  { %v223_v9 = vsel %vm221_vm4, %v17295_v6, %v194_v8  ;;  %v14886_v8 = vld [vmem:[#allocation15 + $0x1a0] ss:$16 sps:$4 sm:$0xff]   ;;  %v14903_v15 = vld [vmem:[#allocation15 + $0x364] ss:$16 sps:$4 sm:$0xff]  }
  0xe2   :  { %v214_v10 = vpop.permute.xlu1 %213  ;;  %v226_v11 = vsel %vm224_vm5, %v223_v9, %v202_v1  ;;  %v14880_v1 = vld [vmem:[#allocation15 + $0x1c0] ss:$16 sps:$4 sm:$0xff]  }
  0xe3   :  { %v229_v12 = vsel %vm227_vm6, %v226_v11, %v214_v10  ;;  %v14889_v9 = vld [vmem:[#allocation15 + $0x3a0] ss:$16 sps:$4 sm:$0xff]   ;;  %v14894_v10 = vld [vmem:[#allocation15 + $0x184] ss:$16 sps:$4 sm:$0xff]  }
  0xe4   :  { %v243_v13 = vpop.permute.xlu0 %242  ;;  %v232_v14 = vsel %vm230_vm7, %v229_v12, %v220_v2  ;;  %v14883_v2 = vld [vmem:[#allocation15 + $0x3c0] ss:$16 sps:$4 sm:$0xff]   ;;  %v14897_v11 = vld [vmem:[#allocation15 + $0x384] ss:$16 sps:$4 sm:$0xff]  }
  0xe5   :  { %13143 = vmatmul.mubr.msk.bf16.vlgmr.msra.gmra.mxu0 %vm429_vm8, %v232_v14  ;;  %13145 = vmatmul.mubr.msk.bf16.vlgmr.msra.gmra.mxu1 %vm429_vm8, %v232_v14  ;;  %v268_v6 = vsel %vm221_vm4, %v17297_v7, %v243_v13  ;;  %v14828_v7 = vld [vmem:[#allocation15 + $0xe4] ss:$16 sps:$4 sm:$0xff]   ;;  %v14892_v12 = vld [vmem:[#allocation15 + $0x180] ss:$16 sps:$4 sm:$0xff]  }
  0xe6   :  { %v260_v16 = vpop.permute.xlu1 %259  ;;  %477 = vmatprep.mubr.bf16.mxu0 %v17177_v53  ;;  %530 = vmatprep.mubr.bf16.mxu1 %v17177_v53  ;;  %v272_v21 = vsel %vm224_vm5, %v268_v6, %v250_v4  ;;  %v14862_v53 = vld [vmem:[#allocation15 + $0x20] ss:$16 sps:$4 sm:$0xff]   ;;  %v14888_v4 = vld [vmem:[#allocation15 + $0x1a4] ss:$16 sps:$4 sm:$0xff]  }
  0xe7   :  { %v278_v19 = vsel %vm227_vm6, %v274_v18, %v260_v16  ;;  %1578 = vmatprep.subr.bf16.mxu0 %v14828_v7  ;;  %1632 = vmatpush1.bf16.msra.mxu1 %v14829_v30  ;;  %v14895_v13 = vld [vmem:[#allocation15 + $0x380] ss:$16 sps:$4 sm:$0xff]   ;;  %v14900_v14 = vld [vmem:[#allocation15 + $0x164] ss:$16 sps:$4 sm:$0xff]   ;;  %v14924_v7 = vld [vmem:[#allocation15 + $0xec] ss:$16 sps:$4 sm:$0xff]  }
  0xe8   :  { %v258_v17 = vpop.permute.xlu0 %257  ;;  %1579 = vmatpush1.bf16.msra.mxu0 %v14826_v29  ;;  %1633 = vmatprep.subr.bf16.mxu1 %v14837_v32  ;;  %v14898_v16 = vld [vmem:[#allocation15 + $0x160] ss:$16 sps:$4 sm:$0xff]   ;;  %v14909_v18 = vld [vmem:[#allocation15 + $0x344] ss:$16 sps:$4 sm:$0xff]   ;;  %v309_v29 = vlaneseq }
  0xe9   :  { %v276_v23 = vsel %vm227_vm6, %v272_v21, %v258_v17  ;;  %1580 = vmatprep.subr.bf16.mxu0 %v14834_v31  ;;  %v14901_v6 = vld [vmem:[#allocation15 + $0x360] ss:$16 sps:$4 sm:$0xff]   ;;  %v14906_v17 = vld [vmem:[#allocation15 + $0x144] ss:$16 sps:$4 sm:$0xff]  }
  0xea   :  { %v266_v20 = vpop.permute.xlu1 %265  ;;  %v14912_v21 = vld [vmem:[#allocation15 + $0x124] ss:$16 sps:$4 sm:$0xff]   ;;  %v17352_v30 = vshrl.u32 %v309_v29, 7 }
  0xeb   :  { %v282_v22 = vsel %vm230_vm7, %v278_v19, %v266_v20  ;;  %1634 = vmatpush1.bf16.msra.mxu1 %v14835_v34  ;;  %v14904_v19 = vld [vmem:[#allocation15 + $0x140] ss:$16 sps:$4 sm:$0xff]  }
  0xec   :  { %v286_v24 = vrot.slane %v282_v22, 2  ;;  %v264_v3 = vpop.permute.xlu0 %263  ;;  %1581 = vmatpush1.bf16.msra.mxu0 %v14832_v33  ;;  %1635 = vmatprep.subr.bf16.mxu1 %v14843_v36  ;;  %v14907_v20 = vld [vmem:[#allocation15 + $0x340] ss:$16 sps:$4 sm:$0xff]   ;;  %v14915_v22 = vld [vmem:[#allocation15 + $0x324] ss:$16 sps:$4 sm:$0xff]   ;;  %18642 = vst [vmem:[#allocation40_spill] sm:$0xff] %v17352_v30 }
  0xed   :  { %v280_v25 = vsel %vm230_vm7, %v276_v23, %v264_v3  ;;  %1582 = vmatprep.subr.bf16.mxu0 %v14840_v35  ;;  %v14910_v23 = vld [vmem:[#allocation15 + $0x120] ss:$16 sps:$4 sm:$0xff]   ;;  %v14918_v3 = vld [vmem:[#allocation15 + $0x104] ss:$16 sps:$4 sm:$0xff]   ;;  %v17355_v31 = vsub.s32 0, %v17352_v30  ;;  %v17358_v32 = vsub.s32 2, %v17352_v30 }
  0xee   :  { %v285_v26 = vrot.slane %v280_v25, 2  ;;  %v14921_v25 = vld [vmem:[#allocation15 + $0x304] ss:$16 sps:$4 sm:$0xff]   ;;  %v179_v33 = vld [vmem:[#allocation13] sm:$0xf]  ;;  %v17361_v34 = vsub.s32 1, %v17352_v30 }
  0xef   :  { %1636 = vmatpush1.bf16.msra.mxu1 %v14841_v38  ;;  %v17364_v35 = vsub.s32 3, %v17352_v30  ;;  %v312_v36 = vrot.slane %v179_v33, %v17355_v31  ;;  %v320_v38 = vrot.slane %v179_v33, %v17358_v32 }
  0xf0   :  { %v287_v27 = vsel %vm215_vm1, %v285_v26, %v286_v24  ;;  %1583 = vmatpush1.bf16.msra.mxu0 %v14838_v37  ;;  %1637 = vmatprep.subr.bf16.mxu1 %v14849_v40  ;;  %v14913_v24 = vld [vmem:[#allocation15 + $0x320] ss:$16 sps:$4 sm:$0xff]   ;;  %18643 = vst [vmem:[#allocation41_spill] sm:$0xff] %v17361_v34  ;;  %v316_v40 = vrot.slane %v179_v33, %v17361_v34 }
  0xf1   :  { %13144 = vmatmul.mubr.msk.bf16.gmra.mxu0 %vm429_vm8, %v287_v27  ;;  %13146 = vmatmul.mubr.msk.bf16.gmra.mxu1 %vm429_vm8, %v287_v27  ;;  %v14916_v26 = vld [vmem:[#allocation15 + $0x100] ss:$16 sps:$4 sm:$0xff]  }
  0xf2   :  { %1584 = vmatprep.subr.bf16.mxu0 %v14846_v39  ;;  %v14919_v27 = vld [vmem:[#allocation15 + $0x300] ss:$16 sps:$4 sm:$0xff]  }
  0xf3   :  { %1638 = vmatpush1.bf16.msra.mxu1 %v14847_v42  ;;  %v324_v42 = vrot.slane %v179_v33, %v17364_v35 }
  0xf4   :  { %1585 = vmatpush1.bf16.msra.mxu0 %v14844_v41  ;;  %1639 = vmatprep.subr.bf16.mxu1 %v14855_v44 }
  0xf5   :  { %1586 = vmatprep.subr.bf16.mxu0 %v14852_v43 }
  0xf7   :  { %1640 = vmatpush1.bf16.msra.mxu1 %v14853_v46 }
  0xf8   :  { %1587 = vmatpush1.bf16.msra.mxu0 %v14850_v45  ;;  %1641 = vmatprep.subr.bf16.mxu1 %v14861_v48 }
  0xf9   :  { %1588 = vmatprep.subr.bf16.mxu0 %v14858_v47 }
  0xfb   :  { %1642 = vmatpush1.bf16.msra.mxu1 %v14859_v50 }
  0xfc   :  { %1589 = vmatpush1.bf16.msra.mxu0 %v14856_v49  ;;  %1643 = vmatprep.subr.bf16.mxu1 %v14867_v52 }
  0xfd   :  { %1590 = vmatprep.subr.bf16.mxu0 %v14864_v51 }
  0xff   :  { %1644 = vmatpush1.bf16.msra.mxu1 %v14865_v54 }
 0x100   :  { %1591 = vmatpush1.bf16.msra.mxu0 %v14862_v53  ;;  %1645 = vmatprep.subr.bf16.mxu1 %v14873_v56 }
 0x101   :  { %1592 = vmatprep.subr.bf16.mxu0 %v14870_v55 }
 0x103   :  { %1646 = vmatpush1.bf16.msra.mxu1 %v14871_v58 }
 0x104   :  { %1593 = vmatpush1.bf16.msra.mxu0 %v14868_v57  ;;  %1647 = vmatprep.subr.bf16.mxu1 %v14879_v60 }
 0x105   :  { %1594 = vmatprep.subr.bf16.mxu0 %v14876_v59 }
 0x107   :  { %1648 = vmatpush2.bf16.msra.mxu1 %v14877_v62 }
 0x108   :  { %1595 = vmatpush2.bf16.msra.mxu0 %v14874_v61  ;;  %1649 = vmatprep.subr.bf16.mxu1 %v14885_v0 }
 0x109   :  { %1596 = vmatprep.subr.bf16.mxu0 %v14882_v63 }
 0x10b   :  { %1650 = vmatpush2.bf16.msra.mxu1 %v14883_v2 }
 0x10c   :  { %1597 = vmatpush2.bf16.msra.mxu0 %v14880_v1  ;;  %1651 = vmatprep.subr.bf16.mxu1 %v14891_v5 }
 0x10d   :  { %1598 = vmatprep.subr.bf16.mxu0 %v14888_v4 }
 0x10f   :  { %1652 = vmatpush2.bf16.msra.mxu1 %v14889_v9 }
 0x110   :  { %1599 = vmatpush2.bf16.msra.mxu0 %v14886_v8  ;;  %1653 = vmatprep.subr.bf16.mxu1 %v14897_v11 }
 0x111   :  { %1600 = vmatprep.subr.bf16.mxu0 %v14894_v10 }
 0x113   :  { %1654 = vmatpush2.bf16.msra.mxu1 %v14895_v13 }
 0x114   :  { %1601 = vmatpush2.bf16.msra.mxu0 %v14892_v12  ;;  %1655 = vmatprep.subr.bf16.mxu1 %v14903_v15 }
 0x115   :  { %1602 = vmatprep.subr.bf16.mxu0 %v14900_v14 }
 0x117   :  { %1656 = vmatpush2.bf16.msra.mxu1 %v14901_v6 }
 0x118   :  { %1603 = vmatpush2.bf16.msra.mxu0 %v14898_v16  ;;  %1657 = vmatprep.subr.bf16.mxu1 %v14909_v18 }
 0x119   :  { %1604 = vmatprep.subr.bf16.mxu0 %v14906_v17 }
 0x11b   :  { %1658 = vmatpush2.bf16.msra.mxu1 %v14907_v20 }
 0x11c   :  { %1605 = vmatpush2.bf16.msra.mxu0 %v14904_v19  ;;  %1659 = vmatprep.subr.bf16.mxu1 %v14915_v22 }
 0x11d   :  { %1606 = vmatprep.subr.bf16.mxu0 %v14912_v21 }
 0x11f   :  { %1660 = vmatpush2.bf16.msra.mxu1 %v14913_v24 }
 0x120   :  { %1607 = vmatpush2.bf16.msra.mxu0 %v14910_v23  ;;  %1661 = vmatprep.subr.bf16.mxu1 %v14921_v25 }
 0x121   :  { %1608 = vmatprep.subr.bf16.mxu0 %v14918_v3 }
 0x123   :  { %1662 = vmatpush2.bf16.msra.mxu1 %v14919_v27 }
 0x124   :  { %1609 = vmatpush2.bf16.msra.mxu0 %v14916_v26  ;;  %1737 = vmatprep.subr.bf16.mxu1 %v14927_v28 }
 0x125   :  { %1684 = vmatprep.subr.bf16.mxu0 %v14924_v7 }
 0x1a5   :  { %v469_v37 = vpop.f32.mrf.mxu0  ;;  %v522_v39 = vpop.f32.mrf.mxu1 }
 0x1a6   :  { %v470_v44 = vadd.f32 %v469_v37, %v312_v36  ;;  %v523_v45 = vadd.f32 %v522_v39, %v320_v38 }
 0x1a7   :  { %v471_v41 = vpop.f32.mrf.mxu0  ;;  %v524_v43 = vpop.f32.mrf.mxu1 }
 0x1a8   :  { %v472_v48 = vadd.f32 %v471_v41, %v316_v40  ;;  %v525_v49 = vadd.f32 %v524_v43, %v324_v42  ;;  %v17370_v56 = vmax.f32 %v470_v44, 0.0  ;;  %v17372_v57 = vmax.f32 %v523_v45, 0.0 }
 0x1a9   :  { %v473_v46 = vpop.f32.mrf.mxu0  ;;  %v526_v47 = vpop.f32.mrf.mxu1 }
 0x1aa   :  { %v474_v50 = vadd.f32 %v473_v46, %v312_v36  ;;  %v527_v51 = vadd.f32 %v526_v47, %v320_v38  ;;  %v17382_v62 = vmax.f32 %v472_v48, 0.0  ;;  %v17384_v63 = vmax.f32 %v525_v49, 0.0 }
 0x1ab   :  { %v475_v52 = vpop.f32.mrf.mxu0  ;;  %v528_v53 = vpop.f32.mrf.mxu1  ;;  %v597_v0 = vmul.f32 %v17370_v56, %v17370_v56  ;;  %v599_v1 = vmul.f32 %v17372_v57, %v17372_v57 }
 0x1ac   :  { %v476_v54 = vadd.f32 %v475_v52, %v316_v40  ;;  %v529_v55 = vadd.f32 %v528_v53, %v324_v42  ;;  %v17374_v58 = vmax.f32 %v474_v50, 0.0  ;;  %v17376_v59 = vmax.f32 %v527_v51, 0.0 }
 0x1ad   :  { %v598_v13 = vmul.f32 %v17382_v62, %v17382_v62  ;;  %v600_v14 = vmul.f32 %v17384_v63, %v17384_v63 }
 0x1ae   :  { %v17378_v60 = vmax.f32 %v476_v54, 0.0  ;;  %v17380_v61 = vmax.f32 %v529_v55, 0.0  ;;  %v601_v2 = vmul.f32 %v17374_v58, %v17374_v58  ;;  %v603_v4 = vmul.f32 %v17376_v59, %v17376_v59 }
 0x1af   :  { %v557_v15 = vadd.f32 %v17374_v58, %v17370_v56  ;;  %v575_v16 = vadd.f32 %v17376_v59, %v17372_v57 }
 0x1b0   :  { %v602_v9 = vmul.f32 %v17378_v60, %v17378_v60  ;;  %v604_v10 = vmul.f32 %v17380_v61, %v17380_v61  ;;  %v613_v22 = vadd.f32 %v601_v2, %v597_v0  ;;  %v631_v23 = vadd.f32 %v603_v4, %v599_v1 }
 0x1b1   :  { %v479_v5 = vpop.f32.mrf.mxu0  ;;  %v532_v8 = vpop.f32.mrf.mxu1  ;;  %v566_v24 = vadd.f32 %v17378_v60, %v17382_v62  ;;  %v584_v3 = vadd.f32 %v17380_v61, %v17384_v63 }
 0x1b2   :  { %v480_v11 = vadd.f32 %v479_v5, %v312_v36  ;;  %v533_v12 = vadd.f32 %v532_v8, %v320_v38  ;;  %v622_v27 = vadd.f32 %v602_v9, %v598_v13  ;;  %v640_v7 = vadd.f32 %v604_v10, %v600_v14 }
 0x1b3   :  { %v481_v6 = vpop.f32.mrf.mxu0  ;;  %v534_v17 = vpop.f32.mrf.mxu1 }
 0x1b4   :  { %v17406_v18 = vmax.f32 %v480_v11, 0.0  ;;  %v17408_v19 = vmax.f32 %v533_v12, 0.0  ;;  %v482_v20 = vadd.f32 %v481_v6, %v316_v40  ;;  %v535_v21 = vadd.f32 %v534_v17, %v324_v42 }
 0x1b5   :  { %v483_v25 = vpop.f32.mrf.mxu0  ;;  %v536_v26 = vpop.f32.mrf.mxu1 }
 0x1b6   :  { %v605_v28 = vmul.f32 %v17406_v18, %v17406_v18  ;;  %v607_v29 = vmul.f32 %v17408_v19, %v17408_v19  ;;  %v17418_v33 = vmax.f32 %v482_v20, 0.0  ;;  %v17420_v37 = vmax.f32 %v535_v21, 0.0 }
 0x1b7   :  { %v484_v39 = vadd.f32 %v483_v25, %v312_v36  ;;  %v537_v41 = vadd.f32 %v536_v26, %v320_v38  ;;  %v485_v43 = vpop.f32.mrf.mxu0  ;;  %v538_v44 = vpop.f32.mrf.mxu1  ;;  %v558_v45 = vadd.f32 %v557_v15, %v17406_v18  ;;  %v576_v46 = vadd.f32 %v575_v16, %v17408_v19 }
 0x1b8   :  { %v486_v47 = vadd.f32 %v485_v43, %v316_v40  ;;  %v539_v48 = vadd.f32 %v538_v44, %v324_v42  ;;  %v614_v49 = vadd.f32 %v613_v22, %v605_v28  ;;  %v632_v50 = vadd.f32 %v631_v23, %v607_v29 }
 0x1b9   :  { %v606_v51 = vmul.f32 %v17418_v33, %v17418_v33  ;;  %v608_v52 = vmul.f32 %v17420_v37, %v17420_v37  ;;  %v17428_v53 = vmax.f32 %v484_v39, 0.0  ;;  %v17430_v36 = vmax.f32 %v537_v41, 0.0 }
 0x1ba   :  { %v17432_v38 = vmax.f32 %v486_v47, 0.0  ;;  %v17434_v54 = vmax.f32 %v539_v48, 0.0  ;;  %v567_v55 = vadd.f32 %v566_v24, %v17418_v33  ;;  %v585_v42 = vadd.f32 %v584_v3, %v17420_v37 }
 0x1bb   :  { %v623_v40 = vadd.f32 %v622_v27, %v606_v51  ;;  %v641_v0 = vadd.f32 %v640_v7, %v608_v52  ;;  %v559_v1 = vadd.f32 %v558_v45, %v17428_v53  ;;  %v609_v2 = vmul.f32 %v17428_v53, %v17428_v53 }
 0x1bc   :  { %v577_v4 = vadd.f32 %v576_v46, %v17430_v36  ;;  %v611_v5 = vmul.f32 %v17430_v36, %v17430_v36  ;;  %v568_v8 = vadd.f32 %v567_v55, %v17432_v38  ;;  %v610_v9 = vmul.f32 %v17432_v38, %v17432_v38 }
 0x1bd   :  { %v586_v10 = vadd.f32 %v585_v42, %v17434_v54  ;;  %v612_v11 = vmul.f32 %v17434_v54, %v17434_v54  ;;  %v560_v12 = vrot.slane %v559_v1, 4  ;;  %v615_v13 = vadd.f32 %v614_v49, %v609_v2 }
 0x1be   :  { %v578_v14 = vrot.slane %v577_v4, 4  ;;  %v633_v15 = vadd.f32 %v632_v50, %v611_v5  ;;  %v569_v16 = vrot.slane %v568_v8, 4  ;;  %v624_v6 = vadd.f32 %v623_v40, %v610_v9 }
 0x1bf   :  { %v587_v17 = vrot.slane %v586_v10, 4  ;;  %v642_v20 = vadd.f32 %v641_v0, %v612_v11  ;;  %v561_v21 = vadd.f32 %v560_v12, %v559_v1  ;;  %v616_v22 = vrot.slane %v615_v13, 4 }
 0x1c0   :  { %v579_v23 = vadd.f32 %v578_v14, %v577_v4  ;;  %v634_v24 = vrot.slane %v633_v15, 4  ;;  %v570_v3 = vadd.f32 %v569_v16, %v568_v8  ;;  %v625_v25 = vrot.slane %v624_v6, 4 }
 0x1c1   :  { %v588_v26 = vadd.f32 %v587_v17, %v586_v10  ;;  %v643_v27 = vrot.slane %v642_v20, 4  ;;  %v562_v7 = vrot.slane %v561_v21, 2  ;;  %v617_v28 = vadd.f32 %v616_v22, %v615_v13 }
 0x1c2   :  { %v580_v29 = vrot.slane %v579_v23, 2  ;;  %v635_v39 = vadd.f32 %v634_v24, %v633_v15  ;;  %v571_v41 = vrot.slane %v570_v3, 2  ;;  %v626_v43 = vadd.f32 %v625_v25, %v624_v6 }
 0x1c3   :  { %v589_v44 = vrot.slane %v588_v26, 2  ;;  %v644_v45 = vadd.f32 %v643_v27, %v642_v20  ;;  %v563_v46 = vadd.f32 %v562_v7, %v561_v21  ;;  %v618_v47 = vrot.slane %v617_v28, 2 }
 0x1c4   :  { %v581_v48 = vadd.f32 %v580_v29, %v579_v23  ;;  %v636_v49 = vrot.slane %v635_v39, 2  ;;  %v572_v50 = vadd.f32 %v571_v41, %v570_v3  ;;  %v627_v51 = vrot.slane %v626_v43, 2 }
 0x1c5   :  { %v590_v52 = vadd.f32 %v589_v44, %v588_v26  ;;  %v645_v55 = vrot.slane %v644_v45, 2  ;;  %v564_v40 = vrot.slane %v563_v46, 1  ;;  %v619_v42 = vadd.f32 %v618_v47, %v617_v28 }
 0x1c6   :  { %v582_v0 = vrot.slane %v581_v48, 1  ;;  %v637_v1 = vadd.f32 %v636_v49, %v635_v39  ;;  %v573_v2 = vrot.slane %v572_v50, 1  ;;  %v628_v4 = vadd.f32 %v627_v51, %v626_v43 }
 0x1c7   :  { %v591_v5 = vrot.slane %v590_v52, 1  ;;  %v646_v8 = vadd.f32 %v645_v55, %v644_v45  ;;  %v565_v9 = vadd.f32 %v564_v40, %v563_v46  ;;  %v620_v10 = vrot.slane %v619_v42, 1 }
 0x1c8   :  { %v583_v11 = vadd.f32 %v582_v0, %v581_v48  ;;  %v638_v12 = vrot.slane %v637_v1, 1  ;;  %v574_v13 = vadd.f32 %v573_v2, %v572_v50  ;;  %v629_v14 = vrot.slane %v628_v4, 1 }
 0x1c9   :  { %v592_v15 = vadd.f32 %v591_v5, %v590_v52  ;;  %v647_v16 = vrot.slane %v646_v8, 1  ;;  %v17450_v6 = vmul.f32 0.03125, %v565_v9  ;;  %v621_v17 = vadd.f32 %v620_v10, %v619_v42 }
 0x1ca   :  { %v17452_v20 = vmul.f32 0.03125, %v583_v11  ;;  %v639_v21 = vadd.f32 %v638_v12, %v637_v1  ;;  %v594_v22 = vmul.f32 0.03125, %v574_v13  ;;  %v630_v23 = vadd.f32 %v629_v14, %v628_v4 }
 0x1cb   :  { %v596_v24 = vmul.f32 0.03125, %v592_v15  ;;  %v648_v3 = vadd.f32 %v647_v16, %v646_v8  ;;  %v649_v25 = vmul.f32 0.03125, %v621_v17  ;;  %v653_v26 = vmul.f32 %v17450_v6, %v17450_v6 }
 0x1cc   :  { %v651_v27 = vmul.f32 0.03125, %v639_v21  ;;  %v655_v7 = vmul.f32 %v17452_v20, %v17452_v20  ;;  %v650_v29 = vmul.f32 0.03125, %v630_v23  ;;  %v654_v39 = vmul.f32 %v594_v22, %v594_v22 }
 0x1cd   :  { %v657_v28 = vsub.f32 %v649_v25, %v653_v26  ;;  %v652_v43 = vmul.f32 0.03125, %v648_v3  ;;  %v656_v44 = vmul.f32 %v596_v24, %v596_v24  ;;  %v674_v0 = vsub.f32 %v17418_v33, %v594_v22  ;;  %v14925_v26 = vld [vmem:[#allocation15 + $0x2e8] ss:$16 sps:$4 sm:$0xff]  }
 0x1ce   :  { %v659_v41 = vsub.f32 %v651_v27, %v655_v7  ;;  %v658_v46 = vsub.f32 %v650_v29, %v654_v39  ;;  %v678_v1 = vsub.f32 %v17432_v38, %v594_v22  ;;  %v676_v4 = vsub.f32 %v17420_v37, %v596_v24  ;;  %v14933_v29 = vld [vmem:[#allocation15 + $0x2cc] ss:$16 sps:$4 sm:$0xff]  }
 0x1cf   :  { %v661_v45 = vmax.f32 %v657_v28, 0.0  ;;  %v660_v48 = vsub.f32 %v652_v43, %v656_v44  ;;  %v666_v5 = vsub.f32 %v17382_v62, %v594_v22  ;;  %v665_v8 = vsub.f32 %v17370_v56, %v17450_v6  ;;  %v14931_v44 = vld [vmem:[#allocation15 + $0x2c8] ss:$16 sps:$4 sm:$0xff]  }
 0x1d0   :  { %v663_v47 = vmax.f32 %v659_v41, 0.0  ;;  %v662_v50 = vmax.f32 %v658_v46, 0.0  ;;  %v669_v9 = vsub.f32 %v17374_v58, %v17450_v6  ;;  %v670_v11 = vsub.f32 %v17378_v60, %v594_v22 }
 0x1d1   :  { %v681_v49 = vadd.f32 1e-05, %v661_v45  ;;  %v664_v52 = vmax.f32 %v660_v48, 0.0  ;;  %v668_v12 = vsub.f32 %v17384_v63, %v596_v24  ;;  %v667_v33 = vsub.f32 %v17372_v57, %v17452_v20  ;;  %v14936_v45 = vld [vmem:[#allocation15 + $0xac] ss:$16 sps:$4 sm:$0xff]  }
 0x1d2   :  { %v683_v51 = vadd.f32 1e-05, %v663_v47  ;;  %v682_v55 = vadd.f32 1e-05, %v662_v50  ;;  %v671_v38 = vsub.f32 %v17376_v59, %v17452_v20  ;;  %v672_v62 = vsub.f32 %v17380_v61, %v596_v24  ;;  %v14922_v59 = vld [vmem:[#allocation15 + $0xe8] ss:$16 sps:$4 sm:$0xff]  }
 0x1d3   :  { %15402 = vrsqrt.f32 %v681_v49  ;;  %v684_v40 = vadd.f32 1e-05, %v664_v52  ;;  %v680_v15 = vsub.f32 %v17434_v54, %v596_v24  ;;  %v14930_v24 = vld [vmem:[#allocation15 + $0xcc] ss:$16 sps:$4 sm:$0xff]   ;;  %v673_v27 = vsub.f32 %v17406_v18, %v17450_v6  ;;  %v14928_v18 = vld [vmem:[#allocation15 + $0xc8] ss:$16 sps:$4 sm:$0xff]  }
 0x1d4   :  { %15404 = vrsqrt.f32 %v683_v51  ;;  %v677_v7 = vsub.f32 %v17428_v53, %v17450_v6  ;;  %v675_v39 = vsub.f32 %v17408_v19, %v17452_v20  ;;  %v679_v41 = vsub.f32 %v17430_v36, %v17452_v20  ;;  %v14939_v19 = vld [vmem:[#allocation15 + $0x2ac] ss:$16 sps:$4 sm:$0xff]   ;;  %v14934_v36 = vld [vmem:[#allocation15 + $0xa8] ss:$16 sps:$4 sm:$0xff]  }
 0x1d5   :  { %15406 = vrsqrt.f32 %v682_v55  ;;  %v14937_v48 = vld [vmem:[#allocation15 + $0x2a8] ss:$16 sps:$4 sm:$0xff]   ;;  %v14942_v50 = vld [vmem:[#allocation15 + $0x8c] ss:$16 sps:$4 sm:$0xff]  }
 0x1d6   :  { %15408 = vrsqrt.f32 %v684_v40  ;;  %v14945_v51 = vld [vmem:[#allocation15 + $0x28c] ss:$16 sps:$4 sm:$0xff]   ;;  %v14940_v52 = vld [vmem:[#allocation15 + $0x88] ss:$16 sps:$4 sm:$0xff]  }
 0x1d7   :  { %v14943_v55 = vld [vmem:[#allocation15 + $0x288] ss:$16 sps:$4 sm:$0xff]   ;;  %v14948_v40 = vld [vmem:[#allocation15 + $0x6c] ss:$16 sps:$4 sm:$0xff]  }
 0x1e0   :  { %v15403_v42 = vpop.eup %15402 }
 0x1e1   :  { %v15405_v2 = vpop.eup %15404  ;;  %v689_v14 = vmul.f32 %v15403_v42, %v665_v8  ;;  %v693_v56 = vmul.f32 %v15403_v42, %v669_v9  ;;  %v697_v53 = vmul.f32 %v15403_v42, %v673_v27  ;;  %v701_v6 = vmul.f32 %v15403_v42, %v677_v7  ;;  %v14951_v42 = vld [vmem:[#allocation15 + $0x26c] ss:$16 sps:$4 sm:$0xff]   ;;  %v14955_v8 = vld [vmem:[#allocation15 + $0x248] ss:$16 sps:$4 sm:$0xff]  }
 0x1e2   :  { %v15407_v10 = vpop.eup %15406  ;;  %v691_v16 = vmul.f32 %v15405_v2, %v667_v33  ;;  %v695_v17 = vmul.f32 %v15405_v2, %v671_v38  ;;  %v699_v46 = vmul.f32 %v15405_v2, %v675_v39  ;;  %v703_v47 = vmul.f32 %v15405_v2, %v679_v41  ;;  %v14954_v2 = vld [vmem:[#allocation15 + $0x4c] ss:$16 sps:$4 sm:$0xff]   ;;  %v14997_v39 = vld [vmem:[#allocation15 + $0x368] ss:$16 sps:$4 sm:$0xff]  }
 0x1e3   :  { %v15409_v37 = vpop.eup %15408  ;;  %v690_v13 = vmul.f32 %v15407_v10, %v666_v5  ;;  %v694_v58 = vmul.f32 %v15407_v10, %v670_v11  ;;  %v698_v60 = vmul.f32 %v15407_v10, %v674_v0  ;;  %v702_v21 = vmul.f32 %v15407_v10, %v678_v1  ;;  %v14946_v0 = vld [vmem:[#allocation15 + $0x68] ss:$16 sps:$4 sm:$0xff]   ;;  %v14960_v9 = vld [vmem:[#allocation15 + $0x2c] ss:$16 sps:$4 sm:$0xff]  }
 0x1e4   :  { %v692_v63 = vmul.f32 %v15409_v37, %v668_v12  ;;  %v696_v22 = vmul.f32 %v15409_v37, %v672_v62  ;;  %v700_v23 = vmul.f32 %v15409_v37, %v676_v4  ;;  %v704_v57 = vmul.f32 %v15409_v37, %v680_v15  ;;  %v14949_v1 = vld [vmem:[#allocation15 + $0x268] ss:$16 sps:$4 sm:$0xff]   ;;  %v14957_v4 = vld [vmem:[#allocation15 + $0x24c] ss:$16 sps:$4 sm:$0xff]  }
 0x1e5   :  { %v17474_v3 = vpack.c.bf16 %v694_v58, %v690_v13  ;;  %v17478_v61 = vpack.c.bf16 %v693_v56, %v689_v14  ;;  %v17481_v54 = vpack.c.bf16 %v695_v17, %v691_v16  ;;  %v17487_v28 = vpack.c.bf16 %v702_v21, %v698_v60  ;;  %v14952_v5 = vld [vmem:[#allocation15 + $0x48] ss:$16 sps:$4 sm:$0xff]   ;;  %v14963_v10 = vld [vmem:[#allocation15 + $0x22c] ss:$16 sps:$4 sm:$0xff]  }
 0x1e6   :  { %v17476_v25 = vpack.c.bf16 %v696_v22, %v692_v63  ;;  %v17495_v43 = vpack.c.bf16 %v704_v57, %v700_v23  ;;  %v17500_v20 = vpack.c.bf16 %v701_v6, %v697_v53  ;;  %v17502_v49 = vpack.c.bf16 %v703_v47, %v699_v46  ;;  %v14958_v11 = vld [vmem:[#allocation15 + $0x28] ss:$16 sps:$4 sm:$0xff]   ;;  %v14966_v33 = vld [vmem:[#allocation15 + $0xc] ss:$16 sps:$4 sm:$0xff]  }
 0x1e7   :  { %1610 = vmatprep.mubr.bf16.mxu0 %v17474_v3  ;;  %v14961_v12 = vld [vmem:[#allocation15 + $0x228] ss:$16 sps:$4 sm:$0xff]   ;;  %v14969_v38 = vld [vmem:[#allocation15 + $0x20c] ss:$16 sps:$4 sm:$0xff]  }
 0x1e8   :  { %1663 = vmatprep.mubr.bf16.mxu1 %v17476_v25  ;;  %1611 = vmatmul.mubr.bf16.vlgmr.msra.gmra.mxu0 %v17478_v61  ;;  %v14964_v37 = vld [vmem:[#allocation15 + $0x8] ss:$16 sps:$4 sm:$0xff]   ;;  %v14972_v62 = vld [vmem:[#allocation15 + $0x1ec] ss:$16 sps:$4 sm:$0xff]  }
 0x1e9   :  { %1664 = vmatmul.mubr.bf16.vlgmr.msra.gmra.mxu1 %v17481_v54  ;;  %1685 = vmatpush1.bf16.msra.mxu0 %v14922_v59  ;;  %v14967_v13 = vld [vmem:[#allocation15 + $0x208] ss:$16 sps:$4 sm:$0xff]   ;;  %v14975_v14 = vld [vmem:[#allocation15 + $0x3ec] ss:$16 sps:$4 sm:$0xff]  }
 0x1ea   :  { %1738 = vmatpush1.bf16.msra.mxu1 %v14925_v26  ;;  %1620 = vmatprep.mubr.bf16.mxu0 %v17487_v28  ;;  %v14970_v56 = vld [vmem:[#allocation15 + $0x1e8] ss:$16 sps:$4 sm:$0xff]   ;;  %v14978_v58 = vld [vmem:[#allocation15 + $0x1cc] ss:$16 sps:$4 sm:$0xff]  }
 0x1eb   :  { %1673 = vmatprep.mubr.bf16.mxu1 %v17495_v43  ;;  %1686 = vmatprep.subr.bf16.mxu0 %v14930_v24  ;;  %v14973_v15 = vld [vmem:[#allocation15 + $0x3e8] ss:$16 sps:$4 sm:$0xff]   ;;  %v14981_v16 = vld [vmem:[#allocation15 + $0x3cc] ss:$16 sps:$4 sm:$0xff]  }
 0x1ec   :  { %1739 = vmatprep.subr.bf16.mxu1 %v14933_v29  ;;  %v14976_v17 = vld [vmem:[#allocation15 + $0x1c8] ss:$16 sps:$4 sm:$0xff]   ;;  %v14984_v21 = vld [vmem:[#allocation15 + $0x1ac] ss:$16 sps:$4 sm:$0xff]  }
 0x1ed   :  { %1687 = vmatpush1.bf16.msra.mxu0 %v14928_v18  ;;  %v14979_v60 = vld [vmem:[#allocation15 + $0x3c8] ss:$16 sps:$4 sm:$0xff]   ;;  %v14987_v63 = vld [vmem:[#allocation15 + $0x3ac] ss:$16 sps:$4 sm:$0xff]  }
 0x1ee   :  { %1740 = vmatpush1.bf16.msra.mxu1 %v14931_v44  ;;  %1688 = vmatprep.subr.bf16.mxu0 %v14936_v45  ;;  %v14982_v22 = vld [vmem:[#allocation15 + $0x1a8] ss:$16 sps:$4 sm:$0xff]   ;;  %v14990_v57 = vld [vmem:[#allocation15 + $0x18c] ss:$16 sps:$4 sm:$0xff]  }
 0x1ef   :  { %1741 = vmatprep.subr.bf16.mxu1 %v14939_v19  ;;  %v14985_v23 = vld [vmem:[#allocation15 + $0x3a8] ss:$16 sps:$4 sm:$0xff]   ;;  %v14993_v59 = vld [vmem:[#allocation15 + $0x38c] ss:$16 sps:$4 sm:$0xff]  }
 0x1f0   :  { %1621 = vmatmul.mubr.bf16.gmra.mxu0 %v17500_v20  ;;  %v14988_v26 = vld [vmem:[#allocation15 + $0x188] ss:$16 sps:$4 sm:$0xff]   ;;  %v14996_v27 = vld [vmem:[#allocation15 + $0x16c] ss:$16 sps:$4 sm:$0xff]  }
 0x1f1   :  { %1674 = vmatmul.mubr.bf16.gmra.mxu1 %v17502_v49  ;;  %1689 = vmatpush1.bf16.msra.mxu0 %v14934_v36  ;;  %v14991_v24 = vld [vmem:[#allocation15 + $0x388] ss:$16 sps:$4 sm:$0xff]   ;;  %v14999_v7 = vld [vmem:[#allocation15 + $0x36c] ss:$16 sps:$4 sm:$0xff]  }
 0x1f2   :  { %1742 = vmatpush1.bf16.msra.mxu1 %v14937_v48  ;;  %1716 = vmatprep.mubr.bf16.mxu0 %v17474_v3  ;;  %v14994_v29 = vld [vmem:[#allocation15 + $0x168] ss:$16 sps:$4 sm:$0xff]   ;;  %v15002_v41 = vld [vmem:[#allocation15 + $0x14c] ss:$16 sps:$4 sm:$0xff]  }
 0x1f3   :  { %1769 = vmatprep.mubr.bf16.mxu1 %v17476_v25  ;;  %1690 = vmatprep.subr.bf16.mxu0 %v14942_v50  ;;  %v15005_v18 = vld [vmem:[#allocation15 + $0x34c] ss:$16 sps:$4 sm:$0xff]   ;;  %v15000_v53 = vld [vmem:[#allocation15 + $0x148] ss:$16 sps:$4 sm:$0xff]  }
 0x1f4   :  { %1743 = vmatprep.subr.bf16.mxu1 %v14945_v51  ;;  %v15003_v6 = vld [vmem:[#allocation15 + $0x348] ss:$16 sps:$4 sm:$0xff]   ;;  %v15008_v44 = vld [vmem:[#allocation15 + $0x12c] ss:$16 sps:$4 sm:$0xff]   ;;  %v15020_v51 = vld [vmem:[#allocation15 + $0x4e4] ss:$16 sps:$4 sm:$0xff]  }
 0x1f5   :  { %1691 = vmatpush1.bf16.msra.mxu0 %v14940_v52  ;;  %v15011_v45 = vld [vmem:[#allocation15 + $0x32c] ss:$16 sps:$4 sm:$0xff]   ;;  %v15006_v46 = vld [vmem:[#allocation15 + $0x128] ss:$16 sps:$4 sm:$0xff]   ;;  %v15023_v52 = vld [vmem:[#allocation15 + $0x6e4] ss:$16 sps:$4 sm:$0xff]  }
 0x1f6   :  { %1744 = vmatpush1.bf16.msra.mxu1 %v14943_v55  ;;  %1692 = vmatprep.subr.bf16.mxu0 %v14948_v40  ;;  %v15009_v47 = vld [vmem:[#allocation15 + $0x328] ss:$16 sps:$4 sm:$0xff]   ;;  %v15014_v19 = vld [vmem:[#allocation15 + $0x10c] ss:$16 sps:$4 sm:$0xff]   ;;  %v15018_v55 = vld [vmem:[#allocation15 + $0x4e0] ss:$16 sps:$4 sm:$0xff]  }
 0x1f7   :  { %1745 = vmatprep.subr.bf16.mxu1 %v14951_v42  ;;  %v15017_v36 = vld [vmem:[#allocation15 + $0x30c] ss:$16 sps:$4 sm:$0xff]   ;;  %v15012_v48 = vld [vmem:[#allocation15 + $0x108] ss:$16 sps:$4 sm:$0xff]   ;;  %v15021_v40 = vld [vmem:[#allocation15 + $0x6e0] ss:$16 sps:$4 sm:$0xff]  }
 0x1f8   :  { %v15015_v50 = vld [vmem:[#allocation15 + $0x308] ss:$16 sps:$4 sm:$0xff]   ;;  %v15026_v42 = vld [vmem:[#allocation15 + $0x4c4] ss:$16 sps:$4 sm:$0xff]  }
 0x1f9   :  { %1693 = vmatpush1.bf16.msra.mxu0 %v14946_v0  ;;  %v15029_v0 = vld [vmem:[#allocation15 + $0x6c4] ss:$16 sps:$4 sm:$0xff]  }
 0x1fa   :  { %1746 = vmatpush1.bf16.msra.mxu1 %v14949_v1  ;;  %1694 = vmatprep.subr.bf16.mxu0 %v14954_v2  ;;  %v15024_v1 = vld [vmem:[#allocation15 + $0x4c0] ss:$16 sps:$4 sm:$0xff]  }
 0x1fb   :  { %1747 = vmatprep.subr.bf16.mxu1 %v14957_v4  ;;  %v15027_v2 = vld [vmem:[#allocation15 + $0x6c0] ss:$16 sps:$4 sm:$0xff]   ;;  %v15032_v4 = vld [vmem:[#allocation15 + $0x4a4] ss:$16 sps:$4 sm:$0xff]  }
 0x1fd   :  { %1695 = vmatpush1.bf16.msra.mxu0 %v14952_v5  ;;  %v15035_v5 = vld [vmem:[#allocation15 + $0x6a4] ss:$16 sps:$4 sm:$0xff]  }
 0x1fe   :  { %1748 = vmatpush1.bf16.msra.mxu1 %v14955_v8  ;;  %1696 = vmatprep.subr.bf16.mxu0 %v14960_v9  ;;  %v15030_v8 = vld [vmem:[#allocation15 + $0x4a0] ss:$16 sps:$4 sm:$0xff]  }
 0x1ff   :  { %1749 = vmatprep.subr.bf16.mxu1 %v14963_v10  ;;  %v15033_v9 = vld [vmem:[#allocation15 + $0x6a0] ss:$16 sps:$4 sm:$0xff]   ;;  %v15038_v10 = vld [vmem:[#allocation15 + $0x484] ss:$16 sps:$4 sm:$0xff]  }
 0x201   :  { %1697 = vmatpush1.bf16.msra.mxu0 %v14958_v11  ;;  %v15041_v11 = vld [vmem:[#allocation15 + $0x684] ss:$16 sps:$4 sm:$0xff]  }
 0x202   :  { %1750 = vmatpush1.bf16.msra.mxu1 %v14961_v12  ;;  %1698 = vmatprep.subr.bf16.mxu0 %v14966_v33  ;;  %v15036_v12 = vld [vmem:[#allocation15 + $0x480] ss:$16 sps:$4 sm:$0xff]  }
 0x203   :  { %1751 = vmatprep.subr.bf16.mxu1 %v14969_v38  ;;  %v15039_v33 = vld [vmem:[#allocation15 + $0x680] ss:$16 sps:$4 sm:$0xff]   ;;  %v15044_v38 = vld [vmem:[#allocation15 + $0x464] ss:$16 sps:$4 sm:$0xff]  }
 0x205   :  { %1699 = vmatpush1.bf16.msra.mxu0 %v14964_v37  ;;  %v15047_v37 = vld [vmem:[#allocation15 + $0x664] ss:$16 sps:$4 sm:$0xff]  }
 0x206   :  { %1752 = vmatpush1.bf16.msra.mxu1 %v14967_v13  ;;  %1700 = vmatprep.subr.bf16.mxu0 %v14972_v62  ;;  %v15042_v13 = vld [vmem:[#allocation15 + $0x460] ss:$16 sps:$4 sm:$0xff]  }
 0x207   :  { %1753 = vmatprep.subr.bf16.mxu1 %v14975_v14  ;;  %v15045_v62 = vld [vmem:[#allocation15 + $0x660] ss:$16 sps:$4 sm:$0xff]   ;;  %v15050_v14 = vld [vmem:[#allocation15 + $0x444] ss:$16 sps:$4 sm:$0xff]  }
 0x209   :  { %1701 = vmatpush2.bf16.msra.mxu0 %v14970_v56  ;;  %v15053_v56 = vld [vmem:[#allocation15 + $0x644] ss:$16 sps:$4 sm:$0xff]  }
 0x20a   :  { %1754 = vmatpush2.bf16.msra.mxu1 %v14973_v15  ;;  %1702 = vmatprep.subr.bf16.mxu0 %v14978_v58  ;;  %v15048_v15 = vld [vmem:[#allocation15 + $0x440] ss:$16 sps:$4 sm:$0xff]  }
 0x20b   :  { %1755 = vmatprep.subr.bf16.mxu1 %v14981_v16  ;;  %v15051_v58 = vld [vmem:[#allocation15 + $0x640] ss:$16 sps:$4 sm:$0xff]   ;;  %v15056_v16 = vld [vmem:[#allocation15 + $0x424] ss:$16 sps:$4 sm:$0xff]  }
 0x20d   :  { %1703 = vmatpush2.bf16.msra.mxu0 %v14976_v17  ;;  %v15059_v17 = vld [vmem:[#allocation15 + $0x624] ss:$16 sps:$4 sm:$0xff]  }
 0x20e   :  { %1756 = vmatpush2.bf16.msra.mxu1 %v14979_v60  ;;  %1704 = vmatprep.subr.bf16.mxu0 %v14984_v21  ;;  %v15054_v60 = vld [vmem:[#allocation15 + $0x420] ss:$16 sps:$4 sm:$0xff]  }
 0x20f   :  { %1757 = vmatprep.subr.bf16.mxu1 %v14987_v63  ;;  %v15057_v21 = vld [vmem:[#allocation15 + $0x620] ss:$16 sps:$4 sm:$0xff]   ;;  %v15062_v63 = vld [vmem:[#allocation15 + $0x404] ss:$16 sps:$4 sm:$0xff]  }
 0x211   :  { %1705 = vmatpush2.bf16.msra.mxu0 %v14982_v22  ;;  %v15065_v22 = vld [vmem:[#allocation15 + $0x604] ss:$16 sps:$4 sm:$0xff]  }
 0x212   :  { %1758 = vmatpush2.bf16.msra.mxu1 %v14985_v23  ;;  %1706 = vmatprep.subr.bf16.mxu0 %v14990_v57  ;;  %v15060_v23 = vld [vmem:[#allocation15 + $0x400] ss:$16 sps:$4 sm:$0xff]  }
 0x213   :  { %1759 = vmatprep.subr.bf16.mxu1 %v14993_v59  ;;  %v15063_v57 = vld [vmem:[#allocation15 + $0x600] ss:$16 sps:$4 sm:$0xff]   ;;  %v15068_v59 = vld [vmem:[#allocation15 + $0x5e4] ss:$16 sps:$4 sm:$0xff]  }
 0x215   :  { %1707 = vmatpush2.bf16.msra.mxu0 %v14988_v26  ;;  %v15071_v26 = vld [vmem:[#allocation15 + $0x7e4] ss:$16 sps:$4 sm:$0xff]  }
 0x216   :  { %1760 = vmatpush2.bf16.msra.mxu1 %v14991_v24  ;;  %1708 = vmatprep.subr.bf16.mxu0 %v14996_v27  ;;  %v15066_v24 = vld [vmem:[#allocation15 + $0x5e0] ss:$16 sps:$4 sm:$0xff]  }
 0x217   :  { %1761 = vmatprep.subr.bf16.mxu1 %v14999_v7  ;;  %v15069_v27 = vld [vmem:[#allocation15 + $0x7e0] ss:$16 sps:$4 sm:$0xff]   ;;  %v15074_v7 = vld [vmem:[#allocation15 + $0x5c4] ss:$16 sps:$4 sm:$0xff]  }
 0x219   :  { %1709 = vmatpush2.bf16.msra.mxu0 %v14994_v29  ;;  %v15077_v29 = vld [vmem:[#allocation15 + $0x7c4] ss:$16 sps:$4 sm:$0xff]  }
 0x21a   :  { %1762 = vmatpush2.bf16.msra.mxu1 %v14997_v39  ;;  %1710 = vmatprep.subr.bf16.mxu0 %v15002_v41  ;;  %v15072_v39 = vld [vmem:[#allocation15 + $0x5c0] ss:$16 sps:$4 sm:$0xff]  }
 0x21b   :  { %1763 = vmatprep.subr.bf16.mxu1 %v15005_v18  ;;  %v15075_v41 = vld [vmem:[#allocation15 + $0x7c0] ss:$16 sps:$4 sm:$0xff]   ;;  %v15080_v18 = vld [vmem:[#allocation15 + $0x5a4] ss:$16 sps:$4 sm:$0xff]  }
 0x21d   :  { %1711 = vmatpush2.bf16.msra.mxu0 %v15000_v53  ;;  %v15083_v53 = vld [vmem:[#allocation15 + $0x7a4] ss:$16 sps:$4 sm:$0xff]  }
 0x21e   :  { %1764 = vmatpush2.bf16.msra.mxu1 %v15003_v6  ;;  %1712 = vmatprep.subr.bf16.mxu0 %v15008_v44  ;;  %v15078_v6 = vld [vmem:[#allocation15 + $0x5a0] ss:$16 sps:$4 sm:$0xff]  }
 0x21f   :  { %1765 = vmatprep.subr.bf16.mxu1 %v15011_v45  ;;  %v15081_v44 = vld [vmem:[#allocation15 + $0x7a0] ss:$16 sps:$4 sm:$0xff]   ;;  %v15086_v45 = vld [vmem:[#allocation15 + $0x584] ss:$16 sps:$4 sm:$0xff]  }
 0x221   :  { %1713 = vmatpush2.bf16.msra.mxu0 %v15006_v46  ;;  %v15089_v46 = vld [vmem:[#allocation15 + $0x784] ss:$16 sps:$4 sm:$0xff]  }
 0x222   :  { %1766 = vmatpush2.bf16.msra.mxu1 %v15009_v47  ;;  %1714 = vmatprep.subr.bf16.mxu0 %v15014_v19  ;;  %v15084_v47 = vld [vmem:[#allocation15 + $0x580] ss:$16 sps:$4 sm:$0xff]  }
 0x223   :  { %1767 = vmatprep.subr.bf16.mxu1 %v15017_v36  ;;  %v15087_v19 = vld [vmem:[#allocation15 + $0x780] ss:$16 sps:$4 sm:$0xff]   ;;  %v15092_v36 = vld [vmem:[#allocation15 + $0x564] ss:$16 sps:$4 sm:$0xff]  }
 0x225   :  { %1715 = vmatpush2.bf16.msra.mxu0 %v15012_v48  ;;  %v15095_v48 = vld [vmem:[#allocation15 + $0x764] ss:$16 sps:$4 sm:$0xff]  }
 0x226   :  { %1768 = vmatpush2.bf16.msra.mxu1 %v15015_v50  ;;  %2559 = vmatprep.subr.bf16.mxu0 %v15020_v51  ;;  %v15090_v50 = vld [vmem:[#allocation15 + $0x560] ss:$16 sps:$4 sm:$0xff]  }
 0x227   :  { %2612 = vmatprep.subr.bf16.mxu1 %v15023_v52  ;;  %v15093_v51 = vld [vmem:[#allocation15 + $0x760] ss:$16 sps:$4 sm:$0xff]   ;;  %v15098_v52 = vld [vmem:[#allocation15 + $0x544] ss:$16 sps:$4 sm:$0xff]  }
 0x228   :  { %1717 = vmatmul.mubr.bf16.vlgmr.msra.gmra.mxu0 %v17478_v61 }
 0x229   :  { %1770 = vmatmul.mubr.bf16.vlgmr.msra.gmra.mxu1 %v17481_v54  ;;  %1726 = vmatprep.mubr.bf16.mxu0 %v17487_v28 }
 0x22a   :  { %1779 = vmatprep.mubr.bf16.mxu1 %v17495_v43  ;;  %2560 = vmatpush1.bf16.msra.mxu0 %v15018_v55  ;;  %v15101_v55 = vld [vmem:[#allocation15 + $0x744] ss:$16 sps:$4 sm:$0xff]  }
 0x22b   :  { %2613 = vmatpush1.bf16.msra.mxu1 %v15021_v40  ;;  %2561 = vmatprep.subr.bf16.mxu0 %v15026_v42  ;;  %v15096_v40 = vld [vmem:[#allocation15 + $0x540] ss:$16 sps:$4 sm:$0xff]  }
 0x22c   :  { %2614 = vmatprep.subr.bf16.mxu1 %v15029_v0  ;;  %v15099_v42 = vld [vmem:[#allocation15 + $0x740] ss:$16 sps:$4 sm:$0xff]   ;;  %v15104_v0 = vld [vmem:[#allocation15 + $0x524] ss:$16 sps:$4 sm:$0xff]  }
 0x22e   :  { %2562 = vmatpush1.bf16.msra.mxu0 %v15024_v1  ;;  %v15107_v1 = vld [vmem:[#allocation15 + $0x724] ss:$16 sps:$4 sm:$0xff]  }
 0x22f   :  { %2615 = vmatpush1.bf16.msra.mxu1 %v15027_v2  ;;  %2563 = vmatprep.subr.bf16.mxu0 %v15032_v4  ;;  %v15102_v2 = vld [vmem:[#allocation15 + $0x520] ss:$16 sps:$4 sm:$0xff]  }
 0x230   :  { %1727 = vmatmul.mubr.bf16.gmra.mxu0 %v17500_v20  ;;  %2616 = vmatprep.subr.bf16.mxu1 %v15035_v5  ;;  %v15105_v4 = vld [vmem:[#allocation15 + $0x720] ss:$16 sps:$4 sm:$0xff]   ;;  %v15110_v5 = vld [vmem:[#allocation15 + $0x504] ss:$16 sps:$4 sm:$0xff]  }
 0x231   :  { %1780 = vmatmul.mubr.bf16.gmra.mxu1 %v17502_v49  ;;  %2591 = vmatprep.mubr.bf16.mxu0 %v17474_v3 }
 0x232   :  { %2564 = vmatpush1.bf16.msra.mxu0 %v15030_v8  ;;  %2644 = vmatprep.mubr.bf16.mxu1 %v17476_v25  ;;  %v15113_v8 = vld [vmem:[#allocation15 + $0x704] ss:$16 sps:$4 sm:$0xff]  }
 0x233   :  { %2617 = vmatpush1.bf16.msra.mxu1 %v15033_v9  ;;  %2565 = vmatprep.subr.bf16.mxu0 %v15038_v10  ;;  %v15108_v9 = vld [vmem:[#allocation15 + $0x500] ss:$16 sps:$4 sm:$0xff]  }
 0x234   :  { %2618 = vmatprep.subr.bf16.mxu1 %v15041_v11  ;;  %v15111_v10 = vld [vmem:[#allocation15 + $0x700] ss:$16 sps:$4 sm:$0xff]   ;;  %v15116_v11 = vld [vmem:[#allocation15 + $0x4ec] ss:$16 sps:$4 sm:$0xff]  }
 0x236   :  { %2566 = vmatpush1.bf16.msra.mxu0 %v15036_v12  ;;  %v15119_v12 = vld [vmem:[#allocation15 + $0x6ec] ss:$16 sps:$4 sm:$0xff]  }
 0x237   :  { %2619 = vmatpush1.bf16.msra.mxu1 %v15039_v33  ;;  %2567 = vmatprep.subr.bf16.mxu0 %v15044_v38  ;;  %v15114_v33 = vld [vmem:[#allocation15 + $0x4e8] ss:$16 sps:$4 sm:$0xff]  }
 0x238   :  { %2620 = vmatprep.subr.bf16.mxu1 %v15047_v37  ;;  %v15117_v38 = vld [vmem:[#allocation15 + $0x6e8] ss:$16 sps:$4 sm:$0xff]   ;;  %v15122_v37 = vld [vmem:[#allocation15 + $0x4cc] ss:$16 sps:$4 sm:$0xff]  }
 0x23a   :  { %2568 = vmatpush1.bf16.msra.mxu0 %v15042_v13  ;;  %v15125_v13 = vld [vmem:[#allocation15 + $0x6cc] ss:$16 sps:$4 sm:$0xff]  }
 0x23b   :  { %2621 = vmatpush1.bf16.msra.mxu1 %v15045_v62  ;;  %2569 = vmatprep.subr.bf16.mxu0 %v15050_v14  ;;  %v15120_v62 = vld [vmem:[#allocation15 + $0x4c8] ss:$16 sps:$4 sm:$0xff]  }
 0x23c   :  { %2622 = vmatprep.subr.bf16.mxu1 %v15053_v56  ;;  %v15123_v14 = vld [vmem:[#allocation15 + $0x6c8] ss:$16 sps:$4 sm:$0xff]   ;;  %v15128_v56 = vld [vmem:[#allocation15 + $0x4ac] ss:$16 sps:$4 sm:$0xff]  }
 0x23e   :  { %2570 = vmatpush1.bf16.msra.mxu0 %v15048_v15  ;;  %v15131_v15 = vld [vmem:[#allocation15 + $0x6ac] ss:$16 sps:$4 sm:$0xff]  }
 0x23f   :  { %2623 = vmatpush1.bf16.msra.mxu1 %v15051_v58  ;;  %2571 = vmatprep.subr.bf16.mxu0 %v15056_v16  ;;  %v15126_v58 = vld [vmem:[#allocation15 + $0x4a8] ss:$16 sps:$4 sm:$0xff]  }
 0x240   :  { %2624 = vmatprep.subr.bf16.mxu1 %v15059_v17  ;;  %v15129_v16 = vld [vmem:[#allocation15 + $0x6a8] ss:$16 sps:$4 sm:$0xff]   ;;  %v15134_v17 = vld [vmem:[#allocation15 + $0x48c] ss:$16 sps:$4 sm:$0xff]  }
 0x242   :  { %2572 = vmatpush1.bf16.msra.mxu0 %v15054_v60  ;;  %v15137_v60 = vld [vmem:[#allocation15 + $0x68c] ss:$16 sps:$4 sm:$0xff]  }
 0x243   :  { %2625 = vmatpush1.bf16.msra.mxu1 %v15057_v21  ;;  %2573 = vmatprep.subr.bf16.mxu0 %v15062_v63  ;;  %v15132_v21 = vld [vmem:[#allocation15 + $0x488] ss:$16 sps:$4 sm:$0xff]  }
 0x244   :  { %2626 = vmatprep.subr.bf16.mxu1 %v15065_v22  ;;  %v15135_v63 = vld [vmem:[#allocation15 + $0x688] ss:$16 sps:$4 sm:$0xff]   ;;  %v15140_v22 = vld [vmem:[#allocation15 + $0x46c] ss:$16 sps:$4 sm:$0xff]  }
 0x246   :  { %2574 = vmatpush1.bf16.msra.mxu0 %v15060_v23  ;;  %v15143_v23 = vld [vmem:[#allocation15 + $0x66c] ss:$16 sps:$4 sm:$0xff]  }
 0x247   :  { %2627 = vmatpush1.bf16.msra.mxu1 %v15063_v57  ;;  %2575 = vmatprep.subr.bf16.mxu0 %v15068_v59  ;;  %v15138_v57 = vld [vmem:[#allocation15 + $0x468] ss:$16 sps:$4 sm:$0xff]  }
 0x248   :  { %2628 = vmatprep.subr.bf16.mxu1 %v15071_v26  ;;  %v15141_v59 = vld [vmem:[#allocation15 + $0x668] ss:$16 sps:$4 sm:$0xff]   ;;  %v15146_v26 = vld [vmem:[#allocation15 + $0x44c] ss:$16 sps:$4 sm:$0xff]  }
 0x24a   :  { %2576 = vmatpush2.bf16.msra.mxu0 %v15066_v24  ;;  %v15149_v24 = vld [vmem:[#allocation15 + $0x64c] ss:$16 sps:$4 sm:$0xff]  }
 0x24b   :  { %2629 = vmatpush2.bf16.msra.mxu1 %v15069_v27  ;;  %2577 = vmatprep.subr.bf16.mxu0 %v15074_v7  ;;  %v15144_v27 = vld [vmem:[#allocation15 + $0x448] ss:$16 sps:$4 sm:$0xff]  }
 0x24c   :  { %2630 = vmatprep.subr.bf16.mxu1 %v15077_v29  ;;  %v15147_v7 = vld [vmem:[#allocation15 + $0x648] ss:$16 sps:$4 sm:$0xff]   ;;  %v15152_v29 = vld [vmem:[#allocation15 + $0x42c] ss:$16 sps:$4 sm:$0xff]  }
 0x24e   :  { %2578 = vmatpush2.bf16.msra.mxu0 %v15072_v39  ;;  %v15155_v39 = vld [vmem:[#allocation15 + $0x62c] ss:$16 sps:$4 sm:$0xff]  }
 0x24f   :  { %2631 = vmatpush2.bf16.msra.mxu1 %v15075_v41  ;;  %2579 = vmatprep.subr.bf16.mxu0 %v15080_v18  ;;  %v15150_v41 = vld [vmem:[#allocation15 + $0x428] ss:$16 sps:$4 sm:$0xff]  }
 0x250   :  { %2632 = vmatprep.subr.bf16.mxu1 %v15083_v53  ;;  %v15153_v18 = vld [vmem:[#allocation15 + $0x628] ss:$16 sps:$4 sm:$0xff]   ;;  %v15158_v53 = vld [vmem:[#allocation15 + $0x40c] ss:$16 sps:$4 sm:$0xff]  }
 0x252   :  { %2580 = vmatpush2.bf16.msra.mxu0 %v15078_v6  ;;  %v15161_v6 = vld [vmem:[#allocation15 + $0x60c] ss:$16 sps:$4 sm:$0xff]  }
 0x253   :  { %2633 = vmatpush2.bf16.msra.mxu1 %v15081_v44  ;;  %2581 = vmatprep.subr.bf16.mxu0 %v15086_v45  ;;  %v15156_v44 = vld [vmem:[#allocation15 + $0x408] ss:$16 sps:$4 sm:$0xff]  }
 0x254   :  { %2634 = vmatprep.subr.bf16.mxu1 %v15089_v46  ;;  %v15159_v45 = vld [vmem:[#allocation15 + $0x608] ss:$16 sps:$4 sm:$0xff]   ;;  %v15164_v46 = vld [vmem:[#allocation15 + $0x5ec] ss:$16 sps:$4 sm:$0xff]  }
 0x256   :  { %2582 = vmatpush2.bf16.msra.mxu0 %v15084_v47  ;;  %v15167_v47 = vld [vmem:[#allocation15 + $0x7ec] ss:$16 sps:$4 sm:$0xff]  }
 0x257   :  { %2635 = vmatpush2.bf16.msra.mxu1 %v15087_v19  ;;  %2583 = vmatprep.subr.bf16.mxu0 %v15092_v36  ;;  %v15162_v19 = vld [vmem:[#allocation15 + $0x5e8] ss:$16 sps:$4 sm:$0xff]  }
 0x258   :  { %2636 = vmatprep.subr.bf16.mxu1 %v15095_v48  ;;  %v15165_v36 = vld [vmem:[#allocation15 + $0x7e8] ss:$16 sps:$4 sm:$0xff]   ;;  %v15170_v48 = vld [vmem:[#allocation15 + $0x5cc] ss:$16 sps:$4 sm:$0xff]  }
 0x25a   :  { %2584 = vmatpush2.bf16.msra.mxu0 %v15090_v50  ;;  %v15173_v50 = vld [vmem:[#allocation15 + $0x7cc] ss:$16 sps:$4 sm:$0xff]  }
 0x25b   :  { %2637 = vmatpush2.bf16.msra.mxu1 %v15093_v51  ;;  %2585 = vmatprep.subr.bf16.mxu0 %v15098_v52  ;;  %v15168_v51 = vld [vmem:[#allocation15 + $0x5c8] ss:$16 sps:$4 sm:$0xff]  }
 0x25c   :  { %2638 = vmatprep.subr.bf16.mxu1 %v15101_v55  ;;  %v15171_v52 = vld [vmem:[#allocation15 + $0x7c8] ss:$16 sps:$4 sm:$0xff]   ;;  %v15176_v55 = vld [vmem:[#allocation15 + $0x5ac] ss:$16 sps:$4 sm:$0xff]  }
 0x25e   :  { %2586 = vmatpush2.bf16.msra.mxu0 %v15096_v40  ;;  %v15179_v40 = vld [vmem:[#allocation15 + $0x7ac] ss:$16 sps:$4 sm:$0xff]  }
 0x25f   :  { %2639 = vmatpush2.bf16.msra.mxu1 %v15099_v42  ;;  %2587 = vmatprep.subr.bf16.mxu0 %v15104_v0  ;;  %v15174_v42 = vld [vmem:[#allocation15 + $0x5a8] ss:$16 sps:$4 sm:$0xff]  }
 0x260   :  { %2640 = vmatprep.subr.bf16.mxu1 %v15107_v1  ;;  %v15177_v0 = vld [vmem:[#allocation15 + $0x7a8] ss:$16 sps:$4 sm:$0xff]   ;;  %v15182_v1 = vld [vmem:[#allocation15 + $0x58c] ss:$16 sps:$4 sm:$0xff]  }
 0x262   :  { %2588 = vmatpush2.bf16.msra.mxu0 %v15102_v2  ;;  %v15185_v2 = vld [vmem:[#allocation15 + $0x78c] ss:$16 sps:$4 sm:$0xff]  }
 0x263   :  { %2641 = vmatpush2.bf16.msra.mxu1 %v15105_v4  ;;  %2589 = vmatprep.subr.bf16.mxu0 %v15110_v5  ;;  %v15180_v4 = vld [vmem:[#allocation15 + $0x588] ss:$16 sps:$4 sm:$0xff]  }
 0x264   :  { %2642 = vmatprep.subr.bf16.mxu1 %v15113_v8  ;;  %v15183_v5 = vld [vmem:[#allocation15 + $0x788] ss:$16 sps:$4 sm:$0xff]   ;;  %v15188_v8 = vld [vmem:[#allocation15 + $0x56c] ss:$16 sps:$4 sm:$0xff]  }
 0x266   :  { %2590 = vmatpush2.bf16.msra.mxu0 %v15108_v9  ;;  %v15191_v9 = vld [vmem:[#allocation15 + $0x76c] ss:$16 sps:$4 sm:$0xff]  }
 0x267   :  { %2643 = vmatpush2.bf16.msra.mxu1 %v15111_v10  ;;  %2665 = vmatprep.subr.bf16.mxu0 %v15116_v11  ;;  %v15186_v10 = vld [vmem:[#allocation15 + $0x568] ss:$16 sps:$4 sm:$0xff]  }
 0x268   :  { %2718 = vmatprep.subr.bf16.mxu1 %v15119_v12  ;;  %v15189_v11 = vld [vmem:[#allocation15 + $0x768] ss:$16 sps:$4 sm:$0xff]   ;;  %v15194_v12 = vld [vmem:[#allocation15 + $0x54c] ss:$16 sps:$4 sm:$0xff]  }
 0x269   :  { %2592 = vmatmul.mubr.bf16.vlgmr.msra.gmra.mxu0 %v17478_v61 }
 0x26a   :  { %2645 = vmatmul.mubr.bf16.vlgmr.msra.gmra.mxu1 %v17481_v54  ;;  %2601 = vmatprep.mubr.bf16.mxu0 %v17487_v28 }
 0x26b   :  { %2654 = vmatprep.mubr.bf16.mxu1 %v17495_v43  ;;  %2666 = vmatpush1.bf16.msra.mxu0 %v15114_v33  ;;  %v15197_v33 = vld [vmem:[#allocation15 + $0x74c] ss:$16 sps:$4 sm:$0xff]  }
 0x26c   :  { %2719 = vmatpush1.bf16.msra.mxu1 %v15117_v38  ;;  %2667 = vmatprep.subr.bf16.mxu0 %v15122_v37  ;;  %v15192_v38 = vld [vmem:[#allocation15 + $0x548] ss:$16 sps:$4 sm:$0xff]  }
 0x26d   :  { %2720 = vmatprep.subr.bf16.mxu1 %v15125_v13  ;;  %v15195_v37 = vld [vmem:[#allocation15 + $0x748] ss:$16 sps:$4 sm:$0xff]   ;;  %v15200_v13 = vld [vmem:[#allocation15 + $0x52c] ss:$16 sps:$4 sm:$0xff]  }
 0x26f   :  { %2668 = vmatpush1.bf16.msra.mxu0 %v15120_v62  ;;  %v15203_v62 = vld [vmem:[#allocation15 + $0x72c] ss:$16 sps:$4 sm:$0xff]  }
 0x270   :  { %2721 = vmatpush1.bf16.msra.mxu1 %v15123_v14  ;;  %2669 = vmatprep.subr.bf16.mxu0 %v15128_v56  ;;  %v15198_v14 = vld [vmem:[#allocation15 + $0x528] ss:$16 sps:$4 sm:$0xff]  }
 0x271   :  { %2602 = vmatmul.mubr.bf16.gmra.mxu0 %v17500_v20  ;;  %2722 = vmatprep.subr.bf16.mxu1 %v15131_v15  ;;  %v15201_v56 = vld [vmem:[#allocation15 + $0x728] ss:$16 sps:$4 sm:$0xff]   ;;  %v15206_v15 = vld [vmem:[#allocation15 + $0x50c] ss:$16 sps:$4 sm:$0xff]  }
 0x272   :  { %2655 = vmatmul.mubr.bf16.gmra.mxu1 %v17502_v49  ;;  %2697 = vmatprep.mubr.bf16.mxu0 %v17474_v3 }
 0x273   :  { %2670 = vmatpush1.bf16.msra.mxu0 %v15126_v58  ;;  %2750 = vmatprep.mubr.bf16.mxu1 %v17476_v25  ;;  %v15209_v58 = vld [vmem:[#allocation15 + $0x70c] ss:$16 sps:$4 sm:$0xff]  }
 0x274   :  { %2723 = vmatpush1.bf16.msra.mxu1 %v15129_v16  ;;  %2671 = vmatprep.subr.bf16.mxu0 %v15134_v17  ;;  %v15204_v16 = vld [vmem:[#allocation15 + $0x508] ss:$16 sps:$4 sm:$0xff]  }
 0x275   :  { %2724 = vmatprep.subr.bf16.mxu1 %v15137_v60  ;;  %v15207_v17 = vld [vmem:[#allocation15 + $0x708] ss:$16 sps:$4 sm:$0xff]   ;;  %v15212_v60 = vld [vmem:[#allocation15 + $0x8e4] ss:$16 sps:$4 sm:$0xff]  }
 0x277   :  { %2672 = vmatpush1.bf16.msra.mxu0 %v15132_v21  ;;  %v15215_v21 = vld [vmem:[#allocation15 + $0xae4] ss:$16 sps:$4 sm:$0xff]  }
 0x278   :  { %2725 = vmatpush1.bf16.msra.mxu1 %v15135_v63  ;;  %2673 = vmatprep.subr.bf16.mxu0 %v15140_v22  ;;  %v15210_v63 = vld [vmem:[#allocation15 + $0x8e0] ss:$16 sps:$4 sm:$0xff]  }
 0x279   :  { %2726 = vmatprep.subr.bf16.mxu1 %v15143_v23  ;;  %v15213_v23 = vld [vmem:[#allocation15 + $0xae0] ss:$16 sps:$4 sm:$0xff]  }
 0x27b   :  { %2674 = vmatpush1.bf16.msra.mxu0 %v15138_v57 }
 0x27c   :  { %2727 = vmatpush1.bf16.msra.mxu1 %v15141_v59  ;;  %2675 = vmatprep.subr.bf16.mxu0 %v15146_v26  ;;  %v15218_v59 = vld [vmem:[#allocation15 + $0x8c4] ss:$16 sps:$4 sm:$0xff]  }
 0x27d   :  { %2728 = vmatprep.subr.bf16.mxu1 %v15149_v24 }
 0x27f   :  { %2676 = vmatpush1.bf16.msra.mxu0 %v15144_v27  ;;  %v15221_v27 = vld [vmem:[#allocation15 + $0xac4] ss:$16 sps:$4 sm:$0xff]  }
 0x280   :  { %2729 = vmatpush1.bf16.msra.mxu1 %v15147_v7  ;;  %2677 = vmatprep.subr.bf16.mxu0 %v15152_v29 }
 0x281   :  { %2730 = vmatprep.subr.bf16.mxu1 %v15155_v39  ;;  %v15216_v39 = vld [vmem:[#allocation15 + $0x8c0] ss:$16 sps:$4 sm:$0xff]  }
 0x283   :  { %2678 = vmatpush1.bf16.msra.mxu0 %v15150_v41 }
 0x284   :  { %2731 = vmatpush1.bf16.msra.mxu1 %v15153_v18  ;;  %2679 = vmatprep.subr.bf16.mxu0 %v15158_v53  ;;  %v15219_v18 = vld [vmem:[#allocation15 + $0xac0] ss:$16 sps:$4 sm:$0xff]  }
 0x285   :  { %2732 = vmatprep.subr.bf16.mxu1 %v15161_v6  ;;  %v15224_v6 = vld [vmem:[#allocation15 + $0x8a4] ss:$16 sps:$4 sm:$0xff]  }
 0x287   :  { %2680 = vmatpush1.bf16.msra.mxu0 %v15156_v44 }
 0x288   :  { %2733 = vmatpush1.bf16.msra.mxu1 %v15159_v45  ;;  %2681 = vmatprep.subr.bf16.mxu0 %v15164_v46  ;;  %v15227_v46 = vld [vmem:[#allocation15 + $0xaa4] ss:$16 sps:$4 sm:$0xff]  }
 0x289   :  { %2734 = vmatprep.subr.bf16.mxu1 %v15167_v47 }
 0x28b   :  { %2682 = vmatpush2.bf16.msra.mxu0 %v15162_v19 }
 0x28c   :  { %2735 = vmatpush2.bf16.msra.mxu1 %v15165_v36  ;;  %2683 = vmatprep.subr.bf16.mxu0 %v15170_v48  ;;  %v15222_v36 = vld [vmem:[#allocation15 + $0x8a0] ss:$16 sps:$4 sm:$0xff]  }
 0x28d   :  { %2736 = vmatprep.subr.bf16.mxu1 %v15173_v50  ;;  %v15225_v50 = vld [vmem:[#allocation15 + $0xaa0] ss:$16 sps:$4 sm:$0xff]  }
 0x28f   :  { %2684 = vmatpush2.bf16.msra.mxu0 %v15168_v51 }
 0x290   :  { %2737 = vmatpush2.bf16.msra.mxu1 %v15171_v52  ;;  %2685 = vmatprep.subr.bf16.mxu0 %v15176_v55  ;;  %v15230_v52 = vld [vmem:[#allocation15 + $0x884] ss:$16 sps:$4 sm:$0xff]  }
 0x291   :  { %2738 = vmatprep.subr.bf16.mxu1 %v15179_v40 }
 0x293   :  { %2686 = vmatpush2.bf16.msra.mxu0 %v15174_v42  ;;  %v15233_v42 = vld [vmem:[#allocation15 + $0xa84] ss:$16 sps:$4 sm:$0xff]  }
 0x294   :  { %2739 = vmatpush2.bf16.msra.mxu1 %v15177_v0  ;;  %2687 = vmatprep.subr.bf16.mxu0 %v15182_v1 }
 0x295   :  { %2740 = vmatprep.subr.bf16.mxu1 %v15185_v2  ;;  %v15228_v2 = vld [vmem:[#allocation15 + $0x880] ss:$16 sps:$4 sm:$0xff]  }
 0x297   :  { %2688 = vmatpush2.bf16.msra.mxu0 %v15180_v4 }
 0x298   :  { %2741 = vmatpush2.bf16.msra.mxu1 %v15183_v5  ;;  %2689 = vmatprep.subr.bf16.mxu0 %v15188_v8  ;;  %v15231_v5 = vld [vmem:[#allocation15 + $0xa80] ss:$16 sps:$4 sm:$0xff]  }
 0x299   :  { %2742 = vmatprep.subr.bf16.mxu1 %v15191_v9  ;;  %v15236_v9 = vld [vmem:[#allocation15 + $0x864] ss:$16 sps:$4 sm:$0xff]  }
 0x29b   :  { %2690 = vmatpush2.bf16.msra.mxu0 %v15186_v10 }
 0x29c   :  { %2743 = vmatpush2.bf16.msra.mxu1 %v15189_v11  ;;  %2691 = vmatprep.subr.bf16.mxu0 %v15194_v12  ;;  %v15239_v12 = vld [vmem:[#allocation15 + $0xa64] ss:$16 sps:$4 sm:$0xff]  }
 0x29d   :  { %2744 = vmatprep.subr.bf16.mxu1 %v15197_v33 }
 0x29f   :  { %2692 = vmatpush2.bf16.msra.mxu0 %v15192_v38 }
 0x2a0   :  { %2745 = vmatpush2.bf16.msra.mxu1 %v15195_v37  ;;  %2693 = vmatprep.subr.bf16.mxu0 %v15200_v13  ;;  %v15234_v37 = vld [vmem:[#allocation15 + $0x860] ss:$16 sps:$4 sm:$0xff]  }
 0x2a1   :  { %2746 = vmatprep.subr.bf16.mxu1 %v15203_v62  ;;  %v15237_v13 = vld [vmem:[#allocation15 + $0xa60] ss:$16 sps:$4 sm:$0xff]   ;;  %v15242_v62 = vld [vmem:[#allocation15 + $0x844] ss:$16 sps:$4 sm:$0xff]  }
 0x2a3   :  { %2694 = vmatpush2.bf16.msra.mxu0 %v15198_v14  ;;  %v15245_v14 = vld [vmem:[#allocation15 + $0xa44] ss:$16 sps:$4 sm:$0xff]  }
 0x2a4   :  { %2747 = vmatpush2.bf16.msra.mxu1 %v15201_v56  ;;  %2695 = vmatprep.subr.bf16.mxu0 %v15206_v15  ;;  %v15240_v56 = vld [vmem:[#allocation15 + $0x840] ss:$16 sps:$4 sm:$0xff]  }
 0x2a5   :  { %2748 = vmatprep.subr.bf16.mxu1 %v15209_v58  ;;  %v15243_v15 = vld [vmem:[#allocation15 + $0xa40] ss:$16 sps:$4 sm:$0xff]   ;;  %v15248_v58 = vld [vmem:[#allocation15 + $0x824] ss:$16 sps:$4 sm:$0xff]  }
 0x2a7   :  { %2696 = vmatpush2.bf16.msra.mxu0 %v15204_v16  ;;  %v15251_v16 = vld [vmem:[#allocation15 + $0xa24] ss:$16 sps:$4 sm:$0xff]  }
 0x2a8   :  { %2749 = vmatpush2.bf16.msra.mxu1 %v15207_v17  ;;  %3540 = vmatprep.subr.bf16.mxu0 %v15212_v60  ;;  %v1612_v22 = vpop.f32.mrf.mxu0  ;;  %v15246_v17 = vld [vmem:[#allocation15 + $0x820] ss:$16 sps:$4 sm:$0xff]  }
 0x2a9   :  { %3593 = vmatprep.subr.bf16.mxu1 %v15215_v21  ;;  %v1665_v57 = vpop.f32.mrf.mxu1  ;;  %v15249_v60 = vld [vmem:[#allocation15 + $0xa20] ss:$16 sps:$4 sm:$0xff]   ;;  %v15254_v21 = vld [vmem:[#allocation15 + $0x804] ss:$16 sps:$4 sm:$0xff]  }
 0x2aa   :  { %2698 = vmatmul.mubr.bf16.vlgmr.msra.gmra.mxu0 %v17478_v61  ;;  %v17525_v26 = vadd.f32 %v1665_v57, %v1612_v22  ;;  %v1614_v24 = vpop.f32.mrf.mxu0  ;;  %v15252_v22 = vld [vmem:[#allocation15 + $0x800] ss:$16 sps:$4 sm:$0xff]   ;;  %v15260_v57 = vld [vmem:[#allocation15 + $0x9e4] ss:$16 sps:$4 sm:$0xff]  }
 0x2ab   :  { %2751 = vmatmul.mubr.bf16.vlgmr.msra.gmra.mxu1 %v17481_v54  ;;  %2707 = vmatprep.mubr.bf16.mxu0 %v17487_v28  ;;  %v1667_v7 = vpop.f32.mrf.mxu1 }
 0x2ac   :  { %2760 = vmatprep.mubr.bf16.mxu1 %v17495_v43  ;;  %3541 = vmatpush1.bf16.msra.mxu0 %v15210_v63  ;;  %v17530_v29 = vadd.f32 %v1667_v7, %v1614_v24  ;;  %v1616_v41 = vpop.f32.mrf.mxu0  ;;  %v15257_v63 = vld [vmem:[#allocation15 + $0xa04] ss:$16 sps:$4 sm:$0xff]   ;;  %v15258_v24 = vld [vmem:[#allocation15 + $0x9e0] ss:$16 sps:$4 sm:$0xff]  }
 0x2ad   :  { %3594 = vmatpush1.bf16.msra.mxu1 %v15213_v23  ;;  %3542 = vmatprep.subr.bf16.mxu0 %v15218_v59  ;;  %v1669_v53 = vpop.f32.mrf.mxu1  ;;  %v15255_v23 = vld [vmem:[#allocation15 + $0xa00] ss:$16 sps:$4 sm:$0xff]   ;;  %v15263_v59 = vld [vmem:[#allocation15 + $0xbe4] ss:$16 sps:$4 sm:$0xff]  }
 0x2ae   :  { %3595 = vmatprep.subr.bf16.mxu1 %v15221_v27  ;;  %v17532_v44 = vadd.f32 %v1669_v53, %v1616_v41  ;;  %v1618_v45 = vpop.f32.mrf.mxu0  ;;  %v15261_v27 = vld [vmem:[#allocation15 + $0xbe0] ss:$16 sps:$4 sm:$0xff]   ;;  %v15266_v7 = vld [vmem:[#allocation15 + $0x9c4] ss:$16 sps:$4 sm:$0xff]  }
 0x2af   :  { %v1671_v47 = vpop.f32.mrf.mxu1  ;;  %v15264_v41 = vld [vmem:[#allocation15 + $0x9c0] ss:$16 sps:$4 sm:$0xff]   ;;  %v15272_v53 = vld [vmem:[#allocation15 + $0x9a4] ss:$16 sps:$4 sm:$0xff]  }
 0x2b0   :  { %3543 = vmatpush1.bf16.msra.mxu0 %v15216_v39  ;;  %v17534_v19 = vadd.f32 %v1671_v47, %v1618_v45  ;;  %v1622_v48 = vpop.f32.mrf.mxu0  ;;  %v15269_v39 = vld [vmem:[#allocation15 + $0xbc4] ss:$16 sps:$4 sm:$0xff]   ;;  %v15270_v45 = vld [vmem:[#allocation15 + $0x9a0] ss:$16 sps:$4 sm:$0xff]  }
 0x2b1   :  { %3596 = vmatpush1.bf16.msra.mxu1 %v15219_v18  ;;  %3544 = vmatprep.subr.bf16.mxu0 %v15224_v6  ;;  %v1675_v51 = vpop.f32.mrf.mxu1  ;;  %v15267_v18 = vld [vmem:[#allocation15 + $0xbc0] ss:$16 sps:$4 sm:$0xff]   ;;  %v15275_v6 = vld [vmem:[#allocation15 + $0xba4] ss:$16 sps:$4 sm:$0xff]  }
 0x2b2   :  { %2708 = vmatmul.mubr.bf16.gmra.mxu0 %v17500_v20  ;;  %3597 = vmatprep.subr.bf16.mxu1 %v15227_v46  ;;  %v17537_v55 = vadd.f32 %v1675_v51, %v1622_v48  ;;  %v1624_v40 = vpop.f32.mrf.mxu0  ;;  %v15273_v46 = vld [vmem:[#allocation15 + $0xba0] ss:$16 sps:$4 sm:$0xff]   ;;  %v15278_v47 = vld [vmem:[#allocation15 + $0x984] ss:$16 sps:$4 sm:$0xff]  }
 0x2b3   :  { %2761 = vmatmul.mubr.bf16.gmra.mxu1 %v17502_v49  ;;  %3572 = vmatprep.mubr.bf16.mxu0 %v17474_v3  ;;  %v1677_v0 = vpop.f32.mrf.mxu1  ;;  %v15276_v48 = vld [vmem:[#allocation15 + $0x980] ss:$16 sps:$4 sm:$0xff]   ;;  %v15284_v51 = vld [vmem:[#allocation15 + $0x964] ss:$16 sps:$4 sm:$0xff]  }
 0x2b4   :  { %3545 = vmatpush1.bf16.msra.mxu0 %v15222_v36  ;;  %3625 = vmatprep.mubr.bf16.mxu1 %v17476_v25  ;;  %v17542_v1 = vadd.f32 %v1677_v0, %v1624_v40  ;;  %v1626_v4 = vpop.f32.mrf.mxu0  ;;  %v15281_v36 = vld [vmem:[#allocation15 + $0xb84] ss:$16 sps:$4 sm:$0xff]   ;;  %v15282_v40 = vld [vmem:[#allocation15 + $0x960] ss:$16 sps:$4 sm:$0xff]  }
 0x2b5   :  { %3598 = vmatpush1.bf16.msra.mxu1 %v15225_v50  ;;  %3546 = vmatprep.subr.bf16.mxu0 %v15230_v52  ;;  %v1679_v8 = vpop.f32.mrf.mxu1  ;;  %v15279_v50 = vld [vmem:[#allocation15 + $0xb80] ss:$16 sps:$4 sm:$0xff]   ;;  %v15287_v52 = vld [vmem:[#allocation15 + $0xb64] ss:$16 sps:$4 sm:$0xff]  }
 0x2b6   :  { %3599 = vmatprep.subr.bf16.mxu1 %v15233_v42  ;;  %v17544_v10 = vadd.f32 %v1679_v8, %v1626_v4  ;;  %v1628_v11 = vpop.f32.mrf.mxu0  ;;  %v15285_v42 = vld [vmem:[#allocation15 + $0xb60] ss:$16 sps:$4 sm:$0xff]   ;;  %v15290_v0 = vld [vmem:[#allocation15 + $0x944] ss:$16 sps:$4 sm:$0xff]  }
 0x2b7   :  { %v1681_v33 = vpop.f32.mrf.mxu1  ;;  %v15288_v4 = vld [vmem:[#allocation15 + $0x940] ss:$16 sps:$4 sm:$0xff]   ;;  %v15296_v8 = vld [vmem:[#allocation15 + $0x924] ss:$16 sps:$4 sm:$0xff]  }
 0x2b8   :  { %3547 = vmatpush1.bf16.msra.mxu0 %v15228_v2  ;;  %v17546_v38 = vadd.f32 %v1681_v33, %v1628_v11  ;;  %v15293_v2 = vld [vmem:[#allocation15 + $0xb44] ss:$16 sps:$4 sm:$0xff]   ;;  %v15294_v11 = vld [vmem:[#allocation15 + $0x920] ss:$16 sps:$4 sm:$0xff]  }
 0x2b9   :  { %3600 = vmatpush1.bf16.msra.mxu1 %v15231_v5  ;;  %3548 = vmatprep.subr.bf16.mxu0 %v15236_v9  ;;  %v15291_v5 = vld [vmem:[#allocation15 + $0xb40] ss:$16 sps:$4 sm:$0xff]   ;;  %v15299_v9 = vld [vmem:[#allocation15 + $0xb24] ss:$16 sps:$4 sm:$0xff]  }
 0x2ba   :  { %3601 = vmatprep.subr.bf16.mxu1 %v15239_v12  ;;  %v15297_v12 = vld [vmem:[#allocation15 + $0xb20] ss:$16 sps:$4 sm:$0xff]   ;;  %v15302_v33 = vld [vmem:[#allocation15 + $0x904] ss:$16 sps:$4 sm:$0xff]  }
 0x2bc   :  { %3549 = vmatpush1.bf16.msra.mxu0 %v15234_v37  ;;  %v15305_v37 = vld [vmem:[#allocation15 + $0xb04] ss:$16 sps:$4 sm:$0xff]  }
 0x2bd   :  { %3602 = vmatpush1.bf16.msra.mxu1 %v15237_v13  ;;  %3550 = vmatprep.subr.bf16.mxu0 %v15242_v62  ;;  %v15300_v13 = vld [vmem:[#allocation15 + $0x900] ss:$16 sps:$4 sm:$0xff]  }
 0x2be   :  { %3603 = vmatprep.subr.bf16.mxu1 %v15245_v14  ;;  %v15303_v62 = vld [vmem:[#allocation15 + $0xb00] ss:$16 sps:$4 sm:$0xff]   ;;  %v15308_v14 = vld [vmem:[#allocation15 + $0x8ec] ss:$16 sps:$4 sm:$0xff]  }
 0x2c0   :  { %3551 = vmatpush1.bf16.msra.mxu0 %v15240_v56  ;;  %v15311_v56 = vld [vmem:[#allocation15 + $0xaec] ss:$16 sps:$4 sm:$0xff]  }
 0x2c1   :  { %3604 = vmatpush1.bf16.msra.mxu1 %v15243_v15  ;;  %3552 = vmatprep.subr.bf16.mxu0 %v15248_v58 }
 0x2c2   :  { %3605 = vmatprep.subr.bf16.mxu1 %v15251_v16  ;;  %v15306_v16 = vld [vmem:[#allocation15 + $0x8e8] ss:$16 sps:$4 sm:$0xff]  }
 0x2c4   :  { %3553 = vmatpush1.bf16.msra.mxu0 %v15246_v17 }
 0x2c5   :  { %3606 = vmatpush1.bf16.msra.mxu1 %v15249_v60  ;;  %3554 = vmatprep.subr.bf16.mxu0 %v15254_v21  ;;  %v15309_v60 = vld [vmem:[#allocation15 + $0xae8] ss:$16 sps:$4 sm:$0xff]  }
 0x2c6   :  { %3607 = vmatprep.subr.bf16.mxu1 %v15257_v63  ;;  %v15314_v63 = vld [vmem:[#allocation15 + $0x8cc] ss:$16 sps:$4 sm:$0xff]  }
 0x2c8   :  { %3555 = vmatpush1.bf16.msra.mxu0 %v15252_v22 }
 0x2c9   :  { %3608 = vmatpush1.bf16.msra.mxu1 %v15255_v23  ;;  %3556 = vmatprep.subr.bf16.mxu0 %v15260_v57  ;;  %v15317_v23 = vld [vmem:[#allocation15 + $0xacc] ss:$16 sps:$4 sm:$0xff]  }
 0x2ca   :  { %3609 = vmatprep.subr.bf16.mxu1 %v15263_v59 }
 0x2cc   :  { %3557 = vmatpush2.bf16.msra.mxu0 %v15258_v24 }
 0x2cd   :  { %3610 = vmatpush2.bf16.msra.mxu1 %v15261_v27  ;;  %3558 = vmatprep.subr.bf16.mxu0 %v15266_v7  ;;  %v15312_v27 = vld [vmem:[#allocation15 + $0x8c8] ss:$16 sps:$4 sm:$0xff]  }
 0x2ce   :  { %3611 = vmatprep.subr.bf16.mxu1 %v15269_v39  ;;  %v15315_v39 = vld [vmem:[#allocation15 + $0xac8] ss:$16 sps:$4 sm:$0xff]  }
 0x2d0   :  { %3559 = vmatpush2.bf16.msra.mxu0 %v15264_v41 }
 0x2d1   :  { %3612 = vmatpush2.bf16.msra.mxu1 %v15267_v18  ;;  %3560 = vmatprep.subr.bf16.mxu0 %v15272_v53  ;;  %v15320_v18 = vld [vmem:[#allocation15 + $0x8ac] ss:$16 sps:$4 sm:$0xff]  }
 0x2d2   :  { %3613 = vmatprep.subr.bf16.mxu1 %v15275_v6  ;;  %v15323_v6 = vld [vmem:[#allocation15 + $0xaac] ss:$16 sps:$4 sm:$0xff]  }
 0x2d4   :  { %3561 = vmatpush2.bf16.msra.mxu0 %v15270_v45 }
 0x2d5   :  { %3614 = vmatpush2.bf16.msra.mxu1 %v15273_v46  ;;  %3562 = vmatprep.subr.bf16.mxu0 %v15278_v47 }
 0x2d6   :  { %3615 = vmatprep.subr.bf16.mxu1 %v15281_v36  ;;  %v15318_v36 = vld [vmem:[#allocation15 + $0x8a8] ss:$16 sps:$4 sm:$0xff]  }
 0x2d8   :  { %3563 = vmatpush2.bf16.msra.mxu0 %v15276_v48 }
 0x2d9   :  { %3616 = vmatpush2.bf16.msra.mxu1 %v15279_v50  ;;  %3564 = vmatprep.subr.bf16.mxu0 %v15284_v51  ;;  %v15321_v50 = vld [vmem:[#allocation15 + $0xaa8] ss:$16 sps:$4 sm:$0xff]  }
 0x2da   :  { %3617 = vmatprep.subr.bf16.mxu1 %v15287_v52  ;;  %v15326_v52 = vld [vmem:[#allocation15 + $0x88c] ss:$16 sps:$4 sm:$0xff]  }
 0x2dc   :  { %3565 = vmatpush2.bf16.msra.mxu0 %v15282_v40 }
 0x2dd   :  { %3618 = vmatpush2.bf16.msra.mxu1 %v15285_v42  ;;  %3566 = vmatprep.subr.bf16.mxu0 %v15290_v0  ;;  %v15329_v42 = vld [vmem:[#allocation15 + $0xa8c] ss:$16 sps:$4 sm:$0xff]  }
 0x2de   :  { %3619 = vmatprep.subr.bf16.mxu1 %v15293_v2 }
 0x2e0   :  { %3567 = vmatpush2.bf16.msra.mxu0 %v15288_v4 }
 0x2e1   :  { %3620 = vmatpush2.bf16.msra.mxu1 %v15291_v5  ;;  %3568 = vmatprep.subr.bf16.mxu0 %v15296_v8  ;;  %v15324_v5 = vld [vmem:[#allocation15 + $0x888] ss:$16 sps:$4 sm:$0xff]  }
 0x2e2   :  { %3621 = vmatprep.subr.bf16.mxu1 %v15299_v9  ;;  %v15327_v9 = vld [vmem:[#allocation15 + $0xa88] ss:$16 sps:$4 sm:$0xff]  }
 0x2e4   :  { %3569 = vmatpush2.bf16.msra.mxu0 %v15294_v11 }
 0x2e5   :  { %3622 = vmatpush2.bf16.msra.mxu1 %v15297_v12  ;;  %3570 = vmatprep.subr.bf16.mxu0 %v15302_v33  ;;  %v15332_v12 = vld [vmem:[#allocation15 + $0x86c] ss:$16 sps:$4 sm:$0xff]  }
 0x2e6   :  { %3623 = vmatprep.subr.bf16.mxu1 %v15305_v37  ;;  %v15335_v37 = vld [vmem:[#allocation15 + $0xa6c] ss:$16 sps:$4 sm:$0xff]  }
 0x2e8   :  { %3571 = vmatpush2.bf16.msra.mxu0 %v15300_v13  ;;  %v1718_v15 = vpop.f32.mrf.mxu0 }
 0x2e9   :  { %3624 = vmatpush2.bf16.msra.mxu1 %v15303_v62  ;;  %v1771_v58 = vpop.f32.mrf.mxu1  ;;  %3646 = vmatprep.subr.bf16.mxu0 %v15308_v14  ;;  %v15333_v62 = vld [vmem:[#allocation15 + $0xa68] ss:$16 sps:$4 sm:$0xff]   ;;  %v15341_v14 = vld [vmem:[#allocation15 + $0xa4c] ss:$16 sps:$4 sm:$0xff]  }
 0x2ea   :  { %v17548_v17 = vadd.f32 %v1771_v58, %v1718_v15  ;;  %3699 = vmatprep.subr.bf16.mxu1 %v15311_v56  ;;  %v1720_v21 = vpop.f32.mrf.mxu0  ;;  %v15336_v56 = vld [vmem:[#allocation15 + $0x848] ss:$16 sps:$4 sm:$0xff]   ;;  %v15344_v58 = vld [vmem:[#allocation15 + $0x82c] ss:$16 sps:$4 sm:$0xff]  }
 0x2eb   :  { %3573 = vmatmul.mubr.bf16.vlgmr.msra.gmra.mxu0 %v17478_v61  ;;  %v1773_v22 = vpop.f32.mrf.mxu1  ;;  %v15339_v15 = vld [vmem:[#allocation15 + $0xa48] ss:$16 sps:$4 sm:$0xff]  }
 0x2ec   :  { %3626 = vmatmul.mubr.bf16.vlgmr.msra.gmra.mxu1 %v17481_v54  ;;  %3582 = vmatprep.mubr.bf16.mxu0 %v17487_v28  ;;  %v17553_v57 = vadd.f32 %v1773_v22, %v1720_v21  ;;  %v1722_v59 = vpop.f32.mrf.mxu0  ;;  %v15345_v21 = vld [vmem:[#allocation15 + $0xa28] ss:$16 sps:$4 sm:$0xff]   ;;  %v15353_v22 = vld [vmem:[#allocation15 + $0xa0c] ss:$16 sps:$4 sm:$0xff]  }
 0x2ed   :  { %3635 = vmatprep.mubr.bf16.mxu1 %v17495_v43  ;;  %3647 = vmatpush1.bf16.msra.mxu0 %v15306_v16  ;;  %v1775_v24 = vpop.f32.mrf.mxu1  ;;  %v15347_v16 = vld [vmem:[#allocation15 + $0xa2c] ss:$16 sps:$4 sm:$0xff]  }
 0x2ee   :  { %3700 = vmatpush1.bf16.msra.mxu1 %v15309_v60  ;;  %v17556_v7 = vadd.f32 %v1775_v24, %v1722_v59  ;;  %3648 = vmatprep.subr.bf16.mxu0 %v15314_v63  ;;  %v1724_v41 = vpop.f32.mrf.mxu0  ;;  %v15342_v60 = vld [vmem:[#allocation15 + $0x828] ss:$16 sps:$4 sm:$0xff]   ;;  %v15350_v63 = vld [vmem:[#allocation15 + $0x80c] ss:$16 sps:$4 sm:$0xff]  }
 0x2ef   :  { %3701 = vmatprep.subr.bf16.mxu1 %v15317_v23  ;;  %v1777_v53 = vpop.f32.mrf.mxu1  ;;  %v15348_v23 = vld [vmem:[#allocation15 + $0x808] ss:$16 sps:$4 sm:$0xff]   ;;  %v15356_v24 = vld [vmem:[#allocation15 + $0x9ec] ss:$16 sps:$4 sm:$0xff]  }
 0x2f0   :  { %v17558_v45 = vadd.f32 %v1777_v53, %v1724_v41  ;;  %v1728_v46 = vpop.f32.mrf.mxu0  ;;  %v15351_v59 = vld [vmem:[#allocation15 + $0xa08] ss:$16 sps:$4 sm:$0xff]   ;;  %v15365_v53 = vld [vmem:[#allocation15 + $0xbcc] ss:$16 sps:$4 sm:$0xff]  }
 0x2f1   :  { %3649 = vmatpush1.bf16.msra.mxu0 %v15312_v27  ;;  %v1781_v47 = vpop.f32.mrf.mxu1  ;;  %v15359_v27 = vld [vmem:[#allocation15 + $0xbec] ss:$16 sps:$4 sm:$0xff]   ;;  %v15357_v41 = vld [vmem:[#allocation15 + $0xbe8] ss:$16 sps:$4 sm:$0xff]  }
 0x2f2   :  { %18644 = vst [vmem:[#allocation42_spill] sm:$0xff] %v17558_v45  ;;  %3702 = vmatpush1.bf16.msra.mxu1 %v15315_v39  ;;  %v17560_v48 = vadd.f32 %v1781_v47, %v1728_v46  ;;  %3650 = vmatprep.subr.bf16.mxu0 %v15320_v18  ;;  %v1730_v51 = vpop.f32.mrf.mxu0  ;;  %v15354_v39 = vld [vmem:[#allocation15 + $0x9e8] ss:$16 sps:$4 sm:$0xff]   ;;  %v15362_v18 = vld [vmem:[#allocation15 + $0x9cc] ss:$16 sps:$4 sm:$0xff]  }
 0x2f3   :  { %3583 = vmatmul.mubr.bf16.gmra.mxu0 %v17500_v20  ;;  %3703 = vmatprep.subr.bf16.mxu1 %v15323_v6  ;;  %v1783_v40 = vpop.f32.mrf.mxu1  ;;  %v15360_v6 = vld [vmem:[#allocation15 + $0x9c8] ss:$16 sps:$4 sm:$0xff]   ;;  %v15368_v47 = vld [vmem:[#allocation15 + $0x9ac] ss:$16 sps:$4 sm:$0xff]  }
 0x2f4   :  { %3636 = vmatmul.mubr.bf16.gmra.mxu1 %v17502_v49  ;;  %3678 = vmatprep.mubr.bf16.mxu0 %v17474_v3  ;;  %v17565_v0 = vadd.f32 %v1783_v40, %v1730_v51  ;;  %v1732_v2 = vpop.f32.mrf.mxu0  ;;  %v15330_v3 = vld [vmem:[#allocation15 + $0x868] ss:$16 sps:$4 sm:$0xff]   ;;  %v15377_v40 = vld [vmem:[#allocation15 + $0xb8c] ss:$16 sps:$4 sm:$0xff]  }
 0x2f5   :  { %3651 = vmatpush1.bf16.msra.mxu0 %v15318_v36  ;;  %3731 = vmatprep.mubr.bf16.mxu1 %v17476_v25  ;;  %v1785_v4 = vpop.f32.mrf.mxu1  ;;  %v15338_v25 = vld [vmem:[#allocation15 + $0x84c] ss:$16 sps:$4 sm:$0xff]   ;;  %v15363_v46 = vld [vmem:[#allocation15 + $0xbc8] ss:$16 sps:$4 sm:$0xff]  }
 0x2f6   :  { %18645 = vst [vmem:[#allocation43_spill] sm:$0xff] %v17565_v0  ;;  %3704 = vmatpush1.bf16.msra.mxu1 %v15321_v50  ;;  %v17568_v8 = vadd.f32 %v1785_v4, %v1732_v2  ;;  %3652 = vmatprep.subr.bf16.mxu0 %v15326_v52  ;;  %v1734_v11 = vpop.f32.mrf.mxu0  ;;  %v15371_v36 = vld [vmem:[#allocation15 + $0xbac] ss:$16 sps:$4 sm:$0xff]   ;;  %v15366_v50 = vld [vmem:[#allocation15 + $0x9a8] ss:$16 sps:$4 sm:$0xff]  }
 0x2f7   :  { %3705 = vmatprep.subr.bf16.mxu1 %v15329_v42  ;;  %v1787_v33 = vpop.f32.mrf.mxu1  ;;  %v15369_v51 = vld [vmem:[#allocation15 + $0xba8] ss:$16 sps:$4 sm:$0xff]   ;;  %v15374_v52 = vld [vmem:[#allocation15 + $0x98c] ss:$16 sps:$4 sm:$0xff]  }
 0x2f8   :  { %v17570_v13 = vadd.f32 %v1787_v33, %v1734_v11  ;;  %v15372_v42 = vld [vmem:[#allocation15 + $0x988] ss:$16 sps:$4 sm:$0xff]   ;;  %v15380_v4 = vld [vmem:[#allocation15 + $0x96c] ss:$16 sps:$4 sm:$0xff]  }
 0x2f9   :  { %3653 = vmatpush1.bf16.msra.mxu0 %v15324_v5  ;;  %v15375_v2 = vld [vmem:[#allocation15 + $0xb88] ss:$16 sps:$4 sm:$0xff]   ;;  %v15383_v5 = vld [vmem:[#allocation15 + $0xb6c] ss:$16 sps:$4 sm:$0xff]  }
 0x2fa   :  { %3706 = vmatpush1.bf16.msra.mxu1 %v15327_v9  ;;  %3654 = vmatprep.subr.bf16.mxu0 %v15332_v12  ;;  %v15378_v9 = vld [vmem:[#allocation15 + $0x968] ss:$16 sps:$4 sm:$0xff]   ;;  %v15386_v12 = vld [vmem:[#allocation15 + $0x94c] ss:$16 sps:$4 sm:$0xff]  }
 0x2fb   :  { %3707 = vmatprep.subr.bf16.mxu1 %v15335_v37  ;;  %v15381_v11 = vld [vmem:[#allocation15 + $0xb68] ss:$16 sps:$4 sm:$0xff]   ;;  %v15389_v33 = vld [vmem:[#allocation15 + $0xb4c] ss:$16 sps:$4 sm:$0xff]  }
 0x2fc   :  { %v15384_v37 = vld [vmem:[#allocation15 + $0x948] ss:$16 sps:$4 sm:$0xff]  }
 0x2fd   :  { %3655 = vmatpush1.bf16.msra.mxu0 %v15330_v3  ;;  %v15387_v3 = vld [vmem:[#allocation15 + $0xb48] ss:$16 sps:$4 sm:$0xff]  }
 0x2fe   :  { %3708 = vmatpush1.bf16.msra.mxu1 %v15333_v62  ;;  %3656 = vmatprep.subr.bf16.mxu0 %v15338_v25  ;;  %v15392_v62 = vld [vmem:[#allocation15 + $0x92c] ss:$16 sps:$4 sm:$0xff]  }
 0x2ff   :  { %3709 = vmatprep.subr.bf16.mxu1 %v15341_v14  ;;  %v15395_v25 = vld [vmem:[#allocation15 + $0xb2c] ss:$16 sps:$4 sm:$0xff]   ;;  %v15390_v14 = vld [vmem:[#allocation15 + $0x928] ss:$16 sps:$4 sm:$0xff]  }
 0x301   :  { %3657 = vmatpush1.bf16.msra.mxu0 %v15336_v56  ;;  %v15393_v56 = vld [vmem:[#allocation15 + $0xb28] ss:$16 sps:$4 sm:$0xff]  }
 0x302   :  { %3710 = vmatpush1.bf16.msra.mxu1 %v15339_v15  ;;  %3658 = vmatprep.subr.bf16.mxu0 %v15344_v58  ;;  %v15398_v15 = vld [vmem:[#allocation15 + $0x90c] ss:$16 sps:$4 sm:$0xff]  }
 0x303   :  { %3711 = vmatprep.subr.bf16.mxu1 %v15347_v16  ;;  %v15401_v58 = vld [vmem:[#allocation15 + $0xb0c] ss:$16 sps:$4 sm:$0xff]   ;;  %v15396_v16 = vld [vmem:[#allocation15 + $0x908] ss:$16 sps:$4 sm:$0xff]  }
 0x305   :  { %3659 = vmatpush1.bf16.msra.mxu0 %v15342_v60  ;;  %v15399_v60 = vld [vmem:[#allocation15 + $0xb08] ss:$16 sps:$4 sm:$0xff]  }
 0x306   :  { %3712 = vmatpush1.bf16.msra.mxu1 %v15345_v21  ;;  %3660 = vmatprep.subr.bf16.mxu0 %v15350_v63 }
 0x307   :  { %3713 = vmatprep.subr.bf16.mxu1 %v15353_v22 }
 0x309   :  { %3661 = vmatpush1.bf16.msra.mxu0 %v15348_v23 }
 0x30a   :  { %3714 = vmatpush1.bf16.msra.mxu1 %v15351_v59  ;;  %3662 = vmatprep.subr.bf16.mxu0 %v15356_v24 }
 0x30b   :  { %3715 = vmatprep.subr.bf16.mxu1 %v15359_v27 }
 0x30d   :  { %3663 = vmatpush2.bf16.msra.mxu0 %v15354_v39 }
 0x30e   :  { %3716 = vmatpush2.bf16.msra.mxu1 %v15357_v41  ;;  %3664 = vmatprep.subr.bf16.mxu0 %v15362_v18 }
 0x30f   :  { %3717 = vmatprep.subr.bf16.mxu1 %v15365_v53 }
 0x311   :  { %3665 = vmatpush2.bf16.msra.mxu0 %v15360_v6 }
 0x312   :  { %3718 = vmatpush2.bf16.msra.mxu1 %v15363_v46  ;;  %3666 = vmatprep.subr.bf16.mxu0 %v15368_v47 }
 0x313   :  { %3719 = vmatprep.subr.bf16.mxu1 %v15371_v36 }
 0x315   :  { %3667 = vmatpush2.bf16.msra.mxu0 %v15366_v50 }
 0x316   :  { %3720 = vmatpush2.bf16.msra.mxu1 %v15369_v51  ;;  %3668 = vmatprep.subr.bf16.mxu0 %v15374_v52 }
 0x317   :  { %3721 = vmatprep.subr.bf16.mxu1 %v15377_v40 }
 0x319   :  { %3669 = vmatpush2.bf16.msra.mxu0 %v15372_v42 }
 0x31a   :  { %3722 = vmatpush2.bf16.msra.mxu1 %v15375_v2  ;;  %3670 = vmatprep.subr.bf16.mxu0 %v15380_v4 }
 0x31b   :  { %3723 = vmatprep.subr.bf16.mxu1 %v15383_v5 }
 0x31d   :  { %3671 = vmatpush2.bf16.msra.mxu0 %v15378_v9 }
 0x31e   :  { %3724 = vmatpush2.bf16.msra.mxu1 %v15381_v11  ;;  %3672 = vmatprep.subr.bf16.mxu0 %v15386_v12 }
 0x31f   :  { %3725 = vmatprep.subr.bf16.mxu1 %v15389_v33 }
 0x321   :  { %3673 = vmatpush2.bf16.msra.mxu0 %v15384_v37 }
 0x322   :  { %3726 = vmatpush2.bf16.msra.mxu1 %v15387_v3  ;;  %3674 = vmatprep.subr.bf16.mxu0 %v15392_v62 }
 0x323   :  { %3727 = vmatprep.subr.bf16.mxu1 %v15395_v25 }
 0x325   :  { %3675 = vmatpush2.bf16.msra.mxu0 %v15390_v14 }
 0x326   :  { %3728 = vmatpush2.bf16.msra.mxu1 %v15393_v56  ;;  %3676 = vmatprep.subr.bf16.mxu0 %v15398_v15 }
 0x327   :  { %3729 = vmatprep.subr.bf16.mxu1 %v15401_v58 }
 0x329   :  { %3677 = vmatpush2.bf16.msra.mxu0 %v15396_v16  ;;  %v2593_v21 = vpop.f32.mrf.mxu0 }
 0x32a   :  { %3730 = vmatpush2.bf16.msra.mxu1 %v15399_v60  ;;  %v2646_v63 = vpop.f32.mrf.mxu1 }
 0x32b   :  { %v2595_v22 = vpop.f32.mrf.mxu0  ;;  %v2647_v16 = vadd.f32 %v2646_v63, %v2593_v21 }
 0x32c   :  { %3679 = vmatmul.mubr.bf16.vlgmr.msra.gmra.mxu0 %v17478_v61  ;;  %v2648_v23 = vpop.f32.mrf.mxu1 }
 0x32d   :  { %3732 = vmatmul.mubr.bf16.vlgmr.msra.gmra.mxu1 %v17481_v54  ;;  %3688 = vmatprep.mubr.bf16.mxu0 %v17487_v28  ;;  %v2597_v59 = vpop.f32.mrf.mxu0  ;;  %v2649_v62 = vadd.f32 %v2648_v23, %v2595_v22 }
 0x32e   :  { %3741 = vmatprep.mubr.bf16.mxu1 %v17495_v43  ;;  %v2650_v24 = vpop.f32.mrf.mxu1 }
 0x32f   :  { %v2599_v27 = vpop.f32.mrf.mxu0  ;;  %v17614_v14 = vadd.f32 %v2650_v24, %v2597_v59  ;;  %v3764_v30 = vrot.slane %v2649_v62, 2 }
 0x330   :  { %v2652_v39 = vpop.f32.mrf.mxu1 }
 0x331   :  { %v2603_v41 = vpop.f32.mrf.mxu0  ;;  %v17612_v33 = vadd.f32 %v2652_v39, %v2599_v27  ;;  %v18638_v22 = vrot.slane %v17614_v14, 2 }
 0x332   :  { %v2656_v61 = vpop.f32.mrf.mxu1 }
 0x333   :  { %v17578_v18 = vpop.f32.mrf.mxu0  ;;  %v18637_v15 = vrot.slane %v17612_v33, 2 }
 0x334   :  { %3689 = vmatmul.mubr.bf16.gmra.mxu0 %v17500_v20  ;;  %v2658_v54 = vpop.f32.mrf.mxu1 }
 0x335   :  { %3742 = vmatmul.mubr.bf16.gmra.mxu1 %v17502_v49  ;;  %v2607_v28 = vpop.f32.mrf.mxu0 }
 0x336   :  { %v2660_v53 = vpop.f32.mrf.mxu1 }
 0x337   :  { %v2609_v43 = vpop.f32.mrf.mxu0  ;;  %v17617_v45 = vadd.f32 %v2660_v53, %v2607_v28 }
 0x338   :  { %v2662_v6 = vpop.f32.mrf.mxu1 }
 0x339   :  { %v17622_v23 = vadd.f32 %v2662_v6, %v2609_v43 }
 0x36a   :  { %v17580_v20 = vpop.f32.mrf.mxu0 }
 0x36b   :  { %v17582_v49 = vpop.f32.mrf.mxu1 }
 0x36c   :  { %v17584_v46 = vpop.f32.mrf.mxu0 }
 0x36d   :  { %v17586_v47 = vpop.f32.mrf.mxu1 }
 0x36e   :  { %v17588_v36 = vpop.f32.mrf.mxu0 }
 0x36f   :  { %v17590_v50 = vpop.f32.mrf.mxu1 }
 0x370   :  { %v17592_v51 = vpop.f32.mrf.mxu0 }
 0x371   :  { %v17594_v52 = vpop.f32.mrf.mxu1 }
 0x372   :  { %v17596_v40 = vpop.f32.mrf.mxu0 }
 0x373   :  { %v17598_v42 = vpop.f32.mrf.mxu1 }
 0x374   :  { %v17600_v2 = vpop.f32.mrf.mxu0 }
 0x375   :  { %v17602_v4 = vpop.f32.mrf.mxu1 }
 0x376   :  { %v17604_v5 = vpop.f32.mrf.mxu0 }
 0x377   :  { %v17606_v9 = vpop.f32.mrf.mxu1 }
 0x378   :  { %v17608_v11 = vpop.f32.mrf.mxu0 }
 0x379   :  { %v17610_v12 = vpop.f32.mrf.mxu1 }
 0x3ab   :  { %v3574_v37 = vpop.f32.mrf.mxu0 }
 0x3ac   :  { %v3627_v3 = vpop.f32.mrf.mxu1 }
 0x3ad   :  { %v3576_v25 = vpop.f32.mrf.mxu0  ;;  %v3628_v59 = vadd.f32 %v3627_v3, %v3574_v37 }
 0x3ae   :  { %v3629_v56 = vpop.f32.mrf.mxu1 }
 0x3af   :  { %v3578_v58 = vpop.f32.mrf.mxu0  ;;  %v3630_v0 = vadd.f32 %v3629_v56, %v3576_v25 }
 0x3b0   :  { %v3631_v60 = vpop.f32.mrf.mxu1 }
 0x3b1   :  { %v17619_v27 = vadd.f32 %v3631_v60, %v3578_v58  ;;  %v3580_v39 = vpop.f32.mrf.mxu0 }
 0x3b2   :  { %v3633_v24 = vpop.f32.mrf.mxu1 }
 0x3b3   :  { %17108 = shalt.err (!%p17105_p2)  }
 0x3b4   :  { %146 = dma.hbm_to_vmem [thread:$0]  %s18626_s5, 49152, %s144_s18, [#allocation10]  ;;  %v17627_v21 = vld [vmem:[#allocation16] sm:$0xf]  ;;  %v3766_v63 = vsel %vm215_vm1, %v3764_v30, %v18637_v15  ;;  %v2657_v28 = vadd.f32 %v2656_v61, %v2603_v41  ;;  %v17632_v53 = vadd.f32 %v3633_v24, %v3580_v39  ;;  %v3584_v43 = vpop.f32.mrf.mxu0  ;;  %v3761_v37 = vrot.slane %v2647_v16, 2  ;;  %v3637_v25 = vpop.f32.mrf.mxu1 }
 0x3b5   :  { %v17636_v6 = vrot.slane %v17627_v21, %v17361_v34  ;;  %v2659_v3 = vadd.f32 %v2658_v54, %v17578_v18  ;;  %v18641_v62 = vrot.slane %v17619_v27, 4  ;;  %s17117_s5 = scalar_lea.vmem %s156_s20, 16384  ;;  %p17122_p4 = scmp.lt.s32.totalorder %s156_s20, %s156_s20 }
 0x3b6   :  { %p17118_p3 = scmp.ne.s32.totalorder %s156_s20, %s17117_s5  ;;  %p17123_p5 = scmp.lt.s32.totalorder %s17117_s5, %s17117_s5 }
 0x3b8   :  { %p17124_p6 = por %p17123_p5, %p17122_p4 }
 0x3ba   :  { %p17125_p7 = pnand %p17124_p6, %p17118_p3 }
 0x3bc   :  { %17128 = shalt.err (!%p17125_p7)  }
 0x3bd   :  { %158 = dma.hbm_to_vmem [thread:$0]  %s18628_s7, 16384, %s156_s20, [#allocation10 + $0x1]  ;;  %v3835_v30 = vrot.slane %v17617_v45, 2  ;;  %v3801_v41 = vrot.slane %v3630_v0, 4  ;;  %vm3797_vm9 = vcmask 1043456   ;;  %v3802_v61 = vrot.slane %v17632_v53, 4  ;;  %v3586_v18 = vpop.f32.mrf.mxu0  ;;  %v3639_v60 = vpop.f32.mrf.mxu1 }
 0x3be   :  { %s17181_s24 = smov [#allocation9]   ;;  %v3763_v54 = vsel %vm215_vm1, %v3761_v37, %v18638_v22  ;;  %v3782_v56 = vadd.f32 %v3766_v63, %v17530_v29  ;;  %v3838_v58 = vrot.slane %v17622_v23, 2  ;;  %v3798_v16 = vrot.slane %v3628_v59, 4 }
 0x3bf   :  { %s167_s6 = sshll.u32 %s17181_s24, 4  ;;  %v3834_v39 = vrot.slane %v2657_v28, 2  ;;  %v3803_v45 = vsel %vm3797_vm9, %v3801_v41, %v3802_v61  ;;  %v3638_v0 = vadd.f32 %v3637_v25, %v3584_v43  ;;  %v3588_v24 = vpop.f32.mrf.mxu0  ;;  %s168_s6 = int_to_ptr.vmem [resolvable:$true] %s167_s6 }
 0x3c0   :  { %s17137_s7 = scalar_lea.vmem %s168_s6, 49152  ;;  %p17142_p9 = scmp.lt.s32.totalorder %s168_s6, %s168_s6 }
 0x3c1   :  { %p17138_p8 = scmp.ne.s32.totalorder %s168_s6, %s17137_s7  ;;  %p17143_p10 = scmp.lt.s32.totalorder %s17137_s7, %s17137_s7 }
 0x3c3   :  { %p17144_p11 = por %p17143_p10, %p17142_p9 }
 0x3c5   :  { %p17145_p12 = pnand %p17144_p11, %p17138_p8 }
 0x3c7   :  { %17148 = shalt.err (!%p17145_p12)  }
 0x3c8   :  { %170 = dma.hbm_to_vmem [thread:$0]  %s18630_s9, 49152, %s168_s6, [#allocation10 + $0x2]  ;;  %v3837_v29 = vrot.slane %v2659_v3, 2  ;;  %v3800_v23 = vsel %vm3797_vm9, %v3798_v16, %v18641_v62  ;;  %v3819_v59 = vadd.f32 %v3803_v45, %v3782_v56  ;;  %v3641_v63 = vpop.f32.mrf.mxu1  ;;  %v3781_v28 = vadd.f32 %v3763_v54, %v17525_v26  ;;  %v3590_v25 = vpop.f32.mrf.mxu0 }
 0x3c9   :  { %v3836_v53 = vsel %vm215_vm1, %v3834_v39, %v3835_v30  ;;  %v3640_v43 = vadd.f32 %v3639_v60, %v3586_v18  ;;  %v3642_v37 = vadd.f32 %v3641_v63, %v3588_v24  ;;  %v3934_v41 = vrot.slane %v17627_v21, %v17355_v31 }
 0x3ca   :  { %v3858_v15 = vadd.f32 %v3835_v30, %v17544_v10  ;;  %v3839_v3 = vsel %vm215_vm1, %v3837_v29, %v3838_v58  ;;  %v3952_v22 = vadd.f32 %v17636_v6, %v3819_v59  ;;  %v3643_v34 = vpop.f32.mrf.mxu1  ;;  %v3818_v16 = vadd.f32 %v3800_v23, %v3781_v28 }
 0x3cb   :  { %v3870_v56 = vrot.slane %v3638_v0, 4  ;;  %v3871_v45 = vrot.slane %v3642_v37, 4  ;;  %v3644_v62 = vadd.f32 %v3643_v34, %v3590_v25  ;;  %v3854_v26 = vadd.f32 %v3836_v53, %v17537_v55 }
 0x3cc   :  { %v3859_v18 = vadd.f32 %v3838_v58, %v17546_v38  ;;  %v3873_v54 = vrot.slane %v3640_v43, 4  ;;  %v18646_v10 = vrot.slane %v17614_v14, 2  ;;  %v3855_v29 = vadd.f32 %v3839_v3, %v17542_v1 }
 0x3cd   :  { %v3872_v60 = vsel %vm3797_vm9, %v3870_v56, %v3871_v45  ;;  %v3894_v39 = vadd.f32 %v3871_v45, %v3858_v15  ;;  %v3874_v24 = vrot.slane %v3644_v62, 4  ;;  %v3951_v23 = vadd.f32 %v3934_v41, %v3818_v16 }
 0x3ce   :  { %v3785_v30 = vadd.f32 %v18646_v10, %v17532_v44  ;;  %v3890_v59 = vadd.f32 %v3872_v60, %v3854_v26  ;;  %v18647_v55 = vrot.slane %v17612_v33, 2  ;;  %v18648_v58 = vrot.slane %v17619_v27, 4 }
 0x3cf   :  { %v3910_v0 = vrot.slane %v3894_v39, 4  ;;  %v3875_v34 = vsel %vm3797_vm9, %v3873_v54, %v3874_v24  ;;  %v3895_v63 = vadd.f32 %v3874_v24, %v3859_v18  ;;  %v17679_v37 = vmax.f32 %v3951_v23, 0.0 }
 0x3d0   :  { %v3786_v38 = vadd.f32 %v18647_v55, %v17534_v19  ;;  %v3822_v15 = vadd.f32 %v18648_v58, %v3785_v30  ;;  %v3906_v62 = vrot.slane %v3890_v59, 4  ;;  %v3891_v28 = vadd.f32 %v3875_v34, %v3855_v29 }
 0x3d1   :  { %v3912_v53 = vrot.slane %v3895_v63, 4  ;;  %v17681_v16 = vmax.f32 %v3952_v22, 0.0  ;;  %v4011_v26 = vmul.f32 %v17679_v37, %v17679_v37 }
 0x3d2   :  { %v3823_v14 = vadd.f32 %v3802_v61, %v3786_v38  ;;  %v3911_v44 = vsel %vm3797_vm9, %v3906_v62, %v3910_v0  ;;  %v3926_v1 = vsel %vm3797_vm9, %v3822_v15, %v3906_v62  ;;  %v3907_v43 = vrot.slane %v3891_v28, 4 }
 0x3d3   :  { %v3955_v25 = vadd.f32 %v3934_v41, %v3926_v1  ;;  %v3959_v3 = vadd.f32 %v3934_v41, %v3911_v44  ;;  %v4012_v54 = vmul.f32 %v17681_v16, %v17681_v16 }
 0x3d4   :  { %v3913_v19 = vsel %vm3797_vm9, %v3907_v43, %v3912_v53  ;;  %v3927_v33 = vsel %vm3797_vm9, %v3823_v14, %v3907_v43 }
 0x3d5   :  { %v17685_v27 = vmax.f32 %v3955_v25, 0.0  ;;  %v17687_v56 = vmax.f32 %v3959_v3, 0.0  ;;  %v3956_v61 = vadd.f32 %v17636_v6, %v3927_v33  ;;  %v3960_v45 = vadd.f32 %v17636_v6, %v3913_v19 }
 0x3d7   :  { %v3975_v41 = vadd.f32 %v17685_v27, %v17679_v37  ;;  %v4015_v22 = vmul.f32 %v17685_v27, %v17685_v27  ;;  %v17697_v18 = vmax.f32 %v3956_v61, 0.0  ;;  %v4019_v60 = vmul.f32 %v17687_v56, %v17687_v56 }
 0x3d8   :  { %v17703_v39 = vmax.f32 %v3960_v45, 0.0 }
 0x3d9   :  { %v3976_v6 = vadd.f32 %v3975_v41, %v17687_v56  ;;  %v4023_v24 = vadd.f32 %v4015_v22, %v4011_v26  ;;  %v3983_v10 = vadd.f32 %v17697_v18, %v17681_v16  ;;  %v4016_v30 = vmul.f32 %v17697_v18, %v17697_v18 }
 0x3da   :  { %v4020_v29 = vmul.f32 %v17703_v39, %v17703_v39 }
 0x3db   :  { %v3977_v59 = vrot.slane %v3976_v6, 4  ;;  %v4024_v23 = vadd.f32 %v4023_v24, %v4019_v60  ;;  %v3984_v0 = vadd.f32 %v3983_v10, %v17703_v39  ;;  %v4031_v34 = vadd.f32 %v4016_v30, %v4012_v54 }
 0x3dd   :  { %v3978_v63 = vadd.f32 %v3977_v59, %v3976_v6  ;;  %v4025_v55 = vrot.slane %v4024_v23, 4  ;;  %v3985_v38 = vrot.slane %v3984_v0, 4  ;;  %v4032_v58 = vadd.f32 %v4031_v34, %v4020_v29 }
 0x3df   :  { %v3979_v15 = vrot.slane %v3978_v63, 2  ;;  %v4026_v62 = vadd.f32 %v4025_v55, %v4024_v23  ;;  %v3986_v28 = vadd.f32 %v3985_v38, %v3984_v0  ;;  %v4033_v53 = vrot.slane %v4032_v58, 4 }
 0x3e1   :  { %v3980_v14 = vadd.f32 %v3979_v15, %v3978_v63  ;;  %v4027_v44 = vrot.slane %v4026_v62, 2  ;;  %v3987_v1 = vrot.slane %v3986_v28, 2  ;;  %v4034_v43 = vadd.f32 %v4033_v53, %v4032_v58 }
 0x3e3   :  { %v3981_v25 = vrot.slane %v3980_v14, 1  ;;  %v4028_v3 = vadd.f32 %v4027_v44, %v4026_v62  ;;  %v3988_v19 = vadd.f32 %v3987_v1, %v3986_v28  ;;  %v4035_v33 = vrot.slane %v4034_v43, 2 }
 0x3e5   :  { %v3982_v61 = vadd.f32 %v3981_v25, %v3980_v14  ;;  %v4029_v45 = vrot.slane %v4028_v3, 1  ;;  %v3989_v26 = vrot.slane %v3988_v19, 1  ;;  %v4036_v41 = vadd.f32 %v4035_v33, %v4034_v43 }
 0x3e7   :  { %v4007_v22 = vmul.f32 0.041666668, %v3982_v61  ;;  %v4030_v54 = vadd.f32 %v4029_v45, %v4028_v3  ;;  %v3990_v60 = vadd.f32 %v3989_v26, %v3988_v19  ;;  %v4037_v6 = vrot.slane %v4036_v41, 1 }
 0x3e9   :  { %v4055_v24 = vmul.f32 0.041666668, %v4030_v54  ;;  %v4059_v10 = vmul.f32 %v4007_v22, %v4007_v22  ;;  %v4071_v30 = vsub.f32 %v17679_v37, %v4007_v22  ;;  %v4075_v29 = vsub.f32 %v17685_v27, %v4007_v22 }
 0x3ea   :  { %v4079_v59 = vsub.f32 %v17687_v56, %v4007_v22  ;;  %v4008_v23 = vmul.f32 0.041666668, %v3990_v60  ;;  %v4038_v0 = vadd.f32 %v4037_v6, %v4036_v41  ;;  %v17721_v27 = vadd.f32 %v17590_v50, %v17588_v36 }
 0x3eb   :  { %v4063_v34 = vsub.f32 %v4055_v24, %v4059_v10  ;;  %v17725_v56 = vadd.f32 %v17594_v52, %v17592_v51  ;;  %v2763_v6 = vadd.f32 %v17598_v42, %v17596_v40 }
 0x3ec   :  { %v4056_v63 = vmul.f32 0.041666668, %v4038_v0  ;;  %v4060_v55 = vmul.f32 %v4008_v23, %v4008_v23  ;;  %v4072_v38 = vsub.f32 %v17681_v16, %v4008_v23  ;;  %v4076_v58 = vsub.f32 %v17697_v18, %v4008_v23  ;;  %v3680_v16 = vpop.f32.mrf.mxu0 }
 0x3ed   :  { %v4067_v15 = vmax.f32 %v4063_v34, 0.0  ;;  %v4080_v62 = vsub.f32 %v17703_v39, %v4008_v23  ;;  %v2753_v18 = vadd.f32 %v17582_v49, %v17580_v20  ;;  %v2755_v39 = vadd.f32 %v17586_v47, %v17584_v46  ;;  %v3733_v44 = vpop.f32.mrf.mxu1 }
 0x3ee   :  { %v4064_v28 = vsub.f32 %v4056_v63, %v4060_v55  ;;  %v3682_v43 = vpop.f32.mrf.mxu0  ;;  %v3768_v25 = vrot.slane %v17721_v27, 2  ;;  %v3771_v52 = vrot.slane %v17725_v56, 2  ;;  %v2767_v46 = vadd.f32 %v17606_v9, %v17604_v5 }
 0x3ef   :  { %v4083_v53 = vadd.f32 1e-05, %v4067_v15  ;;  %v3735_v51 = vpop.f32.mrf.mxu1  ;;  %v3767_v20 = vrot.slane %v2753_v18, 2  ;;  %v3770_v49 = vrot.slane %v2755_v39, 2  ;;  %v3734_v47 = vadd.f32 %v3733_v44, %v3680_v16 }
 0x3f0   :  { %v4068_v14 = vmax.f32 %v4064_v28, 0.0  ;;  %v3684_v19 = vpop.f32.mrf.mxu0  ;;  %v3736_v22 = vadd.f32 %v3735_v51, %v3682_v43  ;;  %v2769_v9 = vadd.f32 %v17610_v12, %v17608_v11  ;;  %v2765_v23 = vadd.f32 %v17602_v4, %v17600_v2 }
 0x3f1   :  { %15410 = vrsqrt.f32 %v4083_v53  ;;  %v3737_v61 = vpop.f32.mrf.mxu1  ;;  %v3769_v60 = vsel %vm215_vm1, %v3767_v20, %v3768_v25  ;;  %v3772_v5 = vsel %vm215_vm1, %v3770_v49, %v3771_v52  ;;  %v3804_v0 = vrot.slane %v3734_v47, 4 }
 0x3f2   :  { %v4084_v37 = vadd.f32 1e-05, %v4068_v14  ;;  %v3686_v54 = vpop.f32.mrf.mxu0  ;;  %v3738_v24 = vadd.f32 %v3737_v61, %v3684_v19  ;;  %v3783_v42 = vadd.f32 %v3769_v60, %v17548_v17  ;;  %v3841_v63 = vrot.slane %v2767_v46, 2 }
 0x3f3   :  { %v3739_v10 = vpop.f32.mrf.mxu1  ;;  %v3807_v55 = vrot.slane %v3736_v22, 4  ;;  %v3946_v11 = vrot.slane %v17627_v21, %v17364_v35  ;;  %v3784_v12 = vadd.f32 %v3772_v5, %v17553_v57  ;;  %v3840_v15 = vrot.slane %v2763_v6, 2 }
 0x3f4   :  { %15412 = vrsqrt.f32 %v4084_v37  ;;  %v3805_v34 = vrot.slane %v3738_v24, 4  ;;  %v3844_v53 = vrot.slane %v2769_v9, 2  ;;  %v3843_v17 = vrot.slane %v2765_v23, 2  ;;  %v18649_v24 = vld [vmem:[#allocation43_spill] sm:$0xff]  ;;  %v18650_v23 = vld [vmem:[#allocation42_spill] sm:$0xff] }
 0x3f5   :  { %v3743_v40 = vpop.f32.mrf.mxu1  ;;  %v3842_v39 = vsel %vm215_vm1, %v3840_v15, %v3841_v63  ;;  %v3860_v57 = vadd.f32 %v3841_v63, %v17568_v8  ;;  %v3787_v8 = vadd.f32 %v3768_v25, %v17556_v7 }
 0x3f6   :  { %v3856_v47 = vadd.f32 %v3842_v39, %v17560_v48  ;;  %v3861_v61 = vadd.f32 %v3844_v53, %v17570_v13  ;;  %v3788_v48 = vadd.f32 %v3771_v52, %v18650_v23 }
 0x3f7   :  { %v3745_v28 = vpop.f32.mrf.mxu1  ;;  %v3824_v13 = vadd.f32 %v3805_v34, %v3787_v8 }
 0x3f9   :  { %v3747_v18 = vpop.f32.mrf.mxu1 }
 0x3fb   :  { %v3749_v19 = vpop.f32.mrf.mxu1 }
 0x3fe   :  { %v15411_v1 = vpop.eup %15410 }
 0x3ff   :  { %v17732_v3 = vmul.f32 %v15411_v1, %v4071_v30  ;;  %v17734_v36 = vmul.f32 %v15411_v1, %v4075_v29  ;;  %v17736_v50 = vmul.f32 %v15411_v1, %v4079_v59  ;;  %v3740_v30 = vadd.f32 %v3739_v10, %v3686_v54  ;;  %v3690_v29 = vpop.f32.mrf.mxu0 }
 0x400   :  { %v3942_v59 = vrot.slane %v17627_v21, %v17358_v32  ;;  %v3744_v14 = vadd.f32 %v3743_v40, %v3690_v29 }
 0x401   :  { %v15413_v33 = vpop.eup %15412 }
 0x402   :  { %v17741_v45 = vmul.f32 %v15413_v33, %v4072_v38  ;;  %v17743_v26 = vmul.f32 %v15413_v33, %v4076_v58  ;;  %v17745_v41 = vmul.f32 %v15413_v33, %v4080_v62  ;;  %v3808_v38 = vrot.slane %v3740_v30, 4  ;;  %v3692_v58 = vpop.f32.mrf.mxu0 }
 0x403   :  { %v3806_v62 = vsel %vm3797_vm9, %v3804_v0, %v3805_v34  ;;  %v3746_v1 = vadd.f32 %v3745_v28, %v3692_v58  ;;  %v3845_v33 = vsel %vm215_vm1, %v3843_v17, %v3844_v53  ;;  %v3876_v20 = vrot.slane %v3744_v14, 4 }
 0x404   :  { %v3820_v2 = vadd.f32 %v3806_v62, %v3783_v42  ;;  %v3809_v4 = vsel %vm3797_vm9, %v3807_v55, %v3808_v38  ;;  %v3694_v37 = vpop.f32.mrf.mxu0  ;;  %v3857_v10 = vadd.f32 %v3845_v33, %v18649_v24  ;;  %v3825_v63 = vadd.f32 %v3808_v38, %v3788_v48 }
 0x405   :  { %v3821_v16 = vadd.f32 %v3809_v4, %v3784_v12  ;;  %v3748_v21 = vadd.f32 %v3747_v18, %v3694_v37  ;;  %v3879_v22 = vrot.slane %v3746_v1, 4 }
 0x406   :  { %v3953_v44 = vadd.f32 %v3942_v59, %v3820_v2  ;;  %v3696_v43 = vpop.f32.mrf.mxu0 }
 0x407   :  { %v3954_v51 = vadd.f32 %v3946_v11, %v3821_v16  ;;  %v3877_v49 = vrot.slane %v3748_v21, 4  ;;  %v3750_v46 = vadd.f32 %v3749_v19, %v3696_v43 }
 0x408   :  { %v17783_v25 = vmax.f32 %v3953_v44, 0.0 }
 0x409   :  { %v3878_v54 = vsel %vm3797_vm9, %v3876_v20, %v3877_v49  ;;  %v3896_v60 = vadd.f32 %v3877_v49, %v3860_v57  ;;  %v3880_v6 = vrot.slane %v3750_v46, 4  ;;  %v17785_v15 = vmax.f32 %v3954_v51, 0.0 }
 0x40a   :  { %v3892_v5 = vadd.f32 %v3878_v54, %v3856_v47  ;;  %v4013_v53 = vmul.f32 %v17783_v25, %v17783_v25 }
 0x40b   :  { %v3914_v9 = vrot.slane %v3896_v60, 4  ;;  %v3881_v30 = vsel %vm3797_vm9, %v3879_v22, %v3880_v6  ;;  %v3897_v29 = vadd.f32 %v3880_v6, %v3861_v61  ;;  %v4014_v14 = vmul.f32 %v17785_v15, %v17785_v15 }
 0x40c   :  { %v3908_v0 = vrot.slane %v3892_v5, 4  ;;  %v3893_v40 = vadd.f32 %v3881_v30, %v3857_v10 }
 0x40d   :  { %v3916_v42 = vrot.slane %v3897_v29, 4 }
 0x40e   :  { %v3915_v55 = vsel %vm3797_vm9, %v3908_v0, %v3914_v9  ;;  %v3928_v7 = vsel %vm3797_vm9, %v3824_v13, %v3908_v0  ;;  %v3909_v27 = vrot.slane %v3893_v40, 4 }
 0x40f   :  { %v3957_v58 = vadd.f32 %v3942_v59, %v3928_v7  ;;  %v3961_v12 = vadd.f32 %v3942_v59, %v3915_v55 }
 0x410   :  { %v3917_v62 = vsel %vm3797_vm9, %v3909_v27, %v3916_v42  ;;  %v3929_v56 = vsel %vm3797_vm9, %v3825_v63, %v3909_v27 }
 0x411   :  { %v17789_v52 = vmax.f32 %v3957_v58, 0.0  ;;  %v17791_v34 = vmax.f32 %v3961_v12, 0.0  ;;  %v3958_v38 = vadd.f32 %v3946_v11, %v3929_v56  ;;  %v3962_v28 = vadd.f32 %v3946_v11, %v3917_v62 }
 0x413   :  { %v3991_v2 = vadd.f32 %v17789_v52, %v17783_v25  ;;  %v4017_v59 = vmul.f32 %v17789_v52, %v17789_v52  ;;  %v17799_v4 = vmax.f32 %v3958_v38, 0.0  ;;  %v4021_v37 = vmul.f32 %v17791_v34, %v17791_v34 }
 0x414   :  { %v3974_v17 = vmax.f32 %v3962_v28, 0.0 }
 0x415   :  { %v3992_v11 = vadd.f32 %v3991_v2, %v17791_v34  ;;  %v4039_v16 = vadd.f32 %v4017_v59, %v4013_v53  ;;  %v3999_v18 = vadd.f32 %v17799_v4, %v17785_v15  ;;  %v4018_v39 = vmul.f32 %v17799_v4, %v17799_v4 }
 0x416   :  { %v4022_v44 = vmul.f32 %v3974_v17, %v3974_v17 }
 0x417   :  { %v3993_v1 = vrot.slane %v3992_v11, 4  ;;  %v4040_v21 = vadd.f32 %v4039_v16, %v4021_v37  ;;  %v4000_v43 = vadd.f32 %v3999_v18, %v3974_v17  ;;  %v4047_v57 = vadd.f32 %v4018_v39, %v4014_v14 }
 0x419   :  { %v3994_v51 = vadd.f32 %v3993_v1, %v3992_v11  ;;  %v4041_v19 = vrot.slane %v4040_v21, 4  ;;  %v4001_v33 = vrot.slane %v4000_v43, 4  ;;  %v4048_v20 = vadd.f32 %v4047_v57, %v4022_v44 }
 0x41b   :  { %v3995_v49 = vrot.slane %v3994_v51, 2  ;;  %v4042_v46 = vadd.f32 %v4041_v19, %v4040_v21  ;;  %v4002_v47 = vadd.f32 %v4001_v33, %v4000_v43  ;;  %v4049_v61 = vrot.slane %v4048_v20, 4 }
 0x41d   :  { %v3996_v22 = vadd.f32 %v3995_v49, %v3994_v51  ;;  %v4043_v54 = vrot.slane %v4042_v46, 2  ;;  %v4003_v60 = vrot.slane %v4002_v47, 2  ;;  %v4050_v6 = vadd.f32 %v4049_v61, %v4048_v20 }
 0x41f   :  { %v3997_v8 = vrot.slane %v3996_v22, 1  ;;  %v4044_v24 = vadd.f32 %v4043_v54, %v4042_v46  ;;  %v4004_v10 = vadd.f32 %v4003_v60, %v4002_v47  ;;  %v4051_v5 = vrot.slane %v4050_v6, 2 }
 0x421   :  { %v3998_v9 = vadd.f32 %v3997_v8, %v3996_v22  ;;  %v4045_v30 = vrot.slane %v4044_v24, 1  ;;  %v4005_v29 = vrot.slane %v4004_v10, 1  ;;  %v4052_v23 = vadd.f32 %v4051_v5, %v4050_v6 }
 0x423   :  { %v4009_v48 = vmul.f32 0.041666668, %v3998_v9  ;;  %v4046_v13 = vadd.f32 %v4045_v30, %v4044_v24  ;;  %v4006_v0 = vadd.f32 %v4005_v29, %v4004_v10  ;;  %v4053_v40 = vrot.slane %v4052_v23, 1 }
 0x425   :  { %v4057_v42 = vmul.f32 0.041666668, %v4046_v13  ;;  %v4061_v63 = vmul.f32 %v4009_v48, %v4009_v48  ;;  %v4073_v55 = vsub.f32 %v17783_v25, %v4009_v48  ;;  %v4077_v7 = vsub.f32 %v17789_v52, %v4009_v48 }
 0x426   :  { %v4081_v27 = vsub.f32 %v17791_v34, %v4009_v48  ;;  %v4010_v58 = vmul.f32 0.041666668, %v4006_v0  ;;  %v4054_v12 = vadd.f32 %v4053_v40, %v4052_v23 }
 0x427   :  { %v4065_v62 = vsub.f32 %v4057_v42, %v4061_v63 }
 0x428   :  { %v4058_v56 = vmul.f32 0.041666668, %v4054_v12  ;;  %v4062_v38 = vmul.f32 %v4010_v58, %v4010_v58  ;;  %v4074_v28 = vsub.f32 %v17785_v15, %v4010_v58  ;;  %v4078_v53 = vsub.f32 %v17799_v4, %v4010_v58 }
 0x429   :  { %v4069_v2 = vmax.f32 %v4065_v62, 0.0  ;;  %v4082_v59 = vsub.f32 %v3974_v17, %v4010_v58 }
 0x42a   :  { %v4066_v14 = vsub.f32 %v4058_v56, %v4062_v38 }
 0x42b   :  { %v4085_v37 = vadd.f32 1e-05, %v4069_v2 }
 0x42c   :  { %v4070_v11 = vmax.f32 %v4066_v14, 0.0 }
 0x42d   :  { %15414 = vrsqrt.f32 %v4085_v37 }
 0x42e   :  { %v4086_v25 = vadd.f32 1e-05, %v4070_v11 }
 0x430   :  { %15416 = vrsqrt.f32 %v4086_v25 }
 0x43a   :  { %v15415_v52 = vpop.eup %15414 }
 0x43b   :  { %v17815_v16 = vmul.f32 %v15415_v52, %v4073_v55  ;;  %v17817_v34 = vmul.f32 %v15415_v52, %v4077_v7  ;;  %v17819_v18 = vmul.f32 %v15415_v52, %v4081_v27 }
 0x43d   :  { %v15417_v39 = vpop.eup %15416 }
 0x43e   :  { %v4094_v44 = vmul.f32 %v15417_v39, %v4074_v28  ;;  %v4098_v15 = vmul.f32 %v15417_v39, %v4078_v53  ;;  %v17821_v1 = vmul.f32 %v15417_v39, %v4082_v59 }
 0x43f   :  { %17159 = dma.done.wait [#allocation10], 49152 }
 0x440   :  { %17160 = vsyncadd [#allocation10], 4294918144  ;;  %v17825_v4 = vpack.c.bf16 %v17743_v26, %v17741_v45  ;;  %v17827_v17 = vpack.c.bf16 %v4098_v15, %v4094_v44  ;;  %v15418_v21 = vld [vmem:[#allocation7 + $0xe4] ss:$16 sps:$4 sm:$0xff]   ;;  %v15422_v57 = vld [vmem:[#allocation7 + $0xe0] ss:$16 sps:$4 sm:$0xff]  }
 0x441   :  { %v15420_v43 = vld [vmem:[#allocation7 + $0x2e4] ss:$16 sps:$4 sm:$0xff]   ;;  %4963 = vmatprep.subr.bf16.mxu0 %v15418_v21  ;;  %v15423_v51 = vld [vmem:[#allocation7 + $0x2e0] ss:$16 sps:$4 sm:$0xff]   ;;  %vm7121_vm10 = vcmask 1044480   ;;  %vm7150_vm11 = vcmask 1041408  }
 0x442   :  { %4995 = vmatprep.mubr.bf16.mxu0 %v17825_v4  ;;  %5046 = vmatprep.mubr.bf16.mxu1 %v17827_v17  ;;  %v15424_v19 = vld [vmem:[#allocation7 + $0xc4] ss:$16 sps:$4 sm:$0xff]   ;;  %v15428_v20 = vld [vmem:[#allocation7 + $0xc0] ss:$16 sps:$4 sm:$0xff]  }
 0x443   :  { %5014 = vmatprep.subr.bf16.mxu1 %v15420_v43  ;;  %4964 = vmatpush1.bf16.msra.mxu0 %v15422_v57  ;;  %v15426_v33 = vld [vmem:[#allocation7 + $0x2c4] ss:$16 sps:$4 sm:$0xff]   ;;  %v15429_v45 = vld [vmem:[#allocation7 + $0x2c0] ss:$16 sps:$4 sm:$0xff]  }
 0x444   :  { %5015 = vmatpush1.bf16.msra.mxu1 %v15423_v51  ;;  %4965 = vmatprep.subr.bf16.mxu0 %v15424_v19  ;;  %v15430_v26 = vld [vmem:[#allocation7 + $0xa4] ss:$16 sps:$4 sm:$0xff]   ;;  %v15434_v46 = vld [vmem:[#allocation7 + $0xa0] ss:$16 sps:$4 sm:$0xff]  }
 0x445   :  { %5016 = vmatprep.subr.bf16.mxu1 %v15426_v33  ;;  %v15432_v49 = vld [vmem:[#allocation7 + $0x2a4] ss:$16 sps:$4 sm:$0xff]   ;;  %v15435_v47 = vld [vmem:[#allocation7 + $0x2a0] ss:$16 sps:$4 sm:$0xff]  }
 0x446   :  { %v15436_v61 = vld [vmem:[#allocation7 + $0x84] ss:$16 sps:$4 sm:$0xff]   ;;  %v15440_v54 = vld [vmem:[#allocation7 + $0x80] ss:$16 sps:$4 sm:$0xff]  }
 0x447   :  { %4966 = vmatpush1.bf16.msra.mxu0 %v15428_v20  ;;  %v15438_v22 = vld [vmem:[#allocation7 + $0x284] ss:$16 sps:$4 sm:$0xff]   ;;  %v15441_v60 = vld [vmem:[#allocation7 + $0x280] ss:$16 sps:$4 sm:$0xff]  }
 0x448   :  { %5017 = vmatpush1.bf16.msra.mxu1 %v15429_v45  ;;  %4967 = vmatprep.subr.bf16.mxu0 %v15430_v26  ;;  %v15442_v6 = vld [vmem:[#allocation7 + $0x64] ss:$16 sps:$4 sm:$0xff]   ;;  %v15446_v24 = vld [vmem:[#allocation7 + $0x60] ss:$16 sps:$4 sm:$0xff]  }
 0x449   :  { %5018 = vmatprep.subr.bf16.mxu1 %v15432_v49  ;;  %v15444_v8 = vld [vmem:[#allocation7 + $0x264] ss:$16 sps:$4 sm:$0xff]   ;;  %v15447_v10 = vld [vmem:[#allocation7 + $0x260] ss:$16 sps:$4 sm:$0xff]  }
 0x44a   :  { %v15448_v5 = vld [vmem:[#allocation7 + $0x44] ss:$16 sps:$4 sm:$0xff]   ;;  %v15452_v30 = vld [vmem:[#allocation7 + $0x40] ss:$16 sps:$4 sm:$0xff]  }
 0x44b   :  { %4968 = vmatpush1.bf16.msra.mxu0 %v15434_v46  ;;  %v15450_v9 = vld [vmem:[#allocation7 + $0x244] ss:$16 sps:$4 sm:$0xff]   ;;  %v15453_v29 = vld [vmem:[#allocation7 + $0x240] ss:$16 sps:$4 sm:$0xff]  }
 0x44c   :  { %5019 = vmatpush1.bf16.msra.mxu1 %v15435_v47  ;;  %4969 = vmatprep.subr.bf16.mxu0 %v15436_v61  ;;  %v15454_v23 = vld [vmem:[#allocation7 + $0x24] ss:$16 sps:$4 sm:$0xff]   ;;  %v15458_v13 = vld [vmem:[#allocation7 + $0x20] ss:$16 sps:$4 sm:$0xff]  }
 0x44d   :  { %5020 = vmatprep.subr.bf16.mxu1 %v15438_v22  ;;  %v15456_v48 = vld [vmem:[#allocation7 + $0x224] ss:$16 sps:$4 sm:$0xff]   ;;  %v15459_v0 = vld [vmem:[#allocation7 + $0x220] ss:$16 sps:$4 sm:$0xff]   ;;  %v15516_v22 = vld [vmem:[#allocation7 + $0xec] ss:$16 sps:$4 sm:$0xff]  }
 0x44e   :  { %v15460_v40 = vld [vmem:[#allocation7 + $0x4] ss:$16 sps:$4 sm:$0xff]   ;;  %v15464_v63 = vld [vmem:[#allocation7] ss:$16 sps:$4 sm:$0xff]  }
 0x44f   :  { %4970 = vmatpush1.bf16.msra.mxu0 %v15440_v54  ;;  %v15462_v42 = vld [vmem:[#allocation7 + $0x204] ss:$16 sps:$4 sm:$0xff]   ;;  %v15465_v55 = vld [vmem:[#allocation7 + $0x200] ss:$16 sps:$4 sm:$0xff]   ;;  %v15519_v54 = vld [vmem:[#allocation7 + $0x2ec] ss:$16 sps:$4 sm:$0xff]  }
 0x450   :  { %5021 = vmatpush1.bf16.msra.mxu1 %v15441_v60  ;;  %4971 = vmatprep.subr.bf16.mxu0 %v15442_v6  ;;  %v15466_v7 = vld [vmem:[#allocation7 + $0x1e4] ss:$16 sps:$4 sm:$0xff]   ;;  %v15470_v58 = vld [vmem:[#allocation7 + $0x1e0] ss:$16 sps:$4 sm:$0xff]   ;;  %v17833_v60 = vpack.c.bf16 %v17734_v36, %v17732_v3  ;;  %v17837_v6 = vpack.c.bf16 %v17817_v34, %v17815_v16  ;;  %v17845_v3 = vpack.c.bf16 %v17821_v1, %v17821_v1  ;;  %v15520_v36 = vld [vmem:[#allocation7 + $0xc8] ss:$16 sps:$4 sm:$0xff]  }
 0x451   :  { %5022 = vmatprep.subr.bf16.mxu1 %v15444_v8  ;;  %v15468_v27 = vld [vmem:[#allocation7 + $0x3e4] ss:$16 sps:$4 sm:$0xff]   ;;  %v15471_v12 = vld [vmem:[#allocation7 + $0x3e0] ss:$16 sps:$4 sm:$0xff]   ;;  %v15514_v8 = vld [vmem:[#allocation7 + $0xe8] ss:$16 sps:$4 sm:$0xff]   ;;  %v17853_v1 = vpack.c.bf16 %v17736_v50, %v17736_v50 }
 0x452   :  { %v15472_v62 = vld [vmem:[#allocation7 + $0x1c4] ss:$16 sps:$4 sm:$0xff]   ;;  %v15476_v38 = vld [vmem:[#allocation7 + $0x1c0] ss:$16 sps:$4 sm:$0xff]   ;;  %v15523_v16 = vld [vmem:[#allocation7 + $0x2c8] ss:$16 sps:$4 sm:$0xff]  }
 0x453   :  { %4972 = vmatpush1.bf16.msra.mxu0 %v15446_v24  ;;  %v15474_v56 = vld [vmem:[#allocation7 + $0x3c4] ss:$16 sps:$4 sm:$0xff]   ;;  %v15477_v28 = vld [vmem:[#allocation7 + $0x3c0] ss:$16 sps:$4 sm:$0xff]   ;;  %v15517_v24 = vld [vmem:[#allocation7 + $0x2e8] ss:$16 sps:$4 sm:$0xff]  }
 0x454   :  { %5023 = vmatpush1.bf16.msra.mxu1 %v15447_v10  ;;  %4973 = vmatprep.subr.bf16.mxu0 %v15448_v5  ;;  %v15478_v53 = vld [vmem:[#allocation7 + $0x1a4] ss:$16 sps:$4 sm:$0xff]   ;;  %v15482_v59 = vld [vmem:[#allocation7 + $0x1a0] ss:$16 sps:$4 sm:$0xff]   ;;  %v15522_v10 = vld [vmem:[#allocation7 + $0xcc] ss:$16 sps:$4 sm:$0xff]  }
 0x455   :  { %5024 = vmatprep.subr.bf16.mxu1 %v15450_v9  ;;  %v15480_v2 = vld [vmem:[#allocation7 + $0x3a4] ss:$16 sps:$4 sm:$0xff]   ;;  %v15483_v14 = vld [vmem:[#allocation7 + $0x3a0] ss:$16 sps:$4 sm:$0xff]   ;;  %v15525_v5 = vld [vmem:[#allocation7 + $0x2cc] ss:$16 sps:$4 sm:$0xff]   ;;  %v17841_v9 = vpack.c.bf16 %v17745_v41, %v17745_v41 }
 0x456   :  { %v15484_v37 = vld [vmem:[#allocation7 + $0x184] ss:$16 sps:$4 sm:$0xff]   ;;  %v15488_v25 = vld [vmem:[#allocation7 + $0x180] ss:$16 sps:$4 sm:$0xff]   ;;  %v15528_v34 = vld [vmem:[#allocation7 + $0xac] ss:$16 sps:$4 sm:$0xff]  }
 0x457   :  { %4974 = vmatpush1.bf16.msra.mxu0 %v15452_v30  ;;  %v15486_v11 = vld [vmem:[#allocation7 + $0x384] ss:$16 sps:$4 sm:$0xff]   ;;  %v15489_v52 = vld [vmem:[#allocation7 + $0x380] ss:$16 sps:$4 sm:$0xff]   ;;  %v15531_v30 = vld [vmem:[#allocation7 + $0x2ac] ss:$16 sps:$4 sm:$0xff]  }
 0x458   :  { %5025 = vmatpush1.bf16.msra.mxu1 %v15453_v29  ;;  %4975 = vmatprep.subr.bf16.mxu0 %v15454_v23  ;;  %v15490_v39 = vld [vmem:[#allocation7 + $0x164] ss:$16 sps:$4 sm:$0xff]   ;;  %v15494_v15 = vld [vmem:[#allocation7 + $0x160] ss:$16 sps:$4 sm:$0xff]   ;;  %v15526_v41 = vld [vmem:[#allocation7 + $0xa8] ss:$16 sps:$4 sm:$0xff]   ;;  %v17857_v23 = vpack.c.bf16 %v17819_v18, %v17819_v18 }
 0x459   :  { %5026 = vmatprep.subr.bf16.mxu1 %v15456_v48  ;;  %v15492_v44 = vld [vmem:[#allocation7 + $0x364] ss:$16 sps:$4 sm:$0xff]   ;;  %v15495_v21 = vld [vmem:[#allocation7 + $0x360] ss:$16 sps:$4 sm:$0xff]   ;;  %v15529_v29 = vld [vmem:[#allocation7 + $0x2a8] ss:$16 sps:$4 sm:$0xff]  }
 0x45a   :  { %v15496_v43 = vld [vmem:[#allocation7 + $0x144] ss:$16 sps:$4 sm:$0xff]   ;;  %v15500_v51 = vld [vmem:[#allocation7 + $0x140] ss:$16 sps:$4 sm:$0xff]   ;;  %v15534_v48 = vld [vmem:[#allocation7 + $0x8c] ss:$16 sps:$4 sm:$0xff]  }
 0x45b   :  { %4976 = vmatpush1.bf16.msra.mxu0 %v15458_v13  ;;  %v15498_v57 = vld [vmem:[#allocation7 + $0x344] ss:$16 sps:$4 sm:$0xff]   ;;  %v15501_v19 = vld [vmem:[#allocation7 + $0x340] ss:$16 sps:$4 sm:$0xff]   ;;  %v15537_v13 = vld [vmem:[#allocation7 + $0x28c] ss:$16 sps:$4 sm:$0xff]  }
 0x45c   :  { %5027 = vmatpush1.bf16.msra.mxu1 %v15459_v0  ;;  %4977 = vmatprep.subr.bf16.mxu0 %v15460_v40  ;;  %v15502_v33 = vld [vmem:[#allocation7 + $0x124] ss:$16 sps:$4 sm:$0xff]   ;;  %v15506_v45 = vld [vmem:[#allocation7 + $0x120] ss:$16 sps:$4 sm:$0xff]   ;;  %v15532_v0 = vld [vmem:[#allocation7 + $0x88] ss:$16 sps:$4 sm:$0xff]  }
 0x45d   :  { %5028 = vmatprep.subr.bf16.mxu1 %v15462_v42  ;;  %v15504_v20 = vld [vmem:[#allocation7 + $0x324] ss:$16 sps:$4 sm:$0xff]   ;;  %v15507_v26 = vld [vmem:[#allocation7 + $0x320] ss:$16 sps:$4 sm:$0xff]   ;;  %v15535_v40 = vld [vmem:[#allocation7 + $0x288] ss:$16 sps:$4 sm:$0xff]  }
 0x45e   :  { %v15508_v49 = vld [vmem:[#allocation7 + $0x104] ss:$16 sps:$4 sm:$0xff]   ;;  %v15512_v47 = vld [vmem:[#allocation7 + $0x100] ss:$16 sps:$4 sm:$0xff]   ;;  %v15540_v50 = vld [vmem:[#allocation7 + $0x6c] ss:$16 sps:$4 sm:$0xff]  }
 0x45f   :  { %4978 = vmatpush1.bf16.msra.mxu0 %v15464_v63  ;;  %v15510_v46 = vld [vmem:[#allocation7 + $0x304] ss:$16 sps:$4 sm:$0xff]   ;;  %v15513_v61 = vld [vmem:[#allocation7 + $0x300] ss:$16 sps:$4 sm:$0xff]   ;;  %v15543_v42 = vld [vmem:[#allocation7 + $0x26c] ss:$16 sps:$4 sm:$0xff]  }
 0x460   :  { %5029 = vmatpush1.bf16.msra.mxu1 %v15465_v55  ;;  %4979 = vmatprep.subr.bf16.mxu0 %v15466_v7  ;;  %v15538_v18 = vld [vmem:[#allocation7 + $0x68] ss:$16 sps:$4 sm:$0xff]   ;;  %v15546_v55 = vld [vmem:[#allocation7 + $0x4c] ss:$16 sps:$4 sm:$0xff]  }
 0x461   :  { %5030 = vmatprep.subr.bf16.mxu1 %v15468_v27  ;;  %v15541_v63 = vld [vmem:[#allocation7 + $0x268] ss:$16 sps:$4 sm:$0xff]   ;;  %v15549_v7 = vld [vmem:[#allocation7 + $0x24c] ss:$16 sps:$4 sm:$0xff]  }
 0x462   :  { %v15544_v27 = vld [vmem:[#allocation7 + $0x48] ss:$16 sps:$4 sm:$0xff]  }
 0x463   :  { %4980 = vmatpush2.bf16.msra.mxu0 %v15470_v58  ;;  %v15547_v58 = vld [vmem:[#allocation7 + $0x248] ss:$16 sps:$4 sm:$0xff]  }
 0x464   :  { %5031 = vmatpush2.bf16.msra.mxu1 %v15471_v12  ;;  %4981 = vmatprep.subr.bf16.mxu0 %v15472_v62  ;;  %v15552_v12 = vld [vmem:[#allocation7 + $0x2c] ss:$16 sps:$4 sm:$0xff]  }
 0x465   :  { %5032 = vmatprep.subr.bf16.mxu1 %v15474_v56  ;;  %v15555_v62 = vld [vmem:[#allocation7 + $0x22c] ss:$16 sps:$4 sm:$0xff]   ;;  %v15550_v56 = vld [vmem:[#allocation7 + $0x28] ss:$16 sps:$4 sm:$0xff]  }
 0x467   :  { %4982 = vmatpush2.bf16.msra.mxu0 %v15476_v38  ;;  %v15553_v38 = vld [vmem:[#allocation7 + $0x228] ss:$16 sps:$4 sm:$0xff]  }
 0x468   :  { %5033 = vmatpush2.bf16.msra.mxu1 %v15477_v28  ;;  %4983 = vmatprep.subr.bf16.mxu0 %v15478_v53  ;;  %v15558_v28 = vld [vmem:[#allocation7 + $0xc] ss:$16 sps:$4 sm:$0xff]  }
 0x469   :  { %5034 = vmatprep.subr.bf16.mxu1 %v15480_v2  ;;  %v15561_v53 = vld [vmem:[#allocation7 + $0x20c] ss:$16 sps:$4 sm:$0xff]   ;;  %v15556_v2 = vld [vmem:[#allocation7 + $0x8] ss:$16 sps:$4 sm:$0xff]  }
 0x46b   :  { %4984 = vmatpush2.bf16.msra.mxu0 %v15482_v59  ;;  %v15559_v59 = vld [vmem:[#allocation7 + $0x208] ss:$16 sps:$4 sm:$0xff]  }
 0x46c   :  { %5035 = vmatpush2.bf16.msra.mxu1 %v15483_v14  ;;  %4985 = vmatprep.subr.bf16.mxu0 %v15484_v37  ;;  %v15564_v14 = vld [vmem:[#allocation7 + $0x1ec] ss:$16 sps:$4 sm:$0xff]  }
 0x46d   :  { %5036 = vmatprep.subr.bf16.mxu1 %v15486_v11  ;;  %v15567_v37 = vld [vmem:[#allocation7 + $0x3ec] ss:$16 sps:$4 sm:$0xff]   ;;  %v15562_v11 = vld [vmem:[#allocation7 + $0x1e8] ss:$16 sps:$4 sm:$0xff]  }
 0x46f   :  { %4986 = vmatpush2.bf16.msra.mxu0 %v15488_v25  ;;  %v15565_v25 = vld [vmem:[#allocation7 + $0x3e8] ss:$16 sps:$4 sm:$0xff]  }
 0x470   :  { %5037 = vmatpush2.bf16.msra.mxu1 %v15489_v52  ;;  %4987 = vmatprep.subr.bf16.mxu0 %v15490_v39  ;;  %v15570_v52 = vld [vmem:[#allocation7 + $0x1cc] ss:$16 sps:$4 sm:$0xff]  }
 0x471   :  { %5038 = vmatprep.subr.bf16.mxu1 %v15492_v44  ;;  %v15573_v39 = vld [vmem:[#allocation7 + $0x3cc] ss:$16 sps:$4 sm:$0xff]   ;;  %v15568_v44 = vld [vmem:[#allocation7 + $0x1c8] ss:$16 sps:$4 sm:$0xff]  }
 0x473   :  { %4988 = vmatpush2.bf16.msra.mxu0 %v15494_v15  ;;  %v15571_v15 = vld [vmem:[#allocation7 + $0x3c8] ss:$16 sps:$4 sm:$0xff]  }
 0x474   :  { %5039 = vmatpush2.bf16.msra.mxu1 %v15495_v21  ;;  %4989 = vmatprep.subr.bf16.mxu0 %v15496_v43  ;;  %v15576_v21 = vld [vmem:[#allocation7 + $0x1ac] ss:$16 sps:$4 sm:$0xff]  }
 0x475   :  { %5040 = vmatprep.subr.bf16.mxu1 %v15498_v57  ;;  %v15579_v43 = vld [vmem:[#allocation7 + $0x3ac] ss:$16 sps:$4 sm:$0xff]   ;;  %v15574_v57 = vld [vmem:[#allocation7 + $0x1a8] ss:$16 sps:$4 sm:$0xff]  }
 0x477   :  { %4990 = vmatpush2.bf16.msra.mxu0 %v15500_v51  ;;  %v15577_v51 = vld [vmem:[#allocation7 + $0x3a8] ss:$16 sps:$4 sm:$0xff]  }
 0x478   :  { %5041 = vmatpush2.bf16.msra.mxu1 %v15501_v19  ;;  %4991 = vmatprep.subr.bf16.mxu0 %v15502_v33  ;;  %v15582_v19 = vld [vmem:[#allocation7 + $0x18c] ss:$16 sps:$4 sm:$0xff]  }
 0x479   :  { %5042 = vmatprep.subr.bf16.mxu1 %v15504_v20  ;;  %v15585_v33 = vld [vmem:[#allocation7 + $0x38c] ss:$16 sps:$4 sm:$0xff]   ;;  %v15580_v20 = vld [vmem:[#allocation7 + $0x188] ss:$16 sps:$4 sm:$0xff]  }
 0x47b   :  { %4992 = vmatpush2.bf16.msra.mxu0 %v15506_v45  ;;  %v15583_v45 = vld [vmem:[#allocation7 + $0x388] ss:$16 sps:$4 sm:$0xff]  }
 0x47c   :  { %5043 = vmatpush2.bf16.msra.mxu1 %v15507_v26  ;;  %4993 = vmatprep.subr.bf16.mxu0 %v15508_v49  ;;  %v15588_v26 = vld [vmem:[#allocation7 + $0x16c] ss:$16 sps:$4 sm:$0xff]  }
 0x47d   :  { %5044 = vmatprep.subr.bf16.mxu1 %v15510_v46  ;;  %v15591_v49 = vld [vmem:[#allocation7 + $0x36c] ss:$16 sps:$4 sm:$0xff]   ;;  %v15586_v46 = vld [vmem:[#allocation7 + $0x168] ss:$16 sps:$4 sm:$0xff]  }
 0x47f   :  { %4994 = vmatpush2.bf16.msra.mxu0 %v15512_v47  ;;  %v15589_v47 = vld [vmem:[#allocation7 + $0x368] ss:$16 sps:$4 sm:$0xff]  }
 0x480   :  { %5045 = vmatpush2.bf16.msra.mxu1 %v15513_v61  ;;  %5065 = vmatprep.subr.bf16.mxu0 %v15516_v22  ;;  %v15594_v61 = vld [vmem:[#allocation7 + $0x14c] ss:$16 sps:$4 sm:$0xff]  }
 0x481   :  { %5116 = vmatprep.subr.bf16.mxu1 %v15519_v54  ;;  %v15597_v22 = vld [vmem:[#allocation7 + $0x34c] ss:$16 sps:$4 sm:$0xff]   ;;  %v15592_v54 = vld [vmem:[#allocation7 + $0x148] ss:$16 sps:$4 sm:$0xff]  }
 0x482   :  { %4996 = vmatmul.mubr.bf16.vlgmr.msra.gmra.mxu0 %v17833_v60 }
 0x483   :  { %5047 = vmatmul.mubr.bf16.vlgmr.msra.gmra.mxu1 %v17837_v6  ;;  %5066 = vmatpush1.bf16.msra.mxu0 %v15514_v8  ;;  %v15595_v8 = vld [vmem:[#allocation7 + $0x348] ss:$16 sps:$4 sm:$0xff]  }
 0x484   :  { %5117 = vmatpush1.bf16.msra.mxu1 %v15517_v24  ;;  %5067 = vmatprep.subr.bf16.mxu0 %v15522_v10  ;;  %v15600_v24 = vld [vmem:[#allocation7 + $0x12c] ss:$16 sps:$4 sm:$0xff]  }
 0x485   :  { %5118 = vmatprep.subr.bf16.mxu1 %v15525_v5  ;;  %5005 = vmatprep.mubr.bf16.mxu0 %v17841_v9  ;;  %v15603_v10 = vld [vmem:[#allocation7 + $0x32c] ss:$16 sps:$4 sm:$0xff]   ;;  %v15598_v5 = vld [vmem:[#allocation7 + $0x128] ss:$16 sps:$4 sm:$0xff]  }
 0x486   :  { %5056 = vmatprep.mubr.bf16.mxu1 %v17845_v3 }
 0x487   :  { %5068 = vmatpush1.bf16.msra.mxu0 %v15520_v36  ;;  %v15601_v36 = vld [vmem:[#allocation7 + $0x328] ss:$16 sps:$4 sm:$0xff]  }
 0x488   :  { %5119 = vmatpush1.bf16.msra.mxu1 %v15523_v16  ;;  %5069 = vmatprep.subr.bf16.mxu0 %v15528_v34  ;;  %v15606_v16 = vld [vmem:[#allocation7 + $0x10c] ss:$16 sps:$4 sm:$0xff]  }
 0x489   :  { %5120 = vmatprep.subr.bf16.mxu1 %v15531_v30  ;;  %v15609_v34 = vld [vmem:[#allocation7 + $0x30c] ss:$16 sps:$4 sm:$0xff]   ;;  %v15604_v30 = vld [vmem:[#allocation7 + $0x108] ss:$16 sps:$4 sm:$0xff]  }
 0x48a   :  { %5006 = vmatmul.mubr.bf16.gmra.mxu0 %v17853_v1 }
 0x48b   :  { %5057 = vmatmul.mubr.bf16.gmra.mxu1 %v17857_v23  ;;  %5070 = vmatpush1.bf16.msra.mxu0 %v15526_v41  ;;  %v15607_v41 = vld [vmem:[#allocation7 + $0x308] ss:$16 sps:$4 sm:$0xff]  }
 0x48c   :  { %5121 = vmatpush1.bf16.msra.mxu1 %v15529_v29  ;;  %5071 = vmatprep.subr.bf16.mxu0 %v15534_v48  ;;  %v15612_v29 = vld [vmem:[#allocation7 + $0x4e4] ss:$16 sps:$4 sm:$0xff]  }
 0x48d   :  { %5122 = vmatprep.subr.bf16.mxu1 %v15537_v13  ;;  %5097 = vmatprep.mubr.bf16.mxu0 %v17825_v4  ;;  %v15615_v48 = vld [vmem:[#allocation7 + $0x6e4] ss:$16 sps:$4 sm:$0xff]   ;;  %v15610_v13 = vld [vmem:[#allocation7 + $0x4e0] ss:$16 sps:$4 sm:$0xff]  }
 0x48e   :  { %5148 = vmatprep.mubr.bf16.mxu1 %v17827_v17 }
 0x48f   :  { %5072 = vmatpush1.bf16.msra.mxu0 %v15532_v0  ;;  %v15613_v0 = vld [vmem:[#allocation7 + $0x6e0] ss:$16 sps:$4 sm:$0xff]  }
 0x490   :  { %5123 = vmatpush1.bf16.msra.mxu1 %v15535_v40  ;;  %5073 = vmatprep.subr.bf16.mxu0 %v15540_v50  ;;  %v15618_v40 = vld [vmem:[#allocation7 + $0x4c4] ss:$16 sps:$4 sm:$0xff]  }
 0x491   :  { %5124 = vmatprep.subr.bf16.mxu1 %v15543_v42  ;;  %v15621_v50 = vld [vmem:[#allocation7 + $0x6c4] ss:$16 sps:$4 sm:$0xff]   ;;  %v15616_v42 = vld [vmem:[#allocation7 + $0x4c0] ss:$16 sps:$4 sm:$0xff]  }
 0x493   :  { %5074 = vmatpush1.bf16.msra.mxu0 %v15538_v18  ;;  %v15619_v18 = vld [vmem:[#allocation7 + $0x6c0] ss:$16 sps:$4 sm:$0xff]  }
 0x494   :  { %5125 = vmatpush1.bf16.msra.mxu1 %v15541_v63  ;;  %5075 = vmatprep.subr.bf16.mxu0 %v15546_v55  ;;  %v15624_v63 = vld [vmem:[#allocation7 + $0x4a4] ss:$16 sps:$4 sm:$0xff]  }
 0x495   :  { %5126 = vmatprep.subr.bf16.mxu1 %v15549_v7  ;;  %v15627_v55 = vld [vmem:[#allocation7 + $0x6a4] ss:$16 sps:$4 sm:$0xff]   ;;  %v15622_v7 = vld [vmem:[#allocation7 + $0x4a0] ss:$16 sps:$4 sm:$0xff]  }
 0x497   :  { %5076 = vmatpush1.bf16.msra.mxu0 %v15544_v27  ;;  %v15625_v27 = vld [vmem:[#allocation7 + $0x6a0] ss:$16 sps:$4 sm:$0xff]  }
 0x498   :  { %5127 = vmatpush1.bf16.msra.mxu1 %v15547_v58  ;;  %5077 = vmatprep.subr.bf16.mxu0 %v15552_v12  ;;  %v15630_v58 = vld [vmem:[#allocation7 + $0x484] ss:$16 sps:$4 sm:$0xff]  }
 0x499   :  { %5128 = vmatprep.subr.bf16.mxu1 %v15555_v62  ;;  %v15633_v12 = vld [vmem:[#allocation7 + $0x684] ss:$16 sps:$4 sm:$0xff]   ;;  %v15628_v62 = vld [vmem:[#allocation7 + $0x480] ss:$16 sps:$4 sm:$0xff]  }
 0x49b   :  { %5078 = vmatpush1.bf16.msra.mxu0 %v15550_v56  ;;  %v15631_v56 = vld [vmem:[#allocation7 + $0x680] ss:$16 sps:$4 sm:$0xff]  }
 0x49c   :  { %5129 = vmatpush1.bf16.msra.mxu1 %v15553_v38  ;;  %5079 = vmatprep.subr.bf16.mxu0 %v15558_v28  ;;  %v15636_v38 = vld [vmem:[#allocation7 + $0x464] ss:$16 sps:$4 sm:$0xff]  }
 0x49d   :  { %5130 = vmatprep.subr.bf16.mxu1 %v15561_v53  ;;  %v15639_v28 = vld [vmem:[#allocation7 + $0x664] ss:$16 sps:$4 sm:$0xff]   ;;  %v15634_v53 = vld [vmem:[#allocation7 + $0x460] ss:$16 sps:$4 sm:$0xff]  }
 0x49f   :  { %5080 = vmatpush1.bf16.msra.mxu0 %v15556_v2  ;;  %v15637_v2 = vld [vmem:[#allocation7 + $0x660] ss:$16 sps:$4 sm:$0xff]  }
 0x4a0   :  { %5131 = vmatpush1.bf16.msra.mxu1 %v15559_v59  ;;  %5081 = vmatprep.subr.bf16.mxu0 %v15564_v14  ;;  %v15642_v59 = vld [vmem:[#allocation7 + $0x444] ss:$16 sps:$4 sm:$0xff]  }
 0x4a1   :  { %5132 = vmatprep.subr.bf16.mxu1 %v15567_v37  ;;  %v15645_v14 = vld [vmem:[#allocation7 + $0x644] ss:$16 sps:$4 sm:$0xff]   ;;  %v15640_v37 = vld [vmem:[#allocation7 + $0x440] ss:$16 sps:$4 sm:$0xff]  }
 0x4a3   :  { %5082 = vmatpush2.bf16.msra.mxu0 %v15562_v11  ;;  %v15643_v11 = vld [vmem:[#allocation7 + $0x640] ss:$16 sps:$4 sm:$0xff]  }
 0x4a4   :  { %5133 = vmatpush2.bf16.msra.mxu1 %v15565_v25  ;;  %5083 = vmatprep.subr.bf16.mxu0 %v15570_v52  ;;  %v15648_v25 = vld [vmem:[#allocation7 + $0x424] ss:$16 sps:$4 sm:$0xff]  }
 0x4a5   :  { %5134 = vmatprep.subr.bf16.mxu1 %v15573_v39  ;;  %v15651_v52 = vld [vmem:[#allocation7 + $0x624] ss:$16 sps:$4 sm:$0xff]   ;;  %v15646_v39 = vld [vmem:[#allocation7 + $0x420] ss:$16 sps:$4 sm:$0xff]  }
 0x4a7   :  { %5084 = vmatpush2.bf16.msra.mxu0 %v15568_v44  ;;  %v15649_v44 = vld [vmem:[#allocation7 + $0x620] ss:$16 sps:$4 sm:$0xff]  }
 0x4a8   :  { %5135 = vmatpush2.bf16.msra.mxu1 %v15571_v15  ;;  %5085 = vmatprep.subr.bf16.mxu0 %v15576_v21  ;;  %v15654_v15 = vld [vmem:[#allocation7 + $0x404] ss:$16 sps:$4 sm:$0xff]  }
 0x4a9   :  { %5136 = vmatprep.subr.bf16.mxu1 %v15579_v43  ;;  %v15657_v21 = vld [vmem:[#allocation7 + $0x604] ss:$16 sps:$4 sm:$0xff]   ;;  %v15652_v43 = vld [vmem:[#allocation7 + $0x400] ss:$16 sps:$4 sm:$0xff]  }
 0x4ab   :  { %5086 = vmatpush2.bf16.msra.mxu0 %v15574_v57  ;;  %v15655_v57 = vld [vmem:[#allocation7 + $0x600] ss:$16 sps:$4 sm:$0xff]  }
 0x4ac   :  { %5137 = vmatpush2.bf16.msra.mxu1 %v15577_v51  ;;  %5087 = vmatprep.subr.bf16.mxu0 %v15582_v19  ;;  %v15660_v51 = vld [vmem:[#allocation7 + $0x5e4] ss:$16 sps:$4 sm:$0xff]  }
 0x4ad   :  { %5138 = vmatprep.subr.bf16.mxu1 %v15585_v33  ;;  %v15663_v19 = vld [vmem:[#allocation7 + $0x7e4] ss:$16 sps:$4 sm:$0xff]   ;;  %v15658_v33 = vld [vmem:[#allocation7 + $0x5e0] ss:$16 sps:$4 sm:$0xff]  }
 0x4af   :  { %5088 = vmatpush2.bf16.msra.mxu0 %v15580_v20  ;;  %v15661_v20 = vld [vmem:[#allocation7 + $0x7e0] ss:$16 sps:$4 sm:$0xff]  }
 0x4b0   :  { %5139 = vmatpush2.bf16.msra.mxu1 %v15583_v45  ;;  %5089 = vmatprep.subr.bf16.mxu0 %v15588_v26  ;;  %v15666_v45 = vld [vmem:[#allocation7 + $0x5c4] ss:$16 sps:$4 sm:$0xff]  }
 0x4b1   :  { %5140 = vmatprep.subr.bf16.mxu1 %v15591_v49  ;;  %v15669_v26 = vld [vmem:[#allocation7 + $0x7c4] ss:$16 sps:$4 sm:$0xff]   ;;  %v15664_v49 = vld [vmem:[#allocation7 + $0x5c0] ss:$16 sps:$4 sm:$0xff]  }
 0x4b3   :  { %5090 = vmatpush2.bf16.msra.mxu0 %v15586_v46  ;;  %v15667_v46 = vld [vmem:[#allocation7 + $0x7c0] ss:$16 sps:$4 sm:$0xff]  }
 0x4b4   :  { %5141 = vmatpush2.bf16.msra.mxu1 %v15589_v47  ;;  %5091 = vmatprep.subr.bf16.mxu0 %v15594_v61  ;;  %v15672_v47 = vld [vmem:[#allocation7 + $0x5a4] ss:$16 sps:$4 sm:$0xff]  }
 0x4b5   :  { %5142 = vmatprep.subr.bf16.mxu1 %v15597_v22  ;;  %v15675_v61 = vld [vmem:[#allocation7 + $0x7a4] ss:$16 sps:$4 sm:$0xff]   ;;  %v15670_v22 = vld [vmem:[#allocation7 + $0x5a0] ss:$16 sps:$4 sm:$0xff]  }
 0x4b7   :  { %5092 = vmatpush2.bf16.msra.mxu0 %v15592_v54  ;;  %v15673_v54 = vld [vmem:[#allocation7 + $0x7a0] ss:$16 sps:$4 sm:$0xff]  }
 0x4b8   :  { %5143 = vmatpush2.bf16.msra.mxu1 %v15595_v8  ;;  %5093 = vmatprep.subr.bf16.mxu0 %v15600_v24  ;;  %v15678_v8 = vld [vmem:[#allocation7 + $0x584] ss:$16 sps:$4 sm:$0xff]  }
 0x4b9   :  { %5144 = vmatprep.subr.bf16.mxu1 %v15603_v10  ;;  %v15681_v24 = vld [vmem:[#allocation7 + $0x784] ss:$16 sps:$4 sm:$0xff]   ;;  %v15676_v10 = vld [vmem:[#allocation7 + $0x580] ss:$16 sps:$4 sm:$0xff]  }
 0x4bb   :  { %5094 = vmatpush2.bf16.msra.mxu0 %v15598_v5  ;;  %v15679_v5 = vld [vmem:[#allocation7 + $0x780] ss:$16 sps:$4 sm:$0xff]  }
 0x4bc   :  { %5145 = vmatpush2.bf16.msra.mxu1 %v15601_v36  ;;  %5095 = vmatprep.subr.bf16.mxu0 %v15606_v16  ;;  %v15684_v36 = vld [vmem:[#allocation7 + $0x564] ss:$16 sps:$4 sm:$0xff]  }
 0x4bd   :  { %5146 = vmatprep.subr.bf16.mxu1 %v15609_v34  ;;  %v15687_v16 = vld [vmem:[#allocation7 + $0x764] ss:$16 sps:$4 sm:$0xff]   ;;  %v15682_v34 = vld [vmem:[#allocation7 + $0x560] ss:$16 sps:$4 sm:$0xff]  }
 0x4bf   :  { %5096 = vmatpush2.bf16.msra.mxu0 %v15604_v30  ;;  %v15685_v30 = vld [vmem:[#allocation7 + $0x760] ss:$16 sps:$4 sm:$0xff]  }
 0x4c0   :  { %5147 = vmatpush2.bf16.msra.mxu1 %v15607_v41  ;;  %5936 = vmatprep.subr.bf16.mxu0 %v15612_v29  ;;  %v15690_v41 = vld [vmem:[#allocation7 + $0x544] ss:$16 sps:$4 sm:$0xff]  }
 0x4c1   :  { %5987 = vmatprep.subr.bf16.mxu1 %v15615_v48  ;;  %v15693_v29 = vld [vmem:[#allocation7 + $0x744] ss:$16 sps:$4 sm:$0xff]   ;;  %v15688_v48 = vld [vmem:[#allocation7 + $0x540] ss:$16 sps:$4 sm:$0xff]  }
 0x4c2   :  { %5098 = vmatmul.mubr.bf16.vlgmr.msra.gmra.mxu0 %v17833_v60 }
 0x4c3   :  { %5149 = vmatmul.mubr.bf16.vlgmr.msra.gmra.mxu1 %v17837_v6  ;;  %5937 = vmatpush1.bf16.msra.mxu0 %v15610_v13  ;;  %v15691_v13 = vld [vmem:[#allocation7 + $0x740] ss:$16 sps:$4 sm:$0xff]  }
 0x4c4   :  { %5988 = vmatpush1.bf16.msra.mxu1 %v15613_v0  ;;  %5938 = vmatprep.subr.bf16.mxu0 %v15618_v40  ;;  %v15696_v0 = vld [vmem:[#allocation7 + $0x524] ss:$16 sps:$4 sm:$0xff]  }
 0x4c5   :  { %5989 = vmatprep.subr.bf16.mxu1 %v15621_v50  ;;  %5107 = vmatprep.mubr.bf16.mxu0 %v17841_v9  ;;  %v15699_v40 = vld [vmem:[#allocation7 + $0x724] ss:$16 sps:$4 sm:$0xff]   ;;  %v15694_v50 = vld [vmem:[#allocation7 + $0x520] ss:$16 sps:$4 sm:$0xff]  }
 0x4c6   :  { %5158 = vmatprep.mubr.bf16.mxu1 %v17845_v3 }
 0x4c7   :  { %5939 = vmatpush1.bf16.msra.mxu0 %v15616_v42  ;;  %v15697_v42 = vld [vmem:[#allocation7 + $0x720] ss:$16 sps:$4 sm:$0xff]  }
 0x4c8   :  { %5990 = vmatpush1.bf16.msra.mxu1 %v15619_v18  ;;  %5940 = vmatprep.subr.bf16.mxu0 %v15624_v63  ;;  %v15702_v18 = vld [vmem:[#allocation7 + $0x504] ss:$16 sps:$4 sm:$0xff]  }
 0x4c9   :  { %5991 = vmatprep.subr.bf16.mxu1 %v15627_v55  ;;  %v15705_v63 = vld [vmem:[#allocation7 + $0x704] ss:$16 sps:$4 sm:$0xff]   ;;  %v15700_v55 = vld [vmem:[#allocation7 + $0x500] ss:$16 sps:$4 sm:$0xff]  }
 0x4ca   :  { %5108 = vmatmul.mubr.bf16.gmra.mxu0 %v17853_v1 }
 0x4cb   :  { %5159 = vmatmul.mubr.bf16.gmra.mxu1 %v17857_v23  ;;  %5941 = vmatpush1.bf16.msra.mxu0 %v15622_v7  ;;  %v15703_v7 = vld [vmem:[#allocation7 + $0x700] ss:$16 sps:$4 sm:$0xff]  }
 0x4cc   :  { %5992 = vmatpush1.bf16.msra.mxu1 %v15625_v27  ;;  %5942 = vmatprep.subr.bf16.mxu0 %v15630_v58  ;;  %v15708_v27 = vld [vmem:[#allocation7 + $0x4ec] ss:$16 sps:$4 sm:$0xff]  }
 0x4cd   :  { %5993 = vmatprep.subr.bf16.mxu1 %v15633_v12  ;;  %5968 = vmatprep.mubr.bf16.mxu0 %v17825_v4  ;;  %v15711_v58 = vld [vmem:[#allocation7 + $0x6ec] ss:$16 sps:$4 sm:$0xff]   ;;  %v15706_v12 = vld [vmem:[#allocation7 + $0x4e8] ss:$16 sps:$4 sm:$0xff]  }
 0x4ce   :  { %6019 = vmatprep.mubr.bf16.mxu1 %v17827_v17 }
 0x4cf   :  { %5943 = vmatpush1.bf16.msra.mxu0 %v15628_v62  ;;  %v15709_v62 = vld [vmem:[#allocation7 + $0x6e8] ss:$16 sps:$4 sm:$0xff]  }
 0x4d0   :  { %5994 = vmatpush1.bf16.msra.mxu1 %v15631_v56  ;;  %5944 = vmatprep.subr.bf16.mxu0 %v15636_v38  ;;  %v15714_v56 = vld [vmem:[#allocation7 + $0x4cc] ss:$16 sps:$4 sm:$0xff]  }
 0x4d1   :  { %5995 = vmatprep.subr.bf16.mxu1 %v15639_v28  ;;  %v15717_v38 = vld [vmem:[#allocation7 + $0x6cc] ss:$16 sps:$4 sm:$0xff]   ;;  %v15712_v28 = vld [vmem:[#allocation7 + $0x4c8] ss:$16 sps:$4 sm:$0xff]  }
 0x4d3   :  { %5945 = vmatpush1.bf16.msra.mxu0 %v15634_v53  ;;  %v15715_v53 = vld [vmem:[#allocation7 + $0x6c8] ss:$16 sps:$4 sm:$0xff]  }
 0x4d4   :  { %5996 = vmatpush1.bf16.msra.mxu1 %v15637_v2  ;;  %5946 = vmatprep.subr.bf16.mxu0 %v15642_v59  ;;  %v15720_v2 = vld [vmem:[#allocation7 + $0x4ac] ss:$16 sps:$4 sm:$0xff]  }
 0x4d5   :  { %5997 = vmatprep.subr.bf16.mxu1 %v15645_v14  ;;  %v15723_v59 = vld [vmem:[#allocation7 + $0x6ac] ss:$16 sps:$4 sm:$0xff]   ;;  %v15718_v14 = vld [vmem:[#allocation7 + $0x4a8] ss:$16 sps:$4 sm:$0xff]  }
 0x4d7   :  { %5947 = vmatpush1.bf16.msra.mxu0 %v15640_v37  ;;  %v15721_v37 = vld [vmem:[#allocation7 + $0x6a8] ss:$16 sps:$4 sm:$0xff]  }
 0x4d8   :  { %5998 = vmatpush1.bf16.msra.mxu1 %v15643_v11  ;;  %5948 = vmatprep.subr.bf16.mxu0 %v15648_v25  ;;  %v15726_v11 = vld [vmem:[#allocation7 + $0x48c] ss:$16 sps:$4 sm:$0xff]  }
 0x4d9   :  { %5999 = vmatprep.subr.bf16.mxu1 %v15651_v52  ;;  %v15729_v25 = vld [vmem:[#allocation7 + $0x68c] ss:$16 sps:$4 sm:$0xff]   ;;  %v15724_v52 = vld [vmem:[#allocation7 + $0x488] ss:$16 sps:$4 sm:$0xff]  }
 0x4db   :  { %5949 = vmatpush1.bf16.msra.mxu0 %v15646_v39  ;;  %v15727_v39 = vld [vmem:[#allocation7 + $0x688] ss:$16 sps:$4 sm:$0xff]  }
 0x4dc   :  { %6000 = vmatpush1.bf16.msra.mxu1 %v15649_v44  ;;  %5950 = vmatprep.subr.bf16.mxu0 %v15654_v15  ;;  %v15732_v44 = vld [vmem:[#allocation7 + $0x46c] ss:$16 sps:$4 sm:$0xff]  }
 0x4dd   :  { %6001 = vmatprep.subr.bf16.mxu1 %v15657_v21  ;;  %v15735_v15 = vld [vmem:[#allocation7 + $0x66c] ss:$16 sps:$4 sm:$0xff]   ;;  %v15730_v21 = vld [vmem:[#allocation7 + $0x468] ss:$16 sps:$4 sm:$0xff]  }
 0x4df   :  { %5951 = vmatpush1.bf16.msra.mxu0 %v15652_v43  ;;  %v15733_v43 = vld [vmem:[#allocation7 + $0x668] ss:$16 sps:$4 sm:$0xff]  }
 0x4e0   :  { %6002 = vmatpush1.bf16.msra.mxu1 %v15655_v57  ;;  %5952 = vmatprep.subr.bf16.mxu0 %v15660_v51  ;;  %v15738_v57 = vld [vmem:[#allocation7 + $0x44c] ss:$16 sps:$4 sm:$0xff]  }
 0x4e1   :  { %6003 = vmatprep.subr.bf16.mxu1 %v15663_v19  ;;  %v15741_v51 = vld [vmem:[#allocation7 + $0x64c] ss:$16 sps:$4 sm:$0xff]   ;;  %v15736_v19 = vld [vmem:[#allocation7 + $0x448] ss:$16 sps:$4 sm:$0xff]  }
 0x4e3   :  { %5953 = vmatpush2.bf16.msra.mxu0 %v15658_v33  ;;  %v15739_v33 = vld [vmem:[#allocation7 + $0x648] ss:$16 sps:$4 sm:$0xff]  }
 0x4e4   :  { %6004 = vmatpush2.bf16.msra.mxu1 %v15661_v20  ;;  %5954 = vmatprep.subr.bf16.mxu0 %v15666_v45  ;;  %v15744_v20 = vld [vmem:[#allocation7 + $0x42c] ss:$16 sps:$4 sm:$0xff]  }
 0x4e5   :  { %6005 = vmatprep.subr.bf16.mxu1 %v15669_v26  ;;  %v15747_v45 = vld [vmem:[#allocation7 + $0x62c] ss:$16 sps:$4 sm:$0xff]   ;;  %v15742_v26 = vld [vmem:[#allocation7 + $0x428] ss:$16 sps:$4 sm:$0xff]  }
 0x4e7   :  { %5955 = vmatpush2.bf16.msra.mxu0 %v15664_v49  ;;  %v15745_v49 = vld [vmem:[#allocation7 + $0x628] ss:$16 sps:$4 sm:$0xff]  }
 0x4e8   :  { %6006 = vmatpush2.bf16.msra.mxu1 %v15667_v46  ;;  %5956 = vmatprep.subr.bf16.mxu0 %v15672_v47  ;;  %v15750_v46 = vld [vmem:[#allocation7 + $0x40c] ss:$16 sps:$4 sm:$0xff]  }
 0x4e9   :  { %6007 = vmatprep.subr.bf16.mxu1 %v15675_v61  ;;  %v15753_v47 = vld [vmem:[#allocation7 + $0x60c] ss:$16 sps:$4 sm:$0xff]   ;;  %v15748_v61 = vld [vmem:[#allocation7 + $0x408] ss:$16 sps:$4 sm:$0xff]  }
 0x4eb   :  { %5957 = vmatpush2.bf16.msra.mxu0 %v15670_v22  ;;  %v15751_v22 = vld [vmem:[#allocation7 + $0x608] ss:$16 sps:$4 sm:$0xff]  }
 0x4ec   :  { %6008 = vmatpush2.bf16.msra.mxu1 %v15673_v54  ;;  %5958 = vmatprep.subr.bf16.mxu0 %v15678_v8  ;;  %v15756_v54 = vld [vmem:[#allocation7 + $0x5ec] ss:$16 sps:$4 sm:$0xff]  }
 0x4ed   :  { %6009 = vmatprep.subr.bf16.mxu1 %v15681_v24  ;;  %v15759_v8 = vld [vmem:[#allocation7 + $0x7ec] ss:$16 sps:$4 sm:$0xff]   ;;  %v15754_v24 = vld [vmem:[#allocation7 + $0x5e8] ss:$16 sps:$4 sm:$0xff]  }
 0x4ef   :  { %5959 = vmatpush2.bf16.msra.mxu0 %v15676_v10  ;;  %v15757_v10 = vld [vmem:[#allocation7 + $0x7e8] ss:$16 sps:$4 sm:$0xff]  }
 0x4f0   :  { %6010 = vmatpush2.bf16.msra.mxu1 %v15679_v5  ;;  %5960 = vmatprep.subr.bf16.mxu0 %v15684_v36  ;;  %v15762_v5 = vld [vmem:[#allocation7 + $0x5cc] ss:$16 sps:$4 sm:$0xff]  }
 0x4f1   :  { %6011 = vmatprep.subr.bf16.mxu1 %v15687_v16  ;;  %v15765_v36 = vld [vmem:[#allocation7 + $0x7cc] ss:$16 sps:$4 sm:$0xff]   ;;  %v15760_v16 = vld [vmem:[#allocation7 + $0x5c8] ss:$16 sps:$4 sm:$0xff]  }
 0x4f3   :  { %5961 = vmatpush2.bf16.msra.mxu0 %v15682_v34  ;;  %v15763_v34 = vld [vmem:[#allocation7 + $0x7c8] ss:$16 sps:$4 sm:$0xff]  }
 0x4f4   :  { %6012 = vmatpush2.bf16.msra.mxu1 %v15685_v30  ;;  %5962 = vmatprep.subr.bf16.mxu0 %v15690_v41  ;;  %v15768_v30 = vld [vmem:[#allocation7 + $0x5ac] ss:$16 sps:$4 sm:$0xff]  }
 0x4f5   :  { %6013 = vmatprep.subr.bf16.mxu1 %v15693_v29  ;;  %v15771_v41 = vld [vmem:[#allocation7 + $0x7ac] ss:$16 sps:$4 sm:$0xff]   ;;  %v15766_v29 = vld [vmem:[#allocation7 + $0x5a8] ss:$16 sps:$4 sm:$0xff]  }
 0x4f7   :  { %5963 = vmatpush2.bf16.msra.mxu0 %v15688_v48  ;;  %v15769_v48 = vld [vmem:[#allocation7 + $0x7a8] ss:$16 sps:$4 sm:$0xff]  }
 0x4f8   :  { %6014 = vmatpush2.bf16.msra.mxu1 %v15691_v13  ;;  %5964 = vmatprep.subr.bf16.mxu0 %v15696_v0  ;;  %v15774_v13 = vld [vmem:[#allocation7 + $0x58c] ss:$16 sps:$4 sm:$0xff]  }
 0x4f9   :  { %6015 = vmatprep.subr.bf16.mxu1 %v15699_v40  ;;  %v15777_v0 = vld [vmem:[#allocation7 + $0x78c] ss:$16 sps:$4 sm:$0xff]   ;;  %v15772_v40 = vld [vmem:[#allocation7 + $0x588] ss:$16 sps:$4 sm:$0xff]  }
 0x4fb   :  { %5965 = vmatpush2.bf16.msra.mxu0 %v15694_v50  ;;  %v15775_v50 = vld [vmem:[#allocation7 + $0x788] ss:$16 sps:$4 sm:$0xff]  }
 0x4fc   :  { %6016 = vmatpush2.bf16.msra.mxu1 %v15697_v42  ;;  %5966 = vmatprep.subr.bf16.mxu0 %v15702_v18  ;;  %v15780_v42 = vld [vmem:[#allocation7 + $0x56c] ss:$16 sps:$4 sm:$0xff]  }
 0x4fd   :  { %6017 = vmatprep.subr.bf16.mxu1 %v15705_v63  ;;  %v15783_v18 = vld [vmem:[#allocation7 + $0x76c] ss:$16 sps:$4 sm:$0xff]   ;;  %v15778_v63 = vld [vmem:[#allocation7 + $0x568] ss:$16 sps:$4 sm:$0xff]  }
 0x4ff   :  { %5967 = vmatpush2.bf16.msra.mxu0 %v15700_v55  ;;  %v15781_v55 = vld [vmem:[#allocation7 + $0x768] ss:$16 sps:$4 sm:$0xff]  }
 0x500   :  { %6018 = vmatpush2.bf16.msra.mxu1 %v15703_v7  ;;  %6038 = vmatprep.subr.bf16.mxu0 %v15708_v27  ;;  %v15786_v7 = vld [vmem:[#allocation7 + $0x54c] ss:$16 sps:$4 sm:$0xff]  }
 0x501   :  { %6089 = vmatprep.subr.bf16.mxu1 %v15711_v58  ;;  %v15789_v27 = vld [vmem:[#allocation7 + $0x74c] ss:$16 sps:$4 sm:$0xff]   ;;  %v15784_v58 = vld [vmem:[#allocation7 + $0x548] ss:$16 sps:$4 sm:$0xff]  }
 0x502   :  { %5969 = vmatmul.mubr.bf16.vlgmr.msra.gmra.mxu0 %v17833_v60 }
 0x503   :  { %6020 = vmatmul.mubr.bf16.vlgmr.msra.gmra.mxu1 %v17837_v6  ;;  %6039 = vmatpush1.bf16.msra.mxu0 %v15706_v12  ;;  %v15787_v12 = vld [vmem:[#allocation7 + $0x748] ss:$16 sps:$4 sm:$0xff]  }
 0x504   :  { %6090 = vmatpush1.bf16.msra.mxu1 %v15709_v62  ;;  %6040 = vmatprep.subr.bf16.mxu0 %v15714_v56  ;;  %v15792_v62 = vld [vmem:[#allocation7 + $0x52c] ss:$16 sps:$4 sm:$0xff]  }
 0x505   :  { %6091 = vmatprep.subr.bf16.mxu1 %v15717_v38  ;;  %5978 = vmatprep.mubr.bf16.mxu0 %v17841_v9  ;;  %v15795_v56 = vld [vmem:[#allocation7 + $0x72c] ss:$16 sps:$4 sm:$0xff]   ;;  %v15790_v38 = vld [vmem:[#allocation7 + $0x528] ss:$16 sps:$4 sm:$0xff]  }
 0x506   :  { %6029 = vmatprep.mubr.bf16.mxu1 %v17845_v3 }
 0x507   :  { %6041 = vmatpush1.bf16.msra.mxu0 %v15712_v28  ;;  %v15793_v28 = vld [vmem:[#allocation7 + $0x728] ss:$16 sps:$4 sm:$0xff]  }
 0x508   :  { %6092 = vmatpush1.bf16.msra.mxu1 %v15715_v53  ;;  %6042 = vmatprep.subr.bf16.mxu0 %v15720_v2  ;;  %v15798_v53 = vld [vmem:[#allocation7 + $0x50c] ss:$16 sps:$4 sm:$0xff]  }
 0x509   :  { %6093 = vmatprep.subr.bf16.mxu1 %v15723_v59  ;;  %v15801_v2 = vld [vmem:[#allocation7 + $0x70c] ss:$16 sps:$4 sm:$0xff]   ;;  %v15796_v59 = vld [vmem:[#allocation7 + $0x508] ss:$16 sps:$4 sm:$0xff]  }
 0x50a   :  { %5979 = vmatmul.mubr.bf16.gmra.mxu0 %v17853_v1 }
 0x50b   :  { %6030 = vmatmul.mubr.bf16.gmra.mxu1 %v17857_v23  ;;  %6043 = vmatpush1.bf16.msra.mxu0 %v15718_v14  ;;  %v15799_v14 = vld [vmem:[#allocation7 + $0x708] ss:$16 sps:$4 sm:$0xff]  }
 0x50c   :  { %6094 = vmatpush1.bf16.msra.mxu1 %v15721_v37  ;;  %6044 = vmatprep.subr.bf16.mxu0 %v15726_v11  ;;  %v15804_v37 = vld [vmem:[#allocation7 + $0x8e4] ss:$16 sps:$4 sm:$0xff]  }
 0x50d   :  { %6095 = vmatprep.subr.bf16.mxu1 %v15729_v25  ;;  %6070 = vmatprep.mubr.bf16.mxu0 %v17825_v4  ;;  %v15807_v11 = vld [vmem:[#allocation7 + $0xae4] ss:$16 sps:$4 sm:$0xff]   ;;  %v15802_v25 = vld [vmem:[#allocation7 + $0x8e0] ss:$16 sps:$4 sm:$0xff]  }
 0x50e   :  { %6121 = vmatprep.mubr.bf16.mxu1 %v17827_v17 }
 0x50f   :  { %6045 = vmatpush1.bf16.msra.mxu0 %v15724_v52  ;;  %v15805_v52 = vld [vmem:[#allocation7 + $0xae0] ss:$16 sps:$4 sm:$0xff]  }
 0x510   :  { %6096 = vmatpush1.bf16.msra.mxu1 %v15727_v39  ;;  %6046 = vmatprep.subr.bf16.mxu0 %v15732_v44  ;;  %v15810_v39 = vld [vmem:[#allocation7 + $0x8c4] ss:$16 sps:$4 sm:$0xff]  }
 0x511   :  { %6097 = vmatprep.subr.bf16.mxu1 %v15735_v15  ;;  %v15813_v44 = vld [vmem:[#allocation7 + $0xac4] ss:$16 sps:$4 sm:$0xff]  }
 0x513   :  { %6047 = vmatpush1.bf16.msra.mxu0 %v15730_v21 }
 0x514   :  { %6098 = vmatpush1.bf16.msra.mxu1 %v15733_v43  ;;  %6048 = vmatprep.subr.bf16.mxu0 %v15738_v57  ;;  %v15808_v57 = vld [vmem:[#allocation7 + $0x8c0] ss:$16 sps:$4 sm:$0xff]  }
 0x515   :  { %6099 = vmatprep.subr.bf16.mxu1 %v15741_v51  ;;  %v15811_v51 = vld [vmem:[#allocation7 + $0xac0] ss:$16 sps:$4 sm:$0xff]  }
 0x517   :  { %6049 = vmatpush1.bf16.msra.mxu0 %v15736_v19 }
 0x518   :  { %6100 = vmatpush1.bf16.msra.mxu1 %v15739_v33  ;;  %6050 = vmatprep.subr.bf16.mxu0 %v15744_v20  ;;  %v15816_v20 = vld [vmem:[#allocation7 + $0x8a4] ss:$16 sps:$4 sm:$0xff]  }
 0x519   :  { %6101 = vmatprep.subr.bf16.mxu1 %v15747_v45  ;;  %v15819_v45 = vld [vmem:[#allocation7 + $0xaa4] ss:$16 sps:$4 sm:$0xff]  }
 0x51b   :  { %6051 = vmatpush1.bf16.msra.mxu0 %v15742_v26 }
 0x51c   :  { %6102 = vmatpush1.bf16.msra.mxu1 %v15745_v49  ;;  %6052 = vmatprep.subr.bf16.mxu0 %v15750_v46 }
 0x51d   :  { %6103 = vmatprep.subr.bf16.mxu1 %v15753_v47 }
 0x51f   :  { %6053 = vmatpush1.bf16.msra.mxu0 %v15748_v61  ;;  %v15814_v61 = vld [vmem:[#allocation7 + $0x8a0] ss:$16 sps:$4 sm:$0xff]  }
 0x520   :  { %6104 = vmatpush1.bf16.msra.mxu1 %v15751_v22  ;;  %6054 = vmatprep.subr.bf16.mxu0 %v15756_v54  ;;  %v15817_v22 = vld [vmem:[#allocation7 + $0xaa0] ss:$16 sps:$4 sm:$0xff]  }
 0x521   :  { %6105 = vmatprep.subr.bf16.mxu1 %v15759_v8 }
 0x523   :  { %6055 = vmatpush2.bf16.msra.mxu0 %v15754_v24  ;;  %v15822_v24 = vld [vmem:[#allocation7 + $0x884] ss:$16 sps:$4 sm:$0xff]  }
 0x524   :  { %6106 = vmatpush2.bf16.msra.mxu1 %v15757_v10  ;;  %6056 = vmatprep.subr.bf16.mxu0 %v15762_v5  ;;  %v15825_v10 = vld [vmem:[#allocation7 + $0xa84] ss:$16 sps:$4 sm:$0xff]  }
 0x525   :  { %6107 = vmatprep.subr.bf16.mxu1 %v15765_v36 }
 0x527   :  { %6057 = vmatpush2.bf16.msra.mxu0 %v15760_v16 }
 0x528   :  { %6108 = vmatpush2.bf16.msra.mxu1 %v15763_v34  ;;  %6058 = vmatprep.subr.bf16.mxu0 %v15768_v30  ;;  %v15820_v34 = vld [vmem:[#allocation7 + $0x880] ss:$16 sps:$4 sm:$0xff]  }
 0x529   :  { %6109 = vmatprep.subr.bf16.mxu1 %v15771_v41  ;;  %v15823_v30 = vld [vmem:[#allocation7 + $0xa80] ss:$16 sps:$4 sm:$0xff]  }
 0x52b   :  { %6059 = vmatpush2.bf16.msra.mxu0 %v15766_v29  ;;  %v15828_v29 = vld [vmem:[#allocation7 + $0x864] ss:$16 sps:$4 sm:$0xff]  }
 0x52c   :  { %6110 = vmatpush2.bf16.msra.mxu1 %v15769_v48  ;;  %6060 = vmatprep.subr.bf16.mxu0 %v15774_v13  ;;  %v15831_v48 = vld [vmem:[#allocation7 + $0xa64] ss:$16 sps:$4 sm:$0xff]  }
 0x52d   :  { %6111 = vmatprep.subr.bf16.mxu1 %v15777_v0 }
 0x52f   :  { %6061 = vmatpush2.bf16.msra.mxu0 %v15772_v40 }
 0x530   :  { %6112 = vmatpush2.bf16.msra.mxu1 %v15775_v50  ;;  %6062 = vmatprep.subr.bf16.mxu0 %v15780_v42 }
 0x531   :  { %6113 = vmatprep.subr.bf16.mxu1 %v15783_v18  ;;  %v15826_v18 = vld [vmem:[#allocation7 + $0x860] ss:$16 sps:$4 sm:$0xff]  }
 0x533   :  { %6063 = vmatpush2.bf16.msra.mxu0 %v15778_v63  ;;  %v15829_v63 = vld [vmem:[#allocation7 + $0xa60] ss:$16 sps:$4 sm:$0xff]  }
 0x534   :  { %6114 = vmatpush2.bf16.msra.mxu1 %v15781_v55  ;;  %6064 = vmatprep.subr.bf16.mxu0 %v15786_v7  ;;  %v15834_v55 = vld [vmem:[#allocation7 + $0x844] ss:$16 sps:$4 sm:$0xff]  }
 0x535   :  { %6115 = vmatprep.subr.bf16.mxu1 %v15789_v27  ;;  %v15837_v7 = vld [vmem:[#allocation7 + $0xa44] ss:$16 sps:$4 sm:$0xff]  }
 0x537   :  { %6065 = vmatpush2.bf16.msra.mxu0 %v15784_v58 }
 0x538   :  { %6116 = vmatpush2.bf16.msra.mxu1 %v15787_v12  ;;  %6066 = vmatprep.subr.bf16.mxu0 %v15792_v62  ;;  %v15832_v12 = vld [vmem:[#allocation7 + $0x840] ss:$16 sps:$4 sm:$0xff]  }
 0x539   :  { %6117 = vmatprep.subr.bf16.mxu1 %v15795_v56  ;;  %v15835_v62 = vld [vmem:[#allocation7 + $0xa40] ss:$16 sps:$4 sm:$0xff]   ;;  %v15840_v56 = vld [vmem:[#allocation7 + $0x824] ss:$16 sps:$4 sm:$0xff]  }
 0x53b   :  { %6067 = vmatpush2.bf16.msra.mxu0 %v15790_v38  ;;  %v15843_v38 = vld [vmem:[#allocation7 + $0xa24] ss:$16 sps:$4 sm:$0xff]  }
 0x53c   :  { %6118 = vmatpush2.bf16.msra.mxu1 %v15793_v28  ;;  %6068 = vmatprep.subr.bf16.mxu0 %v15798_v53  ;;  %v15838_v28 = vld [vmem:[#allocation7 + $0x820] ss:$16 sps:$4 sm:$0xff]  }
 0x53d   :  { %6119 = vmatprep.subr.bf16.mxu1 %v15801_v2  ;;  %v15841_v53 = vld [vmem:[#allocation7 + $0xa20] ss:$16 sps:$4 sm:$0xff]   ;;  %v15846_v2 = vld [vmem:[#allocation7 + $0x804] ss:$16 sps:$4 sm:$0xff]  }
 0x53f   :  { %6069 = vmatpush2.bf16.msra.mxu0 %v15796_v59  ;;  %v15849_v59 = vld [vmem:[#allocation7 + $0xa04] ss:$16 sps:$4 sm:$0xff]  }
 0x540   :  { %6120 = vmatpush2.bf16.msra.mxu1 %v15799_v14  ;;  %6909 = vmatprep.subr.bf16.mxu0 %v15804_v37  ;;  %v15844_v14 = vld [vmem:[#allocation7 + $0x800] ss:$16 sps:$4 sm:$0xff]  }
 0x541   :  { %6960 = vmatprep.subr.bf16.mxu1 %v15807_v11  ;;  %v15847_v37 = vld [vmem:[#allocation7 + $0xa00] ss:$16 sps:$4 sm:$0xff]   ;;  %v15852_v11 = vld [vmem:[#allocation7 + $0x9e4] ss:$16 sps:$4 sm:$0xff]  }
 0x542   :  { %v4997_v15 = vpop.f32.mrf.mxu0  ;;  %6071 = vmatmul.mubr.bf16.vlgmr.msra.gmra.mxu0 %v17833_v60 }
 0x543   :  { %v5048_v21 = vpop.f32.mrf.mxu1  ;;  %6122 = vmatmul.mubr.bf16.vlgmr.msra.gmra.mxu1 %v17837_v6  ;;  %6910 = vmatpush1.bf16.msra.mxu0 %v15802_v25  ;;  %v15855_v25 = vld [vmem:[#allocation7 + $0xbe4] ss:$16 sps:$4 sm:$0xff]  }
 0x544   :  { %v17881_v43 = vadd.f32 %v5048_v21, %v4997_v15  ;;  %6961 = vmatpush1.bf16.msra.mxu1 %v15805_v52  ;;  %v4999_v19 = vpop.f32.mrf.mxu0  ;;  %6911 = vmatprep.subr.bf16.mxu0 %v15810_v39  ;;  %v15850_v52 = vld [vmem:[#allocation7 + $0x9e0] ss:$16 sps:$4 sm:$0xff]   ;;  %v15861_v15 = vld [vmem:[#allocation7 + $0xbc4] ss:$16 sps:$4 sm:$0xff]  }
 0x545   :  { %v5050_v33 = vpop.f32.mrf.mxu1  ;;  %6962 = vmatprep.subr.bf16.mxu1 %v15813_v44  ;;  %6080 = vmatprep.mubr.bf16.mxu0 %v17841_v9  ;;  %v15853_v39 = vld [vmem:[#allocation7 + $0xbe0] ss:$16 sps:$4 sm:$0xff]   ;;  %v15858_v44 = vld [vmem:[#allocation7 + $0x9c4] ss:$16 sps:$4 sm:$0xff]  }
 0x546   :  { %v17883_v26 = vadd.f32 %v5050_v33, %v4999_v19  ;;  %6131 = vmatprep.mubr.bf16.mxu1 %v17845_v3  ;;  %v5001_v49 = vpop.f32.mrf.mxu0  ;;  %v15856_v21 = vld [vmem:[#allocation7 + $0x9c0] ss:$16 sps:$4 sm:$0xff]   ;;  %v15867_v19 = vld [vmem:[#allocation7 + $0xba4] ss:$16 sps:$4 sm:$0xff]  }
 0x547   :  { %v5052_v46 = vpop.f32.mrf.mxu1  ;;  %6912 = vmatpush1.bf16.msra.mxu0 %v15808_v57  ;;  %v15859_v57 = vld [vmem:[#allocation7 + $0xbc0] ss:$16 sps:$4 sm:$0xff]  }
 0x548   :  { %v17887_v47 = vadd.f32 %v5052_v46, %v5001_v49  ;;  %6963 = vmatpush1.bf16.msra.mxu1 %v15811_v51  ;;  %v5003_v54 = vpop.f32.mrf.mxu0  ;;  %6913 = vmatprep.subr.bf16.mxu0 %v15816_v20  ;;  %v15864_v51 = vld [vmem:[#allocation7 + $0x9a4] ss:$16 sps:$4 sm:$0xff]   ;;  %v15862_v33 = vld [vmem:[#allocation7 + $0x9a0] ss:$16 sps:$4 sm:$0xff]  }
 0x549   :  { %v5054_v8 = vpop.f32.mrf.mxu1  ;;  %6964 = vmatprep.subr.bf16.mxu1 %v15819_v45  ;;  %v15865_v20 = vld [vmem:[#allocation7 + $0xba0] ss:$16 sps:$4 sm:$0xff]   ;;  %v15870_v45 = vld [vmem:[#allocation7 + $0x984] ss:$16 sps:$4 sm:$0xff]  }
 0x54a   :  { %v17889_v5 = vadd.f32 %v5054_v8, %v5003_v54  ;;  %6081 = vmatmul.mubr.bf16.gmra.mxu0 %v17853_v1  ;;  %v5007_v36 = vpop.f32.mrf.mxu0  ;;  %v15873_v49 = vld [vmem:[#allocation7 + $0xb84] ss:$16 sps:$4 sm:$0xff]   ;;  %v15868_v46 = vld [vmem:[#allocation7 + $0x980] ss:$16 sps:$4 sm:$0xff]  }
 0x54b   :  { %6132 = vmatmul.mubr.bf16.gmra.mxu1 %v17857_v23  ;;  %v5058_v16 = vpop.f32.mrf.mxu1  ;;  %6914 = vmatpush1.bf16.msra.mxu0 %v15814_v61  ;;  %v15871_v61 = vld [vmem:[#allocation7 + $0xb80] ss:$16 sps:$4 sm:$0xff]   ;;  %v15879_v54 = vld [vmem:[#allocation7 + $0xb64] ss:$16 sps:$4 sm:$0xff]  }
 0x54c   :  { %6965 = vmatpush1.bf16.msra.mxu1 %v15817_v22  ;;  %v17893_v41 = vadd.f32 %v5058_v16, %v5007_v36  ;;  %6915 = vmatprep.subr.bf16.mxu0 %v15822_v24  ;;  %v5009_v13 = vpop.f32.mrf.mxu0  ;;  %v15876_v22 = vld [vmem:[#allocation7 + $0x964] ss:$16 sps:$4 sm:$0xff]   ;;  %v15874_v8 = vld [vmem:[#allocation7 + $0x960] ss:$16 sps:$4 sm:$0xff]  }
 0x54d   :  { %6966 = vmatprep.subr.bf16.mxu1 %v15825_v10  ;;  %v5060_v0 = vpop.f32.mrf.mxu1  ;;  %6941 = vmatprep.mubr.bf16.mxu0 %v17825_v4  ;;  %v15877_v24 = vld [vmem:[#allocation7 + $0xb60] ss:$16 sps:$4 sm:$0xff]   ;;  %v15882_v10 = vld [vmem:[#allocation7 + $0x944] ss:$16 sps:$4 sm:$0xff]  }
 0x54e   :  { %v17895_v40 = vadd.f32 %v5060_v0, %v5009_v13  ;;  %6992 = vmatprep.mubr.bf16.mxu1 %v17827_v17  ;;  %v5011_v50 = vpop.f32.mrf.mxu0  ;;  %v15885_v36 = vld [vmem:[#allocation7 + $0xb44] ss:$16 sps:$4 sm:$0xff]   ;;  %v15880_v16 = vld [vmem:[#allocation7 + $0x940] ss:$16 sps:$4 sm:$0xff]  }
 0x54f   :  { %v5062_v42 = vpop.f32.mrf.mxu1  ;;  %6916 = vmatpush1.bf16.msra.mxu0 %v15820_v34  ;;  %v15883_v34 = vld [vmem:[#allocation7 + $0xb40] ss:$16 sps:$4 sm:$0xff]   ;;  %v15894_v0 = vld [vmem:[#allocation7 + $0x904] ss:$16 sps:$4 sm:$0xff]  }
 0x550   :  { %6967 = vmatpush1.bf16.msra.mxu1 %v15823_v30  ;;  %6917 = vmatprep.subr.bf16.mxu0 %v15828_v29  ;;  %v5012_v27 = vpop.f32.mrf.mxu0  ;;  %v15888_v30 = vld [vmem:[#allocation7 + $0x924] ss:$16 sps:$4 sm:$0xff]   ;;  %v15889_v13 = vld [vmem:[#allocation7 + $0xb20] ss:$16 sps:$4 sm:$0xff]  }
 0x551   :  { %6968 = vmatprep.subr.bf16.mxu1 %v15831_v48  ;;  %v5063_v58 = vpop.f32.mrf.mxu1  ;;  %v15891_v29 = vld [vmem:[#allocation7 + $0xb24] ss:$16 sps:$4 sm:$0xff]   ;;  %v15886_v48 = vld [vmem:[#allocation7 + $0x920] ss:$16 sps:$4 sm:$0xff]   ;;  %v15901_v27 = vld [vmem:[#allocation7 + $0xae8] ss:$16 sps:$4 sm:$0xff]  }
 0x552   :  { %v15897_v50 = vld [vmem:[#allocation7 + $0xb04] ss:$16 sps:$4 sm:$0xff]   ;;  %v15892_v42 = vld [vmem:[#allocation7 + $0x900] ss:$16 sps:$4 sm:$0xff]   ;;  %v15906_v58 = vld [vmem:[#allocation7 + $0x8cc] ss:$16 sps:$4 sm:$0xff]  }
 0x553   :  { %6918 = vmatpush1.bf16.msra.mxu0 %v15826_v18  ;;  %v15895_v18 = vld [vmem:[#allocation7 + $0xb00] ss:$16 sps:$4 sm:$0xff]  }
 0x554   :  { %6969 = vmatpush1.bf16.msra.mxu1 %v15829_v63  ;;  %6919 = vmatprep.subr.bf16.mxu0 %v15834_v55  ;;  %v15900_v63 = vld [vmem:[#allocation7 + $0x8ec] ss:$16 sps:$4 sm:$0xff]  }
 0x555   :  { %6970 = vmatprep.subr.bf16.mxu1 %v15837_v7  ;;  %v15903_v55 = vld [vmem:[#allocation7 + $0xaec] ss:$16 sps:$4 sm:$0xff]   ;;  %v15898_v7 = vld [vmem:[#allocation7 + $0x8e8] ss:$16 sps:$4 sm:$0xff]  }
 0x557   :  { %6920 = vmatpush1.bf16.msra.mxu0 %v15832_v12  ;;  %v15909_v12 = vld [vmem:[#allocation7 + $0xacc] ss:$16 sps:$4 sm:$0xff]  }
 0x558   :  { %6971 = vmatpush1.bf16.msra.mxu1 %v15835_v62  ;;  %6921 = vmatprep.subr.bf16.mxu0 %v15840_v56 }
 0x559   :  { %6972 = vmatprep.subr.bf16.mxu1 %v15843_v38 }
 0x55b   :  { %6922 = vmatpush1.bf16.msra.mxu0 %v15838_v28  ;;  %v15904_v28 = vld [vmem:[#allocation7 + $0x8c8] ss:$16 sps:$4 sm:$0xff]  }
 0x55c   :  { %6973 = vmatpush1.bf16.msra.mxu1 %v15841_v53  ;;  %6923 = vmatprep.subr.bf16.mxu0 %v15846_v2  ;;  %v15907_v53 = vld [vmem:[#allocation7 + $0xac8] ss:$16 sps:$4 sm:$0xff]  }
 0x55d   :  { %6974 = vmatprep.subr.bf16.mxu1 %v15849_v59 }
 0x55f   :  { %6924 = vmatpush1.bf16.msra.mxu0 %v15844_v14  ;;  %v15912_v14 = vld [vmem:[#allocation7 + $0x8ac] ss:$16 sps:$4 sm:$0xff]  }
 0x560   :  { %6975 = vmatpush1.bf16.msra.mxu1 %v15847_v37  ;;  %6925 = vmatprep.subr.bf16.mxu0 %v15852_v11  ;;  %v15915_v37 = vld [vmem:[#allocation7 + $0xaac] ss:$16 sps:$4 sm:$0xff]  }
 0x561   :  { %6976 = vmatprep.subr.bf16.mxu1 %v15855_v25 }
 0x563   :  { %6926 = vmatpush2.bf16.msra.mxu0 %v15850_v52 }
 0x564   :  { %6977 = vmatpush2.bf16.msra.mxu1 %v15853_v39  ;;  %6927 = vmatprep.subr.bf16.mxu0 %v15858_v44  ;;  %v15910_v44 = vld [vmem:[#allocation7 + $0x8a8] ss:$16 sps:$4 sm:$0xff]  }
 0x565   :  { %6978 = vmatprep.subr.bf16.mxu1 %v15861_v15  ;;  %v15913_v15 = vld [vmem:[#allocation7 + $0xaa8] ss:$16 sps:$4 sm:$0xff]  }
 0x567   :  { %6928 = vmatpush2.bf16.msra.mxu0 %v15856_v21 }
 0x568   :  { %6979 = vmatpush2.bf16.msra.mxu1 %v15859_v57  ;;  %6929 = vmatprep.subr.bf16.mxu0 %v15864_v51  ;;  %v15918_v51 = vld [vmem:[#allocation7 + $0x88c] ss:$16 sps:$4 sm:$0xff]  }
 0x569   :  { %6980 = vmatprep.subr.bf16.mxu1 %v15867_v19  ;;  %v15921_v19 = vld [vmem:[#allocation7 + $0xa8c] ss:$16 sps:$4 sm:$0xff]  }
 0x56b   :  { %6930 = vmatpush2.bf16.msra.mxu0 %v15862_v33 }
 0x56c   :  { %6981 = vmatpush2.bf16.msra.mxu1 %v15865_v20  ;;  %6931 = vmatprep.subr.bf16.mxu0 %v15870_v45 }
 0x56d   :  { %6982 = vmatprep.subr.bf16.mxu1 %v15873_v49  ;;  %v15916_v49 = vld [vmem:[#allocation7 + $0x888] ss:$16 sps:$4 sm:$0xff]  }
 0x56f   :  { %6932 = vmatpush2.bf16.msra.mxu0 %v15868_v46  ;;  %v15919_v46 = vld [vmem:[#allocation7 + $0xa88] ss:$16 sps:$4 sm:$0xff]  }
 0x570   :  { %6983 = vmatpush2.bf16.msra.mxu1 %v15871_v61  ;;  %6933 = vmatprep.subr.bf16.mxu0 %v15876_v22  ;;  %v15924_v22 = vld [vmem:[#allocation7 + $0x86c] ss:$16 sps:$4 sm:$0xff]  }
 0x571   :  { %6984 = vmatprep.subr.bf16.mxu1 %v15879_v54  ;;  %v15927_v54 = vld [vmem:[#allocation7 + $0xa6c] ss:$16 sps:$4 sm:$0xff]  }
 0x573   :  { %6934 = vmatpush2.bf16.msra.mxu0 %v15874_v8 }
 0x574   :  { %6985 = vmatpush2.bf16.msra.mxu1 %v15877_v24  ;;  %6935 = vmatprep.subr.bf16.mxu0 %v15882_v10 }
 0x575   :  { %6986 = vmatprep.subr.bf16.mxu1 %v15885_v36 }
 0x577   :  { %6936 = vmatpush2.bf16.msra.mxu0 %v15880_v16 }
 0x578   :  { %6987 = vmatpush2.bf16.msra.mxu1 %v15883_v34  ;;  %6937 = vmatprep.subr.bf16.mxu0 %v15888_v30  ;;  %v15922_v34 = vld [vmem:[#allocation7 + $0x868] ss:$16 sps:$4 sm:$0xff]  }
 0x579   :  { %6988 = vmatprep.subr.bf16.mxu1 %v15891_v29  ;;  %v15925_v30 = vld [vmem:[#allocation7 + $0xa68] ss:$16 sps:$4 sm:$0xff]   ;;  %v15930_v29 = vld [vmem:[#allocation7 + $0x84c] ss:$16 sps:$4 sm:$0xff]  }
 0x57b   :  { %6938 = vmatpush2.bf16.msra.mxu0 %v15886_v48  ;;  %v15933_v48 = vld [vmem:[#allocation7 + $0xa4c] ss:$16 sps:$4 sm:$0xff]  }
 0x57c   :  { %6989 = vmatpush2.bf16.msra.mxu1 %v15889_v13  ;;  %6939 = vmatprep.subr.bf16.mxu0 %v15894_v0 }
 0x57d   :  { %6990 = vmatprep.subr.bf16.mxu1 %v15897_v50  ;;  %v15928_v50 = vld [vmem:[#allocation7 + $0x848] ss:$16 sps:$4 sm:$0xff]  }
 0x57f   :  { %6940 = vmatpush2.bf16.msra.mxu0 %v15892_v42  ;;  %v15931_v42 = vld [vmem:[#allocation7 + $0xa48] ss:$16 sps:$4 sm:$0xff]  }
 0x580   :  { %6991 = vmatpush2.bf16.msra.mxu1 %v15895_v18  ;;  %7011 = vmatprep.subr.bf16.mxu0 %v15900_v63  ;;  %v15934_v18 = vld [vmem:[#allocation7 + $0x828] ss:$16 sps:$4 sm:$0xff]  }
 0x581   :  { %7062 = vmatprep.subr.bf16.mxu1 %v15903_v55  ;;  %v15937_v63 = vld [vmem:[#allocation7 + $0xa28] ss:$16 sps:$4 sm:$0xff]   ;;  %v15942_v55 = vld [vmem:[#allocation7 + $0x80c] ss:$16 sps:$4 sm:$0xff]  }
 0x582   :  { %v5099_v62 = vpop.f32.mrf.mxu0  ;;  %6942 = vmatmul.mubr.bf16.vlgmr.msra.gmra.mxu0 %v17833_v60 }
 0x583   :  { %v5150_v56 = vpop.f32.mrf.mxu1  ;;  %6993 = vmatmul.mubr.bf16.vlgmr.msra.gmra.mxu1 %v17837_v6  ;;  %7012 = vmatpush1.bf16.msra.mxu0 %v15898_v7  ;;  %v15945_v7 = vld [vmem:[#allocation7 + $0xa0c] ss:$16 sps:$4 sm:$0xff]  }
 0x584   :  { %v17901_v38 = vadd.f32 %v5150_v56, %v5099_v62  ;;  %7063 = vmatpush1.bf16.msra.mxu1 %v15901_v27  ;;  %v5101_v2 = vpop.f32.mrf.mxu0  ;;  %7013 = vmatprep.subr.bf16.mxu0 %v15906_v58  ;;  %v15940_v27 = vld [vmem:[#allocation7 + $0x808] ss:$16 sps:$4 sm:$0xff]   ;;  %v15951_v62 = vld [vmem:[#allocation7 + $0xbec] ss:$16 sps:$4 sm:$0xff]  }
 0x585   :  { %v5152_v59 = vpop.f32.mrf.mxu1  ;;  %7064 = vmatprep.subr.bf16.mxu1 %v15909_v12  ;;  %6951 = vmatprep.mubr.bf16.mxu0 %v17841_v9  ;;  %v15943_v58 = vld [vmem:[#allocation7 + $0xa08] ss:$16 sps:$4 sm:$0xff]   ;;  %v15948_v12 = vld [vmem:[#allocation7 + $0x9ec] ss:$16 sps:$4 sm:$0xff]  }
 0x586   :  { %v17903_v11 = vadd.f32 %v5152_v59, %v5101_v2  ;;  %7002 = vmatprep.mubr.bf16.mxu1 %v17845_v3  ;;  %v5103_v25 = vpop.f32.mrf.mxu0  ;;  %v15946_v56 = vld [vmem:[#allocation7 + $0x9e8] ss:$16 sps:$4 sm:$0xff]   ;;  %v15957_v2 = vld [vmem:[#allocation7 + $0xbcc] ss:$16 sps:$4 sm:$0xff]  }
 0x587   :  { %v5154_v52 = vpop.f32.mrf.mxu1  ;;  %7014 = vmatpush1.bf16.msra.mxu0 %v15904_v28  ;;  %v15949_v28 = vld [vmem:[#allocation7 + $0xbe8] ss:$16 sps:$4 sm:$0xff]  }
 0x588   :  { %v17907_v39 = vadd.f32 %v5154_v52, %v5103_v25  ;;  %7065 = vmatpush1.bf16.msra.mxu1 %v15907_v53  ;;  %v5105_v21 = vpop.f32.mrf.mxu0  ;;  %7015 = vmatprep.subr.bf16.mxu0 %v15912_v14  ;;  %v15954_v53 = vld [vmem:[#allocation7 + $0x9cc] ss:$16 sps:$4 sm:$0xff]   ;;  %v15952_v59 = vld [vmem:[#allocation7 + $0x9c8] ss:$16 sps:$4 sm:$0xff]  }
 0x589   :  { %v5156_v57 = vpop.f32.mrf.mxu1  ;;  %7066 = vmatprep.subr.bf16.mxu1 %v15915_v37  ;;  %v15955_v14 = vld [vmem:[#allocation7 + $0xbc8] ss:$16 sps:$4 sm:$0xff]   ;;  %v15960_v37 = vld [vmem:[#allocation7 + $0x9ac] ss:$16 sps:$4 sm:$0xff]  }
 0x58a   :  { %v17909_v33 = vadd.f32 %v5156_v57, %v5105_v21  ;;  %6952 = vmatmul.mubr.bf16.gmra.mxu0 %v17853_v1  ;;  %v5109_v20 = vpop.f32.mrf.mxu0  ;;  %v15963_v25 = vld [vmem:[#allocation7 + $0xbac] ss:$16 sps:$4 sm:$0xff]   ;;  %v15958_v52 = vld [vmem:[#allocation7 + $0x9a8] ss:$16 sps:$4 sm:$0xff]  }
 0x58b   :  { %7003 = vmatmul.mubr.bf16.gmra.mxu1 %v17857_v23  ;;  %v5160_v45 = vpop.f32.mrf.mxu1  ;;  %7016 = vmatpush1.bf16.msra.mxu0 %v15910_v44  ;;  %v15961_v44 = vld [vmem:[#allocation7 + $0xba8] ss:$16 sps:$4 sm:$0xff]   ;;  %v15969_v21 = vld [vmem:[#allocation7 + $0xb8c] ss:$16 sps:$4 sm:$0xff]  }
 0x58c   :  { %7067 = vmatpush1.bf16.msra.mxu1 %v15913_v15  ;;  %v17913_v61 = vadd.f32 %v5160_v45, %v5109_v20  ;;  %7017 = vmatprep.subr.bf16.mxu0 %v15918_v51  ;;  %v5111_v8 = vpop.f32.mrf.mxu0  ;;  %v15966_v15 = vld [vmem:[#allocation7 + $0x98c] ss:$16 sps:$4 sm:$0xff]   ;;  %v15964_v57 = vld [vmem:[#allocation7 + $0x988] ss:$16 sps:$4 sm:$0xff]  }
 0x58d   :  { %7068 = vmatprep.subr.bf16.mxu1 %v15921_v19  ;;  %v5162_v24 = vpop.f32.mrf.mxu1  ;;  %7043 = vmatprep.mubr.bf16.mxu0 %v17825_v4  ;;  %v15936_v4 = vld [vmem:[#allocation7 + $0x82c] ss:$16 sps:$4 sm:$0xff]   ;;  %v15967_v51 = vld [vmem:[#allocation7 + $0xb88] ss:$16 sps:$4 sm:$0xff]  }
 0x58e   :  { %v17915_v10 = vadd.f32 %v5162_v24, %v5111_v8  ;;  %7094 = vmatprep.mubr.bf16.mxu1 %v17827_v17  ;;  %v5113_v36 = vpop.f32.mrf.mxu0  ;;  %v15939_v17 = vld [vmem:[#allocation7 + $0xa2c] ss:$16 sps:$4 sm:$0xff]   ;;  %v15970_v45 = vld [vmem:[#allocation7 + $0x968] ss:$16 sps:$4 sm:$0xff]  }
 0x58f   :  { %v5164_v16 = vpop.f32.mrf.mxu1  ;;  %7018 = vmatpush1.bf16.msra.mxu0 %v15916_v49  ;;  %v15972_v19 = vld [vmem:[#allocation7 + $0x96c] ss:$16 sps:$4 sm:$0xff]   ;;  %v15973_v49 = vld [vmem:[#allocation7 + $0xb68] ss:$16 sps:$4 sm:$0xff]  }
 0x590   :  { %7069 = vmatpush1.bf16.msra.mxu1 %v15919_v46  ;;  %7019 = vmatprep.subr.bf16.mxu0 %v15924_v22  ;;  %v5114_v13 = vpop.f32.mrf.mxu0  ;;  %v15975_v20 = vld [vmem:[#allocation7 + $0xb6c] ss:$16 sps:$4 sm:$0xff]   ;;  %v15979_v8 = vld [vmem:[#allocation7 + $0xb48] ss:$16 sps:$4 sm:$0xff]  }
 0x591   :  { %7070 = vmatprep.subr.bf16.mxu1 %v15927_v54  ;;  %v5165_v0 = vpop.f32.mrf.mxu1  ;;  %v15978_v46 = vld [vmem:[#allocation7 + $0x94c] ss:$16 sps:$4 sm:$0xff]   ;;  %v15976_v54 = vld [vmem:[#allocation7 + $0x948] ss:$16 sps:$4 sm:$0xff]  }
 0x592   :  { %v15981_v22 = vld [vmem:[#allocation7 + $0xb4c] ss:$16 sps:$4 sm:$0xff]   ;;  %v15982_v16 = vld [vmem:[#allocation7 + $0x928] ss:$16 sps:$4 sm:$0xff]  }
 0x593   :  { %7020 = vmatpush1.bf16.msra.mxu0 %v15922_v34  ;;  %v15984_v24 = vld [vmem:[#allocation7 + $0x92c] ss:$16 sps:$4 sm:$0xff]   ;;  %v15985_v34 = vld [vmem:[#allocation7 + $0xb28] ss:$16 sps:$4 sm:$0xff]  }
 0x594   :  { %7071 = vmatpush1.bf16.msra.mxu1 %v15925_v30  ;;  %7021 = vmatprep.subr.bf16.mxu0 %v15930_v29  ;;  %v15987_v36 = vld [vmem:[#allocation7 + $0xb2c] ss:$16 sps:$4 sm:$0xff]   ;;  %v15991_v13 = vld [vmem:[#allocation7 + $0xb08] ss:$16 sps:$4 sm:$0xff]  }
 0x595   :  { %7072 = vmatprep.subr.bf16.mxu1 %v15933_v48  ;;  %v15990_v30 = vld [vmem:[#allocation7 + $0x90c] ss:$16 sps:$4 sm:$0xff]   ;;  %v15988_v48 = vld [vmem:[#allocation7 + $0x908] ss:$16 sps:$4 sm:$0xff]  }
 0x596   :  { %v15993_v29 = vld [vmem:[#allocation7 + $0xb0c] ss:$16 sps:$4 sm:$0xff]  }
 0x597   :  { %7022 = vmatpush1.bf16.msra.mxu0 %v15928_v50 }
 0x598   :  { %7073 = vmatpush1.bf16.msra.mxu1 %v15931_v42  ;;  %7023 = vmatprep.subr.bf16.mxu0 %v15936_v4 }
 0x599   :  { %7074 = vmatprep.subr.bf16.mxu1 %v15939_v17 }
 0x59b   :  { %7024 = vmatpush1.bf16.msra.mxu0 %v15934_v18 }
 0x59c   :  { %7075 = vmatpush1.bf16.msra.mxu1 %v15937_v63  ;;  %7025 = vmatprep.subr.bf16.mxu0 %v15942_v55 }
 0x59d   :  { %7076 = vmatprep.subr.bf16.mxu1 %v15945_v7 }
 0x59f   :  { %7026 = vmatpush1.bf16.msra.mxu0 %v15940_v27 }
 0x5a0   :  { %7077 = vmatpush1.bf16.msra.mxu1 %v15943_v58  ;;  %7027 = vmatprep.subr.bf16.mxu0 %v15948_v12 }
 0x5a1   :  { %7078 = vmatprep.subr.bf16.mxu1 %v15951_v62 }
 0x5a3   :  { %7028 = vmatpush2.bf16.msra.mxu0 %v15946_v56 }
 0x5a4   :  { %7079 = vmatpush2.bf16.msra.mxu1 %v15949_v28  ;;  %7029 = vmatprep.subr.bf16.mxu0 %v15954_v53 }
 0x5a5   :  { %7080 = vmatprep.subr.bf16.mxu1 %v15957_v2 }
 0x5a7   :  { %7030 = vmatpush2.bf16.msra.mxu0 %v15952_v59 }
 0x5a8   :  { %7081 = vmatpush2.bf16.msra.mxu1 %v15955_v14  ;;  %7031 = vmatprep.subr.bf16.mxu0 %v15960_v37 }
 0x5a9   :  { %7082 = vmatprep.subr.bf16.mxu1 %v15963_v25 }
 0x5ab   :  { %7032 = vmatpush2.bf16.msra.mxu0 %v15958_v52 }
 0x5ac   :  { %7083 = vmatpush2.bf16.msra.mxu1 %v15961_v44  ;;  %7033 = vmatprep.subr.bf16.mxu0 %v15966_v15 }
 0x5ad   :  { %7084 = vmatprep.subr.bf16.mxu1 %v15969_v21 }
 0x5af   :  { %7034 = vmatpush2.bf16.msra.mxu0 %v15964_v57 }
 0x5b0   :  { %7085 = vmatpush2.bf16.msra.mxu1 %v15967_v51  ;;  %7035 = vmatprep.subr.bf16.mxu0 %v15972_v19 }
 0x5b1   :  { %7086 = vmatprep.subr.bf16.mxu1 %v15975_v20 }
 0x5b3   :  { %7036 = vmatpush2.bf16.msra.mxu0 %v15970_v45 }
 0x5b4   :  { %7087 = vmatpush2.bf16.msra.mxu1 %v15973_v49  ;;  %7037 = vmatprep.subr.bf16.mxu0 %v15978_v46 }
 0x5b5   :  { %7088 = vmatprep.subr.bf16.mxu1 %v15981_v22 }
 0x5b7   :  { %7038 = vmatpush2.bf16.msra.mxu0 %v15976_v54 }
 0x5b8   :  { %7089 = vmatpush2.bf16.msra.mxu1 %v15979_v8  ;;  %7039 = vmatprep.subr.bf16.mxu0 %v15984_v24 }
 0x5b9   :  { %7090 = vmatprep.subr.bf16.mxu1 %v15987_v36 }
 0x5bb   :  { %7040 = vmatpush2.bf16.msra.mxu0 %v15982_v16 }
 0x5bc   :  { %7091 = vmatpush2.bf16.msra.mxu1 %v15985_v34  ;;  %7041 = vmatprep.subr.bf16.mxu0 %v15990_v30 }
 0x5bd   :  { %7092 = vmatprep.subr.bf16.mxu1 %v15993_v29 }
 0x5bf   :  { %7042 = vmatpush2.bf16.msra.mxu0 %v15988_v48 }
 0x5c0   :  { %7093 = vmatpush2.bf16.msra.mxu1 %v15991_v13 }
 0x5c2   :  { %v5970_v0 = vpop.f32.mrf.mxu0  ;;  %7044 = vmatmul.mubr.bf16.vlgmr.msra.gmra.mxu0 %v17833_v60 }
 0x5c3   :  { %v6021_v50 = vpop.f32.mrf.mxu1  ;;  %7095 = vmatmul.mubr.bf16.vlgmr.msra.gmra.mxu1 %v17837_v6  ;;  %7053 = vmatprep.mubr.bf16.mxu0 %v17841_v9 }
 0x5c4   :  { %v6022_v42 = vadd.f32 %v6021_v50, %v5970_v0  ;;  %7104 = vmatprep.mubr.bf16.mxu1 %v17845_v3  ;;  %v5972_v4 = vpop.f32.mrf.mxu0 }
 0x5c5   :  { %v6023_v17 = vpop.f32.mrf.mxu1 }
 0x5c6   :  { %v6024_v18 = vadd.f32 %v6023_v17, %v5972_v4  ;;  %v5974_v63 = vpop.f32.mrf.mxu0  ;;  %v7122_v12 = vrot.slane %v6022_v42, 3 }
 0x5c7   :  { %v6025_v55 = vpop.f32.mrf.mxu1 }
 0x5c8   :  { %v6026_v7 = vadd.f32 %v6025_v55, %v5974_v63  ;;  %v5976_v27 = vpop.f32.mrf.mxu0  ;;  %v7125_v6 = vrot.slane %v6024_v18, 3 }
 0x5c9   :  { %v6027_v58 = vpop.f32.mrf.mxu1 }
 0x5ca   :  { %v7123_v62 = vrot.slane %v6026_v7, 3  ;;  %v6028_v56 = vadd.f32 %v6027_v58, %v5976_v27  ;;  %v5980_v60 = vpop.f32.mrf.mxu0  ;;  %7054 = vmatmul.mubr.bf16.gmra.mxu0 %v17853_v1 }
 0x5cb   :  { %v6031_v28 = vpop.f32.mrf.mxu1  ;;  %7105 = vmatmul.mubr.bf16.gmra.mxu1 %v17857_v23 }
 0x5cc   :  { %v7124_v9 = vsel %vm7121_vm10, %v7122_v12, %v7123_v62  ;;  %v7126_v3 = vrot.slane %v6028_v56, 3  ;;  %v6032_v53 = vadd.f32 %v6031_v28, %v5980_v60  ;;  %v5982_v59 = vpop.f32.mrf.mxu0 }
 0x5cd   :  { %v17927_v2 = vadd.f32 %v7124_v9, %v17881_v43  ;;  %v6033_v14 = vpop.f32.mrf.mxu1 }
 0x5ce   :  { %v7127_v37 = vsel %vm7121_vm10, %v7125_v6, %v7126_v3  ;;  %v7175_v25 = vrot.slane %v6032_v53, 3  ;;  %v6034_v52 = vadd.f32 %v6033_v14, %v5982_v59  ;;  %v5984_v1 = vpop.f32.mrf.mxu0 }
 0x5cf   :  { %v17931_v44 = vadd.f32 %v7127_v37, %v17883_v26  ;;  %v6035_v15 = vpop.f32.mrf.mxu1 }
 0x5d0   :  { %v7176_v23 = vsel %vm7121_vm10, %v7123_v62, %v7175_v25  ;;  %v17935_v21 = vadd.f32 %v7175_v25, %v17893_v41  ;;  %v7177_v57 = vrot.slane %v6034_v52, 3  ;;  %v5985_v51 = vpop.f32.mrf.mxu0 }
 0x5d1   :  { %v6036_v43 = vpop.f32.mrf.mxu1  ;;  %v17938_v19 = vadd.f32 %v7176_v23, %v17887_v47 }
 0x5d2   :  { %v7178_v20 = vsel %vm7121_vm10, %v7126_v3, %v7177_v57  ;;  %v17942_v45 = vadd.f32 %v7177_v57, %v17895_v40 }
 0x5d3   :  { %v17945_v26 = vadd.f32 %v7178_v20, %v17889_v5 }
 0x602   :  { %v6072_v49 = vpop.f32.mrf.mxu0 }
 0x603   :  { %v6123_v46 = vpop.f32.mrf.mxu1 }
 0x604   :  { %v6124_v22 = vadd.f32 %v6123_v46, %v6072_v49  ;;  %v6074_v54 = vpop.f32.mrf.mxu0 }
 0x605   :  { %v6125_v41 = vpop.f32.mrf.mxu1 }
 0x606   :  { %v6126_v8 = vadd.f32 %v6125_v41, %v6074_v54  ;;  %v6076_v24 = vpop.f32.mrf.mxu0  ;;  %v7128_v30 = vrot.slane %v6124_v22, 3 }
 0x607   :  { %v6127_v36 = vpop.f32.mrf.mxu1 }
 0x608   :  { %v6128_v16 = vadd.f32 %v6127_v36, %v6076_v24  ;;  %v6078_v34 = vpop.f32.mrf.mxu0  ;;  %v7131_v0 = vrot.slane %v6126_v8, 3  ;;  %v17970_v8 = vld [vmem:[#allocation18] sm:$0xf] }
 0x609   :  { %v6129_v47 = vpop.f32.mrf.mxu1 }
 0x60a   :  { %v7129_v29 = vrot.slane %v6128_v16, 3  ;;  %v6130_v48 = vadd.f32 %v6129_v47, %v6078_v34  ;;  %v6082_v13 = vpop.f32.mrf.mxu0 }
 0x60b   :  { %v6133_v40 = vpop.f32.mrf.mxu1 }
 0x60c   :  { %v7130_v5 = vsel %vm7121_vm10, %v7128_v30, %v7129_v29  ;;  %v7132_v50 = vrot.slane %v6130_v48, 3  ;;  %v6134_v42 = vadd.f32 %v6133_v40, %v6082_v13  ;;  %v6084_v17 = vpop.f32.mrf.mxu0  ;;  %v7255_v40 = vrot.slane %v17970_v8, %v17355_v31 }
 0x60d   :  { %v17949_v4 = vadd.f32 %v7130_v5, %v17901_v38  ;;  %v6135_v18 = vpop.f32.mrf.mxu1 }
 0x60e   :  { %v7133_v63 = vsel %vm7121_vm10, %v7131_v0, %v7132_v50  ;;  %v7179_v55 = vrot.slane %v6134_v42, 3  ;;  %v6136_v7 = vadd.f32 %v6135_v18, %v6084_v17  ;;  %v6086_v58 = vpop.f32.mrf.mxu0 }
 0x60f   :  { %v17953_v27 = vadd.f32 %v7133_v63, %v17903_v11  ;;  %v6137_v12 = vpop.f32.mrf.mxu1 }
 0x610   :  { %v7180_v62 = vsel %vm7121_vm10, %v7129_v29, %v7179_v55  ;;  %v17957_v56 = vadd.f32 %v7179_v55, %v17913_v61  ;;  %v7181_v60 = vrot.slane %v6136_v7, 3  ;;  %v6087_v28 = vpop.f32.mrf.mxu0  ;;  %v18651_v55 = vld [vmem:[#allocation41_spill] sm:$0xff] }
 0x611   :  { %v6138_v38 = vpop.f32.mrf.mxu1  ;;  %v17960_v6 = vadd.f32 %v7180_v62, %v17907_v39 }
 0x612   :  { %v7182_v9 = vsel %vm7121_vm10, %v7132_v50, %v7181_v60  ;;  %v17964_v3 = vadd.f32 %v7181_v60, %v17915_v10 }
 0x613   :  { %v17967_v11 = vadd.f32 %v7182_v9, %v17909_v33 }
 0x642   :  { %v6943_v53 = vpop.f32.mrf.mxu0 }
 0x643   :  { %v6994_v59 = vpop.f32.mrf.mxu1 }
 0x644   :  { %v6945_v14 = vpop.f32.mrf.mxu0  ;;  %v6995_v52 = vadd.f32 %v6994_v59, %v6943_v53 }
 0x645   :  { %v6996_v37 = vpop.f32.mrf.mxu1 }
 0x646   :  { %v6947_v61 = vpop.f32.mrf.mxu0  ;;  %v6997_v39 = vadd.f32 %v6996_v37, %v6945_v14  ;;  %v7151_v20 = vrot.slane %v6995_v52, 6 }
 0x647   :  { %v6998_v25 = vpop.f32.mrf.mxu1 }
 0x648   :  { %v6999_v1 = vadd.f32 %v6998_v25, %v6947_v61  ;;  %v6949_v15 = vpop.f32.mrf.mxu0  ;;  %v7154_v54 = vrot.slane %v6997_v39, 6 }
 0x649   :  { %v7000_v23 = vpop.f32.mrf.mxu1 }
 0x64a   :  { %v7152_v57 = vrot.slane %v6999_v1, 6  ;;  %v7001_v51 = vadd.f32 %v7000_v23, %v6949_v15  ;;  %v6953_v43 = vpop.f32.mrf.mxu0 }
 0x64b   :  { %v7004_v10 = vpop.f32.mrf.mxu1 }
 0x64c   :  { %v7155_v49 = vrot.slane %v7001_v51, 6  ;;  %v7005_v33 = vadd.f32 %v7004_v10, %v6953_v43  ;;  %v6955_v46 = vpop.f32.mrf.mxu0  ;;  %v7153_v41 = vsel %vm7150_vm11, %v7151_v20, %v7152_v57 }
 0x64d   :  { %v7006_v22 = vpop.f32.mrf.mxu1  ;;  %v7167_v13 = vadd.f32 %v7153_v41, %v17927_v2 }
 0x64e   :  { %v7203_v24 = vrot.slane %v7005_v33, 6  ;;  %v7007_v36 = vadd.f32 %v7006_v22, %v6955_v46  ;;  %v6957_v16 = vpop.f32.mrf.mxu0  ;;  %v7156_v47 = vsel %vm7150_vm11, %v7154_v54, %v7155_v49 }
 0x64f   :  { %v7008_v34 = vpop.f32.mrf.mxu1  ;;  %v7168_v63 = vadd.f32 %v7156_v47, %v17931_v44 }
 0x650   :  { %v7211_v30 = vadd.f32 %v7203_v24, %v17938_v19  ;;  %v7215_v29 = vadd.f32 %v7203_v24, %v17935_v21  ;;  %v7204_v48 = vrot.slane %v7007_v36, 6  ;;  %v6958_v0 = vpop.f32.mrf.mxu0  ;;  %v7259_v19 = vrot.slane %v17970_v8, %v18651_v55 }
 0x651   :  { %v7009_v5 = vpop.f32.mrf.mxu1 }
 0x652   :  { %v7227_v50 = vrot.slane %v7211_v30, 6  ;;  %v7231_v42 = vrot.slane %v7215_v29, 6  ;;  %v7212_v17 = vadd.f32 %v7204_v48, %v17945_v26  ;;  %v7216_v18 = vadd.f32 %v7204_v48, %v17942_v45 }
 0x654   :  { %v7232_v21 = vsel %vm7150_vm11, %v7227_v50, %v7231_v42  ;;  %v7247_v2 = vsel %vm215_vm1, %v7167_v13, %v7227_v50  ;;  %v7228_v7 = vrot.slane %v7212_v17, 6  ;;  %v7233_v58 = vrot.slane %v7216_v18, 6 }
 0x655   :  { %v7272_v12 = vadd.f32 %v7255_v40, %v7247_v2  ;;  %v7276_v62 = vadd.f32 %v7255_v40, %v7232_v21 }
 0x656   :  { %v7234_v60 = vsel %vm7150_vm11, %v7228_v7, %v7233_v58  ;;  %v7248_v28 = vsel %vm215_vm1, %v7168_v63, %v7228_v7 }
 0x657   :  { %v7280_v26 = vmax.f32 %v7272_v12, 0.0  ;;  %v7284_v38 = vmax.f32 %v7276_v62, 0.0  ;;  %v7273_v45 = vadd.f32 %v7259_v19, %v7248_v28  ;;  %v7277_v9 = vadd.f32 %v7259_v19, %v7234_v60 }
 0x659   :  { %v7288_v44 = vsel %vm3797_vm9, %v7284_v38, 0.0  ;;  %v7324_v53 = vmul.f32 %v7280_v26, %v7280_v26  ;;  %v7328_v59 = vmul.f32 %v7284_v38, %v7284_v38  ;;  %v7281_v14 = vmax.f32 %v7273_v45, 0.0 }
 0x65a   :  { %v7289_v37 = vadd.f32 %v7288_v44, %v7280_v26  ;;  %v7285_v61 = vmax.f32 %v7277_v9, 0.0 }
 0x65b   :  { %v7332_v25 = vsel %vm3797_vm9, %v7328_v59, 0.0  ;;  %v7325_v52 = vmul.f32 %v7281_v14, %v7281_v14 }
 0x65c   :  { %v7290_v1 = vrot.slane %v7289_v37, 4  ;;  %v7333_v15 = vadd.f32 %v7332_v25, %v7324_v53  ;;  %v7296_v23 = vsel %vm3797_vm9, %v7285_v61, 0.0  ;;  %v7329_v39 = vmul.f32 %v7285_v61, %v7285_v61 }
 0x65d   :  { %v7297_v57 = vadd.f32 %v7296_v23, %v7281_v14 }
 0x65e   :  { %v7291_v51 = vadd.f32 %v7290_v1, %v7289_v37  ;;  %v7334_v43 = vrot.slane %v7333_v15, 4  ;;  %v7340_v10 = vsel %vm3797_vm9, %v7329_v39, 0.0 }
 0x65f   :  { %v7298_v20 = vrot.slane %v7297_v57, 4  ;;  %v7341_v49 = vadd.f32 %v7340_v10, %v7325_v52 }
 0x660   :  { %v7292_v33 = vrot.slane %v7291_v51, 2  ;;  %v7335_v46 = vadd.f32 %v7334_v43, %v7333_v15 }
 0x661   :  { %v7299_v22 = vadd.f32 %v7298_v20, %v7297_v57  ;;  %v7342_v54 = vrot.slane %v7341_v49, 4 }
 0x662   :  { %v7293_v41 = vadd.f32 %v7292_v33, %v7291_v51  ;;  %v7336_v24 = vrot.slane %v7335_v46, 2 }
 0x663   :  { %v7300_v36 = vrot.slane %v7299_v22, 2  ;;  %v7343_v16 = vadd.f32 %v7342_v54, %v7341_v49 }
 0x664   :  { %v7294_v34 = vrot.slane %v7293_v41, 1  ;;  %v7337_v47 = vadd.f32 %v7336_v24, %v7335_v46 }
 0x665   :  { %v7301_v30 = vadd.f32 %v7300_v36, %v7299_v22  ;;  %v7344_v29 = vrot.slane %v7343_v16, 2 }
 0x666   :  { %v7295_v48 = vadd.f32 %v7294_v34, %v7293_v41  ;;  %v7338_v13 = vrot.slane %v7337_v47, 1 }
 0x667   :  { %v7302_v40 = vrot.slane %v7301_v30, 1  ;;  %v7345_v0 = vadd.f32 %v7344_v29, %v7343_v16 }
 0x668   :  { %v7320_v5 = vmul.f32 0.083333336, %v7295_v48  ;;  %v7339_v50 = vadd.f32 %v7338_v13, %v7337_v47 }
 0x669   :  { %v7303_v42 = vadd.f32 %v7302_v40, %v7301_v30  ;;  %v7346_v17 = vrot.slane %v7345_v0, 1 }
 0x66a   :  { %v7364_v18 = vmul.f32 0.083333336, %v7339_v50  ;;  %v7368_v63 = vmul.f32 %v7320_v5, %v7320_v5  ;;  %v7380_v19 = vsub.f32 %v7280_v26, %v7320_v5  ;;  %v7384_v21 = vsub.f32 %v7284_v38, %v7320_v5 }
 0x66b   :  { %v7321_v2 = vmul.f32 0.083333336, %v7303_v42  ;;  %v7347_v7 = vadd.f32 %v7346_v17, %v7345_v0 }
 0x66c   :  { %v7372_v58 = vsub.f32 %v7364_v18, %v7368_v63 }
 0x66d   :  { %v7365_v12 = vmul.f32 0.083333336, %v7347_v7  ;;  %v7369_v62 = vmul.f32 %v7321_v2, %v7321_v2  ;;  %v7381_v60 = vsub.f32 %v7281_v14, %v7321_v2  ;;  %v7385_v28 = vsub.f32 %v7285_v61, %v7321_v2 }
 0x66e   :  { %v7376_v45 = vmax.f32 %v7372_v58, 0.0 }
 0x66f   :  { %v7373_v9 = vsub.f32 %v7365_v12, %v7369_v62 }
 0x670   :  { %v7388_v44 = vadd.f32 1e-05, %v7376_v45 }
 0x671   :  { %v7377_v53 = vmax.f32 %v7373_v9, 0.0 }
 0x672   :  { %15994 = vrsqrt.f32 %v7388_v44 }
 0x673   :  { %v7389_v59 = vadd.f32 1e-05, %v7377_v53 }
 0x675   :  { %15996 = vrsqrt.f32 %v7389_v59 }
 0x67f   :  { %v15995_v37 = vpop.eup %15994 }
 0x680   :  { %v7396_v25 = vmul.f32 %v15995_v37, %v7380_v19  ;;  %v7400_v52 = vmul.f32 %v15995_v37, %v7384_v21  ;;  %v7263_v19 = vrot.slane %v17970_v8, %v17358_v32 }
 0x682   :  { %v15997_v1 = vpop.eup %15996  ;;  %v7045_v15 = vpop.f32.mrf.mxu0 }
 0x683   :  { %v7397_v26 = vmul.f32 %v15997_v1, %v7381_v60  ;;  %v7401_v38 = vmul.f32 %v15997_v1, %v7385_v28  ;;  %v7096_v23 = vpop.f32.mrf.mxu1 }
 0x684   :  { %v7047_v51 = vpop.f32.mrf.mxu0  ;;  %v7097_v10 = vadd.f32 %v7096_v23, %v7045_v15 }
 0x685   :  { %v14611_v39 = vpack.c.bf16 %v7397_v26, %v7396_v25  ;;  %v14613_v57 = vpack.c.bf16 %v7401_v38, %v7400_v52  ;;  %v7098_v14 = vpop.f32.mrf.mxu1 }
 0x686   :  { %v7049_v61 = vpop.f32.mrf.mxu0  ;;  %v7099_v46 = vadd.f32 %v7098_v14, %v7047_v51  ;;  %v7157_v36 = vrot.slane %v7097_v10, 6 }
 0x687   :  { %7428 = vst [vmem:[#allocation4 + $0x10] sm:$0xff] %v14611_v39  ;;  %7430 = vst [vmem:[#allocation4 + $0x18] sm:$0x33] %v14613_v57  ;;  %v7100_v43 = vpop.f32.mrf.mxu1 }
 0x688   :  { %v7101_v20 = vadd.f32 %v7100_v43, %v7049_v61  ;;  %v7051_v49 = vpop.f32.mrf.mxu0  ;;  %v7160_v29 = vrot.slane %v7099_v46, 6 }
 0x689   :  { %v7102_v33 = vpop.f32.mrf.mxu1 }
 0x68a   :  { %v7158_v22 = vrot.slane %v7101_v20, 6  ;;  %v7103_v54 = vadd.f32 %v7102_v33, %v7051_v49  ;;  %v7055_v41 = vpop.f32.mrf.mxu0 }
 0x68b   :  { %v7106_v24 = vpop.f32.mrf.mxu1 }
 0x68c   :  { %v7161_v16 = vrot.slane %v7103_v54, 6  ;;  %v7107_v34 = vadd.f32 %v7106_v24, %v7055_v41  ;;  %v7057_v47 = vpop.f32.mrf.mxu0  ;;  %v7159_v48 = vsel %vm7150_vm11, %v7157_v36, %v7158_v22 }
 0x68d   :  { %v7108_v30 = vpop.f32.mrf.mxu1  ;;  %v7169_v63 = vadd.f32 %v7159_v48, %v17949_v4 }
 0x68e   :  { %v7205_v13 = vrot.slane %v7107_v34, 6  ;;  %v7109_v40 = vadd.f32 %v7108_v30, %v7057_v47  ;;  %v7059_v0 = vpop.f32.mrf.mxu0  ;;  %v7162_v50 = vsel %vm7150_vm11, %v7160_v29, %v7161_v16 }
 0x68f   :  { %v7110_v5 = vpop.f32.mrf.mxu1  ;;  %v7170_v60 = vadd.f32 %v7162_v50, %v17953_v27 }
 0x690   :  { %v7213_v42 = vadd.f32 %v7205_v13, %v17960_v6  ;;  %v7217_v17 = vadd.f32 %v7205_v13, %v17957_v56  ;;  %v7206_v18 = vrot.slane %v7109_v40, 6  ;;  %v7060_v21 = vpop.f32.mrf.mxu0  ;;  %v7267_v6 = vrot.slane %v17970_v8, %v17364_v35 }
 0x691   :  { %v7111_v2 = vpop.f32.mrf.mxu1 }
 0x692   :  { %v7229_v7 = vrot.slane %v7213_v42, 6  ;;  %v7235_v58 = vrot.slane %v7217_v17, 6  ;;  %v7214_v12 = vadd.f32 %v7206_v18, %v17967_v11  ;;  %v7218_v62 = vadd.f32 %v7206_v18, %v17964_v3 }
 0x694   :  { %v7236_v56 = vsel %vm7150_vm11, %v7229_v7, %v7235_v58  ;;  %v7249_v4 = vsel %vm215_vm1, %v7169_v63, %v7229_v7  ;;  %v7230_v28 = vrot.slane %v7214_v12, 6  ;;  %v7237_v45 = vrot.slane %v7218_v62, 6 }
 0x695   :  { %v7274_v9 = vadd.f32 %v7263_v19, %v7249_v4  ;;  %v7278_v44 = vadd.f32 %v7263_v19, %v7236_v56 }
 0x696   :  { %v7238_v53 = vsel %vm7150_vm11, %v7230_v28, %v7237_v45  ;;  %v7250_v59 = vsel %vm215_vm1, %v7170_v60, %v7230_v28 }
 0x697   :  { %v7282_v11 = vmax.f32 %v7274_v9, 0.0  ;;  %v7286_v37 = vmax.f32 %v7278_v44, 0.0  ;;  %v7275_v3 = vadd.f32 %v7267_v6, %v7250_v59  ;;  %v7279_v25 = vadd.f32 %v7267_v6, %v7238_v53 }
 0x699   :  { %v7304_v27 = vsel %vm3797_vm9, %v7286_v37, 0.0  ;;  %v7326_v52 = vmul.f32 %v7282_v11, %v7282_v11  ;;  %v7330_v8 = vmul.f32 %v7286_v37, %v7286_v37  ;;  %v7283_v1 = vmax.f32 %v7275_v3, 0.0 }
 0x69a   :  { %v7305_v26 = vadd.f32 %v7304_v27, %v7282_v11  ;;  %v7287_v38 = vmax.f32 %v7279_v25, 0.0 }
 0x69b   :  { %v7348_v15 = vsel %vm3797_vm9, %v7330_v8, 0.0  ;;  %v7327_v23 = vmul.f32 %v7283_v1, %v7283_v1 }
 0x69c   :  { %v7306_v39 = vrot.slane %v7305_v26, 4  ;;  %v7349_v57 = vadd.f32 %v7348_v15, %v7326_v52  ;;  %v7312_v51 = vsel %vm3797_vm9, %v7287_v38, 0.0  ;;  %v7331_v14 = vmul.f32 %v7287_v38, %v7287_v38 }
 0x69d   :  { %v7313_v61 = vadd.f32 %v7312_v51, %v7283_v1 }
 0x69e   :  { %v7307_v43 = vadd.f32 %v7306_v39, %v7305_v26  ;;  %v7350_v10 = vrot.slane %v7349_v57, 4  ;;  %v7356_v20 = vsel %vm3797_vm9, %v7331_v14, 0.0 }
 0x69f   :  { %v7314_v49 = vrot.slane %v7313_v61, 4  ;;  %v7357_v33 = vadd.f32 %v7356_v20, %v7327_v23 }
 0x6a0   :  { %v7308_v46 = vrot.slane %v7307_v43, 2  ;;  %v7351_v22 = vadd.f32 %v7350_v10, %v7349_v57 }
 0x6a1   :  { %v7315_v54 = vadd.f32 %v7314_v49, %v7313_v61  ;;  %v7358_v41 = vrot.slane %v7357_v33, 4 }
 0x6a2   :  { %v7309_v24 = vadd.f32 %v7308_v46, %v7307_v43  ;;  %v7352_v36 = vrot.slane %v7351_v22, 2 }
 0x6a3   :  { %v7316_v16 = vrot.slane %v7315_v54, 2  ;;  %v7359_v34 = vadd.f32 %v7358_v41, %v7357_v33 }
 0x6a4   :  { %v7310_v47 = vrot.slane %v7309_v24, 1  ;;  %v7353_v30 = vadd.f32 %v7352_v36, %v7351_v22 }
 0x6a5   :  { %v7317_v29 = vadd.f32 %v7316_v16, %v7315_v54  ;;  %v7360_v48 = vrot.slane %v7359_v34, 2 }
 0x6a6   :  { %v7311_v13 = vadd.f32 %v7310_v47, %v7309_v24  ;;  %v7354_v40 = vrot.slane %v7353_v30, 1 }
 0x6a7   :  { %v7318_v0 = vrot.slane %v7317_v29, 1  ;;  %v7361_v5 = vadd.f32 %v7360_v48, %v7359_v34 }
 0x6a8   :  { %v7322_v50 = vmul.f32 0.083333336, %v7311_v13  ;;  %v7355_v42 = vadd.f32 %v7354_v40, %v7353_v30 }
 0x6a9   :  { %v7319_v17 = vadd.f32 %v7318_v0, %v7317_v29  ;;  %v7362_v18 = vrot.slane %v7361_v5, 1 }
 0x6aa   :  { %v7366_v63 = vmul.f32 0.083333336, %v7355_v42  ;;  %v7370_v19 = vmul.f32 %v7322_v50, %v7322_v50  ;;  %v7382_v21 = vsub.f32 %v7282_v11, %v7322_v50  ;;  %v7386_v2 = vsub.f32 %v7286_v37, %v7322_v50 }
 0x6ab   :  { %v7323_v7 = vmul.f32 0.083333336, %v7319_v17  ;;  %v7363_v58 = vadd.f32 %v7362_v18, %v7361_v5 }
 0x6ac   :  { %v7374_v12 = vsub.f32 %v7366_v63, %v7370_v19 }
 0x6ad   :  { %v7367_v62 = vmul.f32 0.083333336, %v7363_v58  ;;  %v7371_v60 = vmul.f32 %v7323_v7, %v7323_v7  ;;  %v7383_v6 = vsub.f32 %v7283_v1, %v7323_v7  ;;  %v7387_v56 = vsub.f32 %v7287_v38, %v7323_v7 }
 0x6ae   :  { %v7378_v4 = vmax.f32 %v7374_v12, 0.0 }
 0x6af   :  { %v7375_v28 = vsub.f32 %v7367_v62, %v7371_v60 }
 0x6b0   :  { %v7390_v45 = vadd.f32 1e-05, %v7378_v4 }
 0x6b1   :  { %v7379_v9 = vmax.f32 %v7375_v28, 0.0 }
 0x6b2   :  { %15998 = vrsqrt.f32 %v7390_v45 }
 0x6b3   :  { %v7391_v44 = vadd.f32 1e-05, %v7379_v9 }
 0x6b5   :  { %16000 = vrsqrt.f32 %v7391_v44 }
 0x6bf   :  { %v15999_v53 = vpop.eup %15998 }
 0x6c0   :  { %v7398_v59 = vmul.f32 %v15999_v53, %v7382_v21  ;;  %v7402_v3 = vmul.f32 %v15999_v53, %v7386_v2 }
 0x6c2   :  { %v16001_v25 = vpop.eup %16000 }
 0x6c3   :  { %v7399_v11 = vmul.f32 %v16001_v25, %v7383_v6  ;;  %v7403_v37 = vmul.f32 %v16001_v25, %v7387_v56 }
 0x6c5   :  { %v14612_v27 = vpack.c.bf16 %v7399_v11, %v7398_v59  ;;  %v14614_v52 = vpack.c.bf16 %v7403_v37, %v7402_v3 }
 0x6c7   :  { %7429 = vst [vmem:[#allocation4] sm:$0xff] %v14612_v27  ;;  %7431 = vst [vmem:[#allocation4 + $0x8] sm:$0x33] %v14614_v52 }
 0x6c8   :  { %17161 = dma.done.wait [#allocation10 + $0x1], 16384 }
 0x6c9   :  { %17162 = vsyncadd [#allocation10 + $0x1], 4294950912  ;;  %v16002_v8 = vld [vmem:[#allocation8 + $0xe4] ss:$16 sps:$4 sm:$0xff]   ;;  %v16006_v26 = vld [vmem:[#allocation8 + $0xe0] ss:$16 sps:$4 sm:$0xff]  }
 0x6ca   :  { %v16004_v1 = vld [vmem:[#allocation8 + $0x2e4] ss:$16 sps:$4 sm:$0xff]   ;;  %8251 = vmatprep.subr.bf16.mxu0 %v16002_v8  ;;  %v16007_v38 = vld [vmem:[#allocation8 + $0x2e0] ss:$16 sps:$4 sm:$0xff]  }
 0x6cb   :  { %8294 = vmatprep.subr.bf16.mxu1 %v16004_v1  ;;  %v16008_v15 = vld [vmem:[#allocation8 + $0xc4] ss:$16 sps:$4 sm:$0xff]   ;;  %8252 = vmatpush1.bf16.msra.mxu0 %v16006_v26  ;;  %v16012_v39 = vld [vmem:[#allocation8 + $0xc0] ss:$16 sps:$4 sm:$0xff]  }
 0x6cc   :  { %8295 = vmatpush1.bf16.msra.mxu1 %v16007_v38  ;;  %v16010_v23 = vld [vmem:[#allocation8 + $0x2c4] ss:$16 sps:$4 sm:$0xff]   ;;  %8253 = vmatprep.subr.bf16.mxu0 %v16008_v15  ;;  %v16013_v57 = vld [vmem:[#allocation8 + $0x2c0] ss:$16 sps:$4 sm:$0xff]  }
 0x6cd   :  { %8296 = vmatprep.subr.bf16.mxu1 %v16010_v23  ;;  %v16014_v51 = vld [vmem:[#allocation8 + $0xa4] ss:$16 sps:$4 sm:$0xff]   ;;  %v16018_v61 = vld [vmem:[#allocation8 + $0xa0] ss:$16 sps:$4 sm:$0xff]  }
 0x6ce   :  { %v16016_v14 = vld [vmem:[#allocation8 + $0x2a4] ss:$16 sps:$4 sm:$0xff]   ;;  %v16019_v43 = vld [vmem:[#allocation8 + $0x2a0] ss:$16 sps:$4 sm:$0xff]  }
 0x6cf   :  { %8254 = vmatpush1.bf16.msra.mxu0 %v16012_v39  ;;  %v16020_v10 = vld [vmem:[#allocation8 + $0x84] ss:$16 sps:$4 sm:$0xff]   ;;  %v16024_v49 = vld [vmem:[#allocation8 + $0x80] ss:$16 sps:$4 sm:$0xff]  }
 0x6d0   :  { %8297 = vmatpush1.bf16.msra.mxu1 %v16013_v57  ;;  %8255 = vmatprep.subr.bf16.mxu0 %v16014_v51  ;;  %v16022_v20 = vld [vmem:[#allocation8 + $0x284] ss:$16 sps:$4 sm:$0xff]   ;;  %v16025_v33 = vld [vmem:[#allocation8 + $0x280] ss:$16 sps:$4 sm:$0xff]   ;;  %v16106_v57 = vld [vmem:[#allocation8 + $0xec] ss:$16 sps:$4 sm:$0xff]  }
 0x6d1   :  { %8298 = vmatprep.subr.bf16.mxu1 %v16016_v14  ;;  %v16026_v46 = vld [vmem:[#allocation8 + $0x64] ss:$16 sps:$4 sm:$0xff]   ;;  %v16030_v54 = vld [vmem:[#allocation8 + $0x60] ss:$16 sps:$4 sm:$0xff]   ;;  %v16109_v51 = vld [vmem:[#allocation8 + $0x2ec] ss:$16 sps:$4 sm:$0xff]  }
 0x6d2   :  { %v16028_v22 = vld [vmem:[#allocation8 + $0x264] ss:$16 sps:$4 sm:$0xff]   ;;  %v16031_v41 = vld [vmem:[#allocation8 + $0x260] ss:$16 sps:$4 sm:$0xff]  }
 0x6d3   :  { %8256 = vmatpush1.bf16.msra.mxu0 %v16018_v61  ;;  %v16032_v24 = vld [vmem:[#allocation8 + $0x44] ss:$16 sps:$4 sm:$0xff]   ;;  %v16036_v16 = vld [vmem:[#allocation8 + $0x40] ss:$16 sps:$4 sm:$0xff]   ;;  %v16104_v61 = vld [vmem:[#allocation8 + $0xe8] ss:$16 sps:$4 sm:$0xff]  }
 0x6d4   :  { %8299 = vmatpush1.bf16.msra.mxu1 %v16019_v43  ;;  %8257 = vmatprep.subr.bf16.mxu0 %v16020_v10  ;;  %v16034_v36 = vld [vmem:[#allocation8 + $0x244] ss:$16 sps:$4 sm:$0xff]   ;;  %v16037_v34 = vld [vmem:[#allocation8 + $0x240] ss:$16 sps:$4 sm:$0xff]   ;;  %v16107_v43 = vld [vmem:[#allocation8 + $0x2e8] ss:$16 sps:$4 sm:$0xff]  }
 0x6d5   :  { %8300 = vmatprep.subr.bf16.mxu1 %v16022_v20  ;;  %v16038_v47 = vld [vmem:[#allocation8 + $0x24] ss:$16 sps:$4 sm:$0xff]   ;;  %v16042_v29 = vld [vmem:[#allocation8 + $0x20] ss:$16 sps:$4 sm:$0xff]   ;;  %v16112_v10 = vld [vmem:[#allocation8 + $0xcc] ss:$16 sps:$4 sm:$0xff]  }
 0x6d6   :  { %v16040_v30 = vld [vmem:[#allocation8 + $0x224] ss:$16 sps:$4 sm:$0xff]   ;;  %v16043_v48 = vld [vmem:[#allocation8 + $0x220] ss:$16 sps:$4 sm:$0xff]   ;;  %v16115_v20 = vld [vmem:[#allocation8 + $0x2cc] ss:$16 sps:$4 sm:$0xff]  }
 0x6d7   :  { %8258 = vmatpush1.bf16.msra.mxu0 %v16024_v49  ;;  %v16044_v13 = vld [vmem:[#allocation8 + $0x4] ss:$16 sps:$4 sm:$0xff]   ;;  %v16048_v0 = vld [vmem:[#allocation8] ss:$16 sps:$4 sm:$0xff]   ;;  %v16110_v49 = vld [vmem:[#allocation8 + $0xc8] ss:$16 sps:$4 sm:$0xff]  }
 0x6d8   :  { %8301 = vmatpush1.bf16.msra.mxu1 %v16025_v33  ;;  %8259 = vmatprep.subr.bf16.mxu0 %v16026_v46  ;;  %v16046_v40 = vld [vmem:[#allocation8 + $0x204] ss:$16 sps:$4 sm:$0xff]   ;;  %v16049_v5 = vld [vmem:[#allocation8 + $0x200] ss:$16 sps:$4 sm:$0xff]   ;;  %v16113_v33 = vld [vmem:[#allocation8 + $0x2c8] ss:$16 sps:$4 sm:$0xff]  }
 0x6d9   :  { %8302 = vmatprep.subr.bf16.mxu1 %v16028_v22  ;;  %v16050_v50 = vld [vmem:[#allocation8 + $0x1e4] ss:$16 sps:$4 sm:$0xff]   ;;  %v16054_v17 = vld [vmem:[#allocation8 + $0x1e0] ss:$16 sps:$4 sm:$0xff]   ;;  %v16118_v46 = vld [vmem:[#allocation8 + $0xac] ss:$16 sps:$4 sm:$0xff]  }
 0x6da   :  { %v16052_v42 = vld [vmem:[#allocation8 + $0x3e4] ss:$16 sps:$4 sm:$0xff]   ;;  %v16055_v18 = vld [vmem:[#allocation8 + $0x3e0] ss:$16 sps:$4 sm:$0xff]   ;;  %v16121_v22 = vld [vmem:[#allocation8 + $0x2ac] ss:$16 sps:$4 sm:$0xff]  }
 0x6db   :  { %8260 = vmatpush1.bf16.msra.mxu0 %v16030_v54  ;;  %v16056_v63 = vld [vmem:[#allocation8 + $0x1c4] ss:$16 sps:$4 sm:$0xff]   ;;  %v16060_v21 = vld [vmem:[#allocation8 + $0x1c0] ss:$16 sps:$4 sm:$0xff]   ;;  %v16116_v54 = vld [vmem:[#allocation8 + $0xa8] ss:$16 sps:$4 sm:$0xff]  }
 0x6dc   :  { %8303 = vmatpush1.bf16.msra.mxu1 %v16031_v41  ;;  %8261 = vmatprep.subr.bf16.mxu0 %v16032_v24  ;;  %v16058_v19 = vld [vmem:[#allocation8 + $0x3c4] ss:$16 sps:$4 sm:$0xff]   ;;  %v16061_v2 = vld [vmem:[#allocation8 + $0x3c0] ss:$16 sps:$4 sm:$0xff]   ;;  %v16119_v41 = vld [vmem:[#allocation8 + $0x2a8] ss:$16 sps:$4 sm:$0xff]  }
 0x6dd   :  { %8304 = vmatprep.subr.bf16.mxu1 %v16034_v36  ;;  %v16062_v7 = vld [vmem:[#allocation8 + $0x1a4] ss:$16 sps:$4 sm:$0xff]   ;;  %v16066_v12 = vld [vmem:[#allocation8 + $0x1a0] ss:$16 sps:$4 sm:$0xff]   ;;  %v16124_v24 = vld [vmem:[#allocation8 + $0x8c] ss:$16 sps:$4 sm:$0xff]  }
 0x6de   :  { %v16064_v58 = vld [vmem:[#allocation8 + $0x3a4] ss:$16 sps:$4 sm:$0xff]   ;;  %v16067_v62 = vld [vmem:[#allocation8 + $0x3a0] ss:$16 sps:$4 sm:$0xff]   ;;  %v16127_v36 = vld [vmem:[#allocation8 + $0x28c] ss:$16 sps:$4 sm:$0xff]  }
 0x6df   :  { %8262 = vmatpush1.bf16.msra.mxu0 %v16036_v16  ;;  %v16068_v60 = vld [vmem:[#allocation8 + $0x184] ss:$16 sps:$4 sm:$0xff]   ;;  %v16072_v56 = vld [vmem:[#allocation8 + $0x180] ss:$16 sps:$4 sm:$0xff]   ;;  %v16122_v16 = vld [vmem:[#allocation8 + $0x88] ss:$16 sps:$4 sm:$0xff]  }
 0x6e0   :  { %8305 = vmatpush1.bf16.msra.mxu1 %v16037_v34  ;;  %8263 = vmatprep.subr.bf16.mxu0 %v16038_v47  ;;  %v16070_v6 = vld [vmem:[#allocation8 + $0x384] ss:$16 sps:$4 sm:$0xff]   ;;  %v16073_v4 = vld [vmem:[#allocation8 + $0x380] ss:$16 sps:$4 sm:$0xff]   ;;  %v16125_v34 = vld [vmem:[#allocation8 + $0x288] ss:$16 sps:$4 sm:$0xff]  }
 0x6e1   :  { %8306 = vmatprep.subr.bf16.mxu1 %v16040_v30  ;;  %v16074_v28 = vld [vmem:[#allocation8 + $0x164] ss:$16 sps:$4 sm:$0xff]   ;;  %v16078_v53 = vld [vmem:[#allocation8 + $0x160] ss:$16 sps:$4 sm:$0xff]   ;;  %v16130_v47 = vld [vmem:[#allocation8 + $0x6c] ss:$16 sps:$4 sm:$0xff]  }
 0x6e2   :  { %v16100_v45 = vld [vmem:[#allocation4 + $0x14] ss:$8 sps:$4 sm:$0x3f]   ;;  %v16103_v44 = vld [vmem:[#allocation4 + $0x4] ss:$8 sps:$4 sm:$0x3f]  }
 0x6e3   :  { %8264 = vmatpush1.bf16.msra.mxu0 %v16042_v29  ;;  %v16076_v9 = vld [vmem:[#allocation8 + $0x364] ss:$16 sps:$4 sm:$0xff]   ;;  %8283 = vmatprep.mubr.bf16.mxu0 %v16100_v45  ;;  %v16079_v59 = vld [vmem:[#allocation8 + $0x360] ss:$16 sps:$4 sm:$0xff]   ;;  %v16133_v30 = vld [vmem:[#allocation8 + $0x26c] ss:$16 sps:$4 sm:$0xff]  }
 0x6e4   :  { %8307 = vmatpush1.bf16.msra.mxu1 %v16043_v48  ;;  %8265 = vmatprep.subr.bf16.mxu0 %v16044_v13  ;;  %v16080_v3 = vld [vmem:[#allocation8 + $0x144] ss:$16 sps:$4 sm:$0xff]   ;;  %v16084_v11 = vld [vmem:[#allocation8 + $0x140] ss:$16 sps:$4 sm:$0xff]   ;;  %v16128_v29 = vld [vmem:[#allocation8 + $0x68] ss:$16 sps:$4 sm:$0xff]  }
 0x6e5   :  { %8308 = vmatprep.subr.bf16.mxu1 %v16046_v40  ;;  %8326 = vmatprep.mubr.bf16.mxu1 %v16103_v44  ;;  %v16082_v25 = vld [vmem:[#allocation8 + $0x344] ss:$16 sps:$4 sm:$0xff]   ;;  %v16085_v37 = vld [vmem:[#allocation8 + $0x340] ss:$16 sps:$4 sm:$0xff]   ;;  %v16131_v48 = vld [vmem:[#allocation8 + $0x268] ss:$16 sps:$4 sm:$0xff]  }
 0x6e6   :  { %v16086_v27 = vld [vmem:[#allocation8 + $0x124] ss:$16 sps:$4 sm:$0xff]   ;;  %v16090_v8 = vld [vmem:[#allocation8 + $0x120] ss:$16 sps:$4 sm:$0xff]   ;;  %v16136_v13 = vld [vmem:[#allocation8 + $0x4c] ss:$16 sps:$4 sm:$0xff]  }
 0x6e7   :  { %8266 = vmatpush1.bf16.msra.mxu0 %v16048_v0  ;;  %v16088_v52 = vld [vmem:[#allocation8 + $0x324] ss:$16 sps:$4 sm:$0xff]   ;;  %v16091_v1 = vld [vmem:[#allocation8 + $0x320] ss:$16 sps:$4 sm:$0xff]   ;;  %v16139_v40 = vld [vmem:[#allocation8 + $0x24c] ss:$16 sps:$4 sm:$0xff]  }
 0x6e8   :  { %8309 = vmatpush1.bf16.msra.mxu1 %v16049_v5  ;;  %8267 = vmatprep.subr.bf16.mxu0 %v16050_v50  ;;  %v16092_v26 = vld [vmem:[#allocation8 + $0x104] ss:$16 sps:$4 sm:$0xff]   ;;  %v16096_v15 = vld [vmem:[#allocation8 + $0x100] ss:$16 sps:$4 sm:$0xff]   ;;  %v16134_v0 = vld [vmem:[#allocation8 + $0x48] ss:$16 sps:$4 sm:$0xff]  }
 0x6e9   :  { %8310 = vmatprep.subr.bf16.mxu1 %v16052_v42  ;;  %v16094_v38 = vld [vmem:[#allocation8 + $0x304] ss:$16 sps:$4 sm:$0xff]   ;;  %v16097_v23 = vld [vmem:[#allocation8 + $0x300] ss:$16 sps:$4 sm:$0xff]   ;;  %v16137_v5 = vld [vmem:[#allocation8 + $0x248] ss:$16 sps:$4 sm:$0xff]  }
 0x6ea   :  { %v18011_v39 = vld [vmem:[#allocation4 + $0x10] ss:$8 sps:$4 sm:$0x3f]   ;;  %v18013_v14 = vld [vmem:[#allocation4] ss:$8 sps:$4 sm:$0x3f]  }
 0x6eb   :  { %8268 = vmatpush2.bf16.msra.mxu0 %v16054_v17  ;;  %v16142_v50 = vld [vmem:[#allocation8 + $0x2c] ss:$16 sps:$4 sm:$0xff]   ;;  %v16140_v17 = vld [vmem:[#allocation8 + $0x28] ss:$16 sps:$4 sm:$0xff]  }
 0x6ec   :  { %8311 = vmatpush2.bf16.msra.mxu1 %v16055_v18  ;;  %8269 = vmatprep.subr.bf16.mxu0 %v16056_v63  ;;  %v16145_v42 = vld [vmem:[#allocation8 + $0x22c] ss:$16 sps:$4 sm:$0xff]   ;;  %v16143_v18 = vld [vmem:[#allocation8 + $0x228] ss:$16 sps:$4 sm:$0xff]  }
 0x6ed   :  { %8312 = vmatprep.subr.bf16.mxu1 %v16058_v19  ;;  %v16148_v63 = vld [vmem:[#allocation8 + $0xc] ss:$16 sps:$4 sm:$0xff]  }
 0x6ee   :  { %v16151_v19 = vld [vmem:[#allocation8 + $0x20c] ss:$16 sps:$4 sm:$0xff]  }
 0x6ef   :  { %8270 = vmatpush2.bf16.msra.mxu0 %v16060_v21  ;;  %v16146_v21 = vld [vmem:[#allocation8 + $0x8] ss:$16 sps:$4 sm:$0xff]  }
 0x6f0   :  { %8313 = vmatpush2.bf16.msra.mxu1 %v16061_v2  ;;  %8271 = vmatprep.subr.bf16.mxu0 %v16062_v7  ;;  %v16149_v2 = vld [vmem:[#allocation8 + $0x208] ss:$16 sps:$4 sm:$0xff]   ;;  %v16154_v7 = vld [vmem:[#allocation8 + $0x1ec] ss:$16 sps:$4 sm:$0xff]  }
 0x6f1   :  { %8314 = vmatprep.subr.bf16.mxu1 %v16064_v58  ;;  %v16157_v58 = vld [vmem:[#allocation8 + $0x3ec] ss:$16 sps:$4 sm:$0xff]  }
 0x6f3   :  { %8272 = vmatpush2.bf16.msra.mxu0 %v16066_v12  ;;  %v16152_v12 = vld [vmem:[#allocation8 + $0x1e8] ss:$16 sps:$4 sm:$0xff]  }
 0x6f4   :  { %8315 = vmatpush2.bf16.msra.mxu1 %v16067_v62  ;;  %8273 = vmatprep.subr.bf16.mxu0 %v16068_v60  ;;  %v16155_v62 = vld [vmem:[#allocation8 + $0x3e8] ss:$16 sps:$4 sm:$0xff]   ;;  %v16160_v60 = vld [vmem:[#allocation8 + $0x1cc] ss:$16 sps:$4 sm:$0xff]  }
 0x6f5   :  { %8316 = vmatprep.subr.bf16.mxu1 %v16070_v6  ;;  %v16163_v6 = vld [vmem:[#allocation8 + $0x3cc] ss:$16 sps:$4 sm:$0xff]  }
 0x6f7   :  { %8274 = vmatpush2.bf16.msra.mxu0 %v16072_v56  ;;  %v16158_v56 = vld [vmem:[#allocation8 + $0x1c8] ss:$16 sps:$4 sm:$0xff]  }
 0x6f8   :  { %8317 = vmatpush2.bf16.msra.mxu1 %v16073_v4  ;;  %8275 = vmatprep.subr.bf16.mxu0 %v16074_v28  ;;  %v16161_v4 = vld [vmem:[#allocation8 + $0x3c8] ss:$16 sps:$4 sm:$0xff]   ;;  %v16166_v28 = vld [vmem:[#allocation8 + $0x1ac] ss:$16 sps:$4 sm:$0xff]  }
 0x6f9   :  { %8318 = vmatprep.subr.bf16.mxu1 %v16076_v9  ;;  %v16164_v9 = vld [vmem:[#allocation8 + $0x1a8] ss:$16 sps:$4 sm:$0xff]  }
 0x6fb   :  { %8276 = vmatpush2.bf16.msra.mxu0 %v16078_v53  ;;  %v16172_v53 = vld [vmem:[#allocation8 + $0x18c] ss:$16 sps:$4 sm:$0xff]  }
 0x6fc   :  { %8319 = vmatpush2.bf16.msra.mxu1 %v16079_v59  ;;  %8277 = vmatprep.subr.bf16.mxu0 %v16080_v3  ;;  %v16175_v59 = vld [vmem:[#allocation8 + $0x38c] ss:$16 sps:$4 sm:$0xff]   ;;  %v16170_v3 = vld [vmem:[#allocation8 + $0x188] ss:$16 sps:$4 sm:$0xff]  }
 0x6fd   :  { %8320 = vmatprep.subr.bf16.mxu1 %v16082_v25  ;;  %v16173_v25 = vld [vmem:[#allocation8 + $0x388] ss:$16 sps:$4 sm:$0xff]  }
 0x6ff   :  { %8278 = vmatpush2.bf16.msra.mxu0 %v16084_v11  ;;  %v16178_v11 = vld [vmem:[#allocation8 + $0x16c] ss:$16 sps:$4 sm:$0xff]  }
 0x700   :  { %8321 = vmatpush2.bf16.msra.mxu1 %v16085_v37  ;;  %8279 = vmatprep.subr.bf16.mxu0 %v16086_v27  ;;  %v16181_v37 = vld [vmem:[#allocation8 + $0x36c] ss:$16 sps:$4 sm:$0xff]   ;;  %v16176_v27 = vld [vmem:[#allocation8 + $0x168] ss:$16 sps:$4 sm:$0xff]  }
 0x701   :  { %8322 = vmatprep.subr.bf16.mxu1 %v16088_v52  ;;  %v16179_v52 = vld [vmem:[#allocation8 + $0x368] ss:$16 sps:$4 sm:$0xff]  }
 0x703   :  { %8280 = vmatpush2.bf16.msra.mxu0 %v16090_v8  ;;  %v16184_v8 = vld [vmem:[#allocation8 + $0x14c] ss:$16 sps:$4 sm:$0xff]  }
 0x704   :  { %8323 = vmatpush2.bf16.msra.mxu1 %v16091_v1  ;;  %8281 = vmatprep.subr.bf16.mxu0 %v16092_v26  ;;  %v16187_v1 = vld [vmem:[#allocation8 + $0x34c] ss:$16 sps:$4 sm:$0xff]   ;;  %v16182_v26 = vld [vmem:[#allocation8 + $0x148] ss:$16 sps:$4 sm:$0xff]  }
 0x705   :  { %8324 = vmatprep.subr.bf16.mxu1 %v16094_v38  ;;  %v16185_v38 = vld [vmem:[#allocation8 + $0x348] ss:$16 sps:$4 sm:$0xff]  }
 0x707   :  { %8282 = vmatpush2.bf16.msra.mxu0 %v16096_v15  ;;  %v16190_v15 = vld [vmem:[#allocation8 + $0x12c] ss:$16 sps:$4 sm:$0xff]  }
 0x708   :  { %8325 = vmatpush2.bf16.msra.mxu1 %v16097_v23  ;;  %8337 = vmatprep.subr.bf16.mxu0 %v16106_v57  ;;  %v16193_v23 = vld [vmem:[#allocation8 + $0x32c] ss:$16 sps:$4 sm:$0xff]   ;;  %v16188_v57 = vld [vmem:[#allocation8 + $0x128] ss:$16 sps:$4 sm:$0xff]  }
 0x709   :  { %8380 = vmatprep.subr.bf16.mxu1 %v16109_v51  ;;  %v16191_v51 = vld [vmem:[#allocation8 + $0x328] ss:$16 sps:$4 sm:$0xff]  }
 0x70a   :  { %8284 = vmatmul.mubr.bf16.vlgmr.msra.gmra.mxu0 %v18011_v39 }
 0x70b   :  { %8327 = vmatmul.mubr.bf16.vlgmr.msra.gmra.mxu1 %v18013_v14  ;;  %8338 = vmatpush1.bf16.msra.mxu0 %v16104_v61  ;;  %v16196_v61 = vld [vmem:[#allocation8 + $0x10c] ss:$16 sps:$4 sm:$0xff]  }
 0x70c   :  { %8381 = vmatpush1.bf16.msra.mxu1 %v16107_v43  ;;  %8339 = vmatprep.subr.bf16.mxu0 %v16112_v10  ;;  %v16199_v43 = vld [vmem:[#allocation8 + $0x30c] ss:$16 sps:$4 sm:$0xff]   ;;  %v16194_v10 = vld [vmem:[#allocation8 + $0x108] ss:$16 sps:$4 sm:$0xff]  }
 0x70d   :  { %8382 = vmatprep.subr.bf16.mxu1 %v16115_v20  ;;  %8369 = vmatprep.mubr.bf16.mxu0 %v16100_v45  ;;  %v16169_v45 = vld [vmem:[#allocation8 + $0x3ac] ss:$16 sps:$4 sm:$0xff]   ;;  %v16197_v20 = vld [vmem:[#allocation8 + $0x308] ss:$16 sps:$4 sm:$0xff]  }
 0x70e   :  { %8412 = vmatprep.mubr.bf16.mxu1 %v16103_v44  ;;  %v16167_v44 = vld [vmem:[#allocation8 + $0x3a8] ss:$16 sps:$4 sm:$0xff]  }
 0x70f   :  { %8340 = vmatpush1.bf16.msra.mxu0 %v16110_v49  ;;  %v18019_v49 = vld [vmem:[#allocation19] sm:$0xf] }
 0x710   :  { %8383 = vmatpush1.bf16.msra.mxu1 %v16113_v33  ;;  %8341 = vmatprep.subr.bf16.mxu0 %v16118_v46  ;;  %v7574_v33 = vrot.slane %v18019_v49, %v17355_v31  ;;  %v7578_v46 = vrot.slane %v18019_v49, %v18651_v55 }
 0x711   :  { %8384 = vmatprep.subr.bf16.mxu1 %v16121_v22 }
 0x713   :  { %8342 = vmatpush1.bf16.msra.mxu0 %v16116_v54 }
 0x714   :  { %8385 = vmatpush1.bf16.msra.mxu1 %v16119_v41  ;;  %8343 = vmatprep.subr.bf16.mxu0 %v16124_v24 }
 0x715   :  { %8386 = vmatprep.subr.bf16.mxu1 %v16127_v36 }
 0x717   :  { %8344 = vmatpush1.bf16.msra.mxu0 %v16122_v16 }
 0x718   :  { %8387 = vmatpush1.bf16.msra.mxu1 %v16125_v34  ;;  %8345 = vmatprep.subr.bf16.mxu0 %v16130_v47 }
 0x719   :  { %8388 = vmatprep.subr.bf16.mxu1 %v16133_v30 }
 0x71b   :  { %8346 = vmatpush1.bf16.msra.mxu0 %v16128_v29 }
 0x71c   :  { %8389 = vmatpush1.bf16.msra.mxu1 %v16131_v48  ;;  %8347 = vmatprep.subr.bf16.mxu0 %v16136_v13 }
 0x71d   :  { %8390 = vmatprep.subr.bf16.mxu1 %v16139_v40 }
 0x71f   :  { %8348 = vmatpush1.bf16.msra.mxu0 %v16134_v0 }
 0x720   :  { %8391 = vmatpush1.bf16.msra.mxu1 %v16137_v5  ;;  %8349 = vmatprep.subr.bf16.mxu0 %v16142_v50 }
 0x721   :  { %8392 = vmatprep.subr.bf16.mxu1 %v16145_v42 }
 0x723   :  { %8350 = vmatpush1.bf16.msra.mxu0 %v16140_v17 }
 0x724   :  { %8393 = vmatpush1.bf16.msra.mxu1 %v16143_v18  ;;  %8351 = vmatprep.subr.bf16.mxu0 %v16148_v63 }
 0x725   :  { %8394 = vmatprep.subr.bf16.mxu1 %v16151_v19 }
 0x727   :  { %8352 = vmatpush1.bf16.msra.mxu0 %v16146_v21 }
 0x728   :  { %8395 = vmatpush1.bf16.msra.mxu1 %v16149_v2  ;;  %8353 = vmatprep.subr.bf16.mxu0 %v16154_v7 }
 0x729   :  { %8396 = vmatprep.subr.bf16.mxu1 %v16157_v58 }
 0x72b   :  { %8354 = vmatpush2.bf16.msra.mxu0 %v16152_v12 }
 0x72c   :  { %8397 = vmatpush2.bf16.msra.mxu1 %v16155_v62  ;;  %8355 = vmatprep.subr.bf16.mxu0 %v16160_v60 }
 0x72d   :  { %8398 = vmatprep.subr.bf16.mxu1 %v16163_v6 }
 0x72f   :  { %8356 = vmatpush2.bf16.msra.mxu0 %v16158_v56 }
 0x730   :  { %8399 = vmatpush2.bf16.msra.mxu1 %v16161_v4  ;;  %8357 = vmatprep.subr.bf16.mxu0 %v16166_v28 }
 0x731   :  { %8400 = vmatprep.subr.bf16.mxu1 %v16169_v45 }
 0x733   :  { %8358 = vmatpush2.bf16.msra.mxu0 %v16164_v9 }
 0x734   :  { %8401 = vmatpush2.bf16.msra.mxu1 %v16167_v44  ;;  %8359 = vmatprep.subr.bf16.mxu0 %v16172_v53 }
 0x735   :  { %8402 = vmatprep.subr.bf16.mxu1 %v16175_v59 }
 0x737   :  { %8360 = vmatpush2.bf16.msra.mxu0 %v16170_v3 }
 0x738   :  { %8403 = vmatpush2.bf16.msra.mxu1 %v16173_v25  ;;  %8361 = vmatprep.subr.bf16.mxu0 %v16178_v11 }
 0x739   :  { %8404 = vmatprep.subr.bf16.mxu1 %v16181_v37 }
 0x73b   :  { %8362 = vmatpush2.bf16.msra.mxu0 %v16176_v27 }
 0x73c   :  { %8405 = vmatpush2.bf16.msra.mxu1 %v16179_v52  ;;  %8363 = vmatprep.subr.bf16.mxu0 %v16184_v8 }
 0x73d   :  { %8406 = vmatprep.subr.bf16.mxu1 %v16187_v1 }
 0x73f   :  { %8364 = vmatpush2.bf16.msra.mxu0 %v16182_v26 }
 0x740   :  { %8407 = vmatpush2.bf16.msra.mxu1 %v16185_v38  ;;  %8365 = vmatprep.subr.bf16.mxu0 %v16190_v15 }
 0x741   :  { %8408 = vmatprep.subr.bf16.mxu1 %v16193_v23 }
 0x743   :  { %8366 = vmatpush2.bf16.msra.mxu0 %v16188_v57 }
 0x744   :  { %8409 = vmatpush2.bf16.msra.mxu1 %v16191_v51  ;;  %8367 = vmatprep.subr.bf16.mxu0 %v16196_v61 }
 0x745   :  { %8410 = vmatprep.subr.bf16.mxu1 %v16199_v43 }
 0x747   :  { %8368 = vmatpush2.bf16.msra.mxu0 %v16194_v10 }
 0x748   :  { %8411 = vmatpush2.bf16.msra.mxu1 %v16197_v20 }
 0x74a   :  { %8370 = vmatmul.mubr.bf16.vlgmr.msra.gmra.mxu0 %v18011_v39 }
 0x74b   :  { %8413 = vmatmul.mubr.bf16.vlgmr.msra.gmra.mxu1 %v18013_v14 }
 0x7ca   :  { %v8285_v22 = vpop.f32.mrf.mxu0 }
 0x7cb   :  { %v8328_v54 = vpop.f32.mrf.mxu1  ;;  %v8286_v41 = vadd.f32 %v8285_v22, %v7574_v33 }
 0x7cc   :  { %v8287_v24 = vpop.f32.mrf.mxu0 }
 0x7cd   :  { %v8330_v36 = vpop.f32.mrf.mxu1  ;;  %v8288_v16 = vadd.f32 %v8287_v24, %v7578_v46  ;;  %v8329_v34 = vadd.f32 %v8328_v54, %v8286_v41 }
 0x7ce   :  { %v8289_v47 = vpop.f32.mrf.mxu0 }
 0x7cf   :  { %v8332_v30 = vpop.f32.mrf.mxu1  ;;  %v8290_v39 = vadd.f32 %v8289_v47, %v7574_v33  ;;  %v8331_v29 = vadd.f32 %v8330_v36, %v8288_v16  ;;  %v18025_v40 = vmax.f32 %v8329_v34, 0.0 }
 0x7d0   :  { %v8291_v14 = vpop.f32.mrf.mxu0 }
 0x7d1   :  { %v8333_v48 = vadd.f32 %v8332_v30, %v8290_v39  ;;  %v8292_v13 = vadd.f32 %v8291_v14, %v7578_v46  ;;  %v8334_v0 = vpop.f32.mrf.mxu1  ;;  %v8424_v42 = vmax.f32 %v8331_v29, 0.0  ;;  %v8467_v19 = vmul.f32 %v18025_v40, %v18025_v40 }
 0x7d3   :  { %v8427_v5 = vmax.f32 %v8333_v48, 0.0  ;;  %v8335_v50 = vadd.f32 %v8334_v0, %v8292_v13  ;;  %v8468_v12 = vmul.f32 %v8424_v42, %v8424_v42 }
 0x7d5   :  { %v8431_v17 = vsel %vm3797_vm9, %v8427_v5, 0.0  ;;  %v8471_v18 = vmul.f32 %v8427_v5, %v8427_v5  ;;  %v8428_v63 = vmax.f32 %v8335_v50, 0.0 }
 0x7d6   :  { %v8432_v21 = vadd.f32 %v8431_v17, %v18025_v40 }
 0x7d7   :  { %v8475_v2 = vsel %vm3797_vm9, %v8471_v18, 0.0  ;;  %v8439_v7 = vsel %vm3797_vm9, %v8428_v63, 0.0  ;;  %v8472_v58 = vmul.f32 %v8428_v63, %v8428_v63 }
 0x7d8   :  { %v8433_v62 = vrot.slane %v8432_v21, 4  ;;  %v8476_v60 = vadd.f32 %v8475_v2, %v8467_v19  ;;  %v8440_v6 = vadd.f32 %v8439_v7, %v8424_v42  ;;  %v7582_v7 = vrot.slane %v18019_v49, %v17358_v32 }
 0x7d9   :  { %v8483_v56 = vsel %vm3797_vm9, %v8472_v58, 0.0  ;;  %v7586_v58 = vrot.slane %v18019_v49, %v17364_v35 }
 0x7da   :  { %v8434_v4 = vadd.f32 %v8433_v62, %v8432_v21  ;;  %v8477_v28 = vrot.slane %v8476_v60, 4  ;;  %v8441_v45 = vrot.slane %v8440_v6, 4  ;;  %v8484_v9 = vadd.f32 %v8483_v56, %v8468_v12 }
 0x7dc   :  { %v8435_v44 = vrot.slane %v8434_v4, 2  ;;  %v8478_v53 = vadd.f32 %v8477_v28, %v8476_v60  ;;  %v8442_v59 = vadd.f32 %v8441_v45, %v8440_v6  ;;  %v8485_v3 = vrot.slane %v8484_v9, 4 }
 0x7de   :  { %v8436_v25 = vadd.f32 %v8435_v44, %v8434_v4  ;;  %v8479_v11 = vrot.slane %v8478_v53, 2  ;;  %v8443_v37 = vrot.slane %v8442_v59, 2  ;;  %v8486_v27 = vadd.f32 %v8485_v3, %v8484_v9 }
 0x7e0   :  { %v8437_v52 = vrot.slane %v8436_v25, 1  ;;  %v8480_v8 = vadd.f32 %v8479_v11, %v8478_v53  ;;  %v8444_v1 = vadd.f32 %v8443_v37, %v8442_v59  ;;  %v8487_v26 = vrot.slane %v8486_v27, 2 }
 0x7e2   :  { %v8438_v38 = vadd.f32 %v8437_v52, %v8436_v25  ;;  %v8481_v15 = vrot.slane %v8480_v8, 1  ;;  %v8445_v23 = vrot.slane %v8444_v1, 1  ;;  %v8488_v57 = vadd.f32 %v8487_v26, %v8486_v27 }
 0x7e4   :  { %v8463_v51 = vmul.f32 0.083333336, %v8438_v38  ;;  %v8482_v61 = vadd.f32 %v8481_v15, %v8480_v8  ;;  %v8446_v43 = vadd.f32 %v8445_v23, %v8444_v1  ;;  %v8489_v10 = vrot.slane %v8488_v57, 1 }
 0x7e6   :  { %v8507_v20 = vmul.f32 0.083333336, %v8482_v61  ;;  %v8511_v33 = vmul.f32 %v8463_v51, %v8463_v51  ;;  %v8464_v46 = vmul.f32 0.083333336, %v8446_v43  ;;  %v8490_v22 = vadd.f32 %v8489_v10, %v8488_v57 }
 0x7e7   :  { %v8523_v29 = vsub.f32 %v18025_v40, %v8463_v51  ;;  %v8527_v14 = vsub.f32 %v8427_v5, %v8463_v51 }
 0x7e8   :  { %v8515_v54 = vsub.f32 %v8507_v20, %v8511_v33  ;;  %v8508_v41 = vmul.f32 0.083333336, %v8490_v22  ;;  %v8512_v24 = vmul.f32 %v8464_v46, %v8464_v46  ;;  %v8524_v48 = vsub.f32 %v8424_v42, %v8464_v46 }
 0x7e9   :  { %v8528_v13 = vsub.f32 %v8428_v63, %v8464_v46 }
 0x7ea   :  { %v8519_v36 = vmax.f32 %v8515_v54, 0.0  ;;  %v8516_v16 = vsub.f32 %v8508_v41, %v8512_v24 }
 0x7ec   :  { %v8531_v34 = vadd.f32 1e-05, %v8519_v36  ;;  %v8520_v47 = vmax.f32 %v8516_v16, 0.0 }
 0x7ee   :  { %16200 = vrsqrt.f32 %v8531_v34  ;;  %v8532_v30 = vadd.f32 1e-05, %v8520_v47 }
 0x7f0   :  { %16202 = vrsqrt.f32 %v8532_v30 }
 0x7fb   :  { %v16201_v39 = vpop.eup %16200 }
 0x7fc   :  { %v8539_v50 = vmul.f32 %v16201_v39, %v8523_v29  ;;  %v8543_v17 = vmul.f32 %v16201_v39, %v8527_v14 }
 0x7fd   :  { %v16203_v0 = vpop.eup %16202 }
 0x7fe   :  { %v8540_v18 = vmul.f32 %v16203_v0, %v8524_v48  ;;  %v8544_v19 = vmul.f32 %v16203_v0, %v8528_v13 }
 0x800   :  { %v14615_v21 = vpack.c.bf16 %v8540_v18, %v8539_v50  ;;  %v14617_v2 = vpack.c.bf16 %v8544_v19, %v8543_v17 }
 0x802   :  { %8571 = vst [vmem:[#allocation5] sm:$0xff] %v14615_v21  ;;  %8573 = vst [vmem:[#allocation5 + $0x8] sm:$0x33] %v14617_v2 }
 0x80a   :  { %v8371_v12 = vpop.f32.mrf.mxu0 }
 0x80b   :  { %v8414_v40 = vpop.f32.mrf.mxu1  ;;  %v8372_v5 = vadd.f32 %v8371_v12, %v7582_v7 }
 0x80c   :  { %v8373_v42 = vpop.f32.mrf.mxu0 }
 0x80d   :  { %v8416_v63 = vpop.f32.mrf.mxu1  ;;  %v8374_v62 = vadd.f32 %v8373_v42, %v7586_v58  ;;  %v8415_v60 = vadd.f32 %v8414_v40, %v8372_v5 }
 0x80e   :  { %v8375_v6 = vpop.f32.mrf.mxu0 }
 0x80f   :  { %v8418_v56 = vpop.f32.mrf.mxu1  ;;  %v8376_v4 = vadd.f32 %v8375_v6, %v7582_v7  ;;  %v8417_v28 = vadd.f32 %v8416_v63, %v8374_v62  ;;  %v18039_v53 = vmax.f32 %v8415_v60, 0.0 }
 0x810   :  { %v8377_v45 = vpop.f32.mrf.mxu0 }
 0x811   :  { %v8419_v9 = vadd.f32 %v8418_v56, %v8376_v4  ;;  %v8378_v44 = vadd.f32 %v8377_v45, %v7586_v58  ;;  %v8420_v59 = vpop.f32.mrf.mxu1  ;;  %v8426_v49 = vmax.f32 %v8417_v28, 0.0  ;;  %v8469_v52 = vmul.f32 %v18039_v53, %v18039_v53 }
 0x813   :  { %v8429_v3 = vmax.f32 %v8419_v9, 0.0  ;;  %v8421_v25 = vadd.f32 %v8420_v59, %v8378_v44  ;;  %v8470_v15 = vmul.f32 %v8426_v49, %v8426_v49 }
 0x815   :  { %v8447_v11 = vsel %vm3797_vm9, %v8429_v3, 0.0  ;;  %v8473_v37 = vmul.f32 %v8429_v3, %v8429_v3  ;;  %v8430_v27 = vmax.f32 %v8421_v25, 0.0 }
 0x816   :  { %v8448_v8 = vadd.f32 %v8447_v11, %v18039_v53 }
 0x817   :  { %v8491_v1 = vsel %vm3797_vm9, %v8473_v37, 0.0  ;;  %v8455_v26 = vsel %vm3797_vm9, %v8430_v27, 0.0  ;;  %v8474_v38 = vmul.f32 %v8430_v27, %v8430_v27 }
 0x818   :  { %v8449_v23 = vrot.slane %v8448_v8, 4  ;;  %v8492_v57 = vadd.f32 %v8491_v1, %v8469_v52  ;;  %v8456_v51 = vadd.f32 %v8455_v26, %v8426_v49 }
 0x819   :  { %v8499_v61 = vsel %vm3797_vm9, %v8474_v38, 0.0 }
 0x81a   :  { %v8450_v43 = vadd.f32 %v8449_v23, %v8448_v8  ;;  %v8493_v10 = vrot.slane %v8492_v57, 4  ;;  %v8457_v20 = vrot.slane %v8456_v51, 4  ;;  %v8500_v33 = vadd.f32 %v8499_v61, %v8470_v15 }
 0x81c   :  { %v8451_v46 = vrot.slane %v8450_v43, 2  ;;  %v8494_v22 = vadd.f32 %v8493_v10, %v8492_v57  ;;  %v8458_v54 = vadd.f32 %v8457_v20, %v8456_v51  ;;  %v8501_v41 = vrot.slane %v8500_v33, 4 }
 0x81e   :  { %v8452_v24 = vadd.f32 %v8451_v46, %v8450_v43  ;;  %v8495_v36 = vrot.slane %v8494_v22, 2  ;;  %v8459_v16 = vrot.slane %v8458_v54, 2  ;;  %v8502_v34 = vadd.f32 %v8501_v41, %v8500_v33 }
 0x820   :  { %v8453_v47 = vrot.slane %v8452_v24, 1  ;;  %v8496_v30 = vadd.f32 %v8495_v36, %v8494_v22  ;;  %v8460_v39 = vadd.f32 %v8459_v16, %v8458_v54  ;;  %v8503_v29 = vrot.slane %v8502_v34, 2 }
 0x822   :  { %v8454_v14 = vadd.f32 %v8453_v47, %v8452_v24  ;;  %v8497_v48 = vrot.slane %v8496_v30, 1  ;;  %v8461_v13 = vrot.slane %v8460_v39, 1  ;;  %v8504_v0 = vadd.f32 %v8503_v29, %v8502_v34 }
 0x824   :  { %v8465_v50 = vmul.f32 0.083333336, %v8454_v14  ;;  %v8498_v17 = vadd.f32 %v8497_v48, %v8496_v30  ;;  %v8462_v18 = vadd.f32 %v8461_v13, %v8460_v39  ;;  %v8505_v19 = vrot.slane %v8504_v0, 1 }
 0x826   :  { %v8509_v21 = vmul.f32 0.083333336, %v8498_v17  ;;  %v8513_v2 = vmul.f32 %v8465_v50, %v8465_v50  ;;  %v8466_v7 = vmul.f32 0.083333336, %v8462_v18  ;;  %v8506_v58 = vadd.f32 %v8505_v19, %v8504_v0 }
 0x827   :  { %v8525_v4 = vsub.f32 %v18039_v53, %v8465_v50  ;;  %v8529_v28 = vsub.f32 %v8429_v3, %v8465_v50 }
 0x828   :  { %v8517_v12 = vsub.f32 %v8509_v21, %v8513_v2  ;;  %v8510_v40 = vmul.f32 0.083333336, %v8506_v58  ;;  %v8514_v5 = vmul.f32 %v8466_v7, %v8466_v7  ;;  %v8526_v45 = vsub.f32 %v8426_v49, %v8466_v7 }
 0x829   :  { %v8530_v9 = vsub.f32 %v8430_v27, %v8466_v7 }
 0x82a   :  { %v8521_v42 = vmax.f32 %v8517_v12, 0.0  ;;  %v8518_v63 = vsub.f32 %v8510_v40, %v8514_v5 }
 0x82c   :  { %v8533_v62 = vadd.f32 1e-05, %v8521_v42  ;;  %v8522_v60 = vmax.f32 %v8518_v63, 0.0 }
 0x82e   :  { %16204 = vrsqrt.f32 %v8533_v62  ;;  %v8534_v6 = vadd.f32 1e-05, %v8522_v60 }
 0x830   :  { %16206 = vrsqrt.f32 %v8534_v6 }
 0x83b   :  { %v16205_v56 = vpop.eup %16204 }
 0x83c   :  { %v8541_v59 = vmul.f32 %v16205_v56, %v8525_v4  ;;  %v8545_v25 = vmul.f32 %v16205_v56, %v8529_v28 }
 0x83d   :  { %v16207_v44 = vpop.eup %16206 }
 0x83e   :  { %v8542_v11 = vmul.f32 %v16207_v44, %v8526_v45  ;;  %v8546_v37 = vmul.f32 %v16207_v44, %v8530_v9 }
 0x840   :  { %v14616_v52 = vpack.c.bf16 %v8542_v11, %v8541_v59  ;;  %v14618_v8 = vpack.c.bf16 %v8546_v37, %v8545_v25 }
 0x842   :  { %8572 = vst [vmem:[#allocation5 + $0x18] sm:$0xff] %v14616_v52  ;;  %8574 = vst [vmem:[#allocation5 + $0x10] sm:$0x33] %v14618_v8 }
 0x843   :  { %17163 = dma.done.wait [#allocation10 + $0x2], 49152 }
 0x844   :  { %17164 = vsyncadd [#allocation10 + $0x2], 4294918144  ;;  %v16208_v1 = vld [vmem:[#allocation9 + $0x2a4] ss:$48 sps:$4 sm:$0xff]   ;;  %v16212_v38 = vld [vmem:[#allocation9 + $0x2a0] ss:$48 sps:$4 sm:$0xff]  }
 0x845   :  { %v16210_v26 = vld [vmem:[#allocation9 + $0x8a4] ss:$48 sps:$4 sm:$0xff]   ;;  %10970 = vmatprep.subr.bf16.mxu0 %v16208_v1  ;;  %v16213_v15 = vld [vmem:[#allocation9 + $0x8a0] ss:$48 sps:$4 sm:$0xff]   ;;  %vm13039_vm12 = vcmask 52224   ;;  %vm13037_vm13 = vcmask 56320  }
 0x846   :  { %11013 = vmatprep.subr.bf16.mxu1 %v16210_v26  ;;  %v16214_v53 = vld [vmem:[#allocation9 + $0x244] ss:$48 sps:$4 sm:$0xff]   ;;  %10971 = vmatpush1.bf16.msra.mxu0 %v16212_v38  ;;  %v16218_v49 = vld [vmem:[#allocation9 + $0x240] ss:$48 sps:$4 sm:$0xff]  }
 0x847   :  { %11014 = vmatpush1.bf16.msra.mxu1 %v16213_v15  ;;  %v16216_v3 = vld [vmem:[#allocation9 + $0x844] ss:$48 sps:$4 sm:$0xff]   ;;  %10972 = vmatprep.subr.bf16.mxu0 %v16214_v53  ;;  %v16219_v27 = vld [vmem:[#allocation9 + $0x840] ss:$48 sps:$4 sm:$0xff]  }
 0x848   :  { %11015 = vmatprep.subr.bf16.mxu1 %v16216_v3  ;;  %v16220_v23 = vld [vmem:[#allocation9 + $0x1e4] ss:$48 sps:$4 sm:$0xff]   ;;  %v16224_v51 = vld [vmem:[#allocation9 + $0x1e0] ss:$48 sps:$4 sm:$0xff]  }
 0x849   :  { %v16222_v57 = vld [vmem:[#allocation9 + $0x7e4] ss:$48 sps:$4 sm:$0xff]   ;;  %v16225_v61 = vld [vmem:[#allocation9 + $0x7e0] ss:$48 sps:$4 sm:$0xff]  }
 0x84a   :  { %10973 = vmatpush1.bf16.msra.mxu0 %v16218_v49  ;;  %v16226_v43 = vld [vmem:[#allocation9 + $0x184] ss:$48 sps:$4 sm:$0xff]   ;;  %v16230_v20 = vld [vmem:[#allocation9 + $0x180] ss:$48 sps:$4 sm:$0xff]  }
 0x84b   :  { %11016 = vmatpush1.bf16.msra.mxu1 %v16219_v27  ;;  %10974 = vmatprep.subr.bf16.mxu0 %v16220_v23  ;;  %v16228_v10 = vld [vmem:[#allocation9 + $0x784] ss:$48 sps:$4 sm:$0xff]   ;;  %v16231_v33 = vld [vmem:[#allocation9 + $0x780] ss:$48 sps:$4 sm:$0xff]   ;;  %v16312_v27 = vld [vmem:[#allocation9 + $0x2ac] ss:$48 sps:$4 sm:$0xff]  }
 0x84c   :  { %11017 = vmatprep.subr.bf16.mxu1 %v16222_v57  ;;  %v16232_v46 = vld [vmem:[#allocation9 + $0x124] ss:$48 sps:$4 sm:$0xff]   ;;  %v16236_v54 = vld [vmem:[#allocation9 + $0x120] ss:$48 sps:$4 sm:$0xff]   ;;  %v16315_v23 = vld [vmem:[#allocation9 + $0x8ac] ss:$48 sps:$4 sm:$0xff]  }
 0x84d   :  { %v16234_v22 = vld [vmem:[#allocation9 + $0x724] ss:$48 sps:$4 sm:$0xff]   ;;  %v16237_v41 = vld [vmem:[#allocation9 + $0x720] ss:$48 sps:$4 sm:$0xff]  }
 0x84e   :  { %10975 = vmatpush1.bf16.msra.mxu0 %v16224_v51  ;;  %v16238_v24 = vld [vmem:[#allocation9 + $0xc4] ss:$48 sps:$4 sm:$0xff]   ;;  %v16242_v16 = vld [vmem:[#allocation9 + $0xc0] ss:$48 sps:$4 sm:$0xff]   ;;  %v16310_v51 = vld [vmem:[#allocation9 + $0x2a8] ss:$48 sps:$4 sm:$0xff]  }
 0x84f   :  { %11018 = vmatpush1.bf16.msra.mxu1 %v16225_v61  ;;  %10976 = vmatprep.subr.bf16.mxu0 %v16226_v43  ;;  %v16240_v36 = vld [vmem:[#allocation9 + $0x6c4] ss:$48 sps:$4 sm:$0xff]   ;;  %v16243_v34 = vld [vmem:[#allocation9 + $0x6c0] ss:$48 sps:$4 sm:$0xff]   ;;  %v16313_v61 = vld [vmem:[#allocation9 + $0x8a8] ss:$48 sps:$4 sm:$0xff]  }
 0x850   :  { %11019 = vmatprep.subr.bf16.mxu1 %v16228_v10  ;;  %v16244_v47 = vld [vmem:[#allocation9 + $0x64] ss:$48 sps:$4 sm:$0xff]   ;;  %v16248_v39 = vld [vmem:[#allocation9 + $0x60] ss:$48 sps:$4 sm:$0xff]   ;;  %v16318_v43 = vld [vmem:[#allocation9 + $0x24c] ss:$48 sps:$4 sm:$0xff]  }
 0x851   :  { %v16246_v30 = vld [vmem:[#allocation9 + $0x664] ss:$48 sps:$4 sm:$0xff]   ;;  %v16249_v29 = vld [vmem:[#allocation9 + $0x660] ss:$48 sps:$4 sm:$0xff]   ;;  %v16321_v10 = vld [vmem:[#allocation9 + $0x84c] ss:$48 sps:$4 sm:$0xff]  }
 0x852   :  { %10977 = vmatpush1.bf16.msra.mxu0 %v16230_v20  ;;  %v16250_v14 = vld [vmem:[#allocation9 + $0x4] ss:$48 sps:$4 sm:$0xff]   ;;  %v16254_v13 = vld [vmem:[#allocation9] ss:$48 sps:$4 sm:$0xff]   ;;  %v16316_v20 = vld [vmem:[#allocation9 + $0x248] ss:$48 sps:$4 sm:$0xff]  }
 0x853   :  { %11020 = vmatpush1.bf16.msra.mxu1 %v16231_v33  ;;  %10978 = vmatprep.subr.bf16.mxu0 %v16232_v46  ;;  %v16252_v48 = vld [vmem:[#allocation9 + $0x604] ss:$48 sps:$4 sm:$0xff]   ;;  %v16255_v0 = vld [vmem:[#allocation9 + $0x600] ss:$48 sps:$4 sm:$0xff]   ;;  %v16319_v33 = vld [vmem:[#allocation9 + $0x848] ss:$48 sps:$4 sm:$0xff]  }
 0x854   :  { %11021 = vmatprep.subr.bf16.mxu1 %v16234_v22  ;;  %v16256_v50 = vld [vmem:[#allocation9 + $0x5a4] ss:$48 sps:$4 sm:$0xff]   ;;  %v16260_v18 = vld [vmem:[#allocation9 + $0x5a0] ss:$48 sps:$4 sm:$0xff]   ;;  %v16324_v46 = vld [vmem:[#allocation9 + $0x1ec] ss:$48 sps:$4 sm:$0xff]  }
 0x855   :  { %v16258_v17 = vld [vmem:[#allocation9 + $0xba4] ss:$48 sps:$4 sm:$0xff]   ;;  %v16261_v19 = vld [vmem:[#allocation9 + $0xba0] ss:$48 sps:$4 sm:$0xff]   ;;  %v16327_v22 = vld [vmem:[#allocation9 + $0x7ec] ss:$48 sps:$4 sm:$0xff]  }
 0x856   :  { %10979 = vmatpush1.bf16.msra.mxu0 %v16236_v54  ;;  %v16262_v21 = vld [vmem:[#allocation9 + $0x544] ss:$48 sps:$4 sm:$0xff]   ;;  %v16266_v7 = vld [vmem:[#allocation9 + $0x540] ss:$48 sps:$4 sm:$0xff]   ;;  %v16322_v54 = vld [vmem:[#allocation9 + $0x1e8] ss:$48 sps:$4 sm:$0xff]  }
 0x857   :  { %11022 = vmatpush1.bf16.msra.mxu1 %v16237_v41  ;;  %10980 = vmatprep.subr.bf16.mxu0 %v16238_v24  ;;  %v16264_v2 = vld [vmem:[#allocation9 + $0xb44] ss:$48 sps:$4 sm:$0xff]   ;;  %v16267_v58 = vld [vmem:[#allocation9 + $0xb40] ss:$48 sps:$4 sm:$0xff]   ;;  %v16325_v41 = vld [vmem:[#allocation9 + $0x7e8] ss:$48 sps:$4 sm:$0xff]  }
 0x858   :  { %11023 = vmatprep.subr.bf16.mxu1 %v16240_v36  ;;  %v16268_v12 = vld [vmem:[#allocation9 + $0x4e4] ss:$48 sps:$4 sm:$0xff]   ;;  %v16272_v5 = vld [vmem:[#allocation9 + $0x4e0] ss:$48 sps:$4 sm:$0xff]   ;;  %v16330_v24 = vld [vmem:[#allocation9 + $0x18c] ss:$48 sps:$4 sm:$0xff]  }
 0x859   :  { %v16270_v40 = vld [vmem:[#allocation9 + $0xae4] ss:$48 sps:$4 sm:$0xff]   ;;  %v16273_v42 = vld [vmem:[#allocation9 + $0xae0] ss:$48 sps:$4 sm:$0xff]   ;;  %v16333_v36 = vld [vmem:[#allocation9 + $0x78c] ss:$48 sps:$4 sm:$0xff]  }
 0x85a   :  { %10981 = vmatpush1.bf16.msra.mxu0 %v16242_v16  ;;  %v16274_v63 = vld [vmem:[#allocation9 + $0x484] ss:$48 sps:$4 sm:$0xff]   ;;  %v16278_v60 = vld [vmem:[#allocation9 + $0x480] ss:$48 sps:$4 sm:$0xff]   ;;  %v16328_v16 = vld [vmem:[#allocation9 + $0x188] ss:$48 sps:$4 sm:$0xff]  }
 0x85b   :  { %11024 = vmatpush1.bf16.msra.mxu1 %v16243_v34  ;;  %10982 = vmatprep.subr.bf16.mxu0 %v16244_v47  ;;  %v16276_v62 = vld [vmem:[#allocation9 + $0xa84] ss:$48 sps:$4 sm:$0xff]   ;;  %v16279_v6 = vld [vmem:[#allocation9 + $0xa80] ss:$48 sps:$4 sm:$0xff]   ;;  %v16331_v34 = vld [vmem:[#allocation9 + $0x788] ss:$48 sps:$4 sm:$0xff]  }
 0x85c   :  { %11025 = vmatprep.subr.bf16.mxu1 %v16246_v30  ;;  %v18049_v56 = vld [vmem:[#allocation5 + $0x4] ss:$8 sps:$4 sm:$0x3f]   ;;  %v18051_v4 = vld [vmem:[#allocation5 + $0x1c] ss:$-8 sps:$4 sm:$0x3f]  }
 0x85d   :  { %v16280_v28 = vld [vmem:[#allocation9 + $0x424] ss:$48 sps:$4 sm:$0xff]   ;;  %11002 = vmatprep.mubr.bf16.mxu0 %v18049_v56  ;;  %11045 = vmatprep.mubr.bf16.mxu1 %v18051_v4  ;;  %v16284_v9 = vld [vmem:[#allocation9 + $0x420] ss:$48 sps:$4 sm:$0xff]   ;;  %v16336_v47 = vld [vmem:[#allocation9 + $0x12c] ss:$48 sps:$4 sm:$0xff]  }
 0x85e   :  { %10983 = vmatpush1.bf16.msra.mxu0 %v16248_v39  ;;  %v16282_v45 = vld [vmem:[#allocation9 + $0xa24] ss:$48 sps:$4 sm:$0xff]   ;;  %v16285_v44 = vld [vmem:[#allocation9 + $0xa20] ss:$48 sps:$4 sm:$0xff]   ;;  %v16339_v30 = vld [vmem:[#allocation9 + $0x72c] ss:$48 sps:$4 sm:$0xff]  }
 0x85f   :  { %11026 = vmatpush1.bf16.msra.mxu1 %v16249_v29  ;;  %10984 = vmatprep.subr.bf16.mxu0 %v16250_v14  ;;  %v16286_v59 = vld [vmem:[#allocation9 + $0x3c4] ss:$48 sps:$4 sm:$0xff]   ;;  %v16290_v11 = vld [vmem:[#allocation9 + $0x3c0] ss:$48 sps:$4 sm:$0xff]   ;;  %v16334_v39 = vld [vmem:[#allocation9 + $0x128] ss:$48 sps:$4 sm:$0xff]  }
 0x860   :  { %11027 = vmatprep.subr.bf16.mxu1 %v16252_v48  ;;  %v16288_v25 = vld [vmem:[#allocation9 + $0x9c4] ss:$48 sps:$4 sm:$0xff]   ;;  %v16291_v37 = vld [vmem:[#allocation9 + $0x9c0] ss:$48 sps:$4 sm:$0xff]   ;;  %v16337_v29 = vld [vmem:[#allocation9 + $0x728] ss:$48 sps:$4 sm:$0xff]  }
 0x861   :  { %v16292_v52 = vld [vmem:[#allocation9 + $0x364] ss:$48 sps:$4 sm:$0xff]   ;;  %v16296_v1 = vld [vmem:[#allocation9 + $0x360] ss:$48 sps:$4 sm:$0xff]   ;;  %v16342_v14 = vld [vmem:[#allocation9 + $0xcc] ss:$48 sps:$4 sm:$0xff]  }
 0x862   :  { %10985 = vmatpush1.bf16.msra.mxu0 %v16254_v13  ;;  %v16294_v8 = vld [vmem:[#allocation9 + $0x964] ss:$48 sps:$4 sm:$0xff]   ;;  %v16297_v26 = vld [vmem:[#allocation9 + $0x960] ss:$48 sps:$4 sm:$0xff]   ;;  %v16345_v48 = vld [vmem:[#allocation9 + $0x6cc] ss:$48 sps:$4 sm:$0xff]  }
 0x863   :  { %11028 = vmatpush1.bf16.msra.mxu1 %v16255_v0  ;;  %10986 = vmatprep.subr.bf16.mxu0 %v16256_v50  ;;  %v16298_v38 = vld [vmem:[#allocation9 + $0x304] ss:$48 sps:$4 sm:$0xff]   ;;  %v16302_v53 = vld [vmem:[#allocation9 + $0x300] ss:$48 sps:$4 sm:$0xff]   ;;  %v16340_v13 = vld [vmem:[#allocation9 + $0xc8] ss:$48 sps:$4 sm:$0xff]  }
 0x864   :  { %11029 = vmatprep.subr.bf16.mxu1 %v16258_v17  ;;  %v16300_v15 = vld [vmem:[#allocation9 + $0x904] ss:$48 sps:$4 sm:$0xff]   ;;  %v16303_v3 = vld [vmem:[#allocation9 + $0x900] ss:$48 sps:$4 sm:$0xff]   ;;  %v16343_v0 = vld [vmem:[#allocation9 + $0x6c8] ss:$48 sps:$4 sm:$0xff]  }
 0x865   :  { %v18055_v49 = vld [vmem:[#allocation5] ss:$8 sps:$4 sm:$0x3f]   ;;  %v18057_v57 = vld [vmem:[#allocation5 + $0x18] ss:$-8 sps:$4 sm:$0x3f]  }
 0x866   :  { %10987 = vmatpush2.bf16.msra.mxu0 %v16260_v18  ;;  %v16348_v50 = vld [vmem:[#allocation9 + $0x6c] ss:$48 sps:$4 sm:$0xff]   ;;  %v16346_v18 = vld [vmem:[#allocation9 + $0x68] ss:$48 sps:$4 sm:$0xff]  }
 0x867   :  { %11030 = vmatpush2.bf16.msra.mxu1 %v16261_v19  ;;  %10988 = vmatprep.subr.bf16.mxu0 %v16262_v21  ;;  %v16351_v17 = vld [vmem:[#allocation9 + $0x66c] ss:$48 sps:$4 sm:$0xff]   ;;  %v16349_v19 = vld [vmem:[#allocation9 + $0x668] ss:$48 sps:$4 sm:$0xff]  }
 0x868   :  { %11031 = vmatprep.subr.bf16.mxu1 %v16264_v2  ;;  %v16354_v21 = vld [vmem:[#allocation9 + $0xc] ss:$48 sps:$4 sm:$0xff]  }
 0x869   :  { %v16357_v2 = vld [vmem:[#allocation9 + $0x60c] ss:$48 sps:$4 sm:$0xff]  }
 0x86a   :  { %10989 = vmatpush2.bf16.msra.mxu0 %v16266_v7  ;;  %v16352_v7 = vld [vmem:[#allocation9 + $0x8] ss:$48 sps:$4 sm:$0xff]  }
 0x86b   :  { %11032 = vmatpush2.bf16.msra.mxu1 %v16267_v58  ;;  %10990 = vmatprep.subr.bf16.mxu0 %v16268_v12  ;;  %v16355_v58 = vld [vmem:[#allocation9 + $0x608] ss:$48 sps:$4 sm:$0xff]   ;;  %v16360_v12 = vld [vmem:[#allocation9 + $0x5ac] ss:$48 sps:$4 sm:$0xff]  }
 0x86c   :  { %11033 = vmatprep.subr.bf16.mxu1 %v16270_v40  ;;  %v16363_v40 = vld [vmem:[#allocation9 + $0xbac] ss:$48 sps:$4 sm:$0xff]  }
 0x86e   :  { %10991 = vmatpush2.bf16.msra.mxu0 %v16272_v5  ;;  %v16358_v5 = vld [vmem:[#allocation9 + $0x5a8] ss:$48 sps:$4 sm:$0xff]  }
 0x86f   :  { %11034 = vmatpush2.bf16.msra.mxu1 %v16273_v42  ;;  %10992 = vmatprep.subr.bf16.mxu0 %v16274_v63  ;;  %v16361_v42 = vld [vmem:[#allocation9 + $0xba8] ss:$48 sps:$4 sm:$0xff]   ;;  %v16366_v63 = vld [vmem:[#allocation9 + $0x54c] ss:$48 sps:$4 sm:$0xff]  }
 0x870   :  { %11035 = vmatprep.subr.bf16.mxu1 %v16276_v62  ;;  %v16369_v62 = vld [vmem:[#allocation9 + $0xb4c] ss:$48 sps:$4 sm:$0xff]  }
 0x872   :  { %10993 = vmatpush2.bf16.msra.mxu0 %v16278_v60  ;;  %v16364_v60 = vld [vmem:[#allocation9 + $0x548] ss:$48 sps:$4 sm:$0xff]  }
 0x873   :  { %11036 = vmatpush2.bf16.msra.mxu1 %v16279_v6  ;;  %10994 = vmatprep.subr.bf16.mxu0 %v16280_v28  ;;  %v16367_v6 = vld [vmem:[#allocation9 + $0xb48] ss:$48 sps:$4 sm:$0xff]   ;;  %v16372_v28 = vld [vmem:[#allocation9 + $0x4ec] ss:$48 sps:$4 sm:$0xff]  }
 0x874   :  { %11037 = vmatprep.subr.bf16.mxu1 %v16282_v45  ;;  %v16375_v45 = vld [vmem:[#allocation9 + $0xaec] ss:$48 sps:$4 sm:$0xff]  }
 0x876   :  { %10995 = vmatpush2.bf16.msra.mxu0 %v16284_v9  ;;  %v16370_v9 = vld [vmem:[#allocation9 + $0x4e8] ss:$48 sps:$4 sm:$0xff]  }
 0x877   :  { %11038 = vmatpush2.bf16.msra.mxu1 %v16285_v44  ;;  %10996 = vmatprep.subr.bf16.mxu0 %v16286_v59  ;;  %v16373_v44 = vld [vmem:[#allocation9 + $0xae8] ss:$48 sps:$4 sm:$0xff]   ;;  %v16378_v59 = vld [vmem:[#allocation9 + $0x48c] ss:$48 sps:$4 sm:$0xff]  }
 0x878   :  { %11039 = vmatprep.subr.bf16.mxu1 %v16288_v25  ;;  %v16381_v25 = vld [vmem:[#allocation9 + $0xa8c] ss:$48 sps:$4 sm:$0xff]  }
 0x87a   :  { %10997 = vmatpush2.bf16.msra.mxu0 %v16290_v11  ;;  %v16376_v11 = vld [vmem:[#allocation9 + $0x488] ss:$48 sps:$4 sm:$0xff]  }
 0x87b   :  { %11040 = vmatpush2.bf16.msra.mxu1 %v16291_v37  ;;  %10998 = vmatprep.subr.bf16.mxu0 %v16292_v52  ;;  %v16379_v37 = vld [vmem:[#allocation9 + $0xa88] ss:$48 sps:$4 sm:$0xff]   ;;  %v16384_v52 = vld [vmem:[#allocation9 + $0x42c] ss:$48 sps:$4 sm:$0xff]  }
 0x87c   :  { %11041 = vmatprep.subr.bf16.mxu1 %v16294_v8  ;;  %v16387_v8 = vld [vmem:[#allocation9 + $0xa2c] ss:$48 sps:$4 sm:$0xff]  }
 0x87e   :  { %10999 = vmatpush2.bf16.msra.mxu0 %v16296_v1  ;;  %v16382_v1 = vld [vmem:[#allocation9 + $0x428] ss:$48 sps:$4 sm:$0xff]  }
 0x87f   :  { %11042 = vmatpush2.bf16.msra.mxu1 %v16297_v26  ;;  %11000 = vmatprep.subr.bf16.mxu0 %v16298_v38  ;;  %v16385_v26 = vld [vmem:[#allocation9 + $0xa28] ss:$48 sps:$4 sm:$0xff]   ;;  %v16390_v38 = vld [vmem:[#allocation9 + $0x3cc] ss:$48 sps:$4 sm:$0xff]  }
 0x880   :  { %11043 = vmatprep.subr.bf16.mxu1 %v16300_v15  ;;  %v16393_v15 = vld [vmem:[#allocation9 + $0x9cc] ss:$48 sps:$4 sm:$0xff]  }
 0x882   :  { %11001 = vmatpush2.bf16.msra.mxu0 %v16302_v53  ;;  %v16388_v53 = vld [vmem:[#allocation9 + $0x3c8] ss:$48 sps:$4 sm:$0xff]  }
 0x883   :  { %11044 = vmatpush2.bf16.msra.mxu1 %v16303_v3  ;;  %11056 = vmatprep.subr.bf16.mxu0 %v16312_v27  ;;  %v16391_v3 = vld [vmem:[#allocation9 + $0x9c8] ss:$48 sps:$4 sm:$0xff]   ;;  %v16396_v27 = vld [vmem:[#allocation9 + $0x36c] ss:$48 sps:$4 sm:$0xff]  }
 0x884   :  { %11099 = vmatprep.subr.bf16.mxu1 %v16315_v23  ;;  %v16399_v23 = vld [vmem:[#allocation9 + $0x96c] ss:$48 sps:$4 sm:$0xff]  }
 0x885   :  { %11003 = vmatmul.mubr.bf16.vlgmr.msra.gmra.mxu0 %v18055_v49 }
 0x886   :  { %11046 = vmatmul.mubr.bf16.vlgmr.msra.gmra.mxu1 %v18057_v57  ;;  %11057 = vmatpush1.bf16.msra.mxu0 %v16310_v51  ;;  %v16394_v51 = vld [vmem:[#allocation9 + $0x368] ss:$48 sps:$4 sm:$0xff]  }
 0x887   :  { %11100 = vmatpush1.bf16.msra.mxu1 %v16313_v61  ;;  %11058 = vmatprep.subr.bf16.mxu0 %v16318_v43  ;;  %v16397_v61 = vld [vmem:[#allocation9 + $0x968] ss:$48 sps:$4 sm:$0xff]   ;;  %v16402_v43 = vld [vmem:[#allocation9 + $0x30c] ss:$48 sps:$4 sm:$0xff]  }
 0x888   :  { %11101 = vmatprep.subr.bf16.mxu1 %v16321_v10  ;;  %11088 = vmatprep.mubr.bf16.mxu0 %v18049_v56  ;;  %v16405_v10 = vld [vmem:[#allocation9 + $0x90c] ss:$48 sps:$4 sm:$0xff]  }
 0x889   :  { %11131 = vmatprep.mubr.bf16.mxu1 %v18051_v4 }
 0x88a   :  { %11059 = vmatpush1.bf16.msra.mxu0 %v16316_v20  ;;  %v16400_v20 = vld [vmem:[#allocation9 + $0x308] ss:$48 sps:$4 sm:$0xff]  }
 0x88b   :  { %11102 = vmatpush1.bf16.msra.mxu1 %v16319_v33  ;;  %11060 = vmatprep.subr.bf16.mxu0 %v16324_v46  ;;  %v16403_v33 = vld [vmem:[#allocation9 + $0x908] ss:$48 sps:$4 sm:$0xff]   ;;  %v16408_v46 = vld [vmem:[#allocation9 + $0x2b4] ss:$48 sps:$4 sm:$0xff]  }
 0x88c   :  { %11103 = vmatprep.subr.bf16.mxu1 %v16327_v22  ;;  %v16411_v22 = vld [vmem:[#allocation9 + $0x8b4] ss:$48 sps:$4 sm:$0xff]  }
 0x88e   :  { %11061 = vmatpush1.bf16.msra.mxu0 %v16322_v54  ;;  %v16406_v54 = vld [vmem:[#allocation9 + $0x2b0] ss:$48 sps:$4 sm:$0xff]  }
 0x88f   :  { %11104 = vmatpush1.bf16.msra.mxu1 %v16325_v41  ;;  %11062 = vmatprep.subr.bf16.mxu0 %v16330_v24  ;;  %v16409_v41 = vld [vmem:[#allocation9 + $0x8b0] ss:$48 sps:$4 sm:$0xff]   ;;  %v16414_v24 = vld [vmem:[#allocation9 + $0x254] ss:$48 sps:$4 sm:$0xff]  }
 0x890   :  { %11105 = vmatprep.subr.bf16.mxu1 %v16333_v36  ;;  %v16417_v36 = vld [vmem:[#allocation9 + $0x854] ss:$48 sps:$4 sm:$0xff]  }
 0x892   :  { %11063 = vmatpush1.bf16.msra.mxu0 %v16328_v16  ;;  %v16412_v16 = vld [vmem:[#allocation9 + $0x250] ss:$48 sps:$4 sm:$0xff]  }
 0x893   :  { %11106 = vmatpush1.bf16.msra.mxu1 %v16331_v34  ;;  %11064 = vmatprep.subr.bf16.mxu0 %v16336_v47  ;;  %v16415_v34 = vld [vmem:[#allocation9 + $0x850] ss:$48 sps:$4 sm:$0xff]   ;;  %v16420_v47 = vld [vmem:[#allocation9 + $0x1f4] ss:$48 sps:$4 sm:$0xff]  }
 0x894   :  { %11107 = vmatprep.subr.bf16.mxu1 %v16339_v30  ;;  %v16423_v30 = vld [vmem:[#allocation9 + $0x7f4] ss:$48 sps:$4 sm:$0xff]  }
 0x896   :  { %11065 = vmatpush1.bf16.msra.mxu0 %v16334_v39  ;;  %v16418_v39 = vld [vmem:[#allocation9 + $0x1f0] ss:$48 sps:$4 sm:$0xff]  }
 0x897   :  { %11108 = vmatpush1.bf16.msra.mxu1 %v16337_v29  ;;  %11066 = vmatprep.subr.bf16.mxu0 %v16342_v14  ;;  %v16421_v29 = vld [vmem:[#allocation9 + $0x7f0] ss:$48 sps:$4 sm:$0xff]   ;;  %v16426_v14 = vld [vmem:[#allocation9 + $0x194] ss:$48 sps:$4 sm:$0xff]  }
 0x898   :  { %11109 = vmatprep.subr.bf16.mxu1 %v16345_v48  ;;  %v16429_v48 = vld [vmem:[#allocation9 + $0x794] ss:$48 sps:$4 sm:$0xff]  }
 0x89a   :  { %11067 = vmatpush1.bf16.msra.mxu0 %v16340_v13  ;;  %v16424_v13 = vld [vmem:[#allocation9 + $0x190] ss:$48 sps:$4 sm:$0xff]  }
 0x89b   :  { %11110 = vmatpush1.bf16.msra.mxu1 %v16343_v0  ;;  %11068 = vmatprep.subr.bf16.mxu0 %v16348_v50  ;;  %v16427_v0 = vld [vmem:[#allocation9 + $0x790] ss:$48 sps:$4 sm:$0xff]   ;;  %v16432_v50 = vld [vmem:[#allocation9 + $0x134] ss:$48 sps:$4 sm:$0xff]  }
 0x89c   :  { %11111 = vmatprep.subr.bf16.mxu1 %v16351_v17  ;;  %v16435_v17 = vld [vmem:[#allocation9 + $0x734] ss:$48 sps:$4 sm:$0xff]  }
 0x89e   :  { %11069 = vmatpush1.bf16.msra.mxu0 %v16346_v18  ;;  %v16430_v18 = vld [vmem:[#allocation9 + $0x130] ss:$48 sps:$4 sm:$0xff]  }
 0x89f   :  { %11112 = vmatpush1.bf16.msra.mxu1 %v16349_v19  ;;  %11070 = vmatprep.subr.bf16.mxu0 %v16354_v21  ;;  %v16441_v19 = vld [vmem:[#allocation9 + $0x6d4] ss:$48 sps:$4 sm:$0xff]   ;;  %v16436_v21 = vld [vmem:[#allocation9 + $0xd0] ss:$48 sps:$4 sm:$0xff]  }
 0x8a0   :  { %11113 = vmatprep.subr.bf16.mxu1 %v16357_v2  ;;  %v16439_v2 = vld [vmem:[#allocation9 + $0x6d0] ss:$48 sps:$4 sm:$0xff]  }
 0x8a2   :  { %11071 = vmatpush1.bf16.msra.mxu0 %v16352_v7  ;;  %v16444_v7 = vld [vmem:[#allocation9 + $0x74] ss:$48 sps:$4 sm:$0xff]  }
 0x8a3   :  { %11114 = vmatpush1.bf16.msra.mxu1 %v16355_v58  ;;  %11072 = vmatprep.subr.bf16.mxu0 %v16360_v12  ;;  %v16447_v58 = vld [vmem:[#allocation9 + $0x674] ss:$48 sps:$4 sm:$0xff]   ;;  %v16442_v12 = vld [vmem:[#allocation9 + $0x70] ss:$48 sps:$4 sm:$0xff]  }
 0x8a4   :  { %11115 = vmatprep.subr.bf16.mxu1 %v16363_v40  ;;  %v16445_v40 = vld [vmem:[#allocation9 + $0x670] ss:$48 sps:$4 sm:$0xff]  }
 0x8a6   :  { %11073 = vmatpush2.bf16.msra.mxu0 %v16358_v5  ;;  %v16450_v5 = vld [vmem:[#allocation9 + $0x14] ss:$48 sps:$4 sm:$0xff]  }
 0x8a7   :  { %11116 = vmatpush2.bf16.msra.mxu1 %v16361_v42  ;;  %11074 = vmatprep.subr.bf16.mxu0 %v16366_v63  ;;  %v16453_v42 = vld [vmem:[#allocation9 + $0x614] ss:$48 sps:$4 sm:$0xff]   ;;  %v16448_v63 = vld [vmem:[#allocation9 + $0x10] ss:$48 sps:$4 sm:$0xff]  }
 0x8a8   :  { %11117 = vmatprep.subr.bf16.mxu1 %v16369_v62  ;;  %v16451_v62 = vld [vmem:[#allocation9 + $0x610] ss:$48 sps:$4 sm:$0xff]  }
 0x8aa   :  { %11075 = vmatpush2.bf16.msra.mxu0 %v16364_v60  ;;  %v16456_v60 = vld [vmem:[#allocation9 + $0x5b4] ss:$48 sps:$4 sm:$0xff]  }
 0x8ab   :  { %11118 = vmatpush2.bf16.msra.mxu1 %v16367_v6  ;;  %11076 = vmatprep.subr.bf16.mxu0 %v16372_v28  ;;  %v16459_v6 = vld [vmem:[#allocation9 + $0xbb4] ss:$48 sps:$4 sm:$0xff]   ;;  %v16454_v28 = vld [vmem:[#allocation9 + $0x5b0] ss:$48 sps:$4 sm:$0xff]  }
 0x8ac   :  { %11119 = vmatprep.subr.bf16.mxu1 %v16375_v45  ;;  %v16457_v45 = vld [vmem:[#allocation9 + $0xbb0] ss:$48 sps:$4 sm:$0xff]  }
 0x8ae   :  { %11077 = vmatpush2.bf16.msra.mxu0 %v16370_v9  ;;  %v16462_v9 = vld [vmem:[#allocation9 + $0x554] ss:$48 sps:$4 sm:$0xff]  }
 0x8af   :  { %11120 = vmatpush2.bf16.msra.mxu1 %v16373_v44  ;;  %11078 = vmatprep.subr.bf16.mxu0 %v16378_v59  ;;  %v16465_v44 = vld [vmem:[#allocation9 + $0xb54] ss:$48 sps:$4 sm:$0xff]   ;;  %v16460_v59 = vld [vmem:[#allocation9 + $0x550] ss:$48 sps:$4 sm:$0xff]  }
 0x8b0   :  { %11121 = vmatprep.subr.bf16.mxu1 %v16381_v25  ;;  %v16463_v25 = vld [vmem:[#allocation9 + $0xb50] ss:$48 sps:$4 sm:$0xff]  }
 0x8b2   :  { %11079 = vmatpush2.bf16.msra.mxu0 %v16376_v11  ;;  %v16468_v11 = vld [vmem:[#allocation9 + $0x4f4] ss:$48 sps:$4 sm:$0xff]  }
 0x8b3   :  { %11122 = vmatpush2.bf16.msra.mxu1 %v16379_v37  ;;  %11080 = vmatprep.subr.bf16.mxu0 %v16384_v52  ;;  %v16471_v37 = vld [vmem:[#allocation9 + $0xaf4] ss:$48 sps:$4 sm:$0xff]   ;;  %v16466_v52 = vld [vmem:[#allocation9 + $0x4f0] ss:$48 sps:$4 sm:$0xff]  }
 0x8b4   :  { %11123 = vmatprep.subr.bf16.mxu1 %v16387_v8  ;;  %v16469_v8 = vld [vmem:[#allocation9 + $0xaf0] ss:$48 sps:$4 sm:$0xff]  }
 0x8b6   :  { %11081 = vmatpush2.bf16.msra.mxu0 %v16382_v1  ;;  %v16474_v1 = vld [vmem:[#allocation9 + $0x494] ss:$48 sps:$4 sm:$0xff]  }
 0x8b7   :  { %11124 = vmatpush2.bf16.msra.mxu1 %v16385_v26  ;;  %11082 = vmatprep.subr.bf16.mxu0 %v16390_v38  ;;  %v16477_v26 = vld [vmem:[#allocation9 + $0xa94] ss:$48 sps:$4 sm:$0xff]   ;;  %v16472_v38 = vld [vmem:[#allocation9 + $0x490] ss:$48 sps:$4 sm:$0xff]  }
 0x8b8   :  { %11125 = vmatprep.subr.bf16.mxu1 %v16393_v15  ;;  %v16475_v15 = vld [vmem:[#allocation9 + $0xa90] ss:$48 sps:$4 sm:$0xff]  }
 0x8ba   :  { %11083 = vmatpush2.bf16.msra.mxu0 %v16388_v53  ;;  %v16480_v53 = vld [vmem:[#allocation9 + $0x434] ss:$48 sps:$4 sm:$0xff]  }
 0x8bb   :  { %11126 = vmatpush2.bf16.msra.mxu1 %v16391_v3  ;;  %11084 = vmatprep.subr.bf16.mxu0 %v16396_v27  ;;  %v16483_v3 = vld [vmem:[#allocation9 + $0xa34] ss:$48 sps:$4 sm:$0xff]   ;;  %v16478_v27 = vld [vmem:[#allocation9 + $0x430] ss:$48 sps:$4 sm:$0xff]  }
 0x8bc   :  { %11127 = vmatprep.subr.bf16.mxu1 %v16399_v23  ;;  %v16481_v23 = vld [vmem:[#allocation9 + $0xa30] ss:$48 sps:$4 sm:$0xff]  }
 0x8be   :  { %11085 = vmatpush2.bf16.msra.mxu0 %v16394_v51  ;;  %v16486_v51 = vld [vmem:[#allocation9 + $0x3d4] ss:$48 sps:$4 sm:$0xff]  }
 0x8bf   :  { %11128 = vmatpush2.bf16.msra.mxu1 %v16397_v61  ;;  %11086 = vmatprep.subr.bf16.mxu0 %v16402_v43  ;;  %v16489_v61 = vld [vmem:[#allocation9 + $0x9d4] ss:$48 sps:$4 sm:$0xff]   ;;  %v16484_v43 = vld [vmem:[#allocation9 + $0x3d0] ss:$48 sps:$4 sm:$0xff]  }
 0x8c0   :  { %11129 = vmatprep.subr.bf16.mxu1 %v16405_v10  ;;  %v16487_v10 = vld [vmem:[#allocation9 + $0x9d0] ss:$48 sps:$4 sm:$0xff]  }
 0x8c2   :  { %11087 = vmatpush2.bf16.msra.mxu0 %v16400_v20  ;;  %v16492_v20 = vld [vmem:[#allocation9 + $0x374] ss:$48 sps:$4 sm:$0xff]  }
 0x8c3   :  { %11130 = vmatpush2.bf16.msra.mxu1 %v16403_v33  ;;  %11142 = vmatprep.subr.bf16.mxu0 %v16408_v46  ;;  %v16495_v33 = vld [vmem:[#allocation9 + $0x974] ss:$48 sps:$4 sm:$0xff]   ;;  %v16490_v46 = vld [vmem:[#allocation9 + $0x370] ss:$48 sps:$4 sm:$0xff]  }
 0x8c4   :  { %11185 = vmatprep.subr.bf16.mxu1 %v16411_v22  ;;  %v16493_v22 = vld [vmem:[#allocation9 + $0x970] ss:$48 sps:$4 sm:$0xff]  }
 0x8c5   :  { %11089 = vmatmul.mubr.bf16.vlgmr.msra.gmra.mxu0 %v18055_v49 }
 0x8c6   :  { %11132 = vmatmul.mubr.bf16.vlgmr.msra.gmra.mxu1 %v18057_v57  ;;  %11143 = vmatpush1.bf16.msra.mxu0 %v16406_v54  ;;  %v16498_v54 = vld [vmem:[#allocation9 + $0x314] ss:$48 sps:$4 sm:$0xff]  }
 0x8c7   :  { %11186 = vmatpush1.bf16.msra.mxu1 %v16409_v41  ;;  %11144 = vmatprep.subr.bf16.mxu0 %v16414_v24  ;;  %v16501_v41 = vld [vmem:[#allocation9 + $0x914] ss:$48 sps:$4 sm:$0xff]   ;;  %v16496_v24 = vld [vmem:[#allocation9 + $0x310] ss:$48 sps:$4 sm:$0xff]  }
 0x8c8   :  { %11187 = vmatprep.subr.bf16.mxu1 %v16417_v36  ;;  %11174 = vmatprep.mubr.bf16.mxu0 %v18049_v56  ;;  %v16433_v56 = vld [vmem:[#allocation9 + $0x730] ss:$48 sps:$4 sm:$0xff]  }
 0x8c9   :  { %11217 = vmatprep.mubr.bf16.mxu1 %v18051_v4  ;;  %v16438_v4 = vld [vmem:[#allocation9 + $0xd4] ss:$48 sps:$4 sm:$0xff]   ;;  %v16499_v36 = vld [vmem:[#allocation9 + $0x910] ss:$48 sps:$4 sm:$0xff]  }
 0x8ca   :  { %11145 = vmatpush1.bf16.msra.mxu0 %v16412_v16  ;;  %v16504_v16 = vld [vmem:[#allocation9 + $0x2bc] ss:$48 sps:$4 sm:$0xff]  }
 0x8cb   :  { %11188 = vmatpush1.bf16.msra.mxu1 %v16415_v34  ;;  %11146 = vmatprep.subr.bf16.mxu0 %v16420_v47  ;;  %v16507_v34 = vld [vmem:[#allocation9 + $0x8bc] ss:$48 sps:$4 sm:$0xff]   ;;  %v16502_v47 = vld [vmem:[#allocation9 + $0x2b8] ss:$48 sps:$4 sm:$0xff]  }
 0x8cc   :  { %11189 = vmatprep.subr.bf16.mxu1 %v16423_v30  ;;  %v16505_v30 = vld [vmem:[#allocation9 + $0x8b8] ss:$48 sps:$4 sm:$0xff]  }
 0x8ce   :  { %11147 = vmatpush1.bf16.msra.mxu0 %v16418_v39  ;;  %v16510_v39 = vld [vmem:[#allocation9 + $0x25c] ss:$48 sps:$4 sm:$0xff]  }
 0x8cf   :  { %11190 = vmatpush1.bf16.msra.mxu1 %v16421_v29  ;;  %11148 = vmatprep.subr.bf16.mxu0 %v16426_v14  ;;  %v16513_v29 = vld [vmem:[#allocation9 + $0x85c] ss:$48 sps:$4 sm:$0xff]   ;;  %v16508_v14 = vld [vmem:[#allocation9 + $0x258] ss:$48 sps:$4 sm:$0xff]  }
 0x8d0   :  { %11191 = vmatprep.subr.bf16.mxu1 %v16429_v48  ;;  %v16511_v48 = vld [vmem:[#allocation9 + $0x858] ss:$48 sps:$4 sm:$0xff]  }
 0x8d2   :  { %11149 = vmatpush1.bf16.msra.mxu0 %v16424_v13  ;;  %v16516_v13 = vld [vmem:[#allocation9 + $0x1fc] ss:$48 sps:$4 sm:$0xff]  }
 0x8d3   :  { %11192 = vmatpush1.bf16.msra.mxu1 %v16427_v0  ;;  %11150 = vmatprep.subr.bf16.mxu0 %v16432_v50  ;;  %v16519_v0 = vld [vmem:[#allocation9 + $0x7fc] ss:$48 sps:$4 sm:$0xff]  }
 0x8d4   :  { %11193 = vmatprep.subr.bf16.mxu1 %v16435_v17  ;;  %v18069_v50 = vld [vmem:[#allocation5 + $0x4] ss:$8 sps:$4 sm:$0x3f]   ;;  %v18072_v17 = vld [vmem:[#allocation5 + $0x1c] ss:$-8 sps:$4 sm:$0x3f]  }
 0x8d6   :  { %11151 = vmatpush1.bf16.msra.mxu0 %v16430_v18  ;;  %v16522_v18 = vld [vmem:[#allocation9 + $0x19c] ss:$48 sps:$4 sm:$0xff]  }
 0x8d7   :  { %11194 = vmatpush1.bf16.msra.mxu1 %v16433_v56  ;;  %11152 = vmatprep.subr.bf16.mxu0 %v16438_v4  ;;  %v16525_v56 = vld [vmem:[#allocation9 + $0x79c] ss:$48 sps:$4 sm:$0xff]   ;;  %v16520_v4 = vld [vmem:[#allocation9 + $0x198] ss:$48 sps:$4 sm:$0xff]  }
 0x8d8   :  { %11195 = vmatprep.subr.bf16.mxu1 %v16441_v19  ;;  %v16523_v19 = vld [vmem:[#allocation9 + $0x798] ss:$48 sps:$4 sm:$0xff]  }
 0x8da   :  { %11153 = vmatpush1.bf16.msra.mxu0 %v16436_v21  ;;  %v16528_v21 = vld [vmem:[#allocation9 + $0x13c] ss:$48 sps:$4 sm:$0xff]  }
 0x8db   :  { %11196 = vmatpush1.bf16.msra.mxu1 %v16439_v2  ;;  %11154 = vmatprep.subr.bf16.mxu0 %v16444_v7  ;;  %v16531_v2 = vld [vmem:[#allocation9 + $0x73c] ss:$48 sps:$4 sm:$0xff]   ;;  %v16526_v7 = vld [vmem:[#allocation9 + $0x138] ss:$48 sps:$4 sm:$0xff]  }
 0x8dc   :  { %11197 = vmatprep.subr.bf16.mxu1 %v16447_v58  ;;  %v16529_v58 = vld [vmem:[#allocation9 + $0x738] ss:$48 sps:$4 sm:$0xff]  }
 0x8de   :  { %11155 = vmatpush1.bf16.msra.mxu0 %v16442_v12  ;;  %v16534_v12 = vld [vmem:[#allocation9 + $0xdc] ss:$48 sps:$4 sm:$0xff]  }
 0x8df   :  { %11198 = vmatpush1.bf16.msra.mxu1 %v16445_v40  ;;  %11156 = vmatprep.subr.bf16.mxu0 %v16450_v5  ;;  %v16537_v40 = vld [vmem:[#allocation9 + $0x6dc] ss:$48 sps:$4 sm:$0xff]   ;;  %v16532_v5 = vld [vmem:[#allocation9 + $0xd8] ss:$48 sps:$4 sm:$0xff]  }
 0x8e0   :  { %11199 = vmatprep.subr.bf16.mxu1 %v16453_v42  ;;  %v16535_v42 = vld [vmem:[#allocation9 + $0x6d8] ss:$48 sps:$4 sm:$0xff]  }
 0x8e2   :  { %11157 = vmatpush1.bf16.msra.mxu0 %v16448_v63  ;;  %v16540_v63 = vld [vmem:[#allocation9 + $0x7c] ss:$48 sps:$4 sm:$0xff]  }
 0x8e3   :  { %11200 = vmatpush1.bf16.msra.mxu1 %v16451_v62  ;;  %11158 = vmatprep.subr.bf16.mxu0 %v16456_v60  ;;  %v16543_v62 = vld [vmem:[#allocation9 + $0x67c] ss:$48 sps:$4 sm:$0xff]   ;;  %v16538_v60 = vld [vmem:[#allocation9 + $0x78] ss:$48 sps:$4 sm:$0xff]  }
 0x8e4   :  { %11201 = vmatprep.subr.bf16.mxu1 %v16459_v6  ;;  %v16541_v6 = vld [vmem:[#allocation9 + $0x678] ss:$48 sps:$4 sm:$0xff]  }
 0x8e6   :  { %11159 = vmatpush2.bf16.msra.mxu0 %v16454_v28  ;;  %v16546_v28 = vld [vmem:[#allocation9 + $0x1c] ss:$48 sps:$4 sm:$0xff]  }
 0x8e7   :  { %11202 = vmatpush2.bf16.msra.mxu1 %v16457_v45  ;;  %11160 = vmatprep.subr.bf16.mxu0 %v16462_v9  ;;  %v16549_v45 = vld [vmem:[#allocation9 + $0x61c] ss:$48 sps:$4 sm:$0xff]   ;;  %v16544_v9 = vld [vmem:[#allocation9 + $0x18] ss:$48 sps:$4 sm:$0xff]  }
 0x8e8   :  { %11203 = vmatprep.subr.bf16.mxu1 %v16465_v44  ;;  %v16547_v44 = vld [vmem:[#allocation9 + $0x618] ss:$48 sps:$4 sm:$0xff]  }
 0x8ea   :  { %11161 = vmatpush2.bf16.msra.mxu0 %v16460_v59  ;;  %v16552_v59 = vld [vmem:[#allocation9 + $0x5bc] ss:$48 sps:$4 sm:$0xff]  }
 0x8eb   :  { %11204 = vmatpush2.bf16.msra.mxu1 %v16463_v25  ;;  %11162 = vmatprep.subr.bf16.mxu0 %v16468_v11  ;;  %v16555_v25 = vld [vmem:[#allocation9 + $0xbbc] ss:$48 sps:$4 sm:$0xff]   ;;  %v16550_v11 = vld [vmem:[#allocation9 + $0x5b8] ss:$48 sps:$4 sm:$0xff]  }
 0x8ec   :  { %11205 = vmatprep.subr.bf16.mxu1 %v16471_v37  ;;  %v16553_v37 = vld [vmem:[#allocation9 + $0xbb8] ss:$48 sps:$4 sm:$0xff]  }
 0x8ee   :  { %11163 = vmatpush2.bf16.msra.mxu0 %v16466_v52  ;;  %v16558_v52 = vld [vmem:[#allocation9 + $0x55c] ss:$48 sps:$4 sm:$0xff]  }
 0x8ef   :  { %11206 = vmatpush2.bf16.msra.mxu1 %v16469_v8  ;;  %11164 = vmatprep.subr.bf16.mxu0 %v16474_v1  ;;  %v16561_v8 = vld [vmem:[#allocation9 + $0xb5c] ss:$48 sps:$4 sm:$0xff]   ;;  %v16556_v1 = vld [vmem:[#allocation9 + $0x558] ss:$48 sps:$4 sm:$0xff]  }
 0x8f0   :  { %11207 = vmatprep.subr.bf16.mxu1 %v16477_v26  ;;  %v16559_v26 = vld [vmem:[#allocation9 + $0xb58] ss:$48 sps:$4 sm:$0xff]  }
 0x8f2   :  { %11165 = vmatpush2.bf16.msra.mxu0 %v16472_v38  ;;  %v16564_v38 = vld [vmem:[#allocation9 + $0x4fc] ss:$48 sps:$4 sm:$0xff]  }
 0x8f3   :  { %11208 = vmatpush2.bf16.msra.mxu1 %v16475_v15  ;;  %11166 = vmatprep.subr.bf16.mxu0 %v16480_v53  ;;  %v16567_v15 = vld [vmem:[#allocation9 + $0xafc] ss:$48 sps:$4 sm:$0xff]   ;;  %v16562_v53 = vld [vmem:[#allocation9 + $0x4f8] ss:$48 sps:$4 sm:$0xff]  }
 0x8f4   :  { %11209 = vmatprep.subr.bf16.mxu1 %v16483_v3  ;;  %v16565_v3 = vld [vmem:[#allocation9 + $0xaf8] ss:$48 sps:$4 sm:$0xff]  }
 0x8f6   :  { %11167 = vmatpush2.bf16.msra.mxu0 %v16478_v27  ;;  %v16570_v27 = vld [vmem:[#allocation9 + $0x49c] ss:$48 sps:$4 sm:$0xff]  }
 0x8f7   :  { %11210 = vmatpush2.bf16.msra.mxu1 %v16481_v23  ;;  %11168 = vmatprep.subr.bf16.mxu0 %v16486_v51  ;;  %v16573_v23 = vld [vmem:[#allocation9 + $0xa9c] ss:$48 sps:$4 sm:$0xff]   ;;  %v16568_v51 = vld [vmem:[#allocation9 + $0x498] ss:$48 sps:$4 sm:$0xff]  }
 0x8f8   :  { %11211 = vmatprep.subr.bf16.mxu1 %v16489_v61  ;;  %v16571_v61 = vld [vmem:[#allocation9 + $0xa98] ss:$48 sps:$4 sm:$0xff]  }
 0x8fa   :  { %11169 = vmatpush2.bf16.msra.mxu0 %v16484_v43  ;;  %v16576_v43 = vld [vmem:[#allocation9 + $0x43c] ss:$48 sps:$4 sm:$0xff]  }
 0x8fb   :  { %11212 = vmatpush2.bf16.msra.mxu1 %v16487_v10  ;;  %11170 = vmatprep.subr.bf16.mxu0 %v16492_v20  ;;  %v16579_v10 = vld [vmem:[#allocation9 + $0xa3c] ss:$48 sps:$4 sm:$0xff]   ;;  %v16574_v20 = vld [vmem:[#allocation9 + $0x438] ss:$48 sps:$4 sm:$0xff]  }
 0x8fc   :  { %11213 = vmatprep.subr.bf16.mxu1 %v16495_v33  ;;  %v16577_v33 = vld [vmem:[#allocation9 + $0xa38] ss:$48 sps:$4 sm:$0xff]  }
 0x8fe   :  { %11171 = vmatpush2.bf16.msra.mxu0 %v16490_v46  ;;  %v16582_v46 = vld [vmem:[#allocation9 + $0x3dc] ss:$48 sps:$4 sm:$0xff]  }
 0x8ff   :  { %11214 = vmatpush2.bf16.msra.mxu1 %v16493_v22  ;;  %11172 = vmatprep.subr.bf16.mxu0 %v16498_v54  ;;  %v16585_v22 = vld [vmem:[#allocation9 + $0x9dc] ss:$48 sps:$4 sm:$0xff]   ;;  %v16580_v54 = vld [vmem:[#allocation9 + $0x3d8] ss:$48 sps:$4 sm:$0xff]  }
 0x900   :  { %11215 = vmatprep.subr.bf16.mxu1 %v16501_v41  ;;  %v16583_v41 = vld [vmem:[#allocation9 + $0x9d8] ss:$48 sps:$4 sm:$0xff]  }
 0x902   :  { %11173 = vmatpush2.bf16.msra.mxu0 %v16496_v24  ;;  %v16588_v24 = vld [vmem:[#allocation9 + $0x37c] ss:$48 sps:$4 sm:$0xff]  }
 0x903   :  { %11216 = vmatpush2.bf16.msra.mxu1 %v16499_v36  ;;  %11228 = vmatprep.subr.bf16.mxu0 %v16504_v16  ;;  %v16591_v36 = vld [vmem:[#allocation9 + $0x97c] ss:$48 sps:$4 sm:$0xff]   ;;  %v16586_v16 = vld [vmem:[#allocation9 + $0x378] ss:$48 sps:$4 sm:$0xff]  }
 0x904   :  { %11271 = vmatprep.subr.bf16.mxu1 %v16507_v34  ;;  %v16589_v34 = vld [vmem:[#allocation9 + $0x978] ss:$48 sps:$4 sm:$0xff]  }
 0x905   :  { %11175 = vmatmul.mubr.bf16.vlgmr.msra.gmra.mxu0 %v18055_v49  ;;  %v16514_v49 = vld [vmem:[#allocation9 + $0x1f8] ss:$48 sps:$4 sm:$0xff]  }
 0x906   :  { %11218 = vmatmul.mubr.bf16.vlgmr.msra.gmra.mxu1 %v18057_v57  ;;  %11229 = vmatpush1.bf16.msra.mxu0 %v16502_v47  ;;  %v16517_v57 = vld [vmem:[#allocation9 + $0x7f8] ss:$48 sps:$4 sm:$0xff]   ;;  %v16594_v47 = vld [vmem:[#allocation9 + $0x31c] ss:$48 sps:$4 sm:$0xff]  }
 0x907   :  { %11272 = vmatpush1.bf16.msra.mxu1 %v16505_v30  ;;  %11230 = vmatprep.subr.bf16.mxu0 %v16510_v39  ;;  %v16597_v30 = vld [vmem:[#allocation9 + $0x91c] ss:$48 sps:$4 sm:$0xff]   ;;  %v16592_v39 = vld [vmem:[#allocation9 + $0x318] ss:$48 sps:$4 sm:$0xff]  }
 0x908   :  { %11273 = vmatprep.subr.bf16.mxu1 %v16513_v29  ;;  %11260 = vmatprep.mubr.bf16.mxu0 %v18069_v50  ;;  %v16595_v29 = vld [vmem:[#allocation9 + $0x918] ss:$48 sps:$4 sm:$0xff]  }
 0x909   :  { %11303 = vmatprep.mubr.bf16.mxu1 %v18072_v17 }
 0x90a   :  { %11231 = vmatpush1.bf16.msra.mxu0 %v16508_v14  ;;  %v18075_v14 = vld [vmem:[#allocation21] sm:$0xff] }
 0x90b   :  { %11274 = vmatpush1.bf16.msra.mxu1 %v16511_v48  ;;  %11232 = vmatprep.subr.bf16.mxu0 %v16516_v13  ;;  %v16600_v48 = vld [vmem:[#allocation9 + $0x2c4] ss:$48 sps:$4 sm:$0xff]  }
 0x90c   :  { %11275 = vmatprep.subr.bf16.mxu1 %v16519_v0  ;;  %v16603_v13 = vld [vmem:[#allocation9 + $0x8c4] ss:$48 sps:$4 sm:$0xff]   ;;  %v8973_v0 = vrot.slane %v18075_v14, %v17355_v31 }
 0x90e   :  { %11233 = vmatpush1.bf16.msra.mxu0 %v16514_v49  ;;  %v16598_v49 = vld [vmem:[#allocation9 + $0x2c0] ss:$48 sps:$4 sm:$0xff]  }
 0x90f   :  { %11276 = vmatpush1.bf16.msra.mxu1 %v16517_v57  ;;  %11234 = vmatprep.subr.bf16.mxu0 %v16522_v18  ;;  %v16601_v57 = vld [vmem:[#allocation9 + $0x8c0] ss:$48 sps:$4 sm:$0xff]   ;;  %v16606_v18 = vld [vmem:[#allocation9 + $0x264] ss:$48 sps:$4 sm:$0xff]  }
 0x910   :  { %11277 = vmatprep.subr.bf16.mxu1 %v16525_v56  ;;  %v16609_v56 = vld [vmem:[#allocation9 + $0x864] ss:$48 sps:$4 sm:$0xff]  }
 0x912   :  { %11235 = vmatpush1.bf16.msra.mxu0 %v16520_v4  ;;  %v8977_v4 = vrot.slane %v18075_v14, %v18651_v55 }
 0x913   :  { %11278 = vmatpush1.bf16.msra.mxu1 %v16523_v19  ;;  %11236 = vmatprep.subr.bf16.mxu0 %v16528_v21  ;;  %v16604_v19 = vld [vmem:[#allocation9 + $0x260] ss:$48 sps:$4 sm:$0xff]  }
 0x914   :  { %11279 = vmatprep.subr.bf16.mxu1 %v16531_v2 }
 0x916   :  { %11237 = vmatpush1.bf16.msra.mxu0 %v16526_v7  ;;  %v18081_v7 = vld [vmem:[#allocation5] ss:$8 sps:$4 sm:$0x3f]  }
 0x917   :  { %11280 = vmatpush1.bf16.msra.mxu1 %v16529_v58  ;;  %11238 = vmatprep.subr.bf16.mxu0 %v16534_v12  ;;  %v18084_v58 = vld [vmem:[#allocation5 + $0x18] ss:$-8 sps:$4 sm:$0x3f]  }
 0x918   :  { %11281 = vmatprep.subr.bf16.mxu1 %v16537_v40  ;;  %v16607_v12 = vld [vmem:[#allocation9 + $0x860] ss:$48 sps:$4 sm:$0xff]  }
 0x91a   :  { %11239 = vmatpush1.bf16.msra.mxu0 %v16532_v5  ;;  %v16612_v5 = vld [vmem:[#allocation9 + $0x204] ss:$48 sps:$4 sm:$0xff]  }
 0x91b   :  { %11282 = vmatpush1.bf16.msra.mxu1 %v16535_v42  ;;  %11240 = vmatprep.subr.bf16.mxu0 %v16540_v63 }
 0x91c   :  { %11283 = vmatprep.subr.bf16.mxu1 %v16543_v62  ;;  %v16615_v62 = vld [vmem:[#allocation9 + $0x804] ss:$48 sps:$4 sm:$0xff]  }
 0x91e   :  { %11241 = vmatpush1.bf16.msra.mxu0 %v16538_v60 }
 0x91f   :  { %11284 = vmatpush1.bf16.msra.mxu1 %v16541_v6  ;;  %11242 = vmatprep.subr.bf16.mxu0 %v16546_v28  ;;  %v16610_v6 = vld [vmem:[#allocation9 + $0x200] ss:$48 sps:$4 sm:$0xff]  }
 0x920   :  { %11285 = vmatprep.subr.bf16.mxu1 %v16549_v45 }
 0x922   :  { %11243 = vmatpush1.bf16.msra.mxu0 %v16544_v9 }
 0x923   :  { %11286 = vmatpush1.bf16.msra.mxu1 %v16547_v44  ;;  %11244 = vmatprep.subr.bf16.mxu0 %v16552_v59  ;;  %v16613_v44 = vld [vmem:[#allocation9 + $0x800] ss:$48 sps:$4 sm:$0xff]  }
 0x924   :  { %11287 = vmatprep.subr.bf16.mxu1 %v16555_v25  ;;  %v16618_v25 = vld [vmem:[#allocation9 + $0x1a4] ss:$48 sps:$4 sm:$0xff]  }
 0x926   :  { %11245 = vmatpush2.bf16.msra.mxu0 %v16550_v11 }
 0x927   :  { %11288 = vmatpush2.bf16.msra.mxu1 %v16553_v37  ;;  %11246 = vmatprep.subr.bf16.mxu0 %v16558_v52  ;;  %v16621_v52 = vld [vmem:[#allocation9 + $0x7a4] ss:$48 sps:$4 sm:$0xff]  }
 0x928   :  { %11289 = vmatprep.subr.bf16.mxu1 %v16561_v8 }
 0x92a   :  { %11247 = vmatpush2.bf16.msra.mxu0 %v16556_v1 }
 0x92b   :  { %11290 = vmatpush2.bf16.msra.mxu1 %v16559_v26  ;;  %11248 = vmatprep.subr.bf16.mxu0 %v16564_v38  ;;  %v16616_v26 = vld [vmem:[#allocation9 + $0x1a0] ss:$48 sps:$4 sm:$0xff]  }
 0x92c   :  { %11291 = vmatprep.subr.bf16.mxu1 %v16567_v15  ;;  %v16619_v38 = vld [vmem:[#allocation9 + $0x7a0] ss:$48 sps:$4 sm:$0xff]   ;;  %v16624_v15 = vld [vmem:[#allocation9 + $0x144] ss:$48 sps:$4 sm:$0xff]  }
 0x92e   :  { %11249 = vmatpush2.bf16.msra.mxu0 %v16562_v53  ;;  %v16627_v53 = vld [vmem:[#allocation9 + $0x744] ss:$48 sps:$4 sm:$0xff]  }
 0x92f   :  { %11292 = vmatpush2.bf16.msra.mxu1 %v16565_v3  ;;  %11250 = vmatprep.subr.bf16.mxu0 %v16570_v27 }
 0x930   :  { %11293 = vmatprep.subr.bf16.mxu1 %v16573_v23 }
 0x932   :  { %11251 = vmatpush2.bf16.msra.mxu0 %v16568_v51 }
 0x933   :  { %11294 = vmatpush2.bf16.msra.mxu1 %v16571_v61  ;;  %11252 = vmatprep.subr.bf16.mxu0 %v16576_v43 }
 0x934   :  { %11295 = vmatprep.subr.bf16.mxu1 %v16579_v10  ;;  %v16622_v10 = vld [vmem:[#allocation9 + $0x140] ss:$48 sps:$4 sm:$0xff]  }
 0x936   :  { %11253 = vmatpush2.bf16.msra.mxu0 %v16574_v20  ;;  %v16625_v20 = vld [vmem:[#allocation9 + $0x740] ss:$48 sps:$4 sm:$0xff]  }
 0x937   :  { %11296 = vmatpush2.bf16.msra.mxu1 %v16577_v33  ;;  %11254 = vmatprep.subr.bf16.mxu0 %v16582_v46 }
 0x938   :  { %11297 = vmatprep.subr.bf16.mxu1 %v16585_v22  ;;  %v16630_v22 = vld [vmem:[#allocation9 + $0xe4] ss:$48 sps:$4 sm:$0xff]  }
 0x93a   :  { %11255 = vmatpush2.bf16.msra.mxu0 %v16580_v54 }
 0x93b   :  { %11298 = vmatpush2.bf16.msra.mxu1 %v16583_v41  ;;  %11256 = vmatprep.subr.bf16.mxu0 %v16588_v24 }
 0x93c   :  { %11299 = vmatprep.subr.bf16.mxu1 %v16591_v36  ;;  %v16633_v36 = vld [vmem:[#allocation9 + $0x6e4] ss:$48 sps:$4 sm:$0xff]  }
 0x93e   :  { %11257 = vmatpush2.bf16.msra.mxu0 %v16586_v16 }
 0x93f   :  { %11300 = vmatpush2.bf16.msra.mxu1 %v16589_v34  ;;  %11258 = vmatprep.subr.bf16.mxu0 %v16594_v47 }
 0x940   :  { %11301 = vmatprep.subr.bf16.mxu1 %v16597_v30 }
 0x942   :  { %11259 = vmatpush2.bf16.msra.mxu0 %v16592_v39 }
 0x943   :  { %11302 = vmatpush2.bf16.msra.mxu1 %v16595_v29  ;;  %11314 = vmatprep.subr.bf16.mxu0 %v16600_v48  ;;  %v16628_v29 = vld [vmem:[#allocation9 + $0xe0] ss:$48 sps:$4 sm:$0xff]  }
 0x944   :  { %11357 = vmatprep.subr.bf16.mxu1 %v16603_v13  ;;  %v16631_v48 = vld [vmem:[#allocation9 + $0x6e0] ss:$48 sps:$4 sm:$0xff]  }
 0x945   :  { %v11004_v21 = vpop.f32.mrf.mxu0  ;;  %11261 = vmatmul.mubr.bf16.vlgmr.msra.gmra.mxu0 %v18081_v7 }
 0x946   :  { %v11047_v2 = vpop.f32.mrf.mxu1  ;;  %11304 = vmatmul.mubr.bf16.vlgmr.msra.gmra.mxu1 %v18084_v58  ;;  %v11005_v40 = vadd.f32 %v11004_v21, %v8973_v0  ;;  %11315 = vmatpush1.bf16.msra.mxu0 %v16598_v49 }
 0x947   :  { %11358 = vmatpush1.bf16.msra.mxu1 %v16601_v57  ;;  %v11006_v42 = vpop.f32.mrf.mxu0  ;;  %11316 = vmatprep.subr.bf16.mxu0 %v16606_v18  ;;  %v16636_v18 = vld [vmem:[#allocation9 + $0x84] ss:$48 sps:$4 sm:$0xff]  }
 0x948   :  { %v11049_v63 = vpop.f32.mrf.mxu1  ;;  %11359 = vmatprep.subr.bf16.mxu1 %v16609_v56  ;;  %v11007_v60 = vadd.f32 %v11006_v42, %v8977_v4  ;;  %11346 = vmatprep.mubr.bf16.mxu0 %v18069_v50  ;;  %v11048_v28 = vadd.f32 %v11047_v2, %v11005_v40  ;;  %v16639_v2 = vld [vmem:[#allocation9 + $0x684] ss:$48 sps:$4 sm:$0xff]   ;;  %v16637_v40 = vld [vmem:[#allocation9 + $0x680] ss:$48 sps:$4 sm:$0xff]  }
 0x949   :  { %11389 = vmatprep.mubr.bf16.mxu1 %v18072_v17  ;;  %v11008_v45 = vpop.f32.mrf.mxu0 }
 0x94a   :  { %v11051_v9 = vpop.f32.mrf.mxu1  ;;  %v11009_v59 = vadd.f32 %v11008_v45, %v8973_v0  ;;  %11317 = vmatpush1.bf16.msra.mxu0 %v16604_v19  ;;  %v11050_v11 = vadd.f32 %v11049_v63, %v11007_v60  ;;  %v18089_v50 = vmax.f32 %v11048_v28, 0.0  ;;  %v16642_v60 = vld [vmem:[#allocation9 + $0x24] ss:$48 sps:$4 sm:$0xff]  }
 0x94b   :  { %11360 = vmatpush1.bf16.msra.mxu1 %v16607_v12  ;;  %v11010_v37 = vpop.f32.mrf.mxu0  ;;  %11318 = vmatprep.subr.bf16.mxu0 %v16612_v5  ;;  %v16634_v12 = vld [vmem:[#allocation9 + $0x80] ss:$48 sps:$4 sm:$0xff]  }
 0x94c   :  { %11361 = vmatprep.subr.bf16.mxu1 %v16615_v62  ;;  %v11052_v8 = vadd.f32 %v11051_v9, %v11009_v59  ;;  %v11011_v1 = vadd.f32 %v11010_v37, %v8977_v4  ;;  %v11053_v17 = vpop.f32.mrf.mxu1  ;;  %v18093_v23 = vmax.f32 %v11050_v11, 0.0  ;;  %v11618_v33 = vmul.f32 %v18089_v50, %v18089_v50  ;;  %v16640_v59 = vld [vmem:[#allocation9 + $0x20] ss:$48 sps:$4 sm:$0xff]  }
 0x94e   :  { %v18091_v3 = vmax.f32 %v11052_v8, 0.0  ;;  %v11054_v27 = vadd.f32 %v11053_v17, %v11011_v1  ;;  %11319 = vmatpush1.bf16.msra.mxu0 %v16610_v6  ;;  %v11619_v16 = vmul.f32 %v18093_v23, %v18093_v23  ;;  %v16648_v1 = vld [vmem:[#allocation9 + $0x5c4] ss:$48 sps:$4 sm:$0xff]  }
 0x94f   :  { %11362 = vmatpush1.bf16.msra.mxu1 %v16613_v44  ;;  %11320 = vmatprep.subr.bf16.mxu0 %v16618_v25  ;;  %v16645_v44 = vld [vmem:[#allocation9 + $0x624] ss:$48 sps:$4 sm:$0xff]   ;;  %v16643_v25 = vld [vmem:[#allocation9 + $0x620] ss:$48 sps:$4 sm:$0xff]  }
 0x950   :  { %11363 = vmatprep.subr.bf16.mxu1 %v16621_v52  ;;  %v11510_v51 = vsel %vm3797_vm9, %v18091_v3, 0.0  ;;  %v11630_v61 = vmul.f32 %v18091_v3, %v18091_v3  ;;  %v18099_v43 = vmax.f32 %v11054_v27, 0.0  ;;  %v16646_v27 = vld [vmem:[#allocation9 + $0x5c0] ss:$48 sps:$4 sm:$0xff]  }
 0x951   :  { %v11511_v46 = vadd.f32 %v11510_v51, %v18089_v50  ;;  %v16649_v51 = vld [vmem:[#allocation9 + $0xbc0] ss:$48 sps:$4 sm:$0xff]  }
 0x952   :  { %v11642_v54 = vsel %vm3797_vm9, %v11630_v61, 0.0  ;;  %v11518_v41 = vsel %vm3797_vm9, %v18099_v43, 0.0  ;;  %v11631_v24 = vmul.f32 %v18099_v43, %v18099_v43  ;;  %11321 = vmatpush1.bf16.msra.mxu0 %v16616_v26  ;;  %v16651_v26 = vld [vmem:[#allocation9 + $0xbc4] ss:$48 sps:$4 sm:$0xff]  }
 0x953   :  { %11364 = vmatpush1.bf16.msra.mxu1 %v16619_v38  ;;  %v11512_v34 = vrot.slane %v11511_v46, 4  ;;  %v11643_v47 = vadd.f32 %v11642_v54, %v11618_v33  ;;  %v11519_v30 = vadd.f32 %v11518_v41, %v18093_v23  ;;  %11322 = vmatprep.subr.bf16.mxu0 %v16624_v15 }
 0x954   :  { %11365 = vmatprep.subr.bf16.mxu1 %v16627_v53  ;;  %v11650_v39 = vsel %vm3797_vm9, %v11631_v24, 0.0 }
 0x955   :  { %v11513_v13 = vadd.f32 %v11512_v34, %v11511_v46  ;;  %v11644_v0 = vrot.slane %v11643_v47, 4  ;;  %v11520_v49 = vrot.slane %v11519_v30, 4  ;;  %v11651_v57 = vadd.f32 %v11650_v39, %v11619_v16  ;;  %v16655_v16 = vld [vmem:[#allocation9 + $0xb60] ss:$48 sps:$4 sm:$0xff]  }
 0x956   :  { %11323 = vmatpush1.bf16.msra.mxu0 %v16622_v10 }
 0x957   :  { %11366 = vmatpush1.bf16.msra.mxu1 %v16625_v20  ;;  %v11514_v56 = vrot.slane %v11513_v13, 2  ;;  %v11645_v4 = vadd.f32 %v11644_v0, %v11643_v47  ;;  %v11521_v19 = vadd.f32 %v11520_v49, %v11519_v30  ;;  %v11652_v21 = vrot.slane %v11651_v57, 4  ;;  %11324 = vmatprep.subr.bf16.mxu0 %v16630_v22  ;;  %v16654_v20 = vld [vmem:[#allocation9 + $0x564] ss:$48 sps:$4 sm:$0xff]   ;;  %v16661_v0 = vld [vmem:[#allocation9 + $0xb00] ss:$48 sps:$4 sm:$0xff]  }
 0x958   :  { %11367 = vmatprep.subr.bf16.mxu1 %v16633_v36  ;;  %v16657_v22 = vld [vmem:[#allocation9 + $0xb64] ss:$48 sps:$4 sm:$0xff]   ;;  %v16652_v36 = vld [vmem:[#allocation9 + $0x560] ss:$48 sps:$4 sm:$0xff]  }
 0x959   :  { %v11515_v5 = vadd.f32 %v11514_v56, %v11513_v13  ;;  %v11646_v42 = vrot.slane %v11645_v4, 2  ;;  %v11522_v63 = vrot.slane %v11521_v19, 2  ;;  %v11653_v62 = vadd.f32 %v11652_v21, %v11651_v57  ;;  %v16660_v47 = vld [vmem:[#allocation9 + $0x504] ss:$48 sps:$4 sm:$0xff]   ;;  %v16658_v13 = vld [vmem:[#allocation9 + $0x500] ss:$48 sps:$4 sm:$0xff]  }
 0x95a   :  { %11325 = vmatpush1.bf16.msra.mxu0 %v16628_v29  ;;  %v16663_v29 = vld [vmem:[#allocation9 + $0xb04] ss:$48 sps:$4 sm:$0xff]   ;;  %v16664_v56 = vld [vmem:[#allocation9 + $0x4a0] ss:$48 sps:$4 sm:$0xff]  }
 0x95b   :  { %11368 = vmatpush1.bf16.msra.mxu1 %v16631_v48  ;;  %v11516_v6 = vrot.slane %v11515_v5, 1  ;;  %v11647_v28 = vadd.f32 %v11646_v42, %v11645_v4  ;;  %v11523_v45 = vadd.f32 %v11522_v63, %v11521_v19  ;;  %v11654_v9 = vrot.slane %v11653_v62, 2  ;;  %11326 = vmatprep.subr.bf16.mxu0 %v16636_v18  ;;  %v16666_v49 = vld [vmem:[#allocation9 + $0x4a4] ss:$48 sps:$4 sm:$0xff]   ;;  %v16667_v4 = vld [vmem:[#allocation9 + $0xaa0] ss:$48 sps:$4 sm:$0xff]  }
 0x95c   :  { %11369 = vmatprep.subr.bf16.mxu1 %v16639_v2  ;;  %v16669_v18 = vld [vmem:[#allocation9 + $0xaa4] ss:$48 sps:$4 sm:$0xff]   ;;  %v16670_v2 = vld [vmem:[#allocation9 + $0x440] ss:$48 sps:$4 sm:$0xff]  }
 0x95d   :  { %v11517_v11 = vadd.f32 %v11516_v6, %v11515_v5  ;;  %v11648_v37 = vrot.slane %v11647_v28, 1  ;;  %v11524_v52 = vrot.slane %v11523_v45, 1  ;;  %v11655_v8 = vadd.f32 %v11654_v9, %v11653_v62  ;;  %v16672_v19 = vld [vmem:[#allocation9 + $0x444] ss:$48 sps:$4 sm:$0xff]   ;;  %v16676_v42 = vld [vmem:[#allocation9 + $0x3e0] ss:$48 sps:$4 sm:$0xff]  }
 0x95e   :  { %11327 = vmatpush1.bf16.msra.mxu0 %v16634_v12  ;;  %v16675_v21 = vld [vmem:[#allocation9 + $0xa44] ss:$48 sps:$4 sm:$0xff]   ;;  %v16673_v12 = vld [vmem:[#allocation9 + $0xa40] ss:$48 sps:$4 sm:$0xff]  }
 0x95f   :  { %11370 = vmatpush1.bf16.msra.mxu1 %v16637_v40  ;;  %v18113_v38 = vmul.f32 0.083333336, %v11517_v11  ;;  %v11649_v17 = vadd.f32 %v11648_v37, %v11647_v28  ;;  %v11525_v15 = vadd.f32 %v11524_v52, %v11523_v45  ;;  %v11656_v53 = vrot.slane %v11655_v8, 1  ;;  %11328 = vmatprep.subr.bf16.mxu0 %v16642_v60  ;;  %v16678_v40 = vld [vmem:[#allocation9 + $0x3e4] ss:$48 sps:$4 sm:$0xff]  }
 0x960   :  { %11371 = vmatprep.subr.bf16.mxu1 %v16645_v44  ;;  %v16681_v5 = vld [vmem:[#allocation9 + $0x9e4] ss:$48 sps:$4 sm:$0xff]   ;;  %v16679_v63 = vld [vmem:[#allocation9 + $0x9e0] ss:$48 sps:$4 sm:$0xff]  }
 0x961   :  { %v11738_v61 = vmul.f32 0.083333336, %v11649_v17  ;;  %v11750_v10 = vmul.f32 %v18113_v38, %v18113_v38  ;;  %v18117_v33 = vmul.f32 0.083333336, %v11525_v15  ;;  %v11657_v46 = vadd.f32 %v11656_v53, %v11655_v8  ;;  %v16684_v62 = vld [vmem:[#allocation9 + $0x384] ss:$48 sps:$4 sm:$0xff]  }
 0x962   :  { %11329 = vmatpush1.bf16.msra.mxu0 %v16640_v59  ;;  %v11786_v6 = vsub.f32 %v18089_v50, %v18113_v38  ;;  %v16687_v28 = vld [vmem:[#allocation9 + $0x984] ss:$48 sps:$4 sm:$0xff]   ;;  %v11798_v45 = vsub.f32 %v18091_v3, %v18113_v38  ;;  %v16682_v59 = vld [vmem:[#allocation9 + $0x380] ss:$48 sps:$4 sm:$0xff]   ;;  %v16696_v17 = vld [vmem:[#allocation9 + $0x2cc] ss:$48 sps:$4 sm:$0xff]  }
 0x963   :  { %11372 = vmatpush1.bf16.msra.mxu1 %v16643_v25  ;;  %v11762_v54 = vsub.f32 %v11738_v61, %v11750_v10  ;;  %11330 = vmatprep.subr.bf16.mxu0 %v16648_v1  ;;  %v11739_v41 = vmul.f32 0.083333336, %v11657_v46  ;;  %v11751_v24 = vmul.f32 %v18117_v33, %v18117_v33  ;;  %v11787_v9 = vsub.f32 %v18093_v23, %v18117_v33  ;;  %v16685_v25 = vld [vmem:[#allocation9 + $0x980] ss:$48 sps:$4 sm:$0xff]   ;;  %v16690_v52 = vld [vmem:[#allocation9 + $0x324] ss:$48 sps:$4 sm:$0xff]  }
 0x964   :  { %11373 = vmatprep.subr.bf16.mxu1 %v16651_v26  ;;  %v11799_v44 = vsub.f32 %v18099_v43, %v18117_v33  ;;  %v16693_v26 = vld [vmem:[#allocation9 + $0x924] ss:$48 sps:$4 sm:$0xff]   ;;  %v16688_v23 = vld [vmem:[#allocation9 + $0x320] ss:$48 sps:$4 sm:$0xff]   ;;  %v16699_v15 = vld [vmem:[#allocation9 + $0x8cc] ss:$48 sps:$4 sm:$0xff]   ;;  %v8981_v10 = vrot.slane %v18075_v14, %v17358_v32 }
 0x965   :  { %v11774_v34 = vmax.f32 %v11762_v54, 0.0  ;;  %v11763_v30 = vsub.f32 %v11739_v41, %v11751_v24  ;;  %v16691_v43 = vld [vmem:[#allocation9 + $0x920] ss:$48 sps:$4 sm:$0xff]   ;;  %v16694_v53 = vld [vmem:[#allocation9 + $0x2c8] ss:$48 sps:$4 sm:$0xff]  }
 0x966   :  { %11331 = vmatpush2.bf16.msra.mxu0 %v16646_v27  ;;  %v16697_v27 = vld [vmem:[#allocation9 + $0x8c8] ss:$48 sps:$4 sm:$0xff]   ;;  %v16705_v61 = vld [vmem:[#allocation9 + $0x86c] ss:$48 sps:$4 sm:$0xff]  }
 0x967   :  { %11374 = vmatpush2.bf16.msra.mxu1 %v16649_v51  ;;  %v11810_v39 = vadd.f32 1e-05, %v11774_v34  ;;  %11332 = vmatprep.subr.bf16.mxu0 %v16654_v20  ;;  %v11775_v48 = vmax.f32 %v11763_v30, 0.0  ;;  %v16702_v51 = vld [vmem:[#allocation9 + $0x26c] ss:$48 sps:$4 sm:$0xff]   ;;  %v8985_v20 = vrot.slane %v18075_v14, %v17364_v35 }
 0x968   :  { %11375 = vmatprep.subr.bf16.mxu1 %v16657_v22  ;;  %v16700_v33 = vld [vmem:[#allocation9 + $0x268] ss:$48 sps:$4 sm:$0xff]   ;;  %v16708_v41 = vld [vmem:[#allocation9 + $0x20c] ss:$48 sps:$4 sm:$0xff]  }
 0x969   :  { %16886 = vrsqrt.f32 %v11810_v39  ;;  %v11811_v57 = vadd.f32 1e-05, %v11775_v48  ;;  %v16703_v46 = vld [vmem:[#allocation9 + $0x868] ss:$48 sps:$4 sm:$0xff]   ;;  %v16711_v24 = vld [vmem:[#allocation9 + $0x80c] ss:$48 sps:$4 sm:$0xff]  }
 0x96a   :  { %11333 = vmatpush2.bf16.msra.mxu0 %v16652_v36  ;;  %v16706_v14 = vld [vmem:[#allocation9 + $0x208] ss:$48 sps:$4 sm:$0xff]   ;;  %v16925_v48 = vld [vmem:[#allocation5 + $0x1c] ss:$-8 sps:$4 sm:$0x3f]  }
 0x96b   :  { %11376 = vmatpush2.bf16.msra.mxu1 %v16655_v16  ;;  %11334 = vmatprep.subr.bf16.mxu0 %v16660_v47  ;;  %16888 = vrsqrt.f32 %v11811_v57  ;;  %v16709_v39 = vld [vmem:[#allocation9 + $0x808] ss:$48 sps:$4 sm:$0xff]   ;;  %v16717_v57 = vld [vmem:[#allocation9 + $0x7ac] ss:$48 sps:$4 sm:$0xff]  }
 0x96c   :  { %11377 = vmatprep.subr.bf16.mxu1 %v16663_v29  ;;  %v16924_v29 = vld [vmem:[#allocation5 + $0x4] ss:$8 sps:$4 sm:$0x3f]  }
 0x96e   :  { %11335 = vmatpush2.bf16.msra.mxu0 %v16658_v13 }
 0x96f   :  { %11378 = vmatpush2.bf16.msra.mxu1 %v16661_v0  ;;  %11336 = vmatprep.subr.bf16.mxu0 %v16666_v49 }
 0x970   :  { %11379 = vmatprep.subr.bf16.mxu1 %v16669_v18 }
 0x972   :  { %11337 = vmatpush2.bf16.msra.mxu0 %v16664_v56 }
 0x973   :  { %11380 = vmatpush2.bf16.msra.mxu1 %v16667_v4  ;;  %11338 = vmatprep.subr.bf16.mxu0 %v16672_v19 }
 0x974   :  { %11381 = vmatprep.subr.bf16.mxu1 %v16675_v21  ;;  %v16712_v21 = vld [vmem:[#allocation9 + $0x1a8] ss:$48 sps:$4 sm:$0xff]  }
 0x976   :  { %v16887_v60 = vpop.eup %16886  ;;  %11339 = vmatpush2.bf16.msra.mxu0 %v16670_v2  ;;  %v16715_v2 = vld [vmem:[#allocation9 + $0x7a8] ss:$48 sps:$4 sm:$0xff]  }
 0x977   :  { %11382 = vmatpush2.bf16.msra.mxu1 %v16673_v12  ;;  %11340 = vmatprep.subr.bf16.mxu0 %v16678_v40  ;;  %v11834_v37 = vmul.f32 %v16887_v60, %v11786_v6  ;;  %v11846_v8 = vmul.f32 %v16887_v60, %v11798_v45  ;;  %v16720_v40 = vld [vmem:[#allocation9 + $0x14c] ss:$48 sps:$4 sm:$0xff]   ;;  %v16718_v45 = vld [vmem:[#allocation9 + $0x148] ss:$48 sps:$4 sm:$0xff]  }
 0x978   :  { %11383 = vmatprep.subr.bf16.mxu1 %v16681_v5  ;;  %v16889_v11 = vpop.eup %16888  ;;  %v16723_v5 = vld [vmem:[#allocation9 + $0x74c] ss:$48 sps:$4 sm:$0xff]  }
 0x979   :  { %v11835_v1 = vmul.f32 %v16889_v11, %v11787_v9  ;;  %v11847_v50 = vmul.f32 %v16889_v11, %v11799_v44  ;;  %v16721_v9 = vld [vmem:[#allocation9 + $0x748] ss:$48 sps:$4 sm:$0xff]   ;;  %v16729_v11 = vld [vmem:[#allocation9 + $0x6ec] ss:$48 sps:$4 sm:$0xff]  }
 0x97a   :  { %11341 = vmatpush2.bf16.msra.mxu0 %v16676_v42 }
 0x97b   :  { %11384 = vmatpush2.bf16.msra.mxu1 %v16679_v63  ;;  %11342 = vmatprep.subr.bf16.mxu0 %v16684_v62  ;;  %v18129_v3 = vpack.c.bf16 %v11835_v1, %v11834_v37  ;;  %v14625_v38 = vpack.c.bf16 %v11847_v50, %v11846_v8 }
 0x97c   :  { %11385 = vmatprep.subr.bf16.mxu1 %v16687_v28 }
 0x97d   :  { %11936 = vst [vmem:[#allocation6 + $0x10] sm:$0x33] %v14625_v38 }
 0x97e   :  { %11343 = vmatpush2.bf16.msra.mxu0 %v16682_v59 }
 0x97f   :  { %11386 = vmatpush2.bf16.msra.mxu1 %v16685_v25  ;;  %11344 = vmatprep.subr.bf16.mxu0 %v16690_v52  ;;  %v16726_v25 = vld [vmem:[#allocation9 + $0xec] ss:$48 sps:$4 sm:$0xff]  }
 0x980   :  { %11387 = vmatprep.subr.bf16.mxu1 %v16693_v26 }
 0x982   :  { %11345 = vmatpush2.bf16.msra.mxu0 %v16688_v23 }
 0x983   :  { %11388 = vmatpush2.bf16.msra.mxu1 %v16691_v43  ;;  %11400 = vmatprep.subr.bf16.mxu0 %v16696_v17  ;;  %v16724_v43 = vld [vmem:[#allocation9 + $0xe8] ss:$48 sps:$4 sm:$0xff]  }
 0x984   :  { %11443 = vmatprep.subr.bf16.mxu1 %v16699_v15  ;;  %v16727_v17 = vld [vmem:[#allocation9 + $0x6e8] ss:$48 sps:$4 sm:$0xff]  }
 0x985   :  { %v11090_v22 = vpop.f32.mrf.mxu0  ;;  %11347 = vmatmul.mubr.bf16.vlgmr.msra.gmra.mxu0 %v18081_v7 }
 0x986   :  { %v11133_v54 = vpop.f32.mrf.mxu1  ;;  %11390 = vmatmul.mubr.bf16.vlgmr.msra.gmra.mxu1 %v18084_v58  ;;  %v11091_v36 = vadd.f32 %v11090_v22, %v8981_v10  ;;  %11401 = vmatpush1.bf16.msra.mxu0 %v16694_v53  ;;  %v16714_v58 = vld [vmem:[#allocation9 + $0x1ac] ss:$48 sps:$4 sm:$0xff]  }
 0x987   :  { %11444 = vmatpush1.bf16.msra.mxu1 %v16697_v27  ;;  %v11092_v16 = vpop.f32.mrf.mxu0  ;;  %11402 = vmatprep.subr.bf16.mxu0 %v16702_v51 }
 0x988   :  { %v11135_v34 = vpop.f32.mrf.mxu1  ;;  %11445 = vmatprep.subr.bf16.mxu1 %v16705_v61  ;;  %v11134_v47 = vadd.f32 %v11133_v54, %v11091_v36  ;;  %v11093_v30 = vadd.f32 %v11092_v16, %v8985_v20  ;;  %11432 = vmatprep.mubr.bf16.mxu0 %v16924_v29  ;;  %v16732_v61 = vld [vmem:[#allocation9 + $0x8c] ss:$48 sps:$4 sm:$0xff]   ;;  %v16730_v54 = vld [vmem:[#allocation9 + $0x88] ss:$48 sps:$4 sm:$0xff]  }
 0x989   :  { %11475 = vmatprep.mubr.bf16.mxu1 %v16925_v48  ;;  %v11094_v7 = vpop.f32.mrf.mxu0  ;;  %v16741_v48 = vld [vmem:[#allocation9 + $0x62c] ss:$48 sps:$4 sm:$0xff]  }
 0x98a   :  { %v11137_v13 = vpop.f32.mrf.mxu1  ;;  %v11136_v0 = vadd.f32 %v11135_v34, %v11093_v30  ;;  %v11095_v49 = vadd.f32 %v11094_v7, %v8981_v10  ;;  %11403 = vmatpush1.bf16.msra.mxu0 %v16700_v33  ;;  %v18137_v56 = vmax.f32 %v11134_v47, 0.0  ;;  %v16735_v10 = vld [vmem:[#allocation9 + $0x68c] ss:$48 sps:$4 sm:$0xff]  }
 0x98b   :  { %11446 = vmatpush1.bf16.msra.mxu1 %v16703_v46  ;;  %v11096_v18 = vpop.f32.mrf.mxu0  ;;  %11404 = vmatprep.subr.bf16.mxu0 %v16708_v41  ;;  %v16733_v41 = vld [vmem:[#allocation9 + $0x688] ss:$48 sps:$4 sm:$0xff]   ;;  %v16738_v47 = vld [vmem:[#allocation9 + $0x2c] ss:$48 sps:$4 sm:$0xff]  }
 0x98c   :  { %11447 = vmatprep.subr.bf16.mxu1 %v16711_v24  ;;  %v11138_v4 = vadd.f32 %v11137_v13, %v11095_v49  ;;  %v11097_v19 = vadd.f32 %v11096_v18, %v8985_v20  ;;  %v11139_v12 = vpop.f32.mrf.mxu1  ;;  %v18139_v42 = vmax.f32 %v11136_v0, 0.0  ;;  %v11620_v44 = vmul.f32 %v18137_v56, %v18137_v56  ;;  %v16736_v49 = vld [vmem:[#allocation9 + $0x28] ss:$48 sps:$4 sm:$0xff]   ;;  %v16744_v18 = vld [vmem:[#allocation9 + $0x5cc] ss:$48 sps:$4 sm:$0xff]  }
 0x98e   :  { %v18141_v63 = vmax.f32 %v11138_v4, 0.0  ;;  %v11140_v62 = vadd.f32 %v11139_v12, %v11097_v19  ;;  %11405 = vmatpush1.bf16.msra.mxu0 %v16706_v14  ;;  %v11621_v1 = vmul.f32 %v18139_v42, %v18139_v42  ;;  %v16747_v12 = vld [vmem:[#allocation9 + $0xbcc] ss:$48 sps:$4 sm:$0xff]  }
 0x98f   :  { %11448 = vmatpush1.bf16.msra.mxu1 %v16709_v39  ;;  %11406 = vmatprep.subr.bf16.mxu0 %v16714_v58 }
 0x990   :  { %11449 = vmatprep.subr.bf16.mxu1 %v16717_v57  ;;  %v11526_v60 = vsel %vm3797_vm9, %v18141_v63, 0.0  ;;  %v11632_v6 = vmul.f32 %v18141_v63, %v18141_v63  ;;  %v18147_v28 = vmax.f32 %v11140_v62, 0.0  ;;  %v16739_v57 = vld [vmem:[#allocation9 + $0x628] ss:$48 sps:$4 sm:$0xff]  }
 0x991   :  { %v11527_v59 = vadd.f32 %v11526_v60, %v18137_v56 }
 0x992   :  { %v11658_v37 = vsel %vm3797_vm9, %v11632_v6, 0.0  ;;  %v11534_v52 = vsel %vm3797_vm9, %v18147_v28, 0.0  ;;  %v11633_v8 = vmul.f32 %v18147_v28, %v18147_v28  ;;  %11407 = vmatpush1.bf16.msra.mxu0 %v16712_v21  ;;  %v16742_v6 = vld [vmem:[#allocation9 + $0x5c8] ss:$48 sps:$4 sm:$0xff]  }
 0x993   :  { %11450 = vmatpush1.bf16.msra.mxu1 %v16715_v2  ;;  %v11528_v50 = vrot.slane %v11527_v59, 4  ;;  %v11659_v26 = vadd.f32 %v11658_v37, %v11620_v44  ;;  %v11535_v38 = vadd.f32 %v11534_v52, %v18139_v42  ;;  %11408 = vmatprep.subr.bf16.mxu0 %v16720_v40  ;;  %v16750_v44 = vld [vmem:[#allocation9 + $0x56c] ss:$48 sps:$4 sm:$0xff]  }
 0x994   :  { %11451 = vmatprep.subr.bf16.mxu1 %v16723_v5  ;;  %v11666_v23 = vsel %vm3797_vm9, %v11633_v8, 0.0  ;;  %v16748_v8 = vld [vmem:[#allocation9 + $0x568] ss:$48 sps:$4 sm:$0xff]  }
 0x995   :  { %v11529_v15 = vadd.f32 %v11528_v50, %v11527_v59  ;;  %v11660_v53 = vrot.slane %v11659_v26, 4  ;;  %v11536_v27 = vrot.slane %v11535_v38, 4  ;;  %v11667_v51 = vadd.f32 %v11666_v23, %v11621_v1  ;;  %v16753_v59 = vld [vmem:[#allocation9 + $0xb6c] ss:$48 sps:$4 sm:$0xff]   ;;  %v16751_v1 = vld [vmem:[#allocation9 + $0xb68] ss:$48 sps:$4 sm:$0xff]  }
 0x996   :  { %11409 = vmatpush1.bf16.msra.mxu0 %v16718_v45  ;;  %v16745_v45 = vld [vmem:[#allocation9 + $0xbc8] ss:$48 sps:$4 sm:$0xff]  }
 0x997   :  { %11452 = vmatpush1.bf16.msra.mxu1 %v16721_v9  ;;  %v11530_v20 = vrot.slane %v11529_v15, 2  ;;  %v11661_v33 = vadd.f32 %v11660_v53, %v11659_v26  ;;  %v11537_v46 = vadd.f32 %v11536_v27, %v11535_v38  ;;  %v11668_v22 = vrot.slane %v11667_v51, 4  ;;  %11410 = vmatprep.subr.bf16.mxu0 %v16726_v25  ;;  %v16756_v26 = vld [vmem:[#allocation9 + $0x50c] ss:$48 sps:$4 sm:$0xff]  }
 0x998   :  { %11453 = vmatprep.subr.bf16.mxu1 %v16729_v11  ;;  %v16759_v38 = vld [vmem:[#allocation9 + $0xb0c] ss:$48 sps:$4 sm:$0xff]  }
 0x999   :  { %v11531_v24 = vadd.f32 %v11530_v20, %v11529_v15  ;;  %v11662_v36 = vrot.slane %v11661_v33, 2  ;;  %v11538_v16 = vrot.slane %v11537_v46, 2  ;;  %v11669_v34 = vadd.f32 %v11668_v22, %v11667_v51  ;;  %v16757_v15 = vld [vmem:[#allocation9 + $0xb08] ss:$48 sps:$4 sm:$0xff]   ;;  %v16762_v53 = vld [vmem:[#allocation9 + $0x4ac] ss:$48 sps:$4 sm:$0xff]  }
 0x99a   :  { %11411 = vmatpush1.bf16.msra.mxu0 %v16724_v43  ;;  %v16765_v27 = vld [vmem:[#allocation9 + $0xaac] ss:$48 sps:$4 sm:$0xff]   ;;  %v16760_v51 = vld [vmem:[#allocation9 + $0x4a8] ss:$48 sps:$4 sm:$0xff]  }
 0x99b   :  { %11454 = vmatpush1.bf16.msra.mxu1 %v16727_v17  ;;  %v11532_v30 = vrot.slane %v11531_v24, 1  ;;  %v11663_v14 = vadd.f32 %v11662_v36, %v11661_v33  ;;  %v11539_v39 = vadd.f32 %v11538_v16, %v11537_v46  ;;  %v11670_v29 = vrot.slane %v11669_v34, 2  ;;  %11412 = vmatprep.subr.bf16.mxu0 %v16732_v61  ;;  %v16754_v17 = vld [vmem:[#allocation9 + $0x508] ss:$48 sps:$4 sm:$0xff]   ;;  %v16771_v20 = vld [vmem:[#allocation9 + $0xa4c] ss:$48 sps:$4 sm:$0xff]  }
 0x99c   :  { %11455 = vmatprep.subr.bf16.mxu1 %v16735_v10  ;;  %v16763_v61 = vld [vmem:[#allocation9 + $0xaa8] ss:$48 sps:$4 sm:$0xff]   ;;  %v16768_v10 = vld [vmem:[#allocation9 + $0x44c] ss:$48 sps:$4 sm:$0xff]  }
 0x99d   :  { %v11533_v7 = vadd.f32 %v11532_v30, %v11531_v24  ;;  %v11664_v13 = vrot.slane %v11663_v14, 1  ;;  %v11540_v58 = vrot.slane %v11539_v39, 1  ;;  %v11671_v0 = vadd.f32 %v11670_v29, %v11669_v34  ;;  %v16766_v33 = vld [vmem:[#allocation9 + $0x448] ss:$48 sps:$4 sm:$0xff]   ;;  %v16774_v22 = vld [vmem:[#allocation9 + $0x3ec] ss:$48 sps:$4 sm:$0xff]  }
 0x99e   :  { %11413 = vmatpush1.bf16.msra.mxu0 %v16730_v54  ;;  %v16769_v46 = vld [vmem:[#allocation9 + $0xa48] ss:$48 sps:$4 sm:$0xff]   ;;  %v16777_v54 = vld [vmem:[#allocation9 + $0x9ec] ss:$48 sps:$4 sm:$0xff]  }
 0x99f   :  { %11456 = vmatpush1.bf16.msra.mxu1 %v16733_v41  ;;  %v18161_v4 = vmul.f32 0.083333336, %v11533_v7  ;;  %v11665_v19 = vadd.f32 %v11664_v13, %v11663_v14  ;;  %v11541_v21 = vadd.f32 %v11540_v58, %v11539_v39  ;;  %v11672_v2 = vrot.slane %v11671_v0, 1  ;;  %11414 = vmatprep.subr.bf16.mxu0 %v16738_v47  ;;  %v16772_v24 = vld [vmem:[#allocation9 + $0x3e8] ss:$48 sps:$4 sm:$0xff]  }
 0x9a0   :  { %11457 = vmatprep.subr.bf16.mxu1 %v16741_v48  ;;  %v16775_v36 = vld [vmem:[#allocation9 + $0x9e8] ss:$48 sps:$4 sm:$0xff]   ;;  %v16780_v34 = vld [vmem:[#allocation9 + $0x38c] ss:$48 sps:$4 sm:$0xff]  }
 0x9a1   :  { %v11740_v40 = vmul.f32 0.083333336, %v11665_v19  ;;  %v11752_v5 = vmul.f32 %v18161_v4, %v18161_v4  ;;  %v18165_v62 = vmul.f32 0.083333336, %v11541_v21  ;;  %v11673_v60 = vadd.f32 %v11672_v2, %v11671_v0  ;;  %v16783_v47 = vld [vmem:[#allocation9 + $0x98c] ss:$48 sps:$4 sm:$0xff]  }
 0x9a2   :  { %11415 = vmatpush1.bf16.msra.mxu0 %v16736_v49  ;;  %v11788_v16 = vsub.f32 %v18137_v56, %v18161_v4  ;;  %v11800_v30 = vsub.f32 %v18141_v63, %v18161_v4  ;;  %v16778_v56 = vld [vmem:[#allocation9 + $0x388] ss:$48 sps:$4 sm:$0xff]   ;;  %v16786_v49 = vld [vmem:[#allocation9 + $0x32c] ss:$48 sps:$4 sm:$0xff]  }
 0x9a3   :  { %11458 = vmatpush1.bf16.msra.mxu1 %v16739_v57  ;;  %v11764_v9 = vsub.f32 %v11740_v40, %v11752_v5  ;;  %11416 = vmatprep.subr.bf16.mxu0 %v16744_v18  ;;  %v11741_v25 = vmul.f32 0.083333336, %v11673_v60  ;;  %v11753_v11 = vmul.f32 %v18165_v62, %v18165_v62  ;;  %v11789_v14 = vsub.f32 %v18139_v42, %v18165_v62  ;;  %v16781_v0 = vld [vmem:[#allocation9 + $0x988] ss:$48 sps:$4 sm:$0xff]   ;;  %v16789_v57 = vld [vmem:[#allocation9 + $0x92c] ss:$48 sps:$4 sm:$0xff]  }
 0x9a4   :  { %11459 = vmatprep.subr.bf16.mxu1 %v16747_v12  ;;  %v11801_v39 = vsub.f32 %v18147_v28, %v18165_v62  ;;  %v16784_v42 = vld [vmem:[#allocation9 + $0x328] ss:$48 sps:$4 sm:$0xff]   ;;  %v18652_v4 = vld [vmem:[#allocation40_spill] sm:$0xff]  ;;  %v18187_v40 = vld [vmem:[#allocation6 + $0x10] sm:$0x33] }
 0x9a5   :  { %v11776_v37 = vmax.f32 %v11764_v9, 0.0  ;;  %v11765_v52 = vsub.f32 %v11741_v25, %v11753_v11  ;;  %v16787_v28 = vld [vmem:[#allocation9 + $0x928] ss:$48 sps:$4 sm:$0xff]   ;;  %v8988_v19 = vsub.s32 4, %v18652_v4  ;;  %v8992_v12 = vsub.s32 5, %v18652_v4  ;;  %v18189_v5 = vld [vmem:[#allocation21] sm:$0xff] }
 0x9a6   :  { %11417 = vmatpush2.bf16.msra.mxu0 %v16742_v6  ;;  %v16790_v21 = vld [vmem:[%s18632_s11 + $0x78] sm:$0xff]   ;;  %v14487_v9 = vcombine.high %v18129_v3, %v18187_v40 }
 0x9a7   :  { %11460 = vmatpush2.bf16.msra.mxu1 %v16745_v45  ;;  %v11812_v50 = vadd.f32 1e-05, %v11776_v37  ;;  %11418 = vmatprep.subr.bf16.mxu0 %v16750_v44  ;;  %v11777_v23 = vmax.f32 %v11765_v52, 0.0  ;;  %v16791_v2 = vld [vmem:[%s18632_s11 + $0xf8] sm:$0xff]   ;;  %v8989_v62 = vrot.slane %v18189_v5, %v8988_v19  ;;  %v16794_v45 = vld [vmem:[%s18632_s11 + $0x70] sm:$0xff]   ;;  %v8993_v44 = vrot.slane %v18189_v5, %v8992_v12 }
 0x9a8   :  { %11461 = vmatprep.subr.bf16.mxu1 %v16753_v59  ;;  %v16792_v60 = vld [vmem:[%s18632_s11 + $0x38] sm:$0xff]   ;;  %v16795_v59 = vld [vmem:[%s18632_s11 + $0xf0] sm:$0xff]   ;;  %v16927_v37 = vld [vmem:[#allocation5] ss:$8 sps:$4 sm:$0x3f]  }
 0x9a9   :  { %16890 = vrsqrt.f32 %v11812_v50  ;;  %v11813_v43 = vadd.f32 1e-05, %v11777_v23  ;;  %v16793_v6 = vld [vmem:[%s18632_s11 + $0xb8] sm:$0xff]  }
 0x9aa   :  { %11419 = vmatpush2.bf16.msra.mxu0 %v16748_v8  ;;  %v16928_v52 = vld [vmem:[#allocation5 + $0x18] ss:$-8 sps:$4 sm:$0x3f]  }
 0x9ab   :  { %11462 = vmatpush2.bf16.msra.mxu1 %v16751_v1  ;;  %11420 = vmatprep.subr.bf16.mxu0 %v16756_v26  ;;  %16892 = vrsqrt.f32 %v11813_v43  ;;  %v16796_v26 = vld [vmem:[%s18632_s11 + $0x30] sm:$0xff]  }
 0x9ac   :  { %11463 = vmatprep.subr.bf16.mxu1 %v16759_v38  ;;  %v16797_v43 = vld [vmem:[%s18632_s11 + $0xb0] sm:$0xff]  }
 0x9ae   :  { %11421 = vmatpush2.bf16.msra.mxu0 %v16754_v17  ;;  %v16798_v17 = vld [vmem:[%s18632_s11 + $0x68] sm:$0xff]  }
 0x9af   :  { %11464 = vmatpush2.bf16.msra.mxu1 %v16757_v15  ;;  %11422 = vmatprep.subr.bf16.mxu0 %v16762_v53  ;;  %v16799_v53 = vld [vmem:[%s18632_s11 + $0xe8] sm:$0xff]  }
 0x9b0   :  { %11465 = vmatprep.subr.bf16.mxu1 %v16765_v27 }
 0x9b2   :  { %11423 = vmatpush2.bf16.msra.mxu0 %v16760_v51 }
 0x9b3   :  { %11466 = vmatpush2.bf16.msra.mxu1 %v16763_v61  ;;  %11424 = vmatprep.subr.bf16.mxu0 %v16768_v10 }
 0x9b4   :  { %11467 = vmatprep.subr.bf16.mxu1 %v16771_v20  ;;  %v16800_v20 = vld [vmem:[%s18632_s11 + $0x28] sm:$0xff]  }
 0x9b6   :  { %v16891_v41 = vpop.eup %16890  ;;  %11425 = vmatpush2.bf16.msra.mxu0 %v16766_v33 }
 0x9b7   :  { %11468 = vmatpush2.bf16.msra.mxu1 %v16769_v46  ;;  %11426 = vmatprep.subr.bf16.mxu0 %v16774_v22  ;;  %v11836_v48 = vmul.f32 %v16891_v41, %v11788_v16  ;;  %v11848_v7 = vmul.f32 %v16891_v41, %v11800_v30  ;;  %v16801_v22 = vld [vmem:[%s18632_s11 + $0xa8] sm:$0xff]  }
 0x9b8   :  { %11469 = vmatprep.subr.bf16.mxu1 %v16777_v54  ;;  %v16893_v29 = vpop.eup %16892  ;;  %v16802_v54 = vld [vmem:[%s18632_s11 + $0x60] sm:$0xff]  }
 0x9b9   :  { %v11837_v13 = vmul.f32 %v16893_v29, %v11789_v14  ;;  %v11849_v58 = vmul.f32 %v16893_v29, %v11801_v39  ;;  %v16804_v14 = vld [vmem:[%s18632_s11 + $0x20] sm:$0xff]  }
 0x9ba   :  { %11427 = vmatpush2.bf16.msra.mxu0 %v16772_v24  ;;  %v16805_v29 = vld [vmem:[%s18632_s11 + $0xa0] sm:$0xff]  }
 0x9bb   :  { %11470 = vmatpush2.bf16.msra.mxu1 %v16775_v36  ;;  %11428 = vmatprep.subr.bf16.mxu0 %v16780_v34  ;;  %v18177_v63 = vpack.c.bf16 %v11837_v13, %v11836_v48  ;;  %v14626_v18 = vpack.c.bf16 %v11849_v58, %v11848_v7  ;;  %v16803_v36 = vld [vmem:[%s18632_s11 + $0xe0] sm:$0xff]   ;;  %v16806_v48 = vld [vmem:[%s18632_s11 + $0x58] sm:$0xff]  }
 0x9bc   :  { %11471 = vmatprep.subr.bf16.mxu1 %v16783_v47 }
 0x9bd   :  { %11937 = vst [vmem:[#allocation6 + $0x38] sm:$0x33] %v14626_v18 }
 0x9be   :  { %11429 = vmatpush2.bf16.msra.mxu0 %v16778_v56  ;;  %v16807_v56 = vld [vmem:[%s18632_s11 + $0xd8] sm:$0xff]  }
 0x9bf   :  { %11472 = vmatpush2.bf16.msra.mxu1 %v16781_v0  ;;  %11430 = vmatprep.subr.bf16.mxu0 %v16786_v49 }
 0x9c0   :  { %11473 = vmatprep.subr.bf16.mxu1 %v16789_v57 }
 0x9c2   :  { %11431 = vmatpush2.bf16.msra.mxu0 %v16784_v42 }
 0x9c3   :  { %11474 = vmatpush2.bf16.msra.mxu1 %v16787_v28  ;;  %14647 = vmatprep.subr.bf16.mxu0 %v16790_v21  ;;  %v16808_v28 = vld [vmem:[%s18632_s11 + $0x18] sm:$0xff]  }
 0x9c4   :  { %14669 = vmatprep.subr.bf16.mxu1 %v16791_v2  ;;  %v18207_v8 = vld [vmem:[#allocation6 + $0x38] sm:$0x33] }
 0x9c5   :  { %v11176_v25 = vpop.f32.mrf.mxu0  ;;  %11433 = vmatmul.mubr.bf16.vlgmr.msra.gmra.mxu0 %v16927_v37  ;;  %v14489_v50 = vcombine.high %v18177_v63, %v18207_v8 }
 0x9c6   :  { %v11219_v11 = vpop.f32.mrf.mxu1  ;;  %11476 = vmatmul.mubr.bf16.vlgmr.msra.gmra.mxu1 %v16928_v52  ;;  %v11177_v1 = vadd.f32 %v11176_v25, %v8989_v62  ;;  %14648 = vmatpush3.bf16.msra.mxu0 %v16792_v60  ;;  %v16810_v60 = vld [vmem:[%s18632_s11 + $0x50] sm:$0xff]  }
 0x9c7   :  { %12821 = vmatprep.mubr.bf16.mxu0 %v14487_v9  ;;  %14670 = vmatpush3.bf16.msra.mxu1 %v16793_v6  ;;  %v11178_v38 = vpop.f32.mrf.mxu0 }
 0x9c8   :  { %v11221_v23 = vpop.f32.mrf.mxu1  ;;  %14649 = vmatprep.subr.bf16.mxu0 %v16794_v45  ;;  %v11179_v15 = vadd.f32 %v11178_v38, %v8993_v44  ;;  %12862 = vmatprep.mubr.bf16.mxu1 %v14489_v50  ;;  %v11220_v27 = vadd.f32 %v11219_v11, %v11177_v1  ;;  %v16811_v45 = vld [vmem:[%s18632_s11 + $0xd0] sm:$0xff]   ;;  %v16814_v38 = vld [vmem:[%s18632_s11 + $0x48] sm:$0xff]  }
 0x9c9   :  { %14671 = vmatprep.subr.bf16.mxu1 %v16795_v59  ;;  %v11180_v51 = vpop.f32.mrf.mxu0  ;;  %v16812_v11 = vld [vmem:[%s18632_s11 + $0x10] sm:$0xff]  }
 0x9ca   :  { %v11223_v61 = vpop.f32.mrf.mxu1  ;;  %v11181_v10 = vadd.f32 %v11180_v51, %v8989_v62  ;;  %14650 = vmatpush3.bf16.msra.mxu0 %v16796_v26  ;;  %v11222_v33 = vadd.f32 %v11221_v23, %v11179_v15  ;;  %v18235_v16 = vmax.f32 %v11220_v27, 0.0  ;;  %v16809_v62 = vld [vmem:[%s18632_s11 + $0x98] sm:$0xff]   ;;  %v16813_v26 = vld [vmem:[%s18632_s11 + $0x90] sm:$0xff]   ;;  %v16815_v23 = vld [vmem:[%s18632_s11 + $0xc8] sm:$0xff]  }
 0x9cb   :  { %14672 = vmatpush3.bf16.msra.mxu1 %v16797_v43  ;;  %v11182_v46 = vpop.f32.mrf.mxu0  ;;  %14651 = vmatprep.subr.bf16.mxu0 %v16798_v17  ;;  %v16816_v27 = vld [vmem:[%s18632_s11 + $0x8] sm:$0xff]  }
 0x9cc   :  { %v11224_v41 = vadd.f32 %v11223_v61, %v11181_v10  ;;  %v11183_v24 = vadd.f32 %v11182_v46, %v8993_v44  ;;  %14673 = vmatprep.subr.bf16.mxu1 %v16799_v53  ;;  %v11225_v34 = vpop.f32.mrf.mxu1  ;;  %v18242_v39 = vmax.f32 %v11222_v33, 0.0  ;;  %v11622_v0 = vmul.f32 %v18235_v16, %v18235_v16  ;;  %v16817_v33 = vld [vmem:[%s18632_s11 + $0x88] sm:$0xff]   ;;  %v16818_v46 = vld [vmem:[%s18632_s11 + $0x40] sm:$0xff]  }
 0x9ce   :  { %v18237_v47 = vmax.f32 %v11224_v41, 0.0  ;;  %v11226_v30 = vadd.f32 %v11225_v34, %v11183_v24  ;;  %14652 = vmatpush3.bf16.msra.mxu0 %v16800_v20  ;;  %v11623_v19 = vmul.f32 %v18242_v39, %v18242_v39  ;;  %v16820_v34 = vld [vmem:[%s18632_s11] sm:$0xff]  }
 0x9cf   :  { %14674 = vmatpush3.bf16.msra.mxu1 %v16801_v22  ;;  %14653 = vmatprep.subr.bf16.mxu0 %v16802_v54  ;;  %v16819_v22 = vld [vmem:[%s18632_s11 + $0xc0] sm:$0xff]  }
 0x9d0   :  { %v11542_v7 = vsel %vm3797_vm9, %v18237_v47, 0.0  ;;  %v11634_v13 = vmul.f32 %v18237_v47, %v18237_v47  ;;  %v18254_v58 = vmax.f32 %v11226_v30, 0.0  ;;  %14675 = vmatprep.subr.bf16.mxu1 %v16803_v36 }
 0x9d1   :  { %v11543_v49 = vadd.f32 %v11542_v7, %v18235_v16  ;;  %v16821_v7 = vld [vmem:[%s18632_s11 + $0x80] sm:$0xff]  }
 0x9d2   :  { %v11674_v57 = vsel %vm3797_vm9, %v11634_v13, 0.0  ;;  %v11550_v18 = vsel %vm3797_vm9, %v18254_v58, 0.0  ;;  %v11635_v42 = vmul.f32 %v18254_v58, %v18254_v58  ;;  %14654 = vmatpush3.bf16.msra.mxu0 %v16804_v14  ;;  %v16822_v13 = vld [vmem:[%s18632_s11 + $0x178] sm:$0xff]  }
 0x9d3   :  { %v11544_v21 = vrot.slane %v11543_v49, 4  ;;  %v11675_v2 = vadd.f32 %v11674_v57, %v11622_v0  ;;  %v11551_v12 = vadd.f32 %v11550_v18, %v18242_v39  ;;  %14676 = vmatpush3.bf16.msra.mxu1 %v16805_v29  ;;  %14655 = vmatprep.subr.bf16.mxu0 %v16806_v48 }
 0x9d4   :  { %v11682_v6 = vsel %vm3797_vm9, %v11635_v42, 0.0  ;;  %14677 = vmatprep.subr.bf16.mxu1 %v16807_v56  ;;  %v16838_v56 = vld [vmem:[%s18632_s11 + $0x1f8] sm:$0xff]  }
 0x9d5   :  { %v11545_v9 = vadd.f32 %v11544_v21, %v11543_v49  ;;  %v11676_v44 = vrot.slane %v11675_v2, 4  ;;  %v11552_v59 = vrot.slane %v11551_v12, 4  ;;  %v11683_v25 = vadd.f32 %v11682_v6, %v11623_v19  ;;  %v16823_v42 = vld [vmem:[%s18632_s11 + $0x138] sm:$0xff]   ;;  %v16824_v21 = vld [vmem:[%s18632_s11 + $0x170] sm:$0xff]  }
 0x9d6   :  { %14656 = vmatpush3.bf16.msra.mxu0 %v16808_v28  ;;  %v14486_v28 = vcombine.low %v18129_v3, %v18187_v40  ;;  %v16840_v3 = vld [vmem:[%s18632_s11 + $0x1f0] sm:$0xff]  }
 0x9d7   :  { %v11546_v37 = vrot.slane %v11545_v9, 2  ;;  %v11677_v52 = vadd.f32 %v11676_v44, %v11675_v2  ;;  %v11553_v1 = vadd.f32 %v11552_v59, %v11551_v12  ;;  %v11684_v50 = vrot.slane %v11683_v25, 4  ;;  %14678 = vmatpush3.bf16.msra.mxu1 %v16809_v62  ;;  %14657 = vmatprep.subr.bf16.mxu0 %v16810_v60  ;;  %v16839_v2 = vld [vmem:[%s18632_s11 + $0x1b8] sm:$0xff]   ;;  %v16842_v59 = vld [vmem:[%s18632_s11 + $0x1e8] sm:$0xff]  }
 0x9d8   :  { %14679 = vmatprep.subr.bf16.mxu1 %v16811_v45  ;;  %v14488_v12 = vcombine.low %v18177_v63, %v18207_v8  ;;  %v16825_v45 = vld [vmem:[%s18632_s11 + $0x130] sm:$0xff]   ;;  %v16826_v63 = vld [vmem:[%s18632_s11 + $0x168] sm:$0xff]  }
 0x9d9   :  { %v11547_v43 = vadd.f32 %v11546_v37, %v11545_v9  ;;  %v11678_v17 = vrot.slane %v11677_v52, 2  ;;  %v11554_v15 = vrot.slane %v11553_v1, 2  ;;  %v11685_v53 = vadd.f32 %v11684_v50, %v11683_v25  ;;  %v16841_v8 = vld [vmem:[%s18632_s11 + $0x1b0] sm:$0xff]   ;;  %v16828_v37 = vld [vmem:[%s18632_s11 + $0x160] sm:$0xff]  }
 0x9da   :  { %14658 = vmatpush3.bf16.msra.mxu0 %v16812_v11  ;;  %v16827_v11 = vld [vmem:[%s18632_s11 + $0x128] sm:$0xff]   ;;  %v16829_v50 = vld [vmem:[%s18632_s11 + $0x120] sm:$0xff]  }
 0x9db   :  { %v11548_v51 = vrot.slane %v11547_v43, 1  ;;  %v11679_v61 = vadd.f32 %v11678_v17, %v11677_v52  ;;  %v11555_v10 = vadd.f32 %v11554_v15, %v11553_v1  ;;  %v11686_v20 = vrot.slane %v11685_v53, 2  ;;  %14680 = vmatpush3.bf16.msra.mxu1 %v16813_v26  ;;  %14659 = vmatprep.subr.bf16.mxu0 %v16814_v38  ;;  %v16843_v52 = vld [vmem:[%s18632_s11 + $0x1a8] sm:$0xff]   ;;  %v16844_v1 = vld [vmem:[%s18632_s11 + $0x1e0] sm:$0xff]   ;;  %v16830_v26 = vld [vmem:[%s18632_s11 + $0x158] sm:$0xff]  }
 0x9dc   :  { %14681 = vmatprep.subr.bf16.mxu1 %v16815_v23  ;;  %v16845_v38 = vld [vmem:[%s18632_s11 + $0x1a0] sm:$0xff]   ;;  %v16846_v23 = vld [vmem:[%s18632_s11 + $0x1d8] sm:$0xff]   ;;  %v16832_v17 = vld [vmem:[%s18632_s11 + $0x150] sm:$0xff]  }
 0x9dd   :  { %v11549_v54 = vadd.f32 %v11548_v51, %v11547_v43  ;;  %v11680_v41 = vrot.slane %v11679_v61, 1  ;;  %v11556_v24 = vrot.slane %v11555_v10, 1  ;;  %v11687_v36 = vadd.f32 %v11686_v20, %v11685_v53  ;;  %v16831_v43 = vld [vmem:[%s18632_s11 + $0x118] sm:$0xff]   ;;  %v16848_v53 = vld [vmem:[%s18632_s11 + $0x1d0] sm:$0xff]  }
 0x9de   :  { %14660 = vmatpush3.bf16.msra.mxu0 %v16816_v27  ;;  %v16847_v15 = vld [vmem:[%s18632_s11 + $0x198] sm:$0xff]   ;;  %v16833_v27 = vld [vmem:[%s18632_s11 + $0x110] sm:$0xff]  }
 0x9df   :  { %v18310_v30 = vmul.f32 0.083333336, %v11549_v54  ;;  %v11681_v14 = vadd.f32 %v11680_v41, %v11679_v61  ;;  %v11557_v29 = vadd.f32 %v11556_v24, %v11555_v10  ;;  %v11688_v48 = vrot.slane %v11687_v36, 1  ;;  %14682 = vmatpush3.bf16.msra.mxu1 %v16817_v33  ;;  %14661 = vmatprep.subr.bf16.mxu0 %v16818_v46  ;;  %v16834_v61 = vld [vmem:[%s18632_s11 + $0x148] sm:$0xff]   ;;  %v16849_v10 = vld [vmem:[%s18632_s11 + $0x190] sm:$0xff]  }
 0x9e0   :  { %14683 = vmatprep.subr.bf16.mxu1 %v16819_v22  ;;  %v16850_v54 = vld [vmem:[%s18632_s11 + $0x1c8] sm:$0xff]  }
 0x9e1   :  { %v11742_v0 = vmul.f32 0.083333336, %v11681_v14  ;;  %v11754_v49 = vmul.f32 %v18310_v30, %v18310_v30  ;;  %v18323_v57 = vmul.f32 0.083333336, %v11557_v29  ;;  %v11689_v18 = vadd.f32 %v11688_v48, %v11687_v36  ;;  %v16852_v29 = vld [vmem:[%s18632_s11 + $0x1c0] sm:$0xff]  }
 0x9e2   :  { %14662 = vmatpush3.bf16.msra.mxu0 %v16820_v34  ;;  %v11790_v20 = vsub.f32 %v18235_v16, %v18310_v30  ;;  %v11802_v33 = vsub.f32 %v18237_v47, %v18310_v30  ;;  %v16835_v16 = vld [vmem:[%s18632_s11 + $0x108] sm:$0xff]   ;;  %v16836_v47 = vld [vmem:[%s18632_s11 + $0x140] sm:$0xff]   ;;  %v8996_v48 = vsub.s32 6, %v18652_v4 }
 0x9e3   :  { %v11766_v19 = vsub.f32 %v11742_v0, %v11754_v49  ;;  %14684 = vmatpush3.bf16.msra.mxu1 %v16821_v7  ;;  %14691 = vmatprep.subr.bf16.mxu0 %v16822_v13  ;;  %v11743_v62 = vmul.f32 0.083333336, %v11689_v18  ;;  %v11755_v60 = vmul.f32 %v18323_v57, %v18323_v57  ;;  %v11791_v46 = vsub.f32 %v18242_v39, %v18323_v57  ;;  %v16851_v39 = vld [vmem:[%s18632_s11 + $0x188] sm:$0xff]   ;;  %v16837_v7 = vld [vmem:[%s18632_s11 + $0x100] sm:$0xff]  }
 0x9e4   :  { %14713 = vmatprep.subr.bf16.mxu1 %v16838_v56  ;;  %v11803_v22 = vsub.f32 %v18254_v58, %v18323_v57  ;;  %v16853_v13 = vld [vmem:[%s18632_s11 + $0x180] sm:$0xff]   ;;  %v16854_v56 = vld [vmem:[%s18632_s11 + $0x278] sm:$0xff]   ;;  %v9000_v0 = vsub.s32 7, %v18652_v4  ;;  %v8997_v49 = vrot.slane %v18189_v5, %v8996_v48 }
 0x9e5   :  { %v11778_v40 = vmax.f32 %v11766_v19, 0.0  ;;  %12822 = vmatmul.mubr.bf16.vlgmr.msra.gmra.mxu0 %v14486_v28  ;;  %v11767_v6 = vsub.f32 %v11743_v62, %v11755_v60  ;;  %v16856_v60 = vld [vmem:[%s18632_s11 + $0x270] sm:$0xff]  }
 0x9e6   :  { %12863 = vmatmul.mubr.bf16.vlgmr.msra.gmra.mxu1 %v14488_v12  ;;  %14692 = vmatpush3.bf16.msra.mxu0 %v16823_v42  ;;  %v9001_v57 = vrot.slane %v18189_v5, %v9000_v0  ;;  %v16855_v12 = vld [vmem:[%s18632_s11 + $0x238] sm:$0xff]   ;;  %v16865_v0 = vld [vmem:[%s18632_s11 + $0x210] sm:$0xff]  }
 0x9e7   :  { %v11814_v9 = vadd.f32 1e-05, %v11778_v40  ;;  %14693 = vmatprep.subr.bf16.mxu0 %v16824_v21  ;;  %14714 = vmatpush3.bf16.msra.mxu1 %v16839_v2  ;;  %v11779_v44 = vmax.f32 %v11767_v6, 0.0 }
 0x9e8   :  { %14715 = vmatprep.subr.bf16.mxu1 %v16840_v3 }
 0x9e9   :  { %16894 = vrsqrt.f32 %v11814_v9  ;;  %v11815_v25 = vadd.f32 1e-05, %v11779_v44  ;;  %v16857_v9 = vld [vmem:[%s18632_s11 + $0x230] sm:$0xff]   ;;  %v16858_v44 = vld [vmem:[%s18632_s11 + $0x268] sm:$0xff]  }
 0x9ea   :  { %14694 = vmatpush3.bf16.msra.mxu0 %v16825_v45 }
 0x9eb   :  { %14695 = vmatprep.subr.bf16.mxu0 %v16826_v63  ;;  %14716 = vmatpush3.bf16.msra.mxu1 %v16841_v8  ;;  %16896 = vrsqrt.f32 %v11815_v25 }
 0x9ec   :  { %14717 = vmatprep.subr.bf16.mxu1 %v16842_v59 }
 0x9ee   :  { %14696 = vmatpush3.bf16.msra.mxu0 %v16827_v11 }
 0x9ef   :  { %14697 = vmatprep.subr.bf16.mxu0 %v16828_v37  ;;  %14718 = vmatpush3.bf16.msra.mxu1 %v16843_v52 }
 0x9f0   :  { %14719 = vmatprep.subr.bf16.mxu1 %v16844_v1 }
 0x9f2   :  { %14698 = vmatpush3.bf16.msra.mxu0 %v16829_v50  ;;  %v16859_v50 = vld [vmem:[%s18632_s11 + $0x228] sm:$0xff]  }
 0x9f3   :  { %14699 = vmatprep.subr.bf16.mxu0 %v16830_v26  ;;  %14720 = vmatpush3.bf16.msra.mxu1 %v16845_v38  ;;  %v16860_v38 = vld [vmem:[%s18632_s11 + $0x260] sm:$0xff]  }
 0x9f4   :  { %14721 = vmatprep.subr.bf16.mxu1 %v16846_v23 }
 0x9f6   :  { %14700 = vmatpush3.bf16.msra.mxu0 %v16831_v43  ;;  %v16895_v51 = vpop.eup %16894 }
 0x9f7   :  { %14701 = vmatprep.subr.bf16.mxu0 %v16832_v17  ;;  %14722 = vmatpush3.bf16.msra.mxu1 %v16847_v15  ;;  %v11838_v24 = vmul.f32 %v16895_v51, %v11790_v20  ;;  %v11850_v36 = vmul.f32 %v16895_v51, %v11802_v33 }
 0x9f8   :  { %14723 = vmatprep.subr.bf16.mxu1 %v16848_v53  ;;  %v16897_v41 = vpop.eup %16896 }
 0x9f9   :  { %v11839_v34 = vmul.f32 %v16897_v41, %v11791_v46  ;;  %v11851_v14 = vmul.f32 %v16897_v41, %v11803_v22 }
 0x9fa   :  { %14702 = vmatpush3.bf16.msra.mxu0 %v16833_v27 }
 0x9fb   :  { %14703 = vmatprep.subr.bf16.mxu0 %v16834_v61  ;;  %14724 = vmatpush3.bf16.msra.mxu1 %v16849_v10  ;;  %v14621_v58 = vpack.c.bf16 %v11839_v34, %v11838_v24  ;;  %v14627_v30 = vpack.c.bf16 %v11851_v14, %v11850_v36  ;;  %v16861_v10 = vld [vmem:[%s18632_s11 + $0x220] sm:$0xff]  }
 0x9fc   :  { %14725 = vmatprep.subr.bf16.mxu1 %v16850_v54  ;;  %v16862_v54 = vld [vmem:[%s18632_s11 + $0x258] sm:$0xff]  }
 0x9fd   :  { %11938 = vst [vmem:[#allocation6 + $0x48] sm:$0x33] %v14627_v30 }
 0x9fe   :  { %14704 = vmatpush3.bf16.msra.mxu0 %v16835_v16  ;;  %v16863_v16 = vld [vmem:[%s18632_s11 + $0x218] sm:$0xff]  }
 0x9ff   :  { %14705 = vmatprep.subr.bf16.mxu0 %v16836_v47  ;;  %14726 = vmatpush3.bf16.msra.mxu1 %v16851_v39 }
 0xa00   :  { %14727 = vmatprep.subr.bf16.mxu1 %v16852_v29  ;;  %v16864_v29 = vld [vmem:[%s18632_s11 + $0x250] sm:$0xff]  }
 0xa02   :  { %14706 = vmatpush3.bf16.msra.mxu0 %v16837_v7 }
 0xa03   :  { %14728 = vmatpush3.bf16.msra.mxu1 %v16853_v13  ;;  %14735 = vmatprep.subr.bf16.mxu0 %v16854_v56 }
 0xa04   :  { %v11950_v28 = vld [vmem:[#allocation6 + $0x48] sm:$0x33] }
 0xa05   :  { %v11262_v18 = vpop.f32.mrf.mxu0  ;;  %v14490_v21 = vcombine.low %v14621_v58, %v11950_v28  ;;  %v14491_v2 = vcombine.high %v14621_v58, %v11950_v28  ;;  %v16866_v28 = vld [vmem:[%s18632_s11 + $0x248] sm:$0xff]  }
 0xa06   :  { %v11305_v42 = vpop.f32.mrf.mxu1  ;;  %v11263_v19 = vadd.f32 %v11262_v18, %v8997_v49 }
 0xa07   :  { %v11264_v62 = vpop.f32.mrf.mxu0  ;;  %12903 = vmatprep.mubr.bf16.mxu0 %v14491_v2 }
 0xa08   :  { %v11307_v4 = vpop.f32.mrf.mxu1  ;;  %v11265_v3 = vadd.f32 %v11264_v62, %v9001_v57  ;;  %v11306_v40 = vadd.f32 %v11305_v42, %v11263_v19  ;;  %12904 = vmatmul.mubr.bf16.vlgmr.msra.gmra.mxu0 %v14490_v21  ;;  %v16867_v62 = vld [vmem:[%s18632_s11 + $0x208] sm:$0xff]  }
 0xa09   :  { %v11266_v5 = vpop.f32.mrf.mxu0  ;;  %14736 = vmatpush3.bf16.msra.mxu0 %v16855_v12 }
 0xa0a   :  { %v11309_v6 = vpop.f32.mrf.mxu1  ;;  %v11267_v45 = vadd.f32 %v11266_v5, %v8997_v49  ;;  %v11308_v63 = vadd.f32 %v11307_v4, %v11265_v3  ;;  %14737 = vmatprep.subr.bf16.mxu0 %v16856_v60  ;;  %v18448_v11 = vmax.f32 %v11306_v40, 0.0  ;;  %v16868_v5 = vld [vmem:[%s18632_s11 + $0x240] sm:$0xff]  }
 0xa0b   :  { %v11268_v8 = vpop.f32.mrf.mxu0 }
 0xa0c   :  { %v11310_v59 = vadd.f32 %v11309_v6, %v11267_v45  ;;  %v11269_v25 = vadd.f32 %v11268_v8, %v9001_v57  ;;  %v11311_v37 = vpop.f32.mrf.mxu1  ;;  %v18455_v26 = vmax.f32 %v11308_v63, 0.0  ;;  %v11624_v15 = vmul.f32 %v18448_v11, %v18448_v11  ;;  %v16869_v8 = vld [vmem:[%s18632_s11 + $0x200] sm:$0xff]  }
 0xa0d   :  { %14738 = vmatpush3.bf16.msra.mxu0 %v16857_v9 }
 0xa0e   :  { %v18450_v52 = vmax.f32 %v11310_v59, 0.0  ;;  %v11312_v1 = vadd.f32 %v11311_v37, %v11269_v25  ;;  %14739 = vmatprep.subr.bf16.mxu0 %v16858_v44  ;;  %v11625_v20 = vmul.f32 %v18455_v26, %v18455_v26 }
 0xa10   :  { %v11558_v23 = vsel %vm3797_vm9, %v18450_v52, 0.0  ;;  %v11636_v43 = vmul.f32 %v18450_v52, %v18450_v52  ;;  %v18464_v17 = vmax.f32 %v11312_v1, 0.0 }
 0xa11   :  { %v11559_v53 = vadd.f32 %v11558_v23, %v18448_v11  ;;  %14740 = vmatpush3.bf16.msra.mxu0 %v16859_v50 }
 0xa12   :  { %v11690_v27 = vsel %vm3797_vm9, %v11636_v43, 0.0  ;;  %v11566_v51 = vsel %vm3797_vm9, %v18464_v17, 0.0  ;;  %v11637_v61 = vmul.f32 %v18464_v17, %v18464_v17  ;;  %14741 = vmatprep.subr.bf16.mxu0 %v16860_v38  ;;  %v16870_v38 = vld [vmem:[%s18632_s11 + $0x2f8] sm:$0xff]  }
 0xa13   :  { %v11560_v33 = vrot.slane %v11559_v53, 4  ;;  %v11691_v46 = vadd.f32 %v11690_v27, %v11624_v15  ;;  %v11567_v22 = vadd.f32 %v11566_v51, %v18455_v26  ;;  %14757 = vmatprep.subr.bf16.mxu1 %v16870_v38 }
 0xa14   :  { %v11698_v41 = vsel %vm3797_vm9, %v11637_v61, 0.0 }
 0xa15   :  { %v11561_v24 = vadd.f32 %v11560_v33, %v11559_v53  ;;  %v11692_v36 = vrot.slane %v11691_v46, 4  ;;  %v11568_v34 = vrot.slane %v11567_v22, 4  ;;  %v11699_v14 = vadd.f32 %v11698_v41, %v11625_v20  ;;  %14742 = vmatpush3.bf16.msra.mxu0 %v16861_v10 }
 0xa16   :  { %14743 = vmatprep.subr.bf16.mxu0 %v16862_v54 }
 0xa17   :  { %v11562_v47 = vrot.slane %v11561_v24, 2  ;;  %v11693_v39 = vadd.f32 %v11692_v36, %v11691_v46  ;;  %v11569_v58 = vadd.f32 %v11568_v34, %v11567_v22  ;;  %v11700_v30 = vrot.slane %v11699_v14, 4 }
 0xa19   :  { %v11563_v48 = vadd.f32 %v11562_v47, %v11561_v24  ;;  %v11694_v7 = vrot.slane %v11693_v39, 2  ;;  %v11570_v13 = vrot.slane %v11569_v58, 2  ;;  %v11701_v56 = vadd.f32 %v11700_v30, %v11699_v14  ;;  %14744 = vmatpush3.bf16.msra.mxu0 %v16863_v16  ;;  %v18512_v24 = vld [vmem:[#allocation21 + $0x8] sm:$0xf]  ;;  %v16872_v30 = vld [vmem:[%s18632_s11 + $0x2f0] sm:$0xff]  }
 0xa1a   :  { %14745 = vmatprep.subr.bf16.mxu0 %v16864_v29  ;;  %v9005_v36 = vrot.slane %v18512_v24, %v17355_v31  ;;  %v16871_v47 = vld [vmem:[%s18632_s11 + $0x2b8] sm:$0xff]  }
 0xa1b   :  { %v11564_v49 = vrot.slane %v11563_v48, 1  ;;  %v11695_v57 = vadd.f32 %v11694_v7, %v11693_v39  ;;  %v11571_v18 = vadd.f32 %v11570_v13, %v11569_v58  ;;  %v11702_v42 = vrot.slane %v11701_v56, 2  ;;  %v16873_v13 = vld [vmem:[%s18632_s11 + $0x2b0] sm:$0xff]  }
 0xa1d   :  { %v11565_v19 = vadd.f32 %v11564_v49, %v11563_v48  ;;  %v11696_v21 = vrot.slane %v11695_v57, 1  ;;  %v11572_v2 = vrot.slane %v11571_v18, 1  ;;  %v11703_v12 = vadd.f32 %v11702_v42, %v11701_v56  ;;  %14746 = vmatpush3.bf16.msra.mxu0 %v16865_v0  ;;  %v16874_v49 = vld [vmem:[%s18632_s11 + $0x2e8] sm:$0xff]  }
 0xa1e   :  { %14747 = vmatprep.subr.bf16.mxu0 %v16866_v28 }
 0xa1f   :  { %v11612_v4 = vmul.f32 0.083333336, %v11565_v19  ;;  %v11697_v60 = vadd.f32 %v11696_v21, %v11695_v57  ;;  %v11573_v3 = vadd.f32 %v11572_v2, %v11571_v18  ;;  %v11704_v40 = vrot.slane %v11703_v12, 1  ;;  %v16875_v2 = vld [vmem:[%s18632_s11 + $0x2a8] sm:$0xff]  }
 0xa21   :  { %v11744_v6 = vmul.f32 0.083333336, %v11697_v60  ;;  %v11756_v45 = vmul.f32 %v11612_v4, %v11612_v4  ;;  %v11613_v9 = vmul.f32 0.083333336, %v11573_v3  ;;  %v11705_v63 = vadd.f32 %v11704_v40, %v11703_v12  ;;  %14748 = vmatpush3.bf16.msra.mxu0 %v16867_v62  ;;  %v16876_v62 = vld [vmem:[%s18632_s11 + $0x2e0] sm:$0xff]  }
 0xa22   :  { %14749 = vmatprep.subr.bf16.mxu0 %v16868_v5  ;;  %v11792_v53 = vsub.f32 %v18448_v11, %v11612_v4  ;;  %v11804_v27 = vsub.f32 %v18450_v52, %v11612_v4  ;;  %v9009_v11 = vrot.slane %v18512_v24, %v18651_v55 }
 0xa23   :  { %v11768_v44 = vsub.f32 %v11744_v6, %v11756_v45  ;;  %v11745_v59 = vmul.f32 0.083333336, %v11705_v63  ;;  %v11757_v25 = vmul.f32 %v11613_v9, %v11613_v9  ;;  %v11793_v51 = vsub.f32 %v18455_v26, %v11613_v9  ;;  %v16877_v63 = vld [vmem:[%s18632_s11 + $0x2a0] sm:$0xff]  }
 0xa24   :  { %v11805_v61 = vsub.f32 %v18464_v17, %v11613_v9 }
 0xa25   :  { %v11780_v37 = vmax.f32 %v11768_v44, 0.0  ;;  %v11769_v1 = vsub.f32 %v11745_v59, %v11757_v25  ;;  %14750 = vmatpush3.bf16.msra.mxu0 %v16869_v8 }
 0xa27   :  { %v11816_v50 = vadd.f32 1e-05, %v11780_v37  ;;  %v11781_v23 = vmax.f32 %v11769_v1, 0.0  ;;  %v16878_v37 = vld [vmem:[%s18632_s11 + $0x2d8] sm:$0xff]  }
 0xa29   :  { %16898 = vrsqrt.f32 %v11816_v50  ;;  %v11817_v43 = vadd.f32 1e-05, %v11781_v23 }
 0xa2b   :  { %16900 = vrsqrt.f32 %v11817_v43 }
 0xa36   :  { %v16899_v15 = vpop.eup %16898 }
 0xa37   :  { %v11840_v20 = vmul.f32 %v16899_v15, %v11792_v53  ;;  %v11852_v33 = vmul.f32 %v16899_v15, %v11804_v27  ;;  %v16879_v15 = vld [vmem:[%s18632_s11 + $0x298] sm:$0xff]  }
 0xa38   :  { %v16901_v10 = vpop.eup %16900 }
 0xa39   :  { %v11841_v46 = vmul.f32 %v16901_v10, %v11793_v51  ;;  %v11853_v22 = vmul.f32 %v16901_v10, %v11805_v61  ;;  %v16880_v10 = vld [vmem:[%s18632_s11 + $0x2d0] sm:$0xff]  }
 0xa3b   :  { %v14622_v54 = vpack.c.bf16 %v11841_v46, %v11840_v20  ;;  %v14628_v41 = vpack.c.bf16 %v11853_v22, %v11852_v33 }
 0xa3d   :  { %11939 = vst [vmem:[#allocation6 + $0x50] sm:$0x33] %v14628_v41 }
 0xa44   :  { %v11951_v34 = vld [vmem:[#allocation6 + $0x50] sm:$0x33] }
 0xa45   :  { %v11348_v52 = vpop.f32.mrf.mxu0  ;;  %v14492_v14 = vcombine.low %v14622_v54, %v11951_v34  ;;  %v14493_v16 = vcombine.high %v14622_v54, %v11951_v34  ;;  %v16881_v54 = vld [vmem:[%s18632_s11 + $0x290] sm:$0xff]  }
 0xa46   :  { %v11391_v26 = vpop.f32.mrf.mxu1  ;;  %v11349_v17 = vadd.f32 %v11348_v52, %v9005_v36 }
 0xa47   :  { %v11350_v39 = vpop.f32.mrf.mxu0  ;;  %12944 = vmatprep.mubr.bf16.mxu1 %v14493_v16 }
 0xa48   :  { %v11393_v58 = vpop.f32.mrf.mxu1  ;;  %v11351_v31 = vadd.f32 %v11350_v39, %v9009_v11  ;;  %v11392_v29 = vadd.f32 %v11391_v26, %v11349_v17  ;;  %12945 = vmatmul.mubr.bf16.vlgmr.msra.gmra.mxu1 %v14492_v14  ;;  %v16882_v26 = vld [vmem:[%s18632_s11 + $0x2c8] sm:$0xff]  }
 0xa49   :  { %v11352_v55 = vpop.f32.mrf.mxu0  ;;  %14758 = vmatpush3.bf16.msra.mxu1 %v16871_v47  ;;  %v16883_v47 = vld [vmem:[%s18632_s11 + $0x288] sm:$0xff]  }
 0xa4a   :  { %v11395_v48 = vpop.f32.mrf.mxu1  ;;  %v11353_v7 = vadd.f32 %v11352_v55, %v9005_v36  ;;  %v11394_v56 = vadd.f32 %v11393_v58, %v11351_v31  ;;  %14759 = vmatprep.subr.bf16.mxu1 %v16872_v30  ;;  %v18530_v42 = vmax.f32 %v11392_v29, 0.0  ;;  %v16884_v29 = vld [vmem:[%s18632_s11 + $0x2c0] sm:$0xff]  }
 0xa4b   :  { %v11354_v0 = vpop.f32.mrf.mxu0 }
 0xa4c   :  { %v11396_v57 = vadd.f32 %v11395_v48, %v11353_v7  ;;  %v11355_v18 = vadd.f32 %v11354_v0, %v9009_v11  ;;  %v11397_v28 = vpop.f32.mrf.mxu1  ;;  %v18537_v12 = vmax.f32 %v11394_v56, 0.0  ;;  %v11626_v40 = vmul.f32 %v18530_v42, %v18530_v42  ;;  %v16885_v56 = vld [vmem:[%s18632_s11 + $0x280] sm:$0xff]  }
 0xa4d   :  { %14760 = vmatpush3.bf16.msra.mxu1 %v16873_v13 }
 0xa4e   :  { %v18532_v19 = vmax.f32 %v11396_v57, 0.0  ;;  %v11398_v21 = vadd.f32 %v11397_v28, %v11355_v18  ;;  %14761 = vmatprep.subr.bf16.mxu1 %v16874_v49  ;;  %v11627_v8 = vmul.f32 %v18537_v12, %v18537_v12 }
 0xa50   :  { %v11574_v4 = vsel %vm3797_vm9, %v18532_v19, 0.0  ;;  %v11638_v60 = vmul.f32 %v18532_v19, %v18532_v19  ;;  %v18546_v3 = vmax.f32 %v11398_v21, 0.0 }
 0xa51   :  { %v11575_v5 = vadd.f32 %v11574_v4, %v18530_v42  ;;  %14762 = vmatpush3.bf16.msra.mxu1 %v16875_v2 }
 0xa52   :  { %v11706_v6 = vsel %vm3797_vm9, %v11638_v60, 0.0  ;;  %v11582_v45 = vsel %vm3797_vm9, %v18546_v3, 0.0  ;;  %v11639_v9 = vmul.f32 %v18546_v3, %v18546_v3  ;;  %14763 = vmatprep.subr.bf16.mxu1 %v16876_v62 }
 0xa53   :  { %v11576_v44 = vrot.slane %v11575_v5, 4  ;;  %v11707_v59 = vadd.f32 %v11706_v6, %v11626_v40  ;;  %v11583_v25 = vadd.f32 %v11582_v45, %v18537_v12 }
 0xa54   :  { %v11714_v1 = vsel %vm3797_vm9, %v11639_v9, 0.0 }
 0xa55   :  { %v11577_v50 = vadd.f32 %v11576_v44, %v11575_v5  ;;  %v11708_v38 = vrot.slane %v11707_v59, 4  ;;  %v11584_v23 = vrot.slane %v11583_v25, 4  ;;  %v11715_v43 = vadd.f32 %v11714_v1, %v11627_v8  ;;  %14764 = vmatpush3.bf16.msra.mxu1 %v16877_v63 }
 0xa56   :  { %14765 = vmatprep.subr.bf16.mxu1 %v16878_v37  ;;  %v9013_v37 = vrot.slane %v18512_v24, %v17358_v32 }
 0xa57   :  { %v11578_v53 = vrot.slane %v11577_v50, 2  ;;  %v11709_v27 = vadd.f32 %v11708_v38, %v11707_v59  ;;  %v11585_v51 = vadd.f32 %v11584_v23, %v11583_v25  ;;  %v11716_v61 = vrot.slane %v11715_v43, 4 }
 0xa59   :  { %v11579_v20 = vadd.f32 %v11578_v53, %v11577_v50  ;;  %v11710_v33 = vrot.slane %v11709_v27, 2  ;;  %v11586_v46 = vrot.slane %v11585_v51, 2  ;;  %v11717_v22 = vadd.f32 %v11716_v61, %v11715_v43  ;;  %14766 = vmatpush3.bf16.msra.mxu1 %v16879_v15 }
 0xa5a   :  { %14767 = vmatprep.subr.bf16.mxu1 %v16880_v10 }
 0xa5b   :  { %v11580_v41 = vrot.slane %v11579_v20, 1  ;;  %v11711_v36 = vadd.f32 %v11710_v33, %v11709_v27  ;;  %v11587_v11 = vadd.f32 %v11586_v46, %v11585_v51  ;;  %v11718_v52 = vrot.slane %v11717_v22, 2 }
 0xa5d   :  { %v11581_v34 = vadd.f32 %v11580_v41, %v11579_v20  ;;  %v11712_v17 = vrot.slane %v11711_v36, 1  ;;  %v11588_v14 = vrot.slane %v11587_v11, 1  ;;  %v11719_v16 = vadd.f32 %v11718_v52, %v11717_v22  ;;  %14768 = vmatpush3.bf16.msra.mxu1 %v16881_v54 }
 0xa5e   :  { %14769 = vmatprep.subr.bf16.mxu1 %v16882_v26 }
 0xa5f   :  { %v11614_v39 = vmul.f32 0.083333336, %v11581_v34  ;;  %v11713_v58 = vadd.f32 %v11712_v17, %v11711_v36  ;;  %v11589_v30 = vadd.f32 %v11588_v14, %v11587_v11  ;;  %v11720_v31 = vrot.slane %v11719_v16, 1 }
 0xa61   :  { %v11746_v55 = vmul.f32 0.083333336, %v11713_v58  ;;  %v11758_v48 = vmul.f32 %v11614_v39, %v11614_v39  ;;  %v11615_v7 = vmul.f32 0.083333336, %v11589_v30  ;;  %v11721_v13 = vadd.f32 %v11720_v31, %v11719_v16  ;;  %14770 = vmatpush3.bf16.msra.mxu1 %v16883_v47 }
 0xa62   :  { %14771 = vmatprep.subr.bf16.mxu1 %v16884_v29  ;;  %v11794_v60 = vsub.f32 %v18530_v42, %v11614_v39  ;;  %v11806_v40 = vsub.f32 %v18532_v19, %v11614_v39  ;;  %v9017_v42 = vrot.slane %v18512_v24, %v17364_v35 }
 0xa63   :  { %v11770_v0 = vsub.f32 %v11746_v55, %v11758_v48  ;;  %v11747_v49 = vmul.f32 0.083333336, %v11721_v13  ;;  %v11759_v57 = vmul.f32 %v11615_v7, %v11615_v7  ;;  %v11795_v5 = vsub.f32 %v18537_v12, %v11615_v7 }
 0xa64   :  { %v11807_v6 = vsub.f32 %v18546_v3, %v11615_v7 }
 0xa65   :  { %v11782_v18 = vmax.f32 %v11770_v0, 0.0  ;;  %v11771_v28 = vsub.f32 %v11747_v49, %v11759_v57  ;;  %14772 = vmatpush3.bf16.msra.mxu1 %v16885_v56 }
 0xa67   :  { %v11818_v21 = vadd.f32 1e-05, %v11782_v18  ;;  %v11783_v2 = vmax.f32 %v11771_v28, 0.0 }
 0xa69   :  { %16902 = vrsqrt.f32 %v11818_v21  ;;  %v11819_v62 = vadd.f32 1e-05, %v11783_v2 }
 0xa6b   :  { %16904 = vrsqrt.f32 %v11819_v62 }
 0xa76   :  { %v16903_v4 = vpop.eup %16902 }
 0xa77   :  { %v11842_v9 = vmul.f32 %v16903_v4, %v11794_v60  ;;  %v11854_v63 = vmul.f32 %v16903_v4, %v11806_v40 }
 0xa78   :  { %v16905_v45 = vpop.eup %16904 }
 0xa79   :  { %v11843_v8 = vmul.f32 %v16905_v45, %v11795_v5  ;;  %v11855_v44 = vmul.f32 %v16905_v45, %v11807_v6 }
 0xa7b   :  { %v14623_v59 = vpack.c.bf16 %v11843_v8, %v11842_v9  ;;  %v14629_v25 = vpack.c.bf16 %v11855_v44, %v11854_v63 }
 0xa7d   :  { %11940 = vst [vmem:[#allocation6] sm:$0x33] %v14629_v25 }
 0xa84   :  { %v11952_v50 = vld [vmem:[#allocation6] sm:$0x33] }
 0xa85   :  { %v11434_v1 = vpop.f32.mrf.mxu0  ;;  %v14494_v38 = vcombine.low %v14623_v59, %v11952_v50  ;;  %v14495_v3 = vcombine.high %v14623_v59, %v11952_v50 }
 0xa86   :  { %v11477_v19 = vpop.f32.mrf.mxu1  ;;  %v11435_v12 = vadd.f32 %v11434_v1, %v9013_v37 }
 0xa87   :  { %v11436_v23 = vpop.f32.mrf.mxu0  ;;  %12985 = vmatprep.mubr.bf16.mxu0 %v14495_v3 }
 0xa88   :  { %v11479_v43 = vpop.f32.mrf.mxu1  ;;  %v11437_v15 = vadd.f32 %v11436_v23, %v9017_v42  ;;  %v11478_v53 = vadd.f32 %v11477_v19, %v11435_v12  ;;  %12986 = vmatmul.mubr.bf16.vlgmr.msra.gmra.mxu0 %v14494_v38 }
 0xa89   :  { %v11438_v27 = vpop.f32.mrf.mxu0 }
 0xa8a   :  { %v11481_v51 = vpop.f32.mrf.mxu1  ;;  %v11439_v61 = vadd.f32 %v11438_v27, %v9013_v37  ;;  %v11480_v10 = vadd.f32 %v11479_v43, %v11437_v15  ;;  %v18595_v35 = vmax.f32 %v11478_v53, 0.0 }
 0xa8b   :  { %v11440_v32 = vpop.f32.mrf.mxu0 }
 0xa8c   :  { %v11482_v20 = vadd.f32 %v11481_v51, %v11439_v61  ;;  %v11441_v33 = vadd.f32 %v11440_v32, %v9017_v42  ;;  %v11483_v24 = vpop.f32.mrf.mxu1  ;;  %v11497_v54 = vmax.f32 %v11480_v10, 0.0  ;;  %v11628_v52 = vmul.f32 %v18595_v35, %v18595_v35 }
 0xa8e   :  { %v11508_v46 = vmax.f32 %v11482_v20, 0.0  ;;  %v11484_v22 = vadd.f32 %v11483_v24, %v11441_v33  ;;  %v11629_v16 = vmul.f32 %v11497_v54, %v11497_v54 }
 0xa90   :  { %v11590_v41 = vsel %vm3797_vm9, %v11508_v46, 0.0  ;;  %v11640_v36 = vmul.f32 %v11508_v46, %v11508_v46  ;;  %v11509_v11 = vmax.f32 %v11484_v22, 0.0 }
 0xa91   :  { %v11591_v26 = vadd.f32 %v11590_v41, %v18595_v35 }
 0xa92   :  { %v11722_v34 = vsel %vm3797_vm9, %v11640_v36, 0.0  ;;  %v11598_v17 = vsel %vm3797_vm9, %v11509_v11, 0.0  ;;  %v11641_v14 = vmul.f32 %v11509_v11, %v11509_v11 }
 0xa93   :  { %v11592_v47 = vrot.slane %v11591_v26, 4  ;;  %v11723_v39 = vadd.f32 %v11722_v34, %v11628_v52  ;;  %v11599_v58 = vadd.f32 %v11598_v17, %v11497_v54 }
 0xa94   :  { %v11730_v30 = vsel %vm3797_vm9, %v11641_v14, 0.0 }
 0xa95   :  { %v11593_v31 = vadd.f32 %v11592_v47, %v11591_v26  ;;  %v11724_v29 = vrot.slane %v11723_v39, 4  ;;  %v11600_v55 = vrot.slane %v11599_v58, 4  ;;  %v11731_v48 = vadd.f32 %v11730_v30, %v11629_v16 }
 0xa97   :  { %v11594_v7 = vrot.slane %v11593_v31, 2  ;;  %v11725_v13 = vadd.f32 %v11724_v29, %v11723_v39  ;;  %v11601_v56 = vadd.f32 %v11600_v55, %v11599_v58  ;;  %v11732_v0 = vrot.slane %v11731_v48, 4  ;;  %v14485_v55 = vld [vmem:[#allocation22] ss:$0 sm:$0xff] }
 0xa99   :  { %v11595_v49 = vadd.f32 %v11594_v7, %v11593_v31  ;;  %v11726_v57 = vrot.slane %v11725_v13, 2  ;;  %v11602_v18 = vrot.slane %v11601_v56, 2  ;;  %v11733_v28 = vadd.f32 %v11732_v0, %v11731_v48 }
 0xa9b   :  { %v11596_v21 = vrot.slane %v11595_v49, 1  ;;  %v11727_v2 = vadd.f32 %v11726_v57, %v11725_v13  ;;  %v11603_v62 = vadd.f32 %v11602_v18, %v11601_v56  ;;  %v11734_v4 = vrot.slane %v11733_v28, 2 }
 0xa9d   :  { %v11597_v60 = vadd.f32 %v11596_v21, %v11595_v49  ;;  %v11728_v40 = vrot.slane %v11727_v2, 1  ;;  %v11604_v5 = vrot.slane %v11603_v62, 1  ;;  %v11735_v6 = vadd.f32 %v11734_v4, %v11733_v28 }
 0xa9f   :  { %v11616_v45 = vmul.f32 0.083333336, %v11597_v60  ;;  %v11729_v9 = vadd.f32 %v11728_v40, %v11727_v2  ;;  %v11605_v63 = vadd.f32 %v11604_v5, %v11603_v62  ;;  %v11736_v8 = vrot.slane %v11735_v6, 1 }
 0xaa1   :  { %v11748_v44 = vmul.f32 0.083333336, %v11729_v9  ;;  %v11760_v59 = vmul.f32 %v11616_v45, %v11616_v45  ;;  %v11617_v25 = vmul.f32 0.083333336, %v11605_v63  ;;  %v11737_v37 = vadd.f32 %v11736_v8, %v11735_v6 }
 0xaa2   :  { %v11796_v15 = vsub.f32 %v18595_v35, %v11616_v45  ;;  %v11808_v53 = vsub.f32 %v11508_v46, %v11616_v45 }
 0xaa3   :  { %v11772_v42 = vsub.f32 %v11748_v44, %v11760_v59  ;;  %v11749_v1 = vmul.f32 0.083333336, %v11737_v37  ;;  %v11761_v19 = vmul.f32 %v11617_v25, %v11617_v25  ;;  %v11797_v27 = vsub.f32 %v11497_v54, %v11617_v25 }
 0xaa4   :  { %v11809_v51 = vsub.f32 %v11509_v11, %v11617_v25 }
 0xaa5   :  { %v11784_v50 = vmax.f32 %v11772_v42, 0.0  ;;  %v11773_v12 = vsub.f32 %v11749_v1, %v11761_v19  ;;  %v14663_v26 = vpop.f32.mrf.mxu0 }
 0xaa6   :  { %v14685_v35 = vpop.f32.mrf.mxu1 }
 0xaa7   :  { %v11820_v38 = vadd.f32 1e-05, %v11784_v50  ;;  %v11785_v3 = vmax.f32 %v11773_v12, 0.0  ;;  %v14664_v34 = vpop.f32.mrf.mxu0 }
 0xaa8   :  { %v14686_v11 = vpop.f32.mrf.mxu1  ;;  %v14665_v29 = vadd.f32 %v14664_v34, %v14663_v26 }
 0xaa9   :  { %16906 = vrsqrt.f32 %v11820_v38  ;;  %v11821_v23 = vadd.f32 1e-05, %v11785_v3  ;;  %v14666_v17 = vpop.f32.mrf.mxu0  ;;  %v14687_v49 = vadd.f32 %v14686_v11, %v14685_v35 }
 0xaaa   :  { %v14688_v16 = vpop.f32.mrf.mxu1  ;;  %v12824_v13 = vadd.f32 %v14665_v29, %v14485_v55 }
 0xaab   :  { %16908 = vrsqrt.f32 %v11821_v23  ;;  %v14667_v46 = vpop.f32.mrf.mxu0 }
 0xaac   :  { %v14689_v39 = vpop.f32.mrf.mxu1  ;;  %v14668_v56 = vadd.f32 %v14667_v46, %v14666_v17  ;;  %v12865_v28 = vadd.f32 %v14687_v49, %v12824_v13 }
 0xaad   :  { %v14690_v4 = vadd.f32 %v14689_v39, %v14688_v16 }
 0xaae   :  { %v12827_v21 = vadd.f32 %v14668_v56, %v14485_v55 }
 0xab0   :  { %v12868_v9 = vadd.f32 %v14690_v4, %v12827_v21 }
 0xab6   :  { %v16907_v43 = vpop.eup %16906 }
 0xab7   :  { %v11844_v10 = vmul.f32 %v16907_v43, %v11796_v15  ;;  %v11856_v32 = vmul.f32 %v16907_v43, %v11808_v53 }
 0xab8   :  { %v16909_v61 = vpop.eup %16908 }
 0xab9   :  { %v11845_v20 = vmul.f32 %v16909_v61, %v11797_v27  ;;  %v11857_v33 = vmul.f32 %v16909_v61, %v11809_v51 }
 0xabb   :  { %v14624_v24 = vpack.c.bf16 %v11845_v20, %v11844_v10  ;;  %v14630_v22 = vpack.c.bf16 %v11857_v33, %v11856_v32 }
 0xabd   :  { %11941 = vst [vmem:[#allocation6 + $0x18] sm:$0x33] %v14630_v22 }
 0xac4   :  { %v11953_v41 = vld [vmem:[#allocation6 + $0x18] sm:$0x33] }
 0xac5   :  { %v14496_v36 = vcombine.low %v14624_v24, %v11953_v41  ;;  %v14497_v52 = vcombine.high %v14624_v24, %v11953_v41 }
 0xac7   :  { %13026 = vmatprep.mubr.bf16.mxu1 %v14497_v52 }
 0xac8   :  { %13027 = vmatmul.mubr.bf16.vlgmr.msra.gmra.mxu1 %v14496_v36  ;;  %v14707_v54 = vpop.f32.mrf.mxu0 }
 0xaca   :  { %v14708_v14 = vpop.f32.mrf.mxu0 }
 0xacb   :  { %v14709_v57 = vadd.f32 %v14708_v14, %v14707_v54 }
 0xacc   :  { %v14710_v47 = vpop.f32.mrf.mxu0 }
 0xacd   :  { %v12906_v60 = vadd.f32 %v14709_v57, %v12865_v28 }
 0xace   :  { %v14711_v58 = vpop.f32.mrf.mxu0 }
 0xacf   :  { %v14712_v40 = vadd.f32 %v14711_v58, %v14710_v47 }
 0xad1   :  { %v12909_v59 = vadd.f32 %v14712_v40, %v12868_v9 }
 0xb08   :  { %v14729_v30 = vpop.f32.mrf.mxu1 }
 0xb0a   :  { %v14730_v48 = vpop.f32.mrf.mxu1 }
 0xb0b   :  { %v14731_v2 = vadd.f32 %v14730_v48, %v14729_v30 }
 0xb0c   :  { %v14732_v0 = vpop.f32.mrf.mxu1 }
 0xb0d   :  { %v12947_v63 = vadd.f32 %v14731_v2, %v12906_v60 }
 0xb0e   :  { %v14733_v62 = vpop.f32.mrf.mxu1 }
 0xb0f   :  { %v14734_v8 = vadd.f32 %v14733_v62, %v14732_v0 }
 0xb11   :  { %v12950_v19 = vadd.f32 %v14734_v8, %v12909_v59 }
 0xb48   :  { %v14751_v31 = vpop.f32.mrf.mxu0 }
 0xb4a   :  { %v14752_v7 = vpop.f32.mrf.mxu0 }
 0xb4b   :  { %v14753_v5 = vadd.f32 %v14752_v7, %v14751_v31 }
 0xb4c   :  { %v14754_v18 = vpop.f32.mrf.mxu0 }
 0xb4d   :  { %v12988_v25 = vadd.f32 %v14753_v5, %v12947_v63 }
 0xb4e   :  { %v14755_v6 = vpop.f32.mrf.mxu0 }
 0xb4f   :  { %v14756_v37 = vadd.f32 %v14755_v6, %v14754_v18 }
 0xb51   :  { %v12991_v38 = vadd.f32 %v14756_v37, %v12950_v19 }
 0xb88   :  { %v14773_v45 = vpop.f32.mrf.mxu1 }
 0xb8a   :  { %v14774_v44 = vpop.f32.mrf.mxu1 }
 0xb8b   :  { %v14775_v42 = vadd.f32 %v14774_v44, %v14773_v45 }
 0xb8c   :  { %v14776_v1 = vpop.f32.mrf.mxu1 }
 0xb8d   :  { %v13029_v50 = vadd.f32 %v14775_v42, %v12988_v25 }
 0xb8e   :  { %v14777_v12 = vpop.f32.mrf.mxu1 }
 0xb8f   :  { %v13035_v3 = vmax.f32 %v13029_v50, 0.0  ;;  %v14778_v23 = vadd.f32 %v14777_v12, %v14776_v1 }
 0xb91   :  { %v13032_v43 = vadd.f32 %v14778_v23, %v12991_v38  ;;  %v13049_v15 = vmul.f32 %v13035_v3, %v13035_v3  ;;  %v13038_v61 = vsel %vm13037_vm13, %v13035_v3, 0.0 }
 0xb93   :  { %v13036_v53 = vmax.f32 %v13032_v43, 0.0  ;;  %v13051_v20 = vsel %vm13037_vm13, %v13049_v15, 0.0 }
 0xb95   :  { %v13040_v27 = vsel %vm13039_vm12, %v13036_v53, 0.0  ;;  %v13050_v51 = vmul.f32 %v13036_v53, %v13036_v53 }
 0xb96   :  { %v13041_v10 = vadd.f32 %v13040_v27, %v13038_v61 }
 0xb97   :  { %v13052_v32 = vsel %vm13039_vm12, %v13050_v51, 0.0 }
 0xb98   :  { %v13042_v33 = vrot.slane %v13041_v10, 4  ;;  %v13053_v24 = vadd.f32 %v13052_v32, %v13051_v20 }
 0xb9a   :  { %v13043_v22 = vadd.f32 %v13042_v33, %v13041_v10  ;;  %v13054_v41 = vrot.slane %v13053_v24, 4 }
 0xb9c   :  { %v13044_v36 = vrot.slane %v13043_v22, 2  ;;  %v13055_v52 = vadd.f32 %v13054_v41, %v13053_v24 }
 0xb9e   :  { %v13045_v26 = vadd.f32 %v13044_v36, %v13043_v22  ;;  %v13056_v34 = vrot.slane %v13055_v52, 2 }
 0xba0   :  { %v13046_v17 = vrot.slane %v13045_v26, 1  ;;  %v13057_v35 = vadd.f32 %v13056_v34, %v13055_v52 }
 0xba2   :  { %v13047_v46 = vadd.f32 %v13046_v17, %v13045_v26  ;;  %v13058_v54 = vrot.slane %v13057_v35, 1 }
 0xba4   :  { %v13048_v11 = vmul.f32 0.083333336, %v13047_v46  ;;  %v13059_v14 = vadd.f32 %v13058_v54, %v13057_v35 }
 0xba6   :  { %v13060_v16 = vmul.f32 0.083333336, %v13059_v14  ;;  %v13061_v47 = vmul.f32 %v13048_v11, %v13048_v11  ;;  %v13064_v31 = vsub.f32 %v13035_v3, %v13048_v11  ;;  %v13065_v48 = vsub.f32 %v13036_v53, %v13048_v11 }
 0xba8   :  { %v13062_v39 = vsub.f32 %v13060_v16, %v13061_v47 }
 0xbaa   :  { %v13063_v58 = vmax.f32 %v13062_v39, 0.0 }
 0xbac   :  { %v13066_v30 = vadd.f32 1e-05, %v13063_v58 }
 0xbae   :  { %16910 = vrsqrt.f32 %v13066_v30 }
 0xbbb   :  { %v16911_v29 = vpop.eup %16910 }
 0xbbc   :  { %v13068_v55 = vmul.f32 %v16911_v29, %v13064_v31  ;;  %v13069_v13 = vmul.f32 %v16911_v29, %v13065_v48 }
 0xbbe   :  { %v13070_v7 = vsel %vm13037_vm13, %v13068_v55, -inf  ;;  %v13073_v56 = vsel %vm13039_vm12, %v13069_v13, -inf }
 0xbbf   :  { %13071 = vmax.xlane.f32.xlu0 %v13070_v7 }
 0xbc3   :  { %13074 = vmax.xlane.f32.xlu0 %v13073_v56 }
 0xc48   :  { %v13072_v0 = vpop.xlane.xlu0 %13071 }
 0xc49   :  { %v13076_v49 = vsub.f32 %v13068_v55, %v13072_v0 }
 0xc4b   :  { %v13078_v57 = vmul.f32 1.442695, %v13076_v49 }
 0xc4c   :  { %v13075_v18 = vpop.xlane.xlu0 %13074 }
 0xc4d   :  { %16912 = vpow2.f32 %v13078_v57  ;;  %v13077_v28 = vsub.f32 %v13069_v13, %v13075_v18 }
 0xc4f   :  { %v13080_v21 = vmul.f32 1.442695, %v13077_v28 }
 0xc51   :  { %16914 = vpow2.f32 %v13080_v21 }
 0xc5a   :  { %v16913_v2 = vpop.eup %16912 }
 0xc5b   :  { %v13082_v62 = vsel %vm13037_vm13, %v16913_v2, 0.0 }
 0xc5c   :  { %13083 = vadd.xlane.f32.xlu1 %v13082_v62 }
 0xc5e   :  { %v16915_v4 = vpop.eup %16914 }
 0xc5f   :  { %v13085_v60 = vsel %vm13039_vm12, %v16915_v4, 0.0 }
 0xc60   :  { %13086 = vadd.xlane.f32.xlu1 %v13085_v60 }
 0xce5   :  { %v13084_v40 = vpop.xlane.xlu1 %13083 }
 0xce6   :  { %16916 = vrcp.f32 %v13084_v40 }
 0xce9   :  { %v13087_v5 = vpop.xlane.xlu1 %13086 }
 0xcea   :  { %16918 = vrcp.f32 %v13087_v5 }
 0xcf3   :  { %v16917_v6 = vpop.eup %16916 }
 0xcf4   :  { %v13089_v45 = vmul.f32 %v16917_v6, %v16913_v2 }
 0xcf6   :  { %13092 = vst.msk [vmem:[%s18634_s13] sm:$0xff] %vm13037_vm13, %v13089_v45 }
 0xcf7   :  { %v16919_v9 = vpop.eup %16918 }
 0xcf8   :  { %v13091_v63 = vmul.f32 %v16919_v9, %v16915_v4 }
 0xcfa   :  { %13093 = vst.msk [vmem:[%s18634_s13 + $0x8] sm:$0xf] %vm13039_vm12, %v13091_v63 }
 0xcfb   :  { %13098 = vsyncpa [#allocation12], 1 }
 0xcfc   :  { %13099 = vsyncpa [#allocation14], 1 }
 0xcfd   :  { %13100 = vsyncpa [#allocation17], 1 }
 0xcfe   :  { %13101 = vsyncpa [#allocation20], 1 }
 0xcff   :  { %13102 = vsyncpa [#allocation23], 1 }
 0xd00   :  { %13103 = vsyncmov [#allocation10] }
 0xd03   :  { %s13104_s5 = vpop.sfrf %13103 }
 0xd04   :  { %p14594_p13 = scmp.ne.s32.totalorder %s13104_s5, 0 }
 0xd06   :  { %13108 = shalt.err (%p14594_p13)  }
 0xd07   :  { %13110 = vsyncmov [#allocation10 + $0x1] }
 0xd0a   :  { %s13111_s3 = vpop.sfrf %13110 }
 0xd0b   :  { %p14595_p0 = scmp.ne.s32.totalorder %s13111_s3, 0 }
 0xd0d   :  { %13115 = shalt.err (%p14595_p0)  }
 0xd0e   :  { %13117 = vsyncmov [#allocation10 + $0x2] }
 0xd11   :  { %s13118_s23 = vpop.sfrf %13117 }
 0xd12   :  { %p14596_p1 = scmp.ne.s32.totalorder %s13118_s23, 0 }
 0xd14   :  { %13122 = shalt.err (%p14596_p1)  }

</bundles_post_ra>
